<compile_context>
chip_gen: v7x
topology: tpu7x:2x2x1
jax: 0.10.0
libtpu: 0.0.40
codegen_flags: <defaults>
</compile_context>

<pallas_src>
import jax
import jax.numpy as jnp
from jax.experimental import pallas as pl
from jax.experimental.pallas import tpu as pltpu

_LANE = 128
_VMEM_SPEC = pl.BlockSpec(memory_space=pltpu.MemorySpace.VMEM)
_VMEM_LIMIT = 32 * 1024 * 1024


def _round_up(x, m):
    return -(-x // m) * m


# ---------------------------------------------------------------------------
# Pallas kernels
# ---------------------------------------------------------------------------

def _conv_pool_relu_kernel(p0_ref, p1_ref, p2_ref, p3_ref, w_ref, b_ref, o_ref):
    """Fused conv-as-matmul + 2x2 max-pool + bias + ReLU for one M-tile.

    p*_ref: (bm, kd_pad) bf16 im2col slabs, one per pooling-window position.
    w_ref:  (kd_pad, 128) bf16.  b_ref: (1, 128) f32.  o_ref: (bm, 128) bf16.
    """
    w = w_ref[...]
    y0 = jnp.dot(p0_ref[...], w, preferred_element_type=jnp.float32)
    y1 = jnp.dot(p1_ref[...], w, preferred_element_type=jnp.float32)
    y2 = jnp.dot(p2_ref[...], w, preferred_element_type=jnp.float32)
    y3 = jnp.dot(p3_ref[...], w, preferred_element_type=jnp.float32)
    y = jnp.maximum(jnp.maximum(y0, y1), jnp.maximum(y2, y3))   # 2x2 max-pool
    y = jnp.maximum(y + b_ref[...], 0.0)                        # f32 epilogue
    o_ref[...] = y.astype(o_ref.dtype)                          # single bf16 cast


def _head_kernel(x_ref, w1_ref, b1_ref, w2_ref, b2_ref, o_ref):
    """Fused classifier head: relu(x @ W1 + b1) @ W2 + b2 (bf16 MXU, f32 acc)."""
    h = jnp.dot(x_ref[...], w1_ref[...], preferred_element_type=jnp.float32)
    h = jnp.maximum(h + b1_ref[...], 0.0).astype(jnp.bfloat16)
    y = jnp.dot(h, w2_ref[...], preferred_element_type=jnp.float32)
    o_ref[...] = y + b2_ref[...]


# ---------------------------------------------------------------------------
# Wrapper glue (data movement only; all arithmetic lives in the kernels)
# ---------------------------------------------------------------------------

def _choose_block_m(m, kd_pad, cout_pad=_LANE, cap_bytes=8 << 20):
    """Pick (bm, num_blocks): bm is a multiple of 16, per-block (double-
    buffered) bytes stay under cap_bytes, and large layers use 2 parallel
    blocks so both v7x TensorCores are fed."""
    row_bytes = 2 * (4 * kd_pad + cout_pad) * 2   # bf16 in+out, double-buffered
    cap_rows = max(16, (cap_bytes // row_bytes) // 16 * 16)
    nb = 1 if m <= 1024 else 2
    bm = min(_round_up(m, 16 * nb) // nb, cap_rows)
    nb = -(-m // bm)
    return bm, nb


def _conv_layer(x, w_pad, b_pad, cout, k=5):
    """Valid KxK conv + bias + 2x2 max-pool (floor) + ReLU, fully in Pallas.

    x: (N, H, W, Cin) bf16.  w_pad: (kd_pad, 128) bf16.  b_pad: (1, 128) f32.
    Returns (N, Ho//2, Wo//2, cout) bf16.
    """
    n, h, wd, c = x.shape
    ho, wo = h - k + 1, wd - k + 1
    hp, wp = ho // 2, wo // 2                    # floor mode, like F.max_pool2d
    kd = k * k * c
    kd_pad = w_pad.shape[0]
    m = n * hp * wp

    x = x.astype(jnp.bfloat16)   # cast once BEFORE the 25x im2col fan-out

    # TODO(synk): the pooled im2col gather (strided window slices + concat) and
    # layout transposes stay as XLA data movement under the enclosing jit; only
    # data motion, no arithmetic, happens outside the Pallas kernels.
    def window_patches(dy, dx):
        cols = [x[:, dy + i: dy + i + 2 * hp: 2, dx + j: dx + j + 2 * wp: 2, :]
                for i in range(k) for j in range(k)]
        p = jnp.concatenate(cols, axis=-1).reshape(m, kd)
        if kd_pad != kd:
            p = jnp.pad(p, ((0, 0), (0, kd_pad - kd)))
        return p

    slabs = [window_patches(dy, dx) for dy in range(2) for dx in range(2)]

    bm, nb = _choose_block_m(m, kd_pad)
    m_pad = nb * bm
    if m_pad != m:
        slabs = [jnp.pad(p, ((0, m_pad - m), (0, 0))) for p in slabs]

    patch_spec = pl.BlockSpec((bm, kd_pad), lambda i: (i, 0))
    out = pl.pallas_call(
        _conv_pool_relu_kernel,
        out_shape=jax.ShapeDtypeStruct((m_pad, _LANE), jnp.bfloat16),
        grid=(nb,),
        in_specs=[patch_spec] * 4 + [
            pl.BlockSpec((kd_pad, _LANE), lambda i: (0, 0)),
            pl.BlockSpec((1, _LANE), lambda i: (0, 0)),
        ],
        out_specs=pl.BlockSpec((bm, _LANE), lambda i: (i, 0)),
        compiler_params=pltpu.CompilerParams(
            dimension_semantics=("parallel",),
            vmem_limit_bytes=_VMEM_LIMIT),
    )(*slabs, w_pad, b_pad)

    # Lane-dense (128-wide) store in the kernel; drop pad rows/channels here
    # (cheap slice that XLA fuses into the next layer's im2col).
    return out[:m, :cout].reshape(n, hp, wp, cout)


def _head(x_nhwc, w1, b1, w2, b2, num_classes):
    n = x_nhwc.shape[0]
    # PyTorch x.view(-1, 320) flattens in (C, H, W) order -> transpose back.
    flat = jnp.transpose(x_nhwc, (0, 3, 1, 2)).reshape(n, -1).astype(jnp.bfloat16)
    n_pad = _round_up(n, 8)
    if n_pad != n:
        flat = jnp.pad(flat, ((0, n_pad - n), (0, 0)))
    out = pl.pallas_call(
        _head_kernel,
        out_shape=jax.ShapeDtypeStruct((n_pad, w2.shape[1]), jnp.float32),
        in_specs=[_VMEM_SPEC] * 5,
        out_specs=_VMEM_SPEC,
        compiler_params=pltpu.CompilerParams(vmem_limit_bytes=_VMEM_LIMIT),
    )(flat, w1, b1, w2, b2)
    return out[:n, :num_classes]


# ---------------------------------------------------------------------------
# Parameters (deterministic synthetic init, pre-padded to TPU-friendly shapes)
# ---------------------------------------------------------------------------

def build_params(key, num_classes=500):
    def conv_params(kw, kb, cin, cout, k=5):
        kd = k * k * cin
        kd_pad = _round_up(kd, _LANE)
        w = jax.random.normal(kw, (kd, cout), jnp.float32) / (kd ** 0.5)
        w = jnp.pad(w, ((0, kd_pad - kd), (0, _LANE - cout))).astype(jnp.bfloat16)
        b = 0.05 * jax.random.normal(kb, (1, cout), jnp.float32)
        b = jnp.pad(b, ((0, 0), (0, _LANE - cout)))
        return w, b

    ks = jax.random.split(key, 10)
    c1w, c1b = conv_params(ks[0], ks[1], 3, 10)
    c2w, c2b = conv_params(ks[2], ks[3], 10, 20)
    c3w, c3b = conv_params(ks[4], ks[5], 20, 20)

    hid_pad = _LANE                                  # fc1 hidden 50 -> 128
    cls_pad = _round_up(num_classes, _LANE)          # fc2 output 500 -> 512
    w1 = jax.random.normal(ks[6], (320, 50), jnp.float32) / (320 ** 0.5)
    w1 = jnp.pad(w1, ((0, 0), (0, hid_pad - 50))).astype(jnp.bfloat16)
    b1 = jnp.pad(0.05 * jax.random.normal(ks[7], (1, 50), jnp.float32),
                 ((0, 0), (0, hid_pad - 50)))
    w2 = jax.random.normal(ks[8], (50, num_classes), jnp.float32) / (50 ** 0.5)
    w2 = jnp.pad(w2, ((0, hid_pad - 50), (0, cls_pad - num_classes))
                 ).astype(jnp.bfloat16)
    b2 = jnp.pad(0.05 * jax.random.normal(ks[9], (1, num_classes), jnp.float32),
                 ((0, 0), (0, cls_pad - num_classes)))

    return {
        "conv1_w": c1w, "conv1_b": c1b,
        "conv2_w": c2w, "conv2_b": c2b,
        "conv3_w": c3w, "conv3_b": c3b,
        "fc1_w": w1, "fc1_b": b1, "fc2_w": w2, "fc2_b": b2,
    }


# ---------------------------------------------------------------------------
# Forward pass (single jax.jit around the whole network, 4 pallas_calls)
# ---------------------------------------------------------------------------

def net_forward(params, x_nchw, num_classes=500):
    # NCHW (PyTorch) -> NHWC (channels on the 128-lane axis), bf16 once.
    x = jnp.transpose(x_nchw, (0, 2, 3, 1)).astype(jnp.bfloat16)
    x = _conv_layer(x, params["conv1_w"], params["conv1_b"], cout=10)  # (N,28,28,10)
    x = _conv_layer(x, params["conv2_w"], params["conv2_b"], cout=20)  # (N,12,12,20)
    x = _conv_layer(x, params["conv3_w"], params["conv3_b"], cout=20)  # (N, 4, 4,20)
    return _head(x, params["fc1_w"], params["fc1_b"],
                 params["fc2_w"], params["fc2_b"], num_classes)        # (N, 500)


if __name__ == "__main__":
    key = jax.random.PRNGKey(0)
    k_param, k_input = jax.random.split(key)

    params = build_params(k_param, num_classes=500)

    # 60x60 input: 60 -conv5-> 56 -pool-> 28 -conv5-> 24 -pool-> 12
    #              -conv5-> 8 -pool-> 4  =>  20*4*4 = 320 features,
    # matching the module's x.view(-1, 320).
    x = jax.random.normal(k_input, (2, 3, 60, 60), jnp.float32)

    fwd = jax.jit(net_forward)
    out = jax.block_until_ready(fwd(params, x))

    assert out.shape == (2, 500), out.shape
    assert bool(jnp.all(jnp.isfinite(out)))
    print("KERNEL_OK")
</pallas_src>

<mosaic_0001>
module attributes {stable_mosaic.version = 11 : i64} {
  func.func @_conv_pool_relu_kernel(%arg0: i32, %arg1: memref<784x128xbf16, #tpu.memory_space<vmem>>, %arg2: memref<784x128xbf16, #tpu.memory_space<vmem>>, %arg3: memref<784x128xbf16, #tpu.memory_space<vmem>>, %arg4: memref<784x128xbf16, #tpu.memory_space<vmem>>, %arg5: memref<128x128xbf16, #tpu.memory_space<vmem>>, %arg6: memref<1x128xf32, #tpu.memory_space<vmem>>, %arg7: memref<784x128xbf16, #tpu.memory_space<vmem>>) attributes {dimension_semantics = [#tpu.dimension_semantics<parallel>], iteration_bounds = array<i64: 2>, scalar_prefetch = 0 : i64, scratch_operands = 0 : i64, tpu.core_type = #tpu.core_type<tc>, window_params = [{transform_indices = @transform_0, window_bounds = array<i64: 784, 128>}, {transform_indices = @transform_1, window_bounds = array<i64: 784, 128>}, {transform_indices = @transform_2, window_bounds = array<i64: 784, 128>}, {transform_indices = @transform_3, window_bounds = array<i64: 784, 128>}, {pipeline_mode = #tpu.pipeline_mode<synchronous>, transform_indices = @transform_4, window_bounds = array<i64: 128, 128>}, {pipeline_mode = #tpu.pipeline_mode<synchronous>, transform_indices = @transform_5, window_bounds = array<i64: 1, 128>}, {transform_indices = @transform_6, window_bounds = array<i64: 784, 128>}]} {
    %c0 = arith.constant 0 : index
    %c0_0 = arith.constant 0 : index
    %0 = vector.load %arg5[%c0, %c0_0] : memref<128x128xbf16, #tpu.memory_space<vmem>>, vector<128x128xbf16>
    %c0_1 = arith.constant 0 : index
    %c0_2 = arith.constant 0 : index
    %1 = vector.load %arg1[%c0_1, %c0_2] : memref<784x128xbf16, #tpu.memory_space<vmem>>, vector<784x128xbf16>
    %cst = arith.constant dense<0.000000e+00> : vector<784x128xf32>
    %2 = tpu.matmul %1, %0, %cst {dimension_numbers = #tpu.dot_dimension_numbers<[1], [0], [0], [1], [0, 0, 1, 1], [], []>} : vector<784x128xbf16>, vector<128x128xbf16>, vector<784x128xf32> -> vector<784x128xf32>
    %c0_3 = arith.constant 0 : index
    %c0_4 = arith.constant 0 : index
    %3 = vector.load %arg2[%c0_3, %c0_4] : memref<784x128xbf16, #tpu.memory_space<vmem>>, vector<784x128xbf16>
    %cst_5 = arith.constant dense<0.000000e+00> : vector<784x128xf32>
    %4 = tpu.matmul %3, %0, %cst_5 {dimension_numbers = #tpu.dot_dimension_numbers<[1], [0], [0], [1], [0, 0, 1, 1], [], []>} : vector<784x128xbf16>, vector<128x128xbf16>, vector<784x128xf32> -> vector<784x128xf32>
    %c0_6 = arith.constant 0 : index
    %c0_7 = arith.constant 0 : index
    %5 = vector.load %arg3[%c0_6, %c0_7] : memref<784x128xbf16, #tpu.memory_space<vmem>>, vector<784x128xbf16>
    %cst_8 = arith.constant dense<0.000000e+00> : vector<784x128xf32>
    %6 = tpu.matmul %5, %0, %cst_8 {dimension_numbers = #tpu.dot_dimension_numbers<[1], [0], [0], [1], [0, 0, 1, 1], [], []>} : vector<784x128xbf16>, vector<128x128xbf16>, vector<784x128xf32> -> vector<784x128xf32>
    %c0_9 = arith.constant 0 : index
    %c0_10 = arith.constant 0 : index
    %7 = vector.load %arg4[%c0_9, %c0_10] : memref<784x128xbf16, #tpu.memory_space<vmem>>, vector<784x128xbf16>
    %cst_11 = arith.constant dense<0.000000e+00> : vector<784x128xf32>
    %8 = tpu.matmul %7, %0, %cst_11 {dimension_numbers = #tpu.dot_dimension_numbers<[1], [0], [0], [1], [0, 0, 1, 1], [], []>} : vector<784x128xbf16>, vector<128x128xbf16>, vector<784x128xf32> -> vector<784x128xf32>
    %9 = arith.maximumf %2, %4 : vector<784x128xf32>
    %10 = arith.maximumf %6, %8 : vector<784x128xf32>
    %11 = arith.maximumf %9, %10 : vector<784x128xf32>
    %c0_12 = arith.constant 0 : index
    %c0_13 = arith.constant 0 : index
    %12 = vector.load %arg6[%c0_12, %c0_13] : memref<1x128xf32, #tpu.memory_space<vmem>>, vector<1x128xf32>
    %13 = vector.broadcast %12 : vector<1x128xf32> to vector<784x128xf32>
    %14 = arith.addf %11, %13 : vector<784x128xf32>
    %cst_14 = arith.constant 0.000000e+00 : f32
    %15 = vector.broadcast %cst_14 : f32 to vector<784x128xf32>
    %16 = arith.maximumf %14, %15 : vector<784x128xf32>
    %17 = arith.truncf %16 : vector<784x128xf32> to vector<784x128xbf16>
    %c0_15 = arith.constant 0 : index
    %c0_16 = arith.constant 0 : index
    %18 = vector.load %arg7[%c0_15, %c0_16] : memref<784x128xbf16, #tpu.memory_space<vmem>>, vector<784x128xbf16>
    tpu.vector_store %arg7[%c0_15, %c0_16], %17 {strides = array<i32>} : memref<784x128xbf16, #tpu.memory_space<vmem>>, vector<784x128xbf16>,
    return
  }
  func.func @transform_0(%arg0: i32) -> (i32, i32) {
    %c0_i32 = arith.constant 0 : i32
    %c0_i32_0 = arith.constant 0 : i32
    return %arg0, %c0_i32 : i32, i32
  }
  func.func @transform_1(%arg0: i32) -> (i32, i32) {
    %c0_i32 = arith.constant 0 : i32
    %c0_i32_0 = arith.constant 0 : i32
    return %arg0, %c0_i32 : i32, i32
  }
  func.func @transform_2(%arg0: i32) -> (i32, i32) {
    %c0_i32 = arith.constant 0 : i32
    %c0_i32_0 = arith.constant 0 : i32
    return %arg0, %c0_i32 : i32, i32
  }
  func.func @transform_3(%arg0: i32) -> (i32, i32) {
    %c0_i32 = arith.constant 0 : i32
    %c0_i32_0 = arith.constant 0 : i32
    return %arg0, %c0_i32 : i32, i32
  }
  func.func @transform_4(%arg0: i32) -> (i32, i32) {
    %c0_i32 = arith.constant 0 : i32
    %c0_i32_0 = arith.constant 0 : i32
    %c0_i32_1 = arith.constant 0 : i32
    return %c0_i32, %c0_i32_0 : i32, i32
  }
  func.func @transform_5(%arg0: i32) -> (i32, i32) {
    %c0_i32 = arith.constant 0 : i32
    %c0_i32_0 = arith.constant 0 : i32
    %c0_i32_1 = arith.constant 0 : i32
    return %c0_i32, %c0_i32_0 : i32, i32
  }
  func.func @transform_6(%arg0: i32) -> (i32, i32) {
    %c0_i32 = arith.constant 0 : i32
    %c0_i32_0 = arith.constant 0 : i32
    return %arg0, %c0_i32 : i32, i32
  }
}

module attributes {stable_mosaic.version = 11 : i64} {
  func.func @_conv_pool_relu_kernel(%arg0: i32, %arg1: memref<288x256xbf16, #tpu.memory_space<vmem>>, %arg2: memref<288x256xbf16, #tpu.memory_space<vmem>>, %arg3: memref<288x256xbf16, #tpu.memory_space<vmem>>, %arg4: memref<288x256xbf16, #tpu.memory_space<vmem>>, %arg5: memref<256x128xbf16, #tpu.memory_space<vmem>>, %arg6: memref<1x128xf32, #tpu.memory_space<vmem>>, %arg7: memref<288x128xbf16, #tpu.memory_space<vmem>>) attributes {dimension_semantics = [#tpu.dimension_semantics<parallel>], iteration_bounds = array<i64: 1>, scalar_prefetch = 0 : i64, scratch_operands = 0 : i64, tpu.core_type = #tpu.core_type<tc>, window_params = [{transform_indices = @transform_0, window_bounds = array<i64: 288, 256>}, {transform_indices = @transform_1, window_bounds = array<i64: 288, 256>}, {transform_indices = @transform_2, window_bounds = array<i64: 288, 256>}, {transform_indices = @transform_3, window_bounds = array<i64: 288, 256>}, {pipeline_mode = #tpu.pipeline_mode<synchronous>, transform_indices = @transform_4, window_bounds = array<i64: 256, 128>}, {pipeline_mode = #tpu.pipeline_mode<synchronous>, transform_indices = @transform_5, window_bounds = array<i64: 1, 128>}, {transform_indices = @transform_6, window_bounds = array<i64: 288, 128>}]} {
    %c0 = arith.constant 0 : index
    %c0_0 = arith.constant 0 : index
    %0 = vector.load %arg5[%c0, %c0_0] : memref<256x128xbf16, #tpu.memory_space<vmem>>, vector<256x128xbf16>
    %c0_1 = arith.constant 0 : index
    %c0_2 = arith.constant 0 : index
    %1 = vector.load %arg1[%c0_1, %c0_2] : memref<288x256xbf16, #tpu.memory_space<vmem>>, vector<288x256xbf16>
    %cst = arith.constant dense<0.000000e+00> : vector<288x128xf32>
    %2 = tpu.matmul %1, %0, %cst {dimension_numbers = #tpu.dot_dimension_numbers<[1], [0], [0], [1], [0, 0, 1, 1], [], []>} : vector<288x256xbf16>, vector<256x128xbf16>, vector<288x128xf32> -> vector<288x128xf32>
    %c0_3 = arith.constant 0 : index
    %c0_4 = arith.constant 0 : index
    %3 = vector.load %arg2[%c0_3, %c0_4] : memref<288x256xbf16, #tpu.memory_space<vmem>>, vector<288x256xbf16>
    %cst_5 = arith.constant dense<0.000000e+00> : vector<288x128xf32>
    %4 = tpu.matmul %3, %0, %cst_5 {dimension_numbers = #tpu.dot_dimension_numbers<[1], [0], [0], [1], [0, 0, 1, 1], [], []>} : vector<288x256xbf16>, vector<256x128xbf16>, vector<288x128xf32> -> vector<288x128xf32>
    %c0_6 = arith.constant 0 : index
    %c0_7 = arith.constant 0 : index
    %5 = vector.load %arg3[%c0_6, %c0_7] : memref<288x256xbf16, #tpu.memory_space<vmem>>, vector<288x256xbf16>
    %cst_8 = arith.constant dense<0.000000e+00> : vector<288x128xf32>
    %6 = tpu.matmul %5, %0, %cst_8 {dimension_numbers = #tpu.dot_dimension_numbers<[1], [0], [0], [1], [0, 0, 1, 1], [], []>} : vector<288x256xbf16>, vector<256x128xbf16>, vector<288x128xf32> -> vector<288x128xf32>
    %c0_9 = arith.constant 0 : index
    %c0_10 = arith.constant 0 : index
    %7 = vector.load %arg4[%c0_9, %c0_10] : memref<288x256xbf16, #tpu.memory_space<vmem>>, vector<288x256xbf16>
    %cst_11 = arith.constant dense<0.000000e+00> : vector<288x128xf32>
    %8 = tpu.matmul %7, %0, %cst_11 {dimension_numbers = #tpu.dot_dimension_numbers<[1], [0], [0], [1], [0, 0, 1, 1], [], []>} : vector<288x256xbf16>, vector<256x128xbf16>, vector<288x128xf32> -> vector<288x128xf32>
    %9 = arith.maximumf %2, %4 : vector<288x128xf32>
    %10 = arith.maximumf %6, %8 : vector<288x128xf32>
    %11 = arith.maximumf %9, %10 : vector<288x128xf32>
    %c0_12 = arith.constant 0 : index
    %c0_13 = arith.constant 0 : index
    %12 = vector.load %arg6[%c0_12, %c0_13] : memref<1x128xf32, #tpu.memory_space<vmem>>, vector<1x128xf32>
    %13 = vector.broadcast %12 : vector<1x128xf32> to vector<288x128xf32>
    %14 = arith.addf %11, %13 : vector<288x128xf32>
    %cst_14 = arith.constant 0.000000e+00 : f32
    %15 = vector.broadcast %cst_14 : f32 to vector<288x128xf32>
    %16 = arith.maximumf %14, %15 : vector<288x128xf32>
    %17 = arith.truncf %16 : vector<288x128xf32> to vector<288x128xbf16>
    %c0_15 = arith.constant 0 : index
    %c0_16 = arith.constant 0 : index
    %18 = vector.load %arg7[%c0_15, %c0_16] : memref<288x128xbf16, #tpu.memory_space<vmem>>, vector<288x128xbf16>
    tpu.vector_store %arg7[%c0_15, %c0_16], %17 {strides = array<i32>} : memref<288x128xbf16, #tpu.memory_space<vmem>>, vector<288x128xbf16>,
    return
  }
  func.func @transform_0(%arg0: i32) -> (i32, i32) {
    %c0_i32 = arith.constant 0 : i32
    %c0_i32_0 = arith.constant 0 : i32
    return %arg0, %c0_i32 : i32, i32
  }
  func.func @transform_1(%arg0: i32) -> (i32, i32) {
    %c0_i32 = arith.constant 0 : i32
    %c0_i32_0 = arith.constant 0 : i32
    return %arg0, %c0_i32 : i32, i32
  }
  func.func @transform_2(%arg0: i32) -> (i32, i32) {
    %c0_i32 = arith.constant 0 : i32
    %c0_i32_0 = arith.constant 0 : i32
    return %arg0, %c0_i32 : i32, i32
  }
  func.func @transform_3(%arg0: i32) -> (i32, i32) {
    %c0_i32 = arith.constant 0 : i32
    %c0_i32_0 = arith.constant 0 : i32
    return %arg0, %c0_i32 : i32, i32
  }
  func.func @transform_4(%arg0: i32) -> (i32, i32) {
    %c0_i32 = arith.constant 0 : i32
    %c0_i32_0 = arith.constant 0 : i32
    %c0_i32_1 = arith.constant 0 : i32
    return %c0_i32, %c0_i32_0 : i32, i32
  }
  func.func @transform_5(%arg0: i32) -> (i32, i32) {
    %c0_i32 = arith.constant 0 : i32
    %c0_i32_0 = arith.constant 0 : i32
    %c0_i32_1 = arith.constant 0 : i32
    return %c0_i32, %c0_i32_0 : i32, i32
  }
  func.func @transform_6(%arg0: i32) -> (i32, i32) {
    %c0_i32 = arith.constant 0 : i32
    %c0_i32_0 = arith.constant 0 : i32
    return %arg0, %c0_i32 : i32, i32
  }
}

module attributes {stable_mosaic.version = 11 : i64} {
  func.func @_conv_pool_relu_kernel(%arg0: i32, %arg1: memref<32x512xbf16, #tpu.memory_space<vmem>>, %arg2: memref<32x512xbf16, #tpu.memory_space<vmem>>, %arg3: memref<32x512xbf16, #tpu.memory_space<vmem>>, %arg4: memref<32x512xbf16, #tpu.memory_space<vmem>>, %arg5: memref<512x128xbf16, #tpu.memory_space<vmem>>, %arg6: memref<1x128xf32, #tpu.memory_space<vmem>>, %arg7: memref<32x128xbf16, #tpu.memory_space<vmem>>) attributes {dimension_semantics = [#tpu.dimension_semantics<parallel>], iteration_bounds = array<i64: 1>, scalar_prefetch = 0 : i64, scratch_operands = 0 : i64, tpu.core_type = #tpu.core_type<tc>, window_params = [{transform_indices = @transform_0, window_bounds = array<i64: 32, 512>}, {transform_indices = @transform_1, window_bounds = array<i64: 32, 512>}, {transform_indices = @transform_2, window_bounds = array<i64: 32, 512>}, {transform_indices = @transform_3, window_bounds = array<i64: 32, 512>}, {pipeline_mode = #tpu.pipeline_mode<synchronous>, transform_indices = @transform_4, window_bounds = array<i64: 512, 128>}, {pipeline_mode = #tpu.pipeline_mode<synchronous>, transform_indices = @transform_5, window_bounds = array<i64: 1, 128>}, {transform_indices = @transform_6, window_bounds = array<i64: 32, 128>}]} {
    %c0 = arith.constant 0 : index
    %c0_0 = arith.constant 0 : index
    %0 = vector.load %arg5[%c0, %c0_0] : memref<512x128xbf16, #tpu.memory_space<vmem>>, vector<512x128xbf16>
    %c0_1 = arith.constant 0 : index
    %c0_2 = arith.constant 0 : index
    %1 = vector.load %arg1[%c0_1, %c0_2] : memref<32x512xbf16, #tpu.memory_space<vmem>>, vector<32x512xbf16>
    %cst = arith.constant dense<0.000000e+00> : vector<32x128xf32>
    %2 = tpu.matmul %1, %0, %cst {dimension_numbers = #tpu.dot_dimension_numbers<[1], [0], [0], [1], [0, 0, 1, 1], [], []>} : vector<32x512xbf16>, vector<512x128xbf16>, vector<32x128xf32> -> vector<32x128xf32>
    %c0_3 = arith.constant 0 : index
    %c0_4 = arith.constant 0 : index
    %3 = vector.load %arg2[%c0_3, %c0_4] : memref<32x512xbf16, #tpu.memory_space<vmem>>, vector<32x512xbf16>
    %cst_5 = arith.constant dense<0.000000e+00> : vector<32x128xf32>
    %4 = tpu.matmul %3, %0, %cst_5 {dimension_numbers = #tpu.dot_dimension_numbers<[1], [0], [0], [1], [0, 0, 1, 1], [], []>} : vector<32x512xbf16>, vector<512x128xbf16>, vector<32x128xf32> -> vector<32x128xf32>
    %c0_6 = arith.constant 0 : index
    %c0_7 = arith.constant 0 : index
    %5 = vector.load %arg3[%c0_6, %c0_7] : memref<32x512xbf16, #tpu.memory_space<vmem>>, vector<32x512xbf16>
    %cst_8 = arith.constant dense<0.000000e+00> : vector<32x128xf32>
    %6 = tpu.matmul %5, %0, %cst_8 {dimension_numbers = #tpu.dot_dimension_numbers<[1], [0], [0], [1], [0, 0, 1, 1], [], []>} : vector<32x512xbf16>, vector<512x128xbf16>, vector<32x128xf32> -> vector<32x128xf32>
    %c0_9 = arith.constant 0 : index
    %c0_10 = arith.constant 0 : index
    %7 = vector.load %arg4[%c0_9, %c0_10] : memref<32x512xbf16, #tpu.memory_space<vmem>>, vector<32x512xbf16>
    %cst_11 = arith.constant dense<0.000000e+00> : vector<32x128xf32>
    %8 = tpu.matmul %7, %0, %cst_11 {dimension_numbers = #tpu.dot_dimension_numbers<[1], [0], [0], [1], [0, 0, 1, 1], [], []>} : vector<32x512xbf16>, vector<512x128xbf16>, vector<32x128xf32> -> vector<32x128xf32>
    %9 = arith.maximumf %2, %4 : vector<32x128xf32>
    %10 = arith.maximumf %6, %8 : vector<32x128xf32>
    %11 = arith.maximumf %9, %10 : vector<32x128xf32>
    %c0_12 = arith.constant 0 : index
    %c0_13 = arith.constant 0 : index
    %12 = vector.load %arg6[%c0_12, %c0_13] : memref<1x128xf32, #tpu.memory_space<vmem>>, vector<1x128xf32>
    %13 = vector.broadcast %12 : vector<1x128xf32> to vector<32x128xf32>
    %14 = arith.addf %11, %13 : vector<32x128xf32>
    %cst_14 = arith.constant 0.000000e+00 : f32
    %15 = vector.broadcast %cst_14 : f32 to vector<32x128xf32>
    %16 = arith.maximumf %14, %15 : vector<32x128xf32>
    %17 = arith.truncf %16 : vector<32x128xf32> to vector<32x128xbf16>
    %c0_15 = arith.constant 0 : index
    %c0_16 = arith.constant 0 : index
    %18 = vector.load %arg7[%c0_15, %c0_16] : memref<32x128xbf16, #tpu.memory_space<vmem>>, vector<32x128xbf16>
    tpu.vector_store %arg7[%c0_15, %c0_16], %17 {strides = array<i32>} : memref<32x128xbf16, #tpu.memory_space<vmem>>, vector<32x128xbf16>,
    return
  }
  func.func @transform_0(%arg0: i32) -> (i32, i32) {
    %c0_i32 = arith.constant 0 : i32
    %c0_i32_0 = arith.constant 0 : i32
    return %arg0, %c0_i32 : i32, i32
  }
  func.func @transform_1(%arg0: i32) -> (i32, i32) {
    %c0_i32 = arith.constant 0 : i32
    %c0_i32_0 = arith.constant 0 : i32
    return %arg0, %c0_i32 : i32, i32
  }
  func.func @transform_2(%arg0: i32) -> (i32, i32) {
    %c0_i32 = arith.constant 0 : i32
    %c0_i32_0 = arith.constant 0 : i32
    return %arg0, %c0_i32 : i32, i32
  }
  func.func @transform_3(%arg0: i32) -> (i32, i32) {
    %c0_i32 = arith.constant 0 : i32
    %c0_i32_0 = arith.constant 0 : i32
    return %arg0, %c0_i32 : i32, i32
  }
  func.func @transform_4(%arg0: i32) -> (i32, i32) {
    %c0_i32 = arith.constant 0 : i32
    %c0_i32_0 = arith.constant 0 : i32
    %c0_i32_1 = arith.constant 0 : i32
    return %c0_i32, %c0_i32_0 : i32, i32
  }
  func.func @transform_5(%arg0: i32) -> (i32, i32) {
    %c0_i32 = arith.constant 0 : i32
    %c0_i32_0 = arith.constant 0 : i32
    %c0_i32_1 = arith.constant 0 : i32
    return %c0_i32, %c0_i32_0 : i32, i32
  }
  func.func @transform_6(%arg0: i32) -> (i32, i32) {
    %c0_i32 = arith.constant 0 : i32
    %c0_i32_0 = arith.constant 0 : i32
    return %arg0, %c0_i32 : i32, i32
  }
}

module attributes {stable_mosaic.version = 11 : i64} {
  func.func @_head_kernel(%arg0: memref<8x320xbf16, #tpu.memory_space<vmem>>, %arg1: memref<320x128xbf16, #tpu.memory_space<vmem>>, %arg2: memref<1x128xf32, #tpu.memory_space<vmem>>, %arg3: memref<128x512xbf16, #tpu.memory_space<vmem>>, %arg4: memref<1x512xf32, #tpu.memory_space<vmem>>, %arg5: memref<8x512xf32, #tpu.memory_space<vmem>>) attributes {dimension_semantics = [], scalar_prefetch = 0 : i64, scratch_operands = 0 : i64, tpu.core_type = #tpu.core_type<tc>} {
    %c0 = arith.constant 0 : index
    %c0_0 = arith.constant 0 : index
    %0 = vector.load %arg0[%c0, %c0_0] : memref<8x320xbf16, #tpu.memory_space<vmem>>, vector<8x320xbf16>
    %c0_1 = arith.constant 0 : index
    %c0_2 = arith.constant 0 : index
    %1 = vector.load %arg1[%c0_1, %c0_2] : memref<320x128xbf16, #tpu.memory_space<vmem>>, vector<320x128xbf16>
    %cst = arith.constant dense<0.000000e+00> : vector<8x128xf32>
    %2 = tpu.matmul %0, %1, %cst {dimension_numbers = #tpu.dot_dimension_numbers<[1], [0], [0], [1], [0, 0, 1, 1], [], []>} : vector<8x320xbf16>, vector<320x128xbf16>, vector<8x128xf32> -> vector<8x128xf32>
    %c0_3 = arith.constant 0 : index
    %c0_4 = arith.constant 0 : index
    %3 = vector.load %arg2[%c0_3, %c0_4] : memref<1x128xf32, #tpu.memory_space<vmem>>, vector<1x128xf32>
    %4 = vector.broadcast %3 : vector<1x128xf32> to vector<8x128xf32>
    %5 = arith.addf %2, %4 : vector<8x128xf32>
    %cst_5 = arith.constant 0.000000e+00 : f32
    %6 = vector.broadcast %cst_5 : f32 to vector<8x128xf32>
    %7 = arith.maximumf %5, %6 : vector<8x128xf32>
    %8 = arith.truncf %7 : vector<8x128xf32> to vector<8x128xbf16>
    %c0_6 = arith.constant 0 : index
    %c0_7 = arith.constant 0 : index
    %9 = vector.load %arg3[%c0_6, %c0_7] : memref<128x512xbf16, #tpu.memory_space<vmem>>, vector<128x512xbf16>
    %cst_8 = arith.constant dense<0.000000e+00> : vector<8x512xf32>
    %10 = tpu.matmul %8, %9, %cst_8 {dimension_numbers = #tpu.dot_dimension_numbers<[1], [0], [0], [1], [0, 0, 1, 1], [], []>} : vector<8x128xbf16>, vector<128x512xbf16>, vector<8x512xf32> -> vector<8x512xf32>
    %c0_9 = arith.constant 0 : index
    %c0_10 = arith.constant 0 : index
    %11 = vector.load %arg4[%c0_9, %c0_10] : memref<1x512xf32, #tpu.memory_space<vmem>>, vector<1x512xf32>
    %12 = vector.broadcast %11 : vector<1x512xf32> to vector<8x512xf32>
    %13 = arith.addf %10, %12 : vector<8x512xf32>
    %c0_11 = arith.constant 0 : index
    %c0_12 = arith.constant 0 : index
    %14 = vector.load %arg5[%c0_11, %c0_12] : memref<8x512xf32, #tpu.memory_space<vmem>>, vector<8x512xf32>
    tpu.vector_store %arg5[%c0_11, %c0_12], %13 {strides = array<i32>} : memref<8x512xf32, #tpu.memory_space<vmem>>, vector<8x512xf32>,
    return
  }
}

</mosaic_0001>

<bundles_post_ra>
// kernel: net_forward.4
= control target key start
LH: loop header
LB: loop body
LE: loop exit
PB: predicated region body
PF: predicated region fallthrough
CT: control target
= control target key end

     0   :  { %s6775_s21 = smov 0   ;;  %s8501_s0 = inlined_call_operand.vmem [shape: bf16[1568,128], index: 0, kind: input, shape index: {}]   ;;  %s8502_s1 = inlined_call_operand.vmem [shape: bf16[1568,128], index: 1, kind: input, shape index: {}]   ;;  %s8503_s2 = inlined_call_operand.vmem [shape: bf16[1568,128], index: 2, kind: input, shape index: {}]   ;;  %s8504_s3 = inlined_call_operand.vmem [shape: bf16[1568,128], index: 3, kind: input, shape index: {}]   ;;  %s8505_s4 = inlined_call_operand.vmem [shape: bf16[128,128], index: 4, kind: input, shape index: {}]   ;;  %s8506_s5 = inlined_call_operand.vmem [shape: f32[1,128], index: 5, kind: input, shape index: {}]   ;;  %s8507_s6 = inlined_call_operand.vmem [shape: bf16[1568,128], index: 6, kind: output, shape index: {}]  }
   0x1 LB: > { %s4733_s22 = sadd.s32 4294967295, %s6736_s21   ;;  %p4737_p0 = scmp.ge.s32.totalorder %s6736_s21, 1  ;;  %s6736_s21 = sphi %s6775_s21, %s16_s21  }
   0x2   : > { %p246_p1 = scmp.lt.s32.totalorder %s6736_s21, 3 }
   0x4   : > { %p247_p2 = pnand %p4737_p0, %p246_p1 }
   0x6   : > { %250 = sbr.rel (%p247_p2) target bundleno = 1047 (0x417), region = 44 }
   0xd   : > { %v6525_v0 = vld [vmem:[%s8505_s4] sm:$0xff]   ;;  %v8508_v1 = vmov 0.0   ;;  %v6526_v2 = vld [vmem:[%s8505_s4 + $0x8] sm:$0xff]   ;;  %s291_s27 = smul.u32 98, %s4733_s22  ;;  %vm6739_vm0 = vmmov 0   ;;  %v6527_v3 = vld [vmem:[%s8505_s4 + $0x10] sm:$0xff]  }
   0xe   : > { %5667 = vmatprep.subr.bf16.mxu0 %v8508_v1  ;;  %5879 = vmatprep.subr.bf16.mxu1 %v8508_v1  ;;  %v6528_v4 = vld [vmem:[%s8505_s4 + $0x18] sm:$0xff]   ;;  %v6529_v5 = vld [vmem:[%s8505_s4 + $0x20] sm:$0xff]   ;;  %v6530_v6 = vld [vmem:[%s8505_s4 + $0x28] sm:$0xff]  }
   0xf   : > { %5668 = vmatpush3.bf16.msra.mxu0 %v6525_v0  ;;  %5880 = vmatpush3.bf16.msra.mxu1 %v6525_v0  ;;  %p292_p3 = scmp.lt.s32.totalorder %s291_s27, 195  ;;  %v6531_v7 = vld [vmem:[%s8505_s4 + $0x30] sm:$0xff]   ;;  %v6532_v8 = vld [vmem:[%s8505_s4 + $0x38] sm:$0xff]  }
  0x10   : > { %5669 = vmatprep.subr.bf16.mxu0 %v8508_v1  ;;  %5881 = vmatprep.subr.bf16.mxu1 %v8508_v1 }
  0x11   : > { %5683 = vmatprep.mubr.msk.bf16.mxu0 %vm6739_vm0, %v8508_v1  ;;  %5895 = vmatprep.mubr.msk.bf16.mxu1 %vm6739_vm0, %v8508_v1  ;;  %s9054_s27 = smov (!%p292_p3, %s291_s27), 195 }
  0x12   : > { %s6802_s30 = sshll.u32 %s9054_s27, 2 }
  0x13   : > { %5670 = vmatpush3.bf16.msra.mxu0 %v6526_v2  ;;  %5882 = vmatpush3.bf16.msra.mxu1 %v6526_v2  ;;  %s6808_s9 = scalar_lea.vmem %s8501_s0, %s6802_s30  ;;  %s6817_s14 = scalar_lea.vmem %s8502_s1, %s6802_s30 }
  0x14   : > { %5671 = vmatprep.subr.bf16.mxu0 %v8508_v1  ;;  %5883 = vmatprep.subr.bf16.mxu1 %v8508_v1  ;;  %v6533_v9 = vld [vmem:[%s6808_s9] sm:$0xff]   ;;  %v6535_v11 = vld [vmem:[%s6808_s9 + $0x8] sm:$0xff]   ;;  %v6537_v13 = vld [vmem:[%s6808_s9 + $0x10] sm:$0xff]   ;;  %s7143_s26 = scalar_lea.vmem %s8503_s2, %s6802_s30  ;;  %s7151_s29 = scalar_lea.vmem %s8504_s3, %s6802_s30 }
  0x15   : > { %v6534_v10 = vld [vmem:[%s6817_s14] sm:$0xff]   ;;  %v6536_v12 = vld [vmem:[%s6817_s14 + $0x8] sm:$0xff]   ;;  %v6538_v14 = vld [vmem:[%s6817_s14 + $0x10] sm:$0xff]   ;;  %s7938_s11 = scalar_lea.vmem %s8507_s6, %s6802_s30 }
  0x16   : > { %v6539_v15 = vld [vmem:[%s6808_s9 + $0x18] sm:$0xff]   ;;  %v6541_v17 = vld [vmem:[%s6808_s9 + $0x20] sm:$0xff]   ;;  %v6543_v19 = vld [vmem:[%s6808_s9 + $0x28] sm:$0xff]  }
  0x17   : > { %5672 = vmatpush3.bf16.msra.mxu0 %v6527_v3  ;;  %5884 = vmatpush3.bf16.msra.mxu1 %v6527_v3  ;;  %v6540_v16 = vld [vmem:[%s6817_s14 + $0x18] sm:$0xff]   ;;  %v6542_v18 = vld [vmem:[%s6817_s14 + $0x20] sm:$0xff]   ;;  %v6544_v20 = vld [vmem:[%s6817_s14 + $0x28] sm:$0xff]  }
  0x18   : > { %5673 = vmatprep.subr.bf16.mxu0 %v8508_v1  ;;  %5885 = vmatprep.subr.bf16.mxu1 %v8508_v1  ;;  %v6545_v21 = vld [vmem:[%s6808_s9 + $0x30] sm:$0xff]   ;;  %v6547_v23 = vld [vmem:[%s6808_s9 + $0x38] sm:$0xff]   ;;  %v6549_v25 = vld [vmem:[%s6808_s9 + $0x40] sm:$0xff]  }
  0x19   : > { %v6546_v22 = vld [vmem:[%s6817_s14 + $0x30] sm:$0xff]   ;;  %v6548_v24 = vld [vmem:[%s6817_s14 + $0x38] sm:$0xff]   ;;  %v6550_v26 = vld [vmem:[%s6817_s14 + $0x40] sm:$0xff]  }
  0x1a   : > { %v6551_v27 = vld [vmem:[%s6808_s9 + $0x48] sm:$0xff]   ;;  %v6553_v29 = vld [vmem:[%s6808_s9 + $0x50] sm:$0xff]   ;;  %v6555_v31 = vld [vmem:[%s6808_s9 + $0x58] sm:$0xff]  }
  0x1b   : > { %5674 = vmatpush3.bf16.msra.mxu0 %v6528_v4  ;;  %5886 = vmatpush3.bf16.msra.mxu1 %v6528_v4  ;;  %v6552_v28 = vld [vmem:[%s6817_s14 + $0x48] sm:$0xff]   ;;  %v6554_v30 = vld [vmem:[%s6817_s14 + $0x50] sm:$0xff]   ;;  %v6556_v32 = vld [vmem:[%s6817_s14 + $0x58] sm:$0xff]  }
  0x1c   : > { %5675 = vmatprep.subr.bf16.mxu0 %v8508_v1  ;;  %5887 = vmatprep.subr.bf16.mxu1 %v8508_v1  ;;  %v6557_v33 = vld [vmem:[%s6808_s9 + $0x60] sm:$0xff]   ;;  %v6559_v35 = vld [vmem:[%s6808_s9 + $0x68] sm:$0xff]   ;;  %v6561_v37 = vld [vmem:[%s6808_s9 + $0x70] sm:$0xff]  }
  0x1d   : > { %v6558_v34 = vld [vmem:[%s6817_s14 + $0x60] sm:$0xff]   ;;  %v6560_v36 = vld [vmem:[%s6817_s14 + $0x68] sm:$0xff]   ;;  %v6562_v38 = vld [vmem:[%s6817_s14 + $0x70] sm:$0xff]  }
  0x1e   : > { %v6563_v39 = vld [vmem:[%s6808_s9 + $0x78] sm:$0xff]   ;;  %v6565_v41 = vld [vmem:[%s6808_s9 + $0x80] sm:$0xff]   ;;  %v6567_v43 = vld [vmem:[%s6808_s9 + $0x88] sm:$0xff]  }
  0x1f   : > { %5676 = vmatpush3.bf16.msra.mxu0 %v6529_v5  ;;  %5888 = vmatpush3.bf16.msra.mxu1 %v6529_v5  ;;  %v6564_v40 = vld [vmem:[%s6817_s14 + $0x78] sm:$0xff]   ;;  %v6566_v42 = vld [vmem:[%s6817_s14 + $0x80] sm:$0xff]   ;;  %v6568_v44 = vld [vmem:[%s6817_s14 + $0x88] sm:$0xff]  }
  0x20   : > { %5677 = vmatprep.subr.bf16.mxu0 %v8508_v1  ;;  %5889 = vmatprep.subr.bf16.mxu1 %v8508_v1  ;;  %v6569_v45 = vld [vmem:[%s6808_s9 + $0x90] sm:$0xff]   ;;  %v6571_v47 = vld [vmem:[%s6808_s9 + $0x98] sm:$0xff]   ;;  %v6573_v49 = vld [vmem:[%s6808_s9 + $0xa0] sm:$0xff]  }
  0x21   : > { %v6570_v46 = vld [vmem:[%s6817_s14 + $0x90] sm:$0xff]   ;;  %v6572_v48 = vld [vmem:[%s6817_s14 + $0x98] sm:$0xff]   ;;  %v6574_v50 = vld [vmem:[%s6817_s14 + $0xa0] sm:$0xff]  }
  0x22   : > { %v6575_v51 = vld [vmem:[%s6808_s9 + $0xa8] sm:$0xff]   ;;  %v6577_v53 = vld [vmem:[%s6808_s9 + $0xb0] sm:$0xff]   ;;  %v6579_v55 = vld [vmem:[%s6808_s9 + $0xb8] sm:$0xff]  }
  0x23   : > { %5678 = vmatpush3.bf16.msra.mxu0 %v6530_v6  ;;  %5890 = vmatpush3.bf16.msra.mxu1 %v6530_v6  ;;  %v6576_v52 = vld [vmem:[%s6817_s14 + $0xa8] sm:$0xff]   ;;  %v6578_v54 = vld [vmem:[%s6817_s14 + $0xb0] sm:$0xff]   ;;  %v6580_v56 = vld [vmem:[%s6817_s14 + $0xb8] sm:$0xff]  }
  0x24   : > { %5679 = vmatprep.subr.bf16.mxu0 %v8508_v1  ;;  %5891 = vmatprep.subr.bf16.mxu1 %v8508_v1  ;;  %v6581_v57 = vld [vmem:[%s6808_s9 + $0xc0] sm:$0xff]   ;;  %v6583_v59 = vld [vmem:[%s6808_s9 + $0xc8] sm:$0xff]   ;;  %v6585_v61 = vld [vmem:[%s6808_s9 + $0xd0] sm:$0xff]  }
  0x25   : > { %v6582_v58 = vld [vmem:[%s6817_s14 + $0xc0] sm:$0xff]   ;;  %v6584_v60 = vld [vmem:[%s6817_s14 + $0xc8] sm:$0xff]   ;;  %v6586_v62 = vld [vmem:[%s6817_s14 + $0xd0] sm:$0xff]  }
  0x27   : > { %5680 = vmatpush3.bf16.msra.mxu0 %v6531_v7  ;;  %5892 = vmatpush3.bf16.msra.mxu1 %v6531_v7 }
  0x28   : > { %5681 = vmatprep.subr.bf16.mxu0 %v8508_v1  ;;  %5893 = vmatprep.subr.bf16.mxu1 %v8508_v1 }
  0x2b   : > { %5682 = vmatpush3.bf16.msra.mxu0 %v6532_v8  ;;  %5894 = vmatpush3.bf16.msra.mxu1 %v6532_v8 }
  0x2c   : > { %6091 = vmatprep.subr.bf16.mxu0 %v8508_v1  ;;  %6303 = vmatprep.subr.bf16.mxu1 %v8508_v1 }
  0x2e   : > { %5684 = vmatmul.mubr.bf16.vlgmr.msra.gmra.mrb[0].mxu0 %v6533_v9  ;;  %5896 = vmatmul.mubr.bf16.vlgmr.msra.gmra.mrb[0].mxu1 %v6534_v10 }
  0x2f   : > { %6092 = vmatpush3.bf16.msra.mxu0 %v6525_v0  ;;  %6304 = vmatpush3.bf16.msra.mxu1 %v6525_v0 }
  0x30   : > { %5687 = vmatprep.mubr.msk.bf16.mxu0 %vm6739_vm0, %v8508_v1  ;;  %5899 = vmatprep.mubr.msk.bf16.mxu1 %vm6739_vm0, %v8508_v1 }
  0x31   : > { %6093 = vmatprep.subr.bf16.mxu0 %v8508_v1  ;;  %6305 = vmatprep.subr.bf16.mxu1 %v8508_v1 }
  0x33   : > { %6094 = vmatpush3.bf16.msra.mxu0 %v6526_v2  ;;  %6306 = vmatpush3.bf16.msra.mxu1 %v6526_v2 }
  0x34   : > { %6095 = vmatprep.subr.bf16.mxu0 %v8508_v1  ;;  %6307 = vmatprep.subr.bf16.mxu1 %v8508_v1 }
  0x36   : > { %5688 = vmatmul.mubr.bf16.gmra.mrb[4].mxu0 %v6535_v11  ;;  %5900 = vmatmul.mubr.bf16.gmra.mrb[4].mxu1 %v6536_v12 }
  0x37   : > { %5691 = vmatprep.mubr.msk.bf16.mxu0 %vm6739_vm0, %v8508_v1  ;;  %5903 = vmatprep.mubr.msk.bf16.mxu1 %vm6739_vm0, %v8508_v1 }
  0x38   : > { %6096 = vmatpush3.bf16.msra.mxu0 %v6527_v3  ;;  %6308 = vmatpush3.bf16.msra.mxu1 %v6527_v3 }
  0x39   : > { %6097 = vmatprep.subr.bf16.mxu0 %v8508_v1  ;;  %6309 = vmatprep.subr.bf16.mxu1 %v8508_v1 }
  0x3c   : > { %6098 = vmatpush3.bf16.msra.mxu0 %v6528_v4  ;;  %6310 = vmatpush3.bf16.msra.mxu1 %v6528_v4 }
  0x3d   : > { %6099 = vmatprep.subr.bf16.mxu0 %v8508_v1  ;;  %6311 = vmatprep.subr.bf16.mxu1 %v8508_v1 }
  0x3e   : > { %5692 = vmatmul.mubr.bf16.gmra.mrb[8].mxu0 %v6537_v13  ;;  %5904 = vmatmul.mubr.bf16.gmra.mrb[8].mxu1 %v6538_v14 }
  0x3f   : > { %5695 = vmatprep.mubr.msk.bf16.mxu0 %vm6739_vm0, %v8508_v1  ;;  %5907 = vmatprep.mubr.msk.bf16.mxu1 %vm6739_vm0, %v8508_v1 }
  0x40   : > { %6100 = vmatpush3.bf16.msra.mxu0 %v6529_v5  ;;  %6312 = vmatpush3.bf16.msra.mxu1 %v6529_v5  ;;  %v6587_v5 = vld [vmem:[%s6808_s9 + $0xd8] sm:$0xff]  }
  0x41   : > { %6101 = vmatprep.subr.bf16.mxu0 %v8508_v1  ;;  %6313 = vmatprep.subr.bf16.mxu1 %v8508_v1 }
  0x44   : > { %6102 = vmatpush3.bf16.msra.mxu0 %v6530_v6  ;;  %6314 = vmatpush3.bf16.msra.mxu1 %v6530_v6  ;;  %v6588_v6 = vld [vmem:[%s6817_s14 + $0xd8] sm:$0xff]  }
  0x45   : > { %6103 = vmatprep.subr.bf16.mxu0 %v8508_v1  ;;  %6315 = vmatprep.subr.bf16.mxu1 %v8508_v1 }
  0x46   : > { %5696 = vmatmul.mubr.bf16.gmra.mrb[12].mxu0 %v6539_v15  ;;  %5908 = vmatmul.mubr.bf16.gmra.mrb[12].mxu1 %v6540_v16 }
  0x47   : > { %5699 = vmatprep.mubr.msk.bf16.mxu0 %vm6739_vm0, %v8508_v1  ;;  %5911 = vmatprep.mubr.msk.bf16.mxu1 %vm6739_vm0, %v8508_v1 }
  0x48   : > { %6104 = vmatpush3.bf16.msra.mxu0 %v6531_v7  ;;  %6316 = vmatpush3.bf16.msra.mxu1 %v6531_v7 }
  0x49   : > { %6105 = vmatprep.subr.bf16.mxu0 %v8508_v1  ;;  %6317 = vmatprep.subr.bf16.mxu1 %v8508_v1 }
  0x4c   : > { %6106 = vmatpush3.bf16.msra.mxu0 %v6532_v8  ;;  %6318 = vmatpush3.bf16.msra.mxu1 %v6532_v8 }
  0x4e   : > { %5700 = vmatmul.mubr.bf16.gmra.mrb[16].mxu0 %v6541_v17  ;;  %5912 = vmatmul.mubr.bf16.gmra.mrb[16].mxu1 %v6542_v18  ;;  %v6589_v17 = vld [vmem:[%s6808_s9 + $0xe0] sm:$0xff]  }
  0x4f   : > { %5703 = vmatprep.mubr.msk.bf16.mxu0 %vm6739_vm0, %v8508_v1  ;;  %5915 = vmatprep.mubr.msk.bf16.mxu1 %vm6739_vm0, %v8508_v1  ;;  %v6590_v18 = vld [vmem:[%s6817_s14 + $0xe0] sm:$0xff]  }
  0x56   : > { %5704 = vmatmul.mubr.bf16.gmra.mrb[20].mxu0 %v6543_v19  ;;  %5916 = vmatmul.mubr.bf16.gmra.mrb[20].mxu1 %v6544_v20 }
  0x57   : > { %5707 = vmatprep.mubr.msk.bf16.mxu0 %vm6739_vm0, %v8508_v1  ;;  %5919 = vmatprep.mubr.msk.bf16.mxu1 %vm6739_vm0, %v8508_v1 }
  0x5e   : > { %5708 = vmatmul.mubr.bf16.gmra.mrb[24].mxu0 %v6545_v21  ;;  %5920 = vmatmul.mubr.bf16.gmra.mrb[24].mxu1 %v6546_v22 }
  0x5f   : > { %5711 = vmatprep.mubr.msk.bf16.mxu0 %vm6739_vm0, %v8508_v1  ;;  %5923 = vmatprep.mubr.msk.bf16.mxu1 %vm6739_vm0, %v8508_v1 }
  0x66   : > { %5712 = vmatmul.mubr.bf16.gmra.mrb[28].mxu0 %v6547_v23  ;;  %5924 = vmatmul.mubr.bf16.gmra.mrb[28].mxu1 %v6548_v24 }
  0x67   : > { %5715 = vmatprep.mubr.msk.bf16.mxu0 %vm6739_vm0, %v8508_v1  ;;  %5927 = vmatprep.mubr.msk.bf16.mxu1 %vm6739_vm0, %v8508_v1 }
  0x6e   : > { %5716 = vmatmul.mubr.bf16.gmra.mrb[32].mxu0 %v6549_v25  ;;  %5928 = vmatmul.mubr.bf16.gmra.mrb[32].mxu1 %v6550_v26 }
  0x6f   : > { %5719 = vmatprep.mubr.msk.bf16.mxu0 %vm6739_vm0, %v8508_v1  ;;  %5931 = vmatprep.mubr.msk.bf16.mxu1 %vm6739_vm0, %v8508_v1 }
  0x76   : > { %5720 = vmatmul.mubr.bf16.gmra.mrb[36].mxu0 %v6551_v27  ;;  %5932 = vmatmul.mubr.bf16.gmra.mrb[36].mxu1 %v6552_v28 }
  0x77   : > { %5723 = vmatprep.mubr.msk.bf16.mxu0 %vm6739_vm0, %v8508_v1  ;;  %5935 = vmatprep.mubr.msk.bf16.mxu1 %vm6739_vm0, %v8508_v1 }
  0x7e   : > { %5724 = vmatmul.mubr.bf16.gmra.mrb[40].mxu0 %v6553_v29  ;;  %5936 = vmatmul.mubr.bf16.gmra.mrb[40].mxu1 %v6554_v30  ;;  %v6591_v29 = vld [vmem:[%s6808_s9 + $0xe8] sm:$0xff]  }
  0x7f   : > { %5727 = vmatprep.mubr.msk.bf16.mxu0 %vm6739_vm0, %v8508_v1  ;;  %5939 = vmatprep.mubr.msk.bf16.mxu1 %vm6739_vm0, %v8508_v1  ;;  %v6592_v30 = vld [vmem:[%s6817_s14 + $0xe8] sm:$0xff]  }
  0x86   : > { %5728 = vmatmul.mubr.bf16.gmra.mrb[44].mxu0 %v6555_v31  ;;  %5940 = vmatmul.mubr.bf16.gmra.mrb[44].mxu1 %v6556_v32 }
  0x87   : > { %5731 = vmatprep.mubr.msk.bf16.mxu0 %vm6739_vm0, %v8508_v1  ;;  %5943 = vmatprep.mubr.msk.bf16.mxu1 %vm6739_vm0, %v8508_v1 }
  0x8e   : > { %5732 = vmatmul.mubr.bf16.gmra.mrb[48].mxu0 %v6557_v33  ;;  %5944 = vmatmul.mubr.bf16.gmra.mrb[48].mxu1 %v6558_v34 }
  0x8f   : > { %5735 = vmatprep.mubr.msk.bf16.mxu0 %vm6739_vm0, %v8508_v1  ;;  %5947 = vmatprep.mubr.msk.bf16.mxu1 %vm6739_vm0, %v8508_v1 }
  0x96   : > { %5736 = vmatmul.mubr.bf16.gmra.mrb[52].mxu0 %v6559_v35  ;;  %5948 = vmatmul.mubr.bf16.gmra.mrb[52].mxu1 %v6560_v36 }
  0x97   : > { %5739 = vmatprep.mubr.msk.bf16.mxu0 %vm6739_vm0, %v8508_v1  ;;  %5951 = vmatprep.mubr.msk.bf16.mxu1 %vm6739_vm0, %v8508_v1 }
  0x9e   : > { %5740 = vmatmul.mubr.bf16.gmra.mrb[56].mxu0 %v6561_v37  ;;  %5952 = vmatmul.mubr.bf16.gmra.mrb[56].mxu1 %v6562_v38 }
  0x9f   : > { %5743 = vmatprep.mubr.msk.bf16.mxu0 %vm6739_vm0, %v8508_v1  ;;  %5955 = vmatprep.mubr.msk.bf16.mxu1 %vm6739_vm0, %v8508_v1 }
  0xa6   : > { %5744 = vmatmul.mubr.bf16.gmra.mrb[60].mxu0 %v6563_v39  ;;  %5956 = vmatmul.mubr.bf16.gmra.mrb[60].mxu1 %v6564_v40 }
  0xa7   : > { %5747 = vmatprep.mubr.msk.bf16.mxu0 %vm6739_vm0, %v8508_v1  ;;  %5959 = vmatprep.mubr.msk.bf16.mxu1 %vm6739_vm0, %v8508_v1 }
  0xae   : > { %5748 = vmatmul.mubr.bf16.gmra.mrb[64].mxu0 %v6565_v41  ;;  %5960 = vmatmul.mubr.bf16.gmra.mrb[64].mxu1 %v6566_v42  ;;  %v6593_v41 = vld [vmem:[%s6808_s9 + $0xf0] sm:$0xff]  }
  0xaf   : > { %5751 = vmatprep.mubr.msk.bf16.mxu0 %vm6739_vm0, %v8508_v1  ;;  %5963 = vmatprep.mubr.msk.bf16.mxu1 %vm6739_vm0, %v8508_v1  ;;  %v6594_v42 = vld [vmem:[%s6817_s14 + $0xf0] sm:$0xff]  }
  0xb6   : > { %5752 = vmatmul.mubr.bf16.gmra.mrb[68].mxu0 %v6567_v43  ;;  %5964 = vmatmul.mubr.bf16.gmra.mrb[68].mxu1 %v6568_v44 }
  0xb7   : > { %5755 = vmatprep.mubr.msk.bf16.mxu0 %vm6739_vm0, %v8508_v1  ;;  %5967 = vmatprep.mubr.msk.bf16.mxu1 %vm6739_vm0, %v8508_v1 }
  0xbe   : > { %5756 = vmatmul.mubr.bf16.gmra.mrb[72].mxu0 %v6569_v45  ;;  %5968 = vmatmul.mubr.bf16.gmra.mrb[72].mxu1 %v6570_v46 }
  0xbf   : > { %5759 = vmatprep.mubr.msk.bf16.mxu0 %vm6739_vm0, %v8508_v1  ;;  %5971 = vmatprep.mubr.msk.bf16.mxu1 %vm6739_vm0, %v8508_v1 }
  0xc6   : > { %5760 = vmatmul.mubr.bf16.gmra.mrb[76].mxu0 %v6571_v47  ;;  %5972 = vmatmul.mubr.bf16.gmra.mrb[76].mxu1 %v6572_v48 }
  0xc7   : > { %5763 = vmatprep.mubr.msk.bf16.mxu0 %vm6739_vm0, %v8508_v1  ;;  %5975 = vmatprep.mubr.msk.bf16.mxu1 %vm6739_vm0, %v8508_v1 }
  0xce   : > { %5764 = vmatmul.mubr.bf16.gmra.mrb[80].mxu0 %v6573_v49  ;;  %5976 = vmatmul.mubr.bf16.gmra.mrb[80].mxu1 %v6574_v50 }
  0xcf   : > { %5767 = vmatprep.mubr.msk.bf16.mxu0 %vm6739_vm0, %v8508_v1  ;;  %5979 = vmatprep.mubr.msk.bf16.mxu1 %vm6739_vm0, %v8508_v1 }
  0xd6   : > { %5768 = vmatmul.mubr.bf16.gmra.mrb[84].mxu0 %v6575_v51  ;;  %5980 = vmatmul.mubr.bf16.gmra.mrb[84].mxu1 %v6576_v52 }
  0xd7   : > { %5771 = vmatprep.mubr.msk.bf16.mxu0 %vm6739_vm0, %v8508_v1  ;;  %5983 = vmatprep.mubr.msk.bf16.mxu1 %vm6739_vm0, %v8508_v1 }
  0xde   : > { %5772 = vmatmul.mubr.bf16.gmra.mrb[88].mxu0 %v6577_v53  ;;  %5984 = vmatmul.mubr.bf16.gmra.mrb[88].mxu1 %v6578_v54  ;;  %v6595_v53 = vld [vmem:[%s6808_s9 + $0xf8] sm:$0xff]  }
  0xdf   : > { %5775 = vmatprep.mubr.msk.bf16.mxu0 %vm6739_vm0, %v8508_v1  ;;  %5987 = vmatprep.mubr.msk.bf16.mxu1 %vm6739_vm0, %v8508_v1  ;;  %v6596_v54 = vld [vmem:[%s6817_s14 + $0xf8] sm:$0xff]  }
  0xe6   : > { %5776 = vmatmul.mubr.bf16.gmra.mrb[92].mxu0 %v6579_v55  ;;  %5988 = vmatmul.mubr.bf16.gmra.mrb[92].mxu1 %v6580_v56 }
  0xe7   : > { %5779 = vmatprep.mubr.msk.bf16.mxu0 %vm6739_vm0, %v8508_v1  ;;  %5991 = vmatprep.mubr.msk.bf16.mxu1 %vm6739_vm0, %v8508_v1 }
  0xee   : > { %5780 = vmatmul.mubr.bf16.gmra.mrb[96].mxu0 %v6581_v57  ;;  %5992 = vmatmul.mubr.bf16.gmra.mrb[96].mxu1 %v6582_v58 }
  0xef   : > { %5783 = vmatprep.mubr.msk.bf16.mxu0 %vm6739_vm0, %v8508_v1  ;;  %5995 = vmatprep.mubr.msk.bf16.mxu1 %vm6739_vm0, %v8508_v1 }
  0xf6   : > { %5784 = vmatmul.mubr.bf16.gmra.mrb[100].mxu0 %v6583_v59  ;;  %5996 = vmatmul.mubr.bf16.gmra.mrb[100].mxu1 %v6584_v60 }
  0xf7   : > { %5787 = vmatprep.mubr.msk.bf16.mxu0 %vm6739_vm0, %v8508_v1  ;;  %5999 = vmatprep.mubr.msk.bf16.mxu1 %vm6739_vm0, %v8508_v1 }
  0xfe   : > { %5788 = vmatmul.mubr.bf16.gmra.mrb[104].mxu0 %v6585_v61  ;;  %6000 = vmatmul.mubr.bf16.gmra.mrb[104].mxu1 %v6586_v62 }
  0xff   : > { %5791 = vmatprep.mubr.msk.bf16.mxu0 %vm6739_vm0, %v8508_v1  ;;  %6003 = vmatprep.mubr.msk.bf16.mxu1 %vm6739_vm0, %v8508_v1 }
 0x101   : > { %v7019_v63 = vpop.f32.mrb[0].mxu0  ;;  %v7021_v0 = vpop.f32.mrb[0].mxu1 }
 0x102   : > { %v5685_v3 = vpop.f32.mrb[1].mxu0  ;;  %v5897_v4 = vpop.f32.mrb[1].mxu1 }
 0x103   : > { %v7027_v7 = vpop.f32.mrb[2].mxu0  ;;  %v7029_v8 = vpop.f32.mrb[2].mxu1 }
 0x104   : > { %v5686_v10 = vpop.f32.mrb[3].mxu0  ;;  %v5898_v11 = vpop.f32.mrb[3].mxu1 }
 0x106   : > { %5792 = vmatmul.mubr.bf16.gmra.mrb[108].mxu0 %v6587_v5  ;;  %6004 = vmatmul.mubr.bf16.gmra.mrb[108].mxu1 %v6588_v6  ;;  %v6597_v5 = vld [vmem:[%s6808_s9 + $0x100] sm:$0xff]  }
 0x107   : > { %5795 = vmatprep.mubr.msk.bf16.mxu0 %vm6739_vm0, %v8508_v1  ;;  %6007 = vmatprep.mubr.msk.bf16.mxu1 %vm6739_vm0, %v8508_v1  ;;  %v6598_v6 = vld [vmem:[%s6817_s14 + $0x100] sm:$0xff]  }
 0x109   : > { %v7037_v12 = vpop.f32.mrb[4].mxu0  ;;  %v7039_v13 = vpop.f32.mrb[4].mxu1 }
 0x10a   : > { %v5689_v15 = vpop.f32.mrb[5].mxu0  ;;  %v5901_v16 = vpop.f32.mrb[5].mxu1 }
 0x10b   : > { %v7045_v19 = vpop.f32.mrb[6].mxu0  ;;  %v7047_v20 = vpop.f32.mrb[6].mxu1 }
 0x10c   : > { %v5690_v22 = vpop.f32.mrb[7].mxu0  ;;  %v5902_v23 = vpop.f32.mrb[7].mxu1 }
 0x10e   : > { %5796 = vmatmul.mubr.bf16.gmra.mrb[112].mxu0 %v6589_v17  ;;  %6008 = vmatmul.mubr.bf16.gmra.mrb[112].mxu1 %v6590_v18 }
 0x10f   : > { %5799 = vmatprep.mubr.msk.bf16.mxu0 %vm6739_vm0, %v8508_v1  ;;  %6011 = vmatprep.mubr.msk.bf16.mxu1 %vm6739_vm0, %v8508_v1 }
 0x111   : > { %v7055_v24 = vpop.f32.mrb[8].mxu0  ;;  %v7057_v25 = vpop.f32.mrb[8].mxu1 }
 0x112   : > { %v5693_v27 = vpop.f32.mrb[9].mxu0  ;;  %v5905_v28 = vpop.f32.mrb[9].mxu1 }
 0x113   : > { %v7063_v31 = vpop.f32.mrb[10].mxu0  ;;  %v7065_v32 = vpop.f32.mrb[10].mxu1 }
 0x114   : > { %v5694_v34 = vpop.f32.mrb[11].mxu0  ;;  %v5906_v35 = vpop.f32.mrb[11].mxu1 }
 0x116   : > { %5800 = vmatmul.mubr.bf16.gmra.mrb[116].mxu0 %v6591_v29  ;;  %6012 = vmatmul.mubr.bf16.gmra.mrb[116].mxu1 %v6592_v30  ;;  %v6599_v29 = vld [vmem:[%s6808_s9 + $0x108] sm:$0xff]  }
 0x117   : > { %5803 = vmatprep.mubr.msk.bf16.mxu0 %vm6739_vm0, %v8508_v1  ;;  %6015 = vmatprep.mubr.msk.bf16.mxu1 %vm6739_vm0, %v8508_v1  ;;  %v6600_v30 = vld [vmem:[%s6817_s14 + $0x108] sm:$0xff]  }
 0x119   : > { %v7073_v36 = vpop.f32.mrb[12].mxu0  ;;  %v7075_v37 = vpop.f32.mrb[12].mxu1 }
 0x11a   : > { %v5697_v39 = vpop.f32.mrb[13].mxu0  ;;  %v5909_v40 = vpop.f32.mrb[13].mxu1 }
 0x11b   : > { %v7081_v43 = vpop.f32.mrb[14].mxu0  ;;  %v7083_v44 = vpop.f32.mrb[14].mxu1 }
 0x11c   : > { %v5698_v46 = vpop.f32.mrb[15].mxu0  ;;  %v5910_v47 = vpop.f32.mrb[15].mxu1 }
 0x11d   : > { %v6602_v46 = vld [vmem:[%s6817_s14 + $0x110] sm:$0xff]  }
 0x11e   : > { %5804 = vmatmul.mubr.bf16.gmra.mrb[120].mxu0 %v6593_v41  ;;  %6016 = vmatmul.mubr.bf16.gmra.mrb[120].mxu1 %v6594_v42  ;;  %v6601_v42 = vld [vmem:[%s6808_s9 + $0x110] sm:$0xff]  }
 0x11f   : > { %5807 = vmatprep.mubr.msk.bf16.mxu0 %vm6739_vm0, %v8508_v1  ;;  %6019 = vmatprep.mubr.msk.bf16.mxu1 %vm6739_vm0, %v8508_v1 }
 0x121   : > { %v7091_v48 = vpop.f32.mrb[16].mxu0  ;;  %v7093_v49 = vpop.f32.mrb[16].mxu1 }
 0x122   : > { %v5701_v51 = vpop.f32.mrb[17].mxu0  ;;  %v5913_v52 = vpop.f32.mrb[17].mxu1 }
 0x123   : > { %v7099_v55 = vpop.f32.mrb[18].mxu0  ;;  %v7101_v56 = vpop.f32.mrb[18].mxu1 }
 0x124   : > { %v5702_v58 = vpop.f32.mrb[19].mxu0  ;;  %v5914_v59 = vpop.f32.mrb[19].mxu1 }
 0x126   : > { %5808 = vmatmul.mubr.bf16.gmra.mrb[124].mxu0 %v6595_v53  ;;  %6020 = vmatmul.mubr.bf16.gmra.mrb[124].mxu1 %v6596_v54 }
 0x127   : > { %5811 = vmatprep.mubr.msk.bf16.mxu0 %vm6739_vm0, %v8508_v1  ;;  %6023 = vmatprep.mubr.msk.bf16.mxu1 %vm6739_vm0, %v8508_v1 }
 0x129   : > { %v7109_v60 = vpop.f32.mrb[20].mxu0  ;;  %v7111_v61 = vpop.f32.mrb[20].mxu1 }
 0x12a   : > { %v5705_v3 = vpop.f32.mrb[21].mxu0  ;;  %v5917_v4 = vpop.f32.mrb[21].mxu1 }
 0x12b   : > { %v7117_v10 = vpop.f32.mrb[22].mxu0  ;;  %v7119_v11 = vpop.f32.mrb[22].mxu1 }
 0x12c   : > { %v5706_v16 = vpop.f32.mrb[23].mxu0  ;;  %v5918_v17 = vpop.f32.mrb[23].mxu1 }
 0x12d   : > { %v6604_v16 = vld [vmem:[%s6817_s14 + $0x118] sm:$0xff]  }
 0x12e   : > { %5812 = vmatmul.mubr.bf16.gmra.mrb[128].mxu0 %v6597_v5  ;;  %6024 = vmatmul.mubr.bf16.gmra.mrb[128].mxu1 %v6598_v6  ;;  %v6603_v6 = vld [vmem:[%s6808_s9 + $0x118] sm:$0xff]  }
 0x12f   : > { %5815 = vmatprep.mubr.msk.bf16.mxu0 %vm6739_vm0, %v8508_v1  ;;  %6027 = vmatprep.mubr.msk.bf16.mxu1 %vm6739_vm0, %v8508_v1 }
 0x131   : > { %v7127_v18 = vpop.f32.mrb[24].mxu0  ;;  %v7129_v22 = vpop.f32.mrb[24].mxu1 }
 0x132   : > { %v5709_v27 = vpop.f32.mrb[25].mxu0  ;;  %v5921_v28 = vpop.f32.mrb[25].mxu1 }
 0x133   : > { %v7135_v34 = vpop.f32.mrb[26].mxu0  ;;  %v7137_v35 = vpop.f32.mrb[26].mxu1 }
 0x134   : > { %v5710_v40 = vpop.f32.mrb[27].mxu0  ;;  %v5922_v41 = vpop.f32.mrb[27].mxu1 }
 0x136   : > { %5816 = vmatmul.mubr.bf16.gmra.mrb[132].mxu0 %v6599_v29  ;;  %6028 = vmatmul.mubr.bf16.gmra.mrb[132].mxu1 %v6600_v30 }
 0x137   : > { %5819 = vmatprep.mubr.msk.bf16.mxu0 %vm6739_vm0, %v8508_v1  ;;  %6031 = vmatprep.mubr.msk.bf16.mxu1 %vm6739_vm0, %v8508_v1 }
 0x139   : > { %v7159_v47 = vpop.f32.mrb[28].mxu0  ;;  %v7161_v51 = vpop.f32.mrb[28].mxu1 }
 0x13a   : > { %v5713_v53 = vpop.f32.mrb[29].mxu0  ;;  %v5925_v54 = vpop.f32.mrb[29].mxu1 }
 0x13b   : > { %v7165_v58 = vpop.f32.mrb[30].mxu0  ;;  %v7167_v59 = vpop.f32.mrb[30].mxu1  ;;  %v6605_v54 = vld [vmem:[%s6808_s9 + $0x120] sm:$0xff]  }
 0x13c   : > { %v5714_v4 = vpop.f32.mrb[31].mxu0  ;;  %v5926_v5 = vpop.f32.mrb[31].mxu1 }
 0x13d   : > { %v6606_v4 = vld [vmem:[%s6817_s14 + $0x120] sm:$0xff]  }
 0x13e   : > { %5820 = vmatmul.mubr.bf16.gmra.mrb[136].mxu0 %v6601_v42  ;;  %6032 = vmatmul.mubr.bf16.gmra.mrb[136].mxu1 %v6602_v46 }
 0x13f   : > { %5823 = vmatprep.mubr.msk.bf16.mxu0 %vm6739_vm0, %v8508_v1  ;;  %6035 = vmatprep.mubr.msk.bf16.mxu1 %vm6739_vm0, %v8508_v1 }
 0x141   : > { %v7177_v17 = vpop.f32.mrb[32].mxu0  ;;  %v7179_v27 = vpop.f32.mrb[32].mxu1 }
 0x142   : > { %v5717_v29 = vpop.f32.mrb[33].mxu0  ;;  %v5929_v30 = vpop.f32.mrb[33].mxu1 }
 0x143   : > { %v7183_v40 = vpop.f32.mrb[34].mxu0  ;;  %v7185_v41 = vpop.f32.mrb[34].mxu1  ;;  %v6607_v30 = vld [vmem:[%s6808_s9 + $0x128] sm:$0xff]  }
 0x144   : > { %v5718_v46 = vpop.f32.mrb[35].mxu0  ;;  %v5930_v53 = vpop.f32.mrb[35].mxu1 }
 0x146   : > { %5824 = vmatmul.mubr.bf16.gmra.mrb[140].mxu0 %v6603_v6  ;;  %6036 = vmatmul.mubr.bf16.gmra.mrb[140].mxu1 %v6604_v16 }
 0x147   : > { %5827 = vmatprep.mubr.msk.bf16.mxu0 %vm6739_vm0, %v8508_v1  ;;  %6039 = vmatprep.mubr.msk.bf16.mxu1 %vm6739_vm0, %v8508_v1 }
 0x149   : > { %v7195_v5 = vpop.f32.mrb[36].mxu0  ;;  %v7197_v29 = vpop.f32.mrb[36].mxu1 }
 0x14a   : > { %v5721_v46 = vpop.f32.mrb[37].mxu0  ;;  %v5933_v6 = vpop.f32.mrb[37].mxu1 }
 0x14b   : > { %v7201_v16 = vpop.f32.mrb[38].mxu0  ;;  %v7203_v53 = vpop.f32.mrb[38].mxu1  ;;  %v6608_v46 = vld [vmem:[%s6817_s14 + $0x128] sm:$0xff]  }
 0x14c   : > { %v5722_v28 = vpop.f32.mrb[39].mxu0  ;;  %v5934_v3 = vpop.f32.mrb[39].mxu1 }
 0x14d   : > { %v6609_v28 = vld [vmem:[%s6808_s9 + $0x130] sm:$0xff]  }
 0x14e   : > { %5828 = vmatmul.mubr.bf16.gmra.mrb[144].mxu0 %v6605_v54  ;;  %6040 = vmatmul.mubr.bf16.gmra.mrb[144].mxu1 %v6606_v4 }
 0x14f   : > { %5831 = vmatprep.mubr.msk.bf16.mxu0 %vm6739_vm0, %v8508_v1  ;;  %6043 = vmatprep.mubr.msk.bf16.mxu1 %vm6739_vm0, %v8508_v1 }
 0x151   : > { %v7213_v6 = vpop.f32.mrb[40].mxu0  ;;  %v7215_v52 = vpop.f32.mrb[40].mxu1 }
 0x152   : > { %v5725_v3 = vpop.f32.mrb[41].mxu0  ;;  %v5937_v54 = vpop.f32.mrb[41].mxu1 }
 0x153   : > { %v7219_v4 = vpop.f32.mrb[42].mxu0  ;;  %v7221_v42 = vpop.f32.mrb[42].mxu1  ;;  %v6610_v3 = vld [vmem:[%s6817_s14 + $0x130] sm:$0xff]  }
 0x154   : > { %v5726_v23 = vpop.f32.mrb[43].mxu0  ;;  %v5938_v15 = vpop.f32.mrb[43].mxu1 }
 0x155   : > { %v6611_v23 = vld [vmem:[%s6808_s9 + $0x138] sm:$0xff]  }
 0x156   : > { %5832 = vmatmul.mubr.bf16.gmra.mrb[148].mxu0 %v6607_v30  ;;  %6044 = vmatmul.mubr.bf16.gmra.mrb[148].mxu1 %v6608_v46 }
 0x157   : > { %5835 = vmatprep.mubr.msk.bf16.mxu0 %vm6739_vm0, %v8508_v1  ;;  %6047 = vmatprep.mubr.msk.bf16.mxu1 %vm6739_vm0, %v8508_v1 }
 0x159   : > { %v7231_v54 = vpop.f32.mrb[44].mxu0  ;;  %v7233_v62 = vpop.f32.mrb[44].mxu1 }
 0x15a   : > { %v5729_v15 = vpop.f32.mrb[45].mxu0  ;;  %v5941_v30 = vpop.f32.mrb[45].mxu1 }
 0x15b   : > { %v7237_v46 = vpop.f32.mrb[46].mxu0  ;;  %v7239_v39 = vpop.f32.mrb[46].mxu1  ;;  %v6612_v15 = vld [vmem:[%s6817_s14 + $0x138] sm:$0xff]  }
 0x15c   : > { %v5730_v50 = vpop.f32.mrb[47].mxu0  ;;  %v5942_v45 = vpop.f32.mrb[47].mxu1 }
 0x15d   : > { %v6613_v50 = vld [vmem:[%s6808_s9 + $0x140] sm:$0xff]  }
 0x15e   : > { %5836 = vmatmul.mubr.bf16.gmra.mrb[152].mxu0 %v6609_v28  ;;  %6048 = vmatmul.mubr.bf16.gmra.mrb[152].mxu1 %v6610_v3 }
 0x15f   : > { %5839 = vmatprep.mubr.msk.bf16.mxu0 %vm6739_vm0, %v8508_v1  ;;  %6051 = vmatprep.mubr.msk.bf16.mxu1 %vm6739_vm0, %v8508_v1 }
 0x161   : > { %v7249_v30 = vpop.f32.mrb[48].mxu0  ;;  %v7251_v38 = vpop.f32.mrb[48].mxu1 }
 0x162   : > { %8658 = vst [vmem:[#allocation2_spill] sm:$0xff] %v7249_v30  ;;  %8659 = vst [vmem:[#allocation3_spill] sm:$0xff] %v7251_v38  ;;  %v5733_v45 = vpop.f32.mrb[49].mxu0  ;;  %v5945_v28 = vpop.f32.mrb[49].mxu1  ;;  %v6686_v38 = vld [vmem:[%s7151_s29 + $0xd8] sm:$0xff]  }
 0x163   : > { %v7255_v3 = vpop.f32.mrb[50].mxu0  ;;  %v7257_v57 = vpop.f32.mrb[50].mxu1  ;;  %v6614_v45 = vld [vmem:[%s6817_s14 + $0x140] sm:$0xff]  }
 0x164   : > { %8660 = vst [vmem:[#allocation4_spill] sm:$0xff] %v7255_v3  ;;  %8661 = vst [vmem:[#allocation5_spill] sm:$0xff] %v7257_v57  ;;  %v5734_v26 = vpop.f32.mrb[51].mxu0  ;;  %v5946_v21 = vpop.f32.mrb[51].mxu1  ;;  %v8666_v57 = vmov 0.0   ;;  %v6685_v3 = vld [vmem:[%s7143_s26 + $0xd8] sm:$0xff]  }
 0x165   : > { %v6615_v26 = vld [vmem:[%s6808_s9 + $0x148] sm:$0xff]  }
 0x166   : > { %5840 = vmatmul.mubr.bf16.gmra.mrb[156].mxu0 %v6611_v23  ;;  %6052 = vmatmul.mubr.bf16.gmra.mrb[156].mxu1 %v6612_v15 }
 0x167   : > { %5843 = vmatprep.mubr.msk.bf16.mxu0 %vm6739_vm0, %v8508_v1  ;;  %6055 = vmatprep.mubr.msk.bf16.mxu1 %vm6739_vm0, %v8508_v1 }
 0x169   : > { %v7267_v28 = vpop.f32.mrb[52].mxu0  ;;  %v7269_v14 = vpop.f32.mrb[52].mxu1 }
 0x16a   : > { %8662 = vst [vmem:[#allocation6_spill] sm:$0xff] %v7267_v28  ;;  %8663 = vst [vmem:[#allocation7_spill] sm:$0xff] %v7269_v14  ;;  %v5737_v21 = vpop.f32.mrb[53].mxu0  ;;  %v5949_v23 = vpop.f32.mrb[53].mxu1 }
 0x16b   : > { %v7273_v15 = vpop.f32.mrb[54].mxu0  ;;  %v7275_v33 = vpop.f32.mrb[54].mxu1  ;;  %v6616_v21 = vld [vmem:[%s6817_s14 + $0x148] sm:$0xff]  }
 0x16c   : > { %8664 = vst [vmem:[#allocation8_spill] sm:$0xff] %v7273_v15  ;;  %8665 = vst [vmem:[#allocation9_spill] sm:$0xff] %v7275_v33  ;;  %v5738_v2 = vpop.f32.mrb[55].mxu0  ;;  %v5950_v1 = vpop.f32.mrb[55].mxu1 }
 0x16d   : > { %v6617_v2 = vld [vmem:[%s6808_s9 + $0x150] sm:$0xff]  }
 0x16e   : > { %5844 = vmatmul.mubr.bf16.gmra.mrb[160].mxu0 %v6613_v50  ;;  %6056 = vmatmul.mubr.bf16.gmra.mrb[160].mxu1 %v6614_v45 }
 0x16f   : > { %5847 = vmatprep.mubr.msk.bf16.mxu0 %vm6739_vm0, %v8666_v57  ;;  %6059 = vmatprep.mubr.msk.bf16.mxu1 %vm6739_vm0, %v8666_v57 }
 0x171   : > { %v7285_v23 = vpop.f32.mrb[56].mxu0  ;;  %v7287_v14 = vpop.f32.mrb[56].mxu1 }
 0x172   : > { %8667 = vst [vmem:[#allocation10_spill] sm:$0xff] %v7285_v23  ;;  %8668 = vst [vmem:[#allocation11_spill] sm:$0xff] %v7287_v14  ;;  %v5741_v1 = vpop.f32.mrb[57].mxu0  ;;  %v5953_v50 = vpop.f32.mrb[57].mxu1 }
 0x173   : > { %v7291_v45 = vpop.f32.mrb[58].mxu0  ;;  %v7293_v9 = vpop.f32.mrb[58].mxu1  ;;  %v6618_v1 = vld [vmem:[%s6817_s14 + $0x150] sm:$0xff]  }
 0x174   : > { %8669 = vst [vmem:[#allocation12_spill] sm:$0xff] %v7291_v45  ;;  %8670 = vst [vmem:[#allocation13_spill] sm:$0xff] %v7293_v9  ;;  %v5742_v15 = vpop.f32.mrb[59].mxu0  ;;  %v5954_v28 = vpop.f32.mrb[59].mxu1 }
 0x175   : > { %v6619_v15 = vld [vmem:[%s6808_s9 + $0x158] sm:$0xff]  }
 0x176   : > { %5848 = vmatmul.mubr.bf16.gmra.mrb[164].mxu0 %v6615_v26  ;;  %6060 = vmatmul.mubr.bf16.gmra.mrb[164].mxu1 %v6616_v21 }
 0x177   : > { %5851 = vmatprep.mubr.msk.bf16.mxu0 %vm6739_vm0, %v8666_v57  ;;  %6063 = vmatprep.mubr.msk.bf16.mxu1 %vm6739_vm0, %v8666_v57 }
 0x179   : > { %v7303_v50 = vpop.f32.mrb[60].mxu0  ;;  %v7305_v14 = vpop.f32.mrb[60].mxu1 }
 0x17a   : > { %8671 = vst [vmem:[#allocation14_spill] sm:$0xff] %v7303_v50  ;;  %8672 = vst [vmem:[#allocation15_spill] sm:$0xff] %v7305_v14  ;;  %v5745_v28 = vpop.f32.mrb[61].mxu0  ;;  %v5957_v26 = vpop.f32.mrb[61].mxu1 }
 0x17b   : > { %v7309_v21 = vpop.f32.mrb[62].mxu0  ;;  %v7311_v33 = vpop.f32.mrb[62].mxu1  ;;  %v6620_v28 = vld [vmem:[%s6817_s14 + $0x158] sm:$0xff]  }
 0x17c   : > { %8673 = vst [vmem:[#allocation16_spill] sm:$0xff] %v7309_v21  ;;  %8674 = vst [vmem:[#allocation17_spill] sm:$0xff] %v7311_v33  ;;  %v5746_v45 = vpop.f32.mrb[63].mxu0  ;;  %v5958_v23 = vpop.f32.mrb[63].mxu1 }
 0x17e   : > { %5852 = vmatmul.mubr.bf16.gmra.mrb[168].mxu0 %v6617_v2  ;;  %6064 = vmatmul.mubr.bf16.gmra.mrb[168].mxu1 %v6618_v1  ;;  %v6621_v1 = vld [vmem:[%s6808_s9 + $0x160] sm:$0xff]  }
 0x17f   : > { %5855 = vmatprep.mubr.msk.bf16.mxu0 %vm6739_vm0, %v8666_v57  ;;  %6067 = vmatprep.mubr.msk.bf16.mxu1 %vm6739_vm0, %v8666_v57 }
 0x181   : > { %v7321_v26 = vpop.f32.mrb[64].mxu0  ;;  %v7323_v14 = vpop.f32.mrb[64].mxu1 }
 0x182   : > { %8675 = vst [vmem:[#allocation18_spill] sm:$0xff] %v7321_v26  ;;  %8676 = vst [vmem:[#allocation19_spill] sm:$0xff] %v7323_v14  ;;  %v5749_v9 = vpop.f32.mrb[65].mxu0  ;;  %v5961_v23 = vpop.f32.mrb[65].mxu1 }
 0x183   : > { %v7327_v2 = vpop.f32.mrb[66].mxu0  ;;  %v7329_v45 = vpop.f32.mrb[66].mxu1 }
 0x184   : > { %8677 = vst [vmem:[#allocation20_spill] sm:$0xff] %v7327_v2  ;;  %8678 = vst [vmem:[#allocation21_spill] sm:$0xff] %v7329_v45  ;;  %v5750_v33 = vpop.f32.mrb[67].mxu0  ;;  %v5962_v21 = vpop.f32.mrb[67].mxu1 }
 0x185   : > { %v6622_v33 = vld [vmem:[%s6817_s14 + $0x160] sm:$0xff]  }
 0x186   : > { %5856 = vmatmul.mubr.bf16.gmra.mrb[172].mxu0 %v6619_v15  ;;  %6068 = vmatmul.mubr.bf16.gmra.mrb[172].mxu1 %v6620_v28  ;;  %v6623_v28 = vld [vmem:[%s6808_s9 + $0x168] sm:$0xff]  }
 0x187   : > { %5859 = vmatprep.mubr.msk.bf16.mxu0 %vm6739_vm0, %v8666_v57  ;;  %6071 = vmatprep.mubr.msk.bf16.mxu1 %vm6739_vm0, %v8666_v57 }
 0x189   : > { %v7337_v9 = vpop.f32.mrb[68].mxu0  ;;  %v7339_v23 = vpop.f32.mrb[68].mxu1 }
 0x18a   : > { %8679 = vst [vmem:[#allocation22_spill] sm:$0xff] %v7337_v9  ;;  %8680 = vst [vmem:[#allocation23_spill] sm:$0xff] %v7339_v23  ;;  %v5753_v14 = vpop.f32.mrb[69].mxu0  ;;  %v5965_v26 = vpop.f32.mrb[69].mxu1 }
 0x18b   : > { %v7345_v15 = vpop.f32.mrb[70].mxu0  ;;  %v7347_v21 = vpop.f32.mrb[70].mxu1 }
 0x18c   : > { %8681 = vst [vmem:[#allocation24_spill] sm:$0xff] %v7345_v15  ;;  %8682 = vst [vmem:[#allocation25_spill] sm:$0xff] %v7347_v21  ;;  %v5754_v45 = vpop.f32.mrb[71].mxu0  ;;  %v5966_v2 = vpop.f32.mrb[71].mxu1 }
 0x18d   : > { %v6624_v2 = vld [vmem:[%s6817_s14 + $0x168] sm:$0xff]  }
 0x18e   : > { %5860 = vmatmul.mubr.bf16.gmra.mrb[176].mxu0 %v6621_v1  ;;  %6072 = vmatmul.mubr.bf16.gmra.mrb[176].mxu1 %v6622_v33  ;;  %v6625_v33 = vld [vmem:[%s6808_s9 + $0x170] sm:$0xff]  }
 0x18f   : > { %5863 = vmatprep.mubr.msk.bf16.mxu0 %vm6739_vm0, %v8666_v57  ;;  %6075 = vmatprep.mubr.msk.bf16.mxu1 %vm6739_vm0, %v8666_v57 }
 0x191   : > { %v7355_v14 = vpop.f32.mrb[72].mxu0  ;;  %v7357_v26 = vpop.f32.mrb[72].mxu1 }
 0x192   : > { %8683 = vst [vmem:[#allocation26_spill] sm:$0xff] %v7355_v14  ;;  %8684 = vst [vmem:[#allocation27_spill] sm:$0xff] %v7357_v26  ;;  %v5757_v23 = vpop.f32.mrb[73].mxu0  ;;  %v5969_v9 = vpop.f32.mrb[73].mxu1 }
 0x193   : > { %v7363_v45 = vpop.f32.mrb[74].mxu0  ;;  %v7365_v1 = vpop.f32.mrb[74].mxu1 }
 0x194   : > { %8685 = vst [vmem:[#allocation28_spill] sm:$0xff] %v7363_v45  ;;  %8686 = vst [vmem:[#allocation29_spill] sm:$0xff] %v7365_v1  ;;  %v5758_v21 = vpop.f32.mrb[75].mxu0  ;;  %v5970_v15 = vpop.f32.mrb[75].mxu1 }
 0x195   : > { %v6626_v15 = vld [vmem:[%s6817_s14 + $0x170] sm:$0xff]  }
 0x196   : > { %5864 = vmatmul.mubr.bf16.gmra.mrb[180].mxu0 %v6623_v28  ;;  %6076 = vmatmul.mubr.bf16.gmra.mrb[180].mxu1 %v6624_v2  ;;  %v6627_v2 = vld [vmem:[%s6808_s9 + $0x178] sm:$0xff]  }
 0x197   : > { %5867 = vmatprep.mubr.msk.bf16.mxu0 %vm6739_vm0, %v8666_v57  ;;  %6079 = vmatprep.mubr.msk.bf16.mxu1 %vm6739_vm0, %v8666_v57 }
 0x199   : > { %v7373_v9 = vpop.f32.mrb[76].mxu0  ;;  %v7375_v23 = vpop.f32.mrb[76].mxu1 }
 0x19a   : > { %8687 = vst [vmem:[#allocation30_spill] sm:$0xff] %v7373_v9  ;;  %8688 = vst [vmem:[#allocation31_spill] sm:$0xff] %v7375_v23  ;;  %v5761_v26 = vpop.f32.mrb[77].mxu0  ;;  %v5973_v14 = vpop.f32.mrb[77].mxu1 }
 0x19b   : > { %v7381_v21 = vpop.f32.mrb[78].mxu0  ;;  %v7383_v28 = vpop.f32.mrb[78].mxu1 }
 0x19c   : > { %8689 = vst [vmem:[#allocation32_spill] sm:$0xff] %v7381_v21  ;;  %8690 = vst [vmem:[#allocation33_spill] sm:$0xff] %v7383_v28  ;;  %v5762_v1 = vpop.f32.mrb[79].mxu0  ;;  %v5974_v45 = vpop.f32.mrb[79].mxu1 }
 0x19d   : > { %v6628_v45 = vld [vmem:[%s6817_s14 + $0x178] sm:$0xff]  }
 0x19e   : > { %5868 = vmatmul.mubr.bf16.gmra.mrb[184].mxu0 %v6625_v33  ;;  %6080 = vmatmul.mubr.bf16.gmra.mrb[184].mxu1 %v6626_v15  ;;  %v6629_v15 = vld [vmem:[%s6808_s9 + $0x180] sm:$0xff]  }
 0x19f   : > { %5871 = vmatprep.mubr.msk.bf16.mxu0 %vm6739_vm0, %v8666_v57  ;;  %6083 = vmatprep.mubr.msk.bf16.mxu1 %vm6739_vm0, %v8666_v57 }
 0x1a1   : > { %v7391_v14 = vpop.f32.mrb[80].mxu0  ;;  %v7393_v26 = vpop.f32.mrb[80].mxu1 }
 0x1a2   : > { %8691 = vst [vmem:[#allocation34_spill] sm:$0xff] %v7391_v14  ;;  %8692 = vst [vmem:[#allocation35_spill] sm:$0xff] %v7393_v26  ;;  %v5765_v23 = vpop.f32.mrb[81].mxu0  ;;  %v5977_v9 = vpop.f32.mrb[81].mxu1 }
 0x1a3   : > { %v7399_v1 = vpop.f32.mrb[82].mxu0  ;;  %v7401_v33 = vpop.f32.mrb[82].mxu1 }
 0x1a4   : > { %8693 = vst [vmem:[#allocation36_spill] sm:$0xff] %v7399_v1  ;;  %8694 = vst [vmem:[#allocation37_spill] sm:$0xff] %v7401_v33  ;;  %v5766_v28 = vpop.f32.mrb[83].mxu0  ;;  %v5978_v21 = vpop.f32.mrb[83].mxu1 }
 0x1a5   : > { %v6630_v21 = vld [vmem:[%s6817_s14 + $0x180] sm:$0xff]  }
 0x1a6   : > { %5872 = vmatmul.mubr.bf16.gmra.mrb[188].mxu0 %v6627_v2  ;;  %6084 = vmatmul.mubr.bf16.gmra.mrb[188].mxu1 %v6628_v45  ;;  %v6631_v45 = vld [vmem:[%s7143_s26] sm:$0xff]  }
 0x1a7   : > { %5875 = vmatprep.mubr.msk.bf16.mxu0 %vm6739_vm0, %v8666_v57  ;;  %6087 = vmatprep.mubr.msk.bf16.mxu1 %vm6739_vm0, %v8666_v57 }
 0x1a9   : > { %v7409_v9 = vpop.f32.mrb[84].mxu0  ;;  %v7411_v23 = vpop.f32.mrb[84].mxu1 }
 0x1aa   : > { %8695 = vst [vmem:[#allocation38_spill] sm:$0xff] %v7409_v9  ;;  %8696 = vst [vmem:[#allocation39_spill] sm:$0xff] %v7411_v23  ;;  %v5769_v26 = vpop.f32.mrb[85].mxu0  ;;  %v5981_v14 = vpop.f32.mrb[85].mxu1 }
 0x1ab   : > { %v7417_v28 = vpop.f32.mrb[86].mxu0  ;;  %v7419_v2 = vpop.f32.mrb[86].mxu1 }
 0x1ac   : > { %8697 = vst [vmem:[#allocation40_spill] sm:$0xff] %v7417_v28  ;;  %8698 = vst [vmem:[#allocation41_spill] sm:$0xff] %v7419_v2  ;;  %v5770_v33 = vpop.f32.mrb[87].mxu0  ;;  %v5982_v1 = vpop.f32.mrb[87].mxu1 }
 0x1ad   : > { %v6632_v1 = vld [vmem:[%s7151_s29] sm:$0xff]  }
 0x1ae   : > { %5876 = vmatmul.mubr.bf16.gmra.mrb[192].mxu0 %v6629_v15  ;;  %6088 = vmatmul.mubr.bf16.gmra.mrb[192].mxu1 %v6630_v21  ;;  %v6633_v21 = vld [vmem:[%s7143_s26 + $0x8] sm:$0xff]  }
 0x1af   : > { %6107 = vmatprep.mubr.msk.bf16.mxu0 %vm6739_vm0, %v8666_v57  ;;  %6319 = vmatprep.mubr.msk.bf16.mxu1 %vm6739_vm0, %v8666_v57 }
 0x1b1   : > { %v7427_v14 = vpop.f32.mrb[88].mxu0  ;;  %v7429_v26 = vpop.f32.mrb[88].mxu1 }
 0x1b2   : > { %8699 = vst [vmem:[#allocation42_spill] sm:$0xff] %v7427_v14  ;;  %8700 = vst [vmem:[#allocation43_spill] sm:$0xff] %v7429_v26  ;;  %v5773_v23 = vpop.f32.mrb[89].mxu0  ;;  %v5985_v9 = vpop.f32.mrb[89].mxu1 }
 0x1b3   : > { %v7435_v33 = vpop.f32.mrb[90].mxu0  ;;  %v7437_v15 = vpop.f32.mrb[90].mxu1 }
 0x1b4   : > { %8701 = vst [vmem:[#allocation44_spill] sm:$0xff] %v7435_v33  ;;  %8702 = vst [vmem:[#allocation45_spill] sm:$0xff] %v7437_v15  ;;  %v5774_v2 = vpop.f32.mrb[91].mxu0  ;;  %v5986_v28 = vpop.f32.mrb[91].mxu1 }
 0x1b5   : > { %v6634_v28 = vld [vmem:[%s7151_s29 + $0x8] sm:$0xff]  }
 0x1b6   : > { %6108 = vmatmul.mubr.bf16.vlgmr.msra.gmra.mrb[196].mxu0 %v6631_v45  ;;  %6320 = vmatmul.mubr.bf16.vlgmr.msra.gmra.mrb[196].mxu1 %v6632_v1  ;;  %v6635_v1 = vld [vmem:[%s7143_s26 + $0x10] sm:$0xff]  }
 0x1b7   : > { %6111 = vmatprep.mubr.msk.bf16.mxu0 %vm6739_vm0, %v8666_v57  ;;  %6323 = vmatprep.mubr.msk.bf16.mxu1 %vm6739_vm0, %v8666_v57 }
 0x1b9   : > { %v7445_v9 = vpop.f32.mrb[92].mxu0  ;;  %v7447_v23 = vpop.f32.mrb[92].mxu1 }
 0x1ba   : > { %8703 = vst [vmem:[#allocation46_spill] sm:$0xff] %v7445_v9  ;;  %8704 = vst [vmem:[#allocation47_spill] sm:$0xff] %v7447_v23  ;;  %v5777_v26 = vpop.f32.mrb[93].mxu0  ;;  %v5989_v14 = vpop.f32.mrb[93].mxu1 }
 0x1bb   : > { %v7453_v2 = vpop.f32.mrb[94].mxu0  ;;  %v7455_v45 = vpop.f32.mrb[94].mxu1 }
 0x1bc   : > { %8705 = vst [vmem:[#allocation48_spill] sm:$0xff] %v7453_v2  ;;  %8706 = vst [vmem:[#allocation49_spill] sm:$0xff] %v7455_v45  ;;  %v5778_v15 = vpop.f32.mrb[95].mxu0  ;;  %v5990_v33 = vpop.f32.mrb[95].mxu1 }
 0x1bd   : > { %v6636_v33 = vld [vmem:[%s7151_s29 + $0x10] sm:$0xff]  }
 0x1be   : > { %6112 = vmatmul.mubr.bf16.gmra.mrb[200].mxu0 %v6633_v21  ;;  %6324 = vmatmul.mubr.bf16.gmra.mrb[200].mxu1 %v6634_v28  ;;  %v6637_v28 = vld [vmem:[%s7143_s26 + $0x18] sm:$0xff]  }
 0x1bf   : > { %6115 = vmatprep.mubr.msk.bf16.mxu0 %vm6739_vm0, %v8666_v57  ;;  %6327 = vmatprep.mubr.msk.bf16.mxu1 %vm6739_vm0, %v8666_v57 }
 0x1c1   : > { %v7463_v14 = vpop.f32.mrb[96].mxu0  ;;  %v7465_v26 = vpop.f32.mrb[96].mxu1 }
 0x1c2   : > { %8707 = vst [vmem:[#allocation50_spill] sm:$0xff] %v7463_v14  ;;  %8708 = vst [vmem:[#allocation51_spill] sm:$0xff] %v7465_v26  ;;  %v5781_v23 = vpop.f32.mrb[97].mxu0  ;;  %v5993_v9 = vpop.f32.mrb[97].mxu1 }
 0x1c3   : > { %v7471_v15 = vpop.f32.mrb[98].mxu0  ;;  %v7473_v21 = vpop.f32.mrb[98].mxu1 }
 0x1c4   : > { %8709 = vst [vmem:[#allocation52_spill] sm:$0xff] %v7471_v15  ;;  %8710 = vst [vmem:[#allocation53_spill] sm:$0xff] %v7473_v21  ;;  %v5782_v45 = vpop.f32.mrb[99].mxu0  ;;  %v5994_v2 = vpop.f32.mrb[99].mxu1 }
 0x1c5   : > { %v6638_v2 = vld [vmem:[%s7151_s29 + $0x18] sm:$0xff]  }
 0x1c6   : > { %6116 = vmatmul.mubr.bf16.gmra.mrb[204].mxu0 %v6635_v1  ;;  %6328 = vmatmul.mubr.bf16.gmra.mrb[204].mxu1 %v6636_v33  ;;  %v6639_v33 = vld [vmem:[%s7143_s26 + $0x20] sm:$0xff]  }
 0x1c7   : > { %6119 = vmatprep.mubr.msk.bf16.mxu0 %vm6739_vm0, %v8666_v57  ;;  %6331 = vmatprep.mubr.msk.bf16.mxu1 %vm6739_vm0, %v8666_v57 }
 0x1c9   : > { %v7481_v9 = vpop.f32.mrb[100].mxu0  ;;  %v7483_v23 = vpop.f32.mrb[100].mxu1 }
 0x1ca   : > { %8711 = vst [vmem:[#allocation54_spill] sm:$0xff] %v7481_v9  ;;  %8712 = vst [vmem:[#allocation55_spill] sm:$0xff] %v7483_v23  ;;  %v5785_v26 = vpop.f32.mrb[101].mxu0  ;;  %v5997_v14 = vpop.f32.mrb[101].mxu1 }
 0x1cb   : > { %v7489_v45 = vpop.f32.mrb[102].mxu0  ;;  %v7491_v1 = vpop.f32.mrb[102].mxu1 }
 0x1cc   : > { %8713 = vst [vmem:[#allocation56_spill] sm:$0xff] %v7489_v45  ;;  %8714 = vst [vmem:[#allocation57_spill] sm:$0xff] %v7491_v1  ;;  %v5786_v21 = vpop.f32.mrb[103].mxu0  ;;  %v5998_v15 = vpop.f32.mrb[103].mxu1 }
 0x1cd   : > { %v6640_v15 = vld [vmem:[%s7151_s29 + $0x20] sm:$0xff]  }
 0x1ce   : > { %6120 = vmatmul.mubr.bf16.gmra.mrb[208].mxu0 %v6637_v28  ;;  %6332 = vmatmul.mubr.bf16.gmra.mrb[208].mxu1 %v6638_v2  ;;  %v6641_v2 = vld [vmem:[%s7143_s26 + $0x28] sm:$0xff]  }
 0x1cf   : > { %6123 = vmatprep.mubr.msk.bf16.mxu0 %vm6739_vm0, %v8666_v57  ;;  %6335 = vmatprep.mubr.msk.bf16.mxu1 %vm6739_vm0, %v8666_v57 }
 0x1d1   : > { %v7499_v14 = vpop.f32.mrb[104].mxu0  ;;  %v7501_v26 = vpop.f32.mrb[104].mxu1 }
 0x1d2   : > { %8715 = vst [vmem:[#allocation58_spill] sm:$0xff] %v7499_v14  ;;  %8716 = vst [vmem:[#allocation59_spill] sm:$0xff] %v7501_v26  ;;  %v5789_v23 = vpop.f32.mrb[105].mxu0  ;;  %v6001_v9 = vpop.f32.mrb[105].mxu1 }
 0x1d3   : > { %v7507_v21 = vpop.f32.mrb[106].mxu0  ;;  %v7509_v28 = vpop.f32.mrb[106].mxu1 }
 0x1d4   : > { %8717 = vst [vmem:[#allocation60_spill] sm:$0xff] %v7507_v21  ;;  %8718 = vst [vmem:[#allocation61_spill] sm:$0xff] %v7509_v28  ;;  %v5790_v1 = vpop.f32.mrb[107].mxu0  ;;  %v6002_v45 = vpop.f32.mrb[107].mxu1 }
 0x1d5   : > { %v6642_v45 = vld [vmem:[%s7151_s29 + $0x28] sm:$0xff]  }
 0x1d6   : > { %6124 = vmatmul.mubr.bf16.gmra.mrb[212].mxu0 %v6639_v33  ;;  %6336 = vmatmul.mubr.bf16.gmra.mrb[212].mxu1 %v6640_v15  ;;  %v6643_v15 = vld [vmem:[%s7143_s26 + $0x30] sm:$0xff]  }
 0x1d7   : > { %6127 = vmatprep.mubr.msk.bf16.mxu0 %vm6739_vm0, %v8666_v57  ;;  %6339 = vmatprep.mubr.msk.bf16.mxu1 %vm6739_vm0, %v8666_v57 }
 0x1d9   : > { %v7517_v9 = vpop.f32.mrb[108].mxu0  ;;  %v7519_v23 = vpop.f32.mrb[108].mxu1 }
 0x1da   : > { %8719 = vst [vmem:[#allocation62_spill] sm:$0xff] %v7517_v9  ;;  %8720 = vst [vmem:[#allocation63_spill] sm:$0xff] %v7519_v23  ;;  %v5793_v26 = vpop.f32.mrb[109].mxu0  ;;  %v6005_v14 = vpop.f32.mrb[109].mxu1 }
 0x1db   : > { %v7525_v1 = vpop.f32.mrb[110].mxu0  ;;  %v7527_v33 = vpop.f32.mrb[110].mxu1 }
 0x1dc   : > { %8721 = vst [vmem:[#allocation64_spill] sm:$0xff] %v7525_v1  ;;  %8722 = vst [vmem:[#allocation65_spill] sm:$0xff] %v7527_v33  ;;  %v5794_v28 = vpop.f32.mrb[111].mxu0  ;;  %v6006_v21 = vpop.f32.mrb[111].mxu1 }
 0x1dd   : > { %v6644_v21 = vld [vmem:[%s7151_s29 + $0x30] sm:$0xff]  }
 0x1de   : > { %6128 = vmatmul.mubr.bf16.gmra.mrb[216].mxu0 %v6641_v2  ;;  %6340 = vmatmul.mubr.bf16.gmra.mrb[216].mxu1 %v6642_v45  ;;  %v6645_v45 = vld [vmem:[%s7143_s26 + $0x38] sm:$0xff]  }
 0x1df   : > { %6131 = vmatprep.mubr.msk.bf16.mxu0 %vm6739_vm0, %v8666_v57  ;;  %6343 = vmatprep.mubr.msk.bf16.mxu1 %vm6739_vm0, %v8666_v57 }
 0x1e1   : > { %v7535_v14 = vpop.f32.mrb[112].mxu0  ;;  %v7537_v26 = vpop.f32.mrb[112].mxu1 }
 0x1e2   : > { %8723 = vst [vmem:[#allocation66_spill] sm:$0xff] %v7535_v14  ;;  %8724 = vst [vmem:[#allocation67_spill] sm:$0xff] %v7537_v26  ;;  %v5797_v23 = vpop.f32.mrb[113].mxu0  ;;  %v6009_v9 = vpop.f32.mrb[113].mxu1 }
 0x1e3   : > { %v7543_v28 = vpop.f32.mrb[114].mxu0  ;;  %v7545_v2 = vpop.f32.mrb[114].mxu1 }
 0x1e4   : > { %8725 = vst [vmem:[#allocation68_spill] sm:$0xff] %v7543_v28  ;;  %8726 = vst [vmem:[#allocation69_spill] sm:$0xff] %v7545_v2  ;;  %v5798_v33 = vpop.f32.mrb[115].mxu0  ;;  %v6010_v1 = vpop.f32.mrb[115].mxu1 }
 0x1e5   : > { %v6646_v1 = vld [vmem:[%s7151_s29 + $0x38] sm:$0xff]  }
 0x1e6   : > { %6132 = vmatmul.mubr.bf16.gmra.mrb[220].mxu0 %v6643_v15  ;;  %6344 = vmatmul.mubr.bf16.gmra.mrb[220].mxu1 %v6644_v21  ;;  %v6647_v21 = vld [vmem:[%s7143_s26 + $0x40] sm:$0xff]  }
 0x1e7   : > { %6135 = vmatprep.mubr.msk.bf16.mxu0 %vm6739_vm0, %v8666_v57  ;;  %6347 = vmatprep.mubr.msk.bf16.mxu1 %vm6739_vm0, %v8666_v57 }
 0x1e9   : > { %v7553_v9 = vpop.f32.mrb[116].mxu0  ;;  %v7555_v23 = vpop.f32.mrb[116].mxu1 }
 0x1ea   : > { %8727 = vst [vmem:[#allocation70_spill] sm:$0xff] %v7553_v9  ;;  %8728 = vst [vmem:[#allocation71_spill] sm:$0xff] %v7555_v23  ;;  %v5801_v26 = vpop.f32.mrb[117].mxu0  ;;  %v6013_v14 = vpop.f32.mrb[117].mxu1 }
 0x1eb   : > { %v7561_v33 = vpop.f32.mrb[118].mxu0  ;;  %v7563_v15 = vpop.f32.mrb[118].mxu1 }
 0x1ec   : > { %8729 = vst [vmem:[#allocation72_spill] sm:$0xff] %v7561_v33  ;;  %8730 = vst [vmem:[#allocation73_spill] sm:$0xff] %v7563_v15  ;;  %v5802_v2 = vpop.f32.mrb[119].mxu0  ;;  %v6014_v28 = vpop.f32.mrb[119].mxu1 }
 0x1ed   : > { %v6648_v28 = vld [vmem:[%s7151_s29 + $0x40] sm:$0xff]  }
 0x1ee   : > { %6136 = vmatmul.mubr.bf16.gmra.mrb[224].mxu0 %v6645_v45  ;;  %6348 = vmatmul.mubr.bf16.gmra.mrb[224].mxu1 %v6646_v1  ;;  %v6649_v1 = vld [vmem:[%s7143_s26 + $0x48] sm:$0xff]  }
 0x1ef   : > { %6139 = vmatprep.mubr.msk.bf16.mxu0 %vm6739_vm0, %v8666_v57  ;;  %6351 = vmatprep.mubr.msk.bf16.mxu1 %vm6739_vm0, %v8666_v57 }
 0x1f1   : > { %v7571_v14 = vpop.f32.mrb[120].mxu0  ;;  %v7573_v26 = vpop.f32.mrb[120].mxu1 }
 0x1f2   : > { %8731 = vst [vmem:[#allocation74_spill] sm:$0xff] %v7571_v14  ;;  %8732 = vst [vmem:[#allocation75_spill] sm:$0xff] %v7573_v26  ;;  %v5805_v23 = vpop.f32.mrb[121].mxu0  ;;  %v6017_v9 = vpop.f32.mrb[121].mxu1 }
 0x1f3   : > { %v7579_v2 = vpop.f32.mrb[122].mxu0  ;;  %v7581_v45 = vpop.f32.mrb[122].mxu1 }
 0x1f4   : > { %8733 = vst [vmem:[#allocation76_spill] sm:$0xff] %v7579_v2  ;;  %8734 = vst [vmem:[#allocation77_spill] sm:$0xff] %v7581_v45  ;;  %v5806_v15 = vpop.f32.mrb[123].mxu0  ;;  %v6018_v33 = vpop.f32.mrb[123].mxu1 }
 0x1f5   : > { %v6650_v33 = vld [vmem:[%s7151_s29 + $0x48] sm:$0xff]  }
 0x1f6   : > { %6140 = vmatmul.mubr.bf16.gmra.mrb[228].mxu0 %v6647_v21  ;;  %6352 = vmatmul.mubr.bf16.gmra.mrb[228].mxu1 %v6648_v28  ;;  %v6651_v28 = vld [vmem:[%s7143_s26 + $0x50] sm:$0xff]  }
 0x1f7   : > { %6143 = vmatprep.mubr.msk.bf16.mxu0 %vm6739_vm0, %v8666_v57  ;;  %6355 = vmatprep.mubr.msk.bf16.mxu1 %vm6739_vm0, %v8666_v57 }
 0x1f9   : > { %v7589_v9 = vpop.f32.mrb[124].mxu0  ;;  %v7591_v23 = vpop.f32.mrb[124].mxu1 }
 0x1fa   : > { %8735 = vst [vmem:[#allocation78_spill] sm:$0xff] %v7589_v9  ;;  %8736 = vst [vmem:[#allocation79_spill] sm:$0xff] %v7591_v23  ;;  %v5809_v26 = vpop.f32.mrb[125].mxu0  ;;  %v6021_v14 = vpop.f32.mrb[125].mxu1 }
 0x1fb   : > { %v7597_v15 = vpop.f32.mrb[126].mxu0  ;;  %v7599_v21 = vpop.f32.mrb[126].mxu1 }
 0x1fc   : > { %8737 = vst [vmem:[#allocation80_spill] sm:$0xff] %v7597_v15  ;;  %8738 = vst [vmem:[#allocation81_spill] sm:$0xff] %v7599_v21  ;;  %v5810_v45 = vpop.f32.mrb[127].mxu0  ;;  %v6022_v2 = vpop.f32.mrb[127].mxu1 }
 0x1fd   : > { %v6652_v2 = vld [vmem:[%s7151_s29 + $0x50] sm:$0xff]  }
 0x1fe   : > { %6144 = vmatmul.mubr.bf16.gmra.mrb[232].mxu0 %v6649_v1  ;;  %6356 = vmatmul.mubr.bf16.gmra.mrb[232].mxu1 %v6650_v33  ;;  %v6653_v33 = vld [vmem:[%s7143_s26 + $0x58] sm:$0xff]  }
 0x1ff   : > { %6147 = vmatprep.mubr.msk.bf16.mxu0 %vm6739_vm0, %v8666_v57  ;;  %6359 = vmatprep.mubr.msk.bf16.mxu1 %vm6739_vm0, %v8666_v57 }
 0x201   : > { %v7607_v14 = vpop.f32.mrb[128].mxu0  ;;  %v7609_v26 = vpop.f32.mrb[128].mxu1 }
 0x202   : > { %8739 = vst [vmem:[#allocation82_spill] sm:$0xff] %v7607_v14  ;;  %8740 = vst [vmem:[#allocation83_spill] sm:$0xff] %v7609_v26  ;;  %v5813_v23 = vpop.f32.mrb[129].mxu0  ;;  %v6025_v9 = vpop.f32.mrb[129].mxu1 }
 0x203   : > { %v7615_v45 = vpop.f32.mrb[130].mxu0  ;;  %v7617_v1 = vpop.f32.mrb[130].mxu1 }
 0x204   : > { %8741 = vst [vmem:[#allocation84_spill] sm:$0xff] %v7615_v45  ;;  %8742 = vst [vmem:[#allocation85_spill] sm:$0xff] %v7617_v1  ;;  %v5814_v21 = vpop.f32.mrb[131].mxu0  ;;  %v6026_v15 = vpop.f32.mrb[131].mxu1 }
 0x205   : > { %v6654_v15 = vld [vmem:[%s7151_s29 + $0x58] sm:$0xff]  }
 0x206   : > { %6148 = vmatmul.mubr.bf16.gmra.mrb[236].mxu0 %v6651_v28  ;;  %6360 = vmatmul.mubr.bf16.gmra.mrb[236].mxu1 %v6652_v2  ;;  %v6655_v2 = vld [vmem:[%s7143_s26 + $0x60] sm:$0xff]  }
 0x207   : > { %6151 = vmatprep.mubr.msk.bf16.mxu0 %vm6739_vm0, %v8666_v57  ;;  %6363 = vmatprep.mubr.msk.bf16.mxu1 %vm6739_vm0, %v8666_v57 }
 0x209   : > { %v7625_v9 = vpop.f32.mrb[132].mxu0  ;;  %v7627_v23 = vpop.f32.mrb[132].mxu1 }
 0x20a   : > { %8743 = vst [vmem:[#allocation86_spill] sm:$0xff] %v7625_v9  ;;  %8744 = vst [vmem:[#allocation87_spill] sm:$0xff] %v7627_v23  ;;  %v5817_v26 = vpop.f32.mrb[133].mxu0  ;;  %v6029_v14 = vpop.f32.mrb[133].mxu1 }
 0x20b   : > { %v7633_v21 = vpop.f32.mrb[134].mxu0  ;;  %v7635_v28 = vpop.f32.mrb[134].mxu1 }
 0x20c   : > { %8745 = vst [vmem:[#allocation88_spill] sm:$0xff] %v7633_v21  ;;  %8746 = vst [vmem:[#allocation89_spill] sm:$0xff] %v7635_v28  ;;  %v5818_v1 = vpop.f32.mrb[135].mxu0  ;;  %v6030_v45 = vpop.f32.mrb[135].mxu1 }
 0x20d   : > { %v6656_v45 = vld [vmem:[%s7151_s29 + $0x60] sm:$0xff]  }
 0x20e   : > { %6152 = vmatmul.mubr.bf16.gmra.mrb[240].mxu0 %v6653_v33  ;;  %6364 = vmatmul.mubr.bf16.gmra.mrb[240].mxu1 %v6654_v15  ;;  %v6657_v15 = vld [vmem:[%s7143_s26 + $0x68] sm:$0xff]  }
 0x20f   : > { %6155 = vmatprep.mubr.msk.bf16.mxu0 %vm6739_vm0, %v8666_v57  ;;  %6367 = vmatprep.mubr.msk.bf16.mxu1 %vm6739_vm0, %v8666_v57 }
 0x211   : > { %v7643_v14 = vpop.f32.mrb[136].mxu0  ;;  %v7645_v26 = vpop.f32.mrb[136].mxu1 }
 0x212   : > { %8747 = vst [vmem:[#allocation90_spill] sm:$0xff] %v7643_v14  ;;  %8748 = vst [vmem:[#allocation91_spill] sm:$0xff] %v7645_v26  ;;  %v5821_v23 = vpop.f32.mrb[137].mxu0  ;;  %v6033_v9 = vpop.f32.mrb[137].mxu1 }
 0x213   : > { %v7651_v1 = vpop.f32.mrb[138].mxu0  ;;  %v7653_v33 = vpop.f32.mrb[138].mxu1 }
 0x214   : > { %8749 = vst [vmem:[#allocation92_spill] sm:$0xff] %v7651_v1  ;;  %8750 = vst [vmem:[#allocation93_spill] sm:$0xff] %v7653_v33  ;;  %v5822_v28 = vpop.f32.mrb[139].mxu0  ;;  %v6034_v21 = vpop.f32.mrb[139].mxu1 }
 0x215   : > { %v6658_v21 = vld [vmem:[%s7151_s29 + $0x68] sm:$0xff]  }
 0x216   : > { %6156 = vmatmul.mubr.bf16.gmra.mrb[244].mxu0 %v6655_v2  ;;  %6368 = vmatmul.mubr.bf16.gmra.mrb[244].mxu1 %v6656_v45  ;;  %v6659_v45 = vld [vmem:[%s7143_s26 + $0x70] sm:$0xff]  }
 0x217   : > { %6159 = vmatprep.mubr.msk.bf16.mxu0 %vm6739_vm0, %v8666_v57  ;;  %6371 = vmatprep.mubr.msk.bf16.mxu1 %vm6739_vm0, %v8666_v57 }
 0x219   : > { %v7661_v9 = vpop.f32.mrb[140].mxu0  ;;  %v7663_v23 = vpop.f32.mrb[140].mxu1 }
 0x21a   : > { %8751 = vst [vmem:[#allocation94_spill] sm:$0xff] %v7661_v9  ;;  %8752 = vst [vmem:[#allocation95_spill] sm:$0xff] %v7663_v23  ;;  %v5825_v26 = vpop.f32.mrb[141].mxu0  ;;  %v6037_v14 = vpop.f32.mrb[141].mxu1 }
 0x21b   : > { %v7669_v28 = vpop.f32.mrb[142].mxu0  ;;  %v7671_v2 = vpop.f32.mrb[142].mxu1 }
 0x21c   : > { %8753 = vst [vmem:[#allocation96_spill] sm:$0xff] %v7669_v28  ;;  %8754 = vst [vmem:[#allocation97_spill] sm:$0xff] %v7671_v2  ;;  %v5826_v33 = vpop.f32.mrb[143].mxu0  ;;  %v6038_v1 = vpop.f32.mrb[143].mxu1 }
 0x21d   : > { %v6660_v1 = vld [vmem:[%s7151_s29 + $0x70] sm:$0xff]  }
 0x21e   : > { %6160 = vmatmul.mubr.bf16.gmra.mrb[248].mxu0 %v6657_v15  ;;  %6372 = vmatmul.mubr.bf16.gmra.mrb[248].mxu1 %v6658_v21  ;;  %v6661_v21 = vld [vmem:[%s7143_s26 + $0x78] sm:$0xff]  }
 0x21f   : > { %6163 = vmatprep.mubr.msk.bf16.mxu0 %vm6739_vm0, %v8666_v57  ;;  %6375 = vmatprep.mubr.msk.bf16.mxu1 %vm6739_vm0, %v8666_v57 }
 0x221   : > { %v7679_v14 = vpop.f32.mrb[144].mxu0  ;;  %v7681_v26 = vpop.f32.mrb[144].mxu1 }
 0x222   : > { %8755 = vst [vmem:[#allocation98_spill] sm:$0xff] %v7679_v14  ;;  %8756 = vst [vmem:[#allocation99_spill] sm:$0xff] %v7681_v26  ;;  %v5829_v23 = vpop.f32.mrb[145].mxu0  ;;  %v6041_v9 = vpop.f32.mrb[145].mxu1 }
 0x223   : > { %v7687_v33 = vpop.f32.mrb[146].mxu0  ;;  %v7689_v15 = vpop.f32.mrb[146].mxu1 }
 0x224   : > { %8757 = vst [vmem:[#allocation100_spill] sm:$0xff] %v7687_v33  ;;  %8758 = vst [vmem:[#allocation101_spill] sm:$0xff] %v7689_v15  ;;  %v5830_v2 = vpop.f32.mrb[147].mxu0  ;;  %v6042_v28 = vpop.f32.mrb[147].mxu1 }
 0x225   : > { %v6662_v28 = vld [vmem:[%s7151_s29 + $0x78] sm:$0xff]  }
 0x226   : > { %6164 = vmatmul.mubr.bf16.gmra.mrb[252].mxu0 %v6659_v45  ;;  %6376 = vmatmul.mubr.bf16.gmra.mrb[252].mxu1 %v6660_v1  ;;  %v6663_v1 = vld [vmem:[%s7143_s26 + $0x80] sm:$0xff]  }
 0x227   : > { %6167 = vmatprep.mubr.msk.bf16.mxu0 %vm6739_vm0, %v8666_v57  ;;  %6379 = vmatprep.mubr.msk.bf16.mxu1 %vm6739_vm0, %v8666_v57 }
 0x229   : > { %v7697_v9 = vpop.f32.mrb[148].mxu0  ;;  %v7699_v23 = vpop.f32.mrb[148].mxu1 }
 0x22a   : > { %8759 = vst [vmem:[#allocation102_spill] sm:$0xff] %v7697_v9  ;;  %8760 = vst [vmem:[#allocation103_spill] sm:$0xff] %v7699_v23  ;;  %v5833_v26 = vpop.f32.mrb[149].mxu0  ;;  %v6045_v14 = vpop.f32.mrb[149].mxu1 }
 0x22b   : > { %v7705_v2 = vpop.f32.mrb[150].mxu0  ;;  %v7707_v45 = vpop.f32.mrb[150].mxu1 }
 0x22c   : > { %8761 = vst [vmem:[#allocation104_spill] sm:$0xff] %v7705_v2  ;;  %8762 = vst [vmem:[#allocation105_spill] sm:$0xff] %v7707_v45  ;;  %v5834_v15 = vpop.f32.mrb[151].mxu0  ;;  %v6046_v33 = vpop.f32.mrb[151].mxu1 }
 0x22d   : > { %v6664_v33 = vld [vmem:[%s7151_s29 + $0x80] sm:$0xff]  }
 0x22e   : > { %6168 = vmatmul.mubr.bf16.gmra.mrb[0].mxu0 %v6661_v21  ;;  %6380 = vmatmul.mubr.bf16.gmra.mrb[0].mxu1 %v6662_v28  ;;  %v6665_v28 = vld [vmem:[%s7143_s26 + $0x88] sm:$0xff]  }
 0x22f   : > { %6171 = vmatprep.mubr.msk.bf16.mxu0 %vm6739_vm0, %v8666_v57  ;;  %6383 = vmatprep.mubr.msk.bf16.mxu1 %vm6739_vm0, %v8666_v57 }
 0x231   : > { %v7715_v14 = vpop.f32.mrb[152].mxu0  ;;  %v7717_v26 = vpop.f32.mrb[152].mxu1 }
 0x232   : > { %8763 = vst [vmem:[#allocation106_spill] sm:$0xff] %v7715_v14  ;;  %8764 = vst [vmem:[#allocation107_spill] sm:$0xff] %v7717_v26  ;;  %v5837_v23 = vpop.f32.mrb[153].mxu0  ;;  %v6049_v9 = vpop.f32.mrb[153].mxu1 }
 0x233   : > { %v7723_v15 = vpop.f32.mrb[154].mxu0  ;;  %v7725_v21 = vpop.f32.mrb[154].mxu1 }
 0x234   : > { %8765 = vst [vmem:[#allocation108_spill] sm:$0xff] %v7723_v15  ;;  %8766 = vst [vmem:[#allocation109_spill] sm:$0xff] %v7725_v21  ;;  %v5838_v45 = vpop.f32.mrb[155].mxu0  ;;  %v6050_v2 = vpop.f32.mrb[155].mxu1 }
 0x235   : > { %v6666_v2 = vld [vmem:[%s7151_s29 + $0x88] sm:$0xff]  }
 0x236   : > { %6172 = vmatmul.mubr.bf16.gmra.mrb[4].mxu0 %v6663_v1  ;;  %6384 = vmatmul.mubr.bf16.gmra.mrb[4].mxu1 %v6664_v33  ;;  %v6667_v33 = vld [vmem:[%s7143_s26 + $0x90] sm:$0xff]  }
 0x237   : > { %6175 = vmatprep.mubr.msk.bf16.mxu0 %vm6739_vm0, %v8666_v57  ;;  %6387 = vmatprep.mubr.msk.bf16.mxu1 %vm6739_vm0, %v8666_v57 }
 0x239   : > { %v7733_v9 = vpop.f32.mrb[156].mxu0  ;;  %v7735_v23 = vpop.f32.mrb[156].mxu1 }
 0x23a   : > { %8767 = vst [vmem:[#allocation110_spill] sm:$0xff] %v7733_v9  ;;  %8768 = vst [vmem:[#allocation111_spill] sm:$0xff] %v7735_v23  ;;  %v5841_v26 = vpop.f32.mrb[157].mxu0  ;;  %v6053_v14 = vpop.f32.mrb[157].mxu1 }
 0x23b   : > { %v7741_v45 = vpop.f32.mrb[158].mxu0  ;;  %v7743_v1 = vpop.f32.mrb[158].mxu1 }
 0x23c   : > { %8769 = vst [vmem:[#allocation112_spill] sm:$0xff] %v7741_v45  ;;  %8770 = vst [vmem:[#allocation113_spill] sm:$0xff] %v7743_v1  ;;  %v5842_v21 = vpop.f32.mrb[159].mxu0  ;;  %v6054_v15 = vpop.f32.mrb[159].mxu1 }
 0x23d   : > { %v6668_v15 = vld [vmem:[%s7151_s29 + $0x90] sm:$0xff]  }
 0x23e   : > { %6176 = vmatmul.mubr.bf16.gmra.mrb[8].mxu0 %v6665_v28  ;;  %6388 = vmatmul.mubr.bf16.gmra.mrb[8].mxu1 %v6666_v2  ;;  %v6669_v2 = vld [vmem:[%s7143_s26 + $0x98] sm:$0xff]  }
 0x23f   : > { %6179 = vmatprep.mubr.msk.bf16.mxu0 %vm6739_vm0, %v8666_v57  ;;  %6391 = vmatprep.mubr.msk.bf16.mxu1 %vm6739_vm0, %v8666_v57 }
 0x241   : > { %v7751_v14 = vpop.f32.mrb[160].mxu0  ;;  %v7753_v26 = vpop.f32.mrb[160].mxu1 }
 0x242   : > { %8771 = vst [vmem:[#allocation114_spill] sm:$0xff] %v7751_v14  ;;  %8772 = vst [vmem:[#allocation115_spill] sm:$0xff] %v7753_v26  ;;  %v5845_v23 = vpop.f32.mrb[161].mxu0  ;;  %v6057_v9 = vpop.f32.mrb[161].mxu1 }
 0x243   : > { %v7759_v21 = vpop.f32.mrb[162].mxu0  ;;  %v7761_v28 = vpop.f32.mrb[162].mxu1 }
 0x244   : > { %8773 = vst [vmem:[#allocation116_spill] sm:$0xff] %v7759_v21  ;;  %8774 = vst [vmem:[#allocation117_spill] sm:$0xff] %v7761_v28  ;;  %v5846_v1 = vpop.f32.mrb[163].mxu0  ;;  %v6058_v45 = vpop.f32.mrb[163].mxu1 }
 0x245   : > { %v6670_v45 = vld [vmem:[%s7151_s29 + $0x98] sm:$0xff]  }
 0x246   : > { %6180 = vmatmul.mubr.bf16.gmra.mrb[12].mxu0 %v6667_v33  ;;  %6392 = vmatmul.mubr.bf16.gmra.mrb[12].mxu1 %v6668_v15  ;;  %v6671_v15 = vld [vmem:[%s7143_s26 + $0xa0] sm:$0xff]  }
 0x247   : > { %6183 = vmatprep.mubr.msk.bf16.mxu0 %vm6739_vm0, %v8666_v57  ;;  %6395 = vmatprep.mubr.msk.bf16.mxu1 %vm6739_vm0, %v8666_v57 }
 0x249   : > { %v7769_v9 = vpop.f32.mrb[164].mxu0  ;;  %v7771_v23 = vpop.f32.mrb[164].mxu1 }
 0x24a   : > { %8775 = vst [vmem:[#allocation118_spill] sm:$0xff] %v7769_v9  ;;  %8776 = vst [vmem:[#allocation119_spill] sm:$0xff] %v7771_v23  ;;  %v5849_v26 = vpop.f32.mrb[165].mxu0  ;;  %v6061_v14 = vpop.f32.mrb[165].mxu1 }
 0x24b   : > { %v7777_v1 = vpop.f32.mrb[166].mxu0  ;;  %v7779_v33 = vpop.f32.mrb[166].mxu1 }
 0x24c   : > { %8777 = vst [vmem:[#allocation120_spill] sm:$0xff] %v7777_v1  ;;  %8778 = vst [vmem:[#allocation121_spill] sm:$0xff] %v7779_v33  ;;  %v5850_v28 = vpop.f32.mrb[167].mxu0  ;;  %v6062_v21 = vpop.f32.mrb[167].mxu1 }
 0x24d   : > { %v6672_v21 = vld [vmem:[%s7151_s29 + $0xa0] sm:$0xff]  }
 0x24e   : > { %6184 = vmatmul.mubr.bf16.gmra.mrb[16].mxu0 %v6669_v2  ;;  %6396 = vmatmul.mubr.bf16.gmra.mrb[16].mxu1 %v6670_v45  ;;  %v6673_v45 = vld [vmem:[%s7143_s26 + $0xa8] sm:$0xff]  }
 0x24f   : > { %6187 = vmatprep.mubr.msk.bf16.mxu0 %vm6739_vm0, %v8666_v57  ;;  %6399 = vmatprep.mubr.msk.bf16.mxu1 %vm6739_vm0, %v8666_v57 }
 0x251   : > { %v7787_v14 = vpop.f32.mrb[168].mxu0  ;;  %v7789_v26 = vpop.f32.mrb[168].mxu1 }
 0x252   : > { %8779 = vst [vmem:[#allocation122_spill] sm:$0xff] %v7787_v14  ;;  %8780 = vst [vmem:[#allocation123_spill] sm:$0xff] %v7789_v26  ;;  %v5853_v23 = vpop.f32.mrb[169].mxu0  ;;  %v6065_v9 = vpop.f32.mrb[169].mxu1 }
 0x253   : > { %v7795_v28 = vpop.f32.mrb[170].mxu0  ;;  %v7797_v2 = vpop.f32.mrb[170].mxu1 }
 0x254   : > { %8781 = vst [vmem:[#allocation124_spill] sm:$0xff] %v7795_v28  ;;  %8782 = vst [vmem:[#allocation125_spill] sm:$0xff] %v7797_v2  ;;  %v5854_v33 = vpop.f32.mrb[171].mxu0  ;;  %v6066_v1 = vpop.f32.mrb[171].mxu1 }
 0x255   : > { %v6674_v1 = vld [vmem:[%s7151_s29 + $0xa8] sm:$0xff]  }
 0x256   : > { %6188 = vmatmul.mubr.bf16.gmra.mrb[20].mxu0 %v6671_v15  ;;  %6400 = vmatmul.mubr.bf16.gmra.mrb[20].mxu1 %v6672_v21  ;;  %v6675_v21 = vld [vmem:[%s7143_s26 + $0xb0] sm:$0xff]  }
 0x257   : > { %6191 = vmatprep.mubr.msk.bf16.mxu0 %vm6739_vm0, %v8666_v57  ;;  %6403 = vmatprep.mubr.msk.bf16.mxu1 %vm6739_vm0, %v8666_v57 }
 0x259   : > { %v7805_v9 = vpop.f32.mrb[172].mxu0  ;;  %v7807_v23 = vpop.f32.mrb[172].mxu1 }
 0x25a   : > { %8783 = vst [vmem:[#allocation126_spill] sm:$0xff] %v7805_v9  ;;  %8784 = vst [vmem:[#allocation127_spill] sm:$0xff] %v7807_v23  ;;  %v5857_v26 = vpop.f32.mrb[173].mxu0  ;;  %v6069_v14 = vpop.f32.mrb[173].mxu1 }
 0x25b   : > { %v7813_v33 = vpop.f32.mrb[174].mxu0  ;;  %v7815_v15 = vpop.f32.mrb[174].mxu1 }
 0x25c   : > { %8785 = vst [vmem:[#allocation128_spill] sm:$0xff] %v7813_v33  ;;  %8786 = vst [vmem:[#allocation129_spill] sm:$0xff] %v7815_v15  ;;  %v5858_v2 = vpop.f32.mrb[175].mxu0  ;;  %v6070_v28 = vpop.f32.mrb[175].mxu1 }
 0x25d   : > { %v6676_v28 = vld [vmem:[%s7151_s29 + $0xb0] sm:$0xff]  }
 0x25e   : > { %6192 = vmatmul.mubr.bf16.gmra.mrb[24].mxu0 %v6673_v45  ;;  %6404 = vmatmul.mubr.bf16.gmra.mrb[24].mxu1 %v6674_v1  ;;  %v6677_v1 = vld [vmem:[%s7143_s26 + $0xb8] sm:$0xff]  }
 0x25f   : > { %6195 = vmatprep.mubr.msk.bf16.mxu0 %vm6739_vm0, %v8666_v57  ;;  %6407 = vmatprep.mubr.msk.bf16.mxu1 %vm6739_vm0, %v8666_v57 }
 0x261   : > { %v7823_v14 = vpop.f32.mrb[176].mxu0  ;;  %v7825_v26 = vpop.f32.mrb[176].mxu1 }
 0x262   : > { %8787 = vst [vmem:[#allocation130_spill] sm:$0xff] %v7823_v14  ;;  %8788 = vst [vmem:[#allocation131_spill] sm:$0xff] %v7825_v26  ;;  %v5861_v23 = vpop.f32.mrb[177].mxu0  ;;  %v6073_v9 = vpop.f32.mrb[177].mxu1 }
 0x263   : > { %v7831_v2 = vpop.f32.mrb[178].mxu0  ;;  %v7833_v45 = vpop.f32.mrb[178].mxu1 }
 0x264   : > { %8789 = vst [vmem:[#allocation132_spill] sm:$0xff] %v7831_v2  ;;  %8790 = vst [vmem:[#allocation133_spill] sm:$0xff] %v7833_v45  ;;  %v5862_v15 = vpop.f32.mrb[179].mxu0  ;;  %v6074_v33 = vpop.f32.mrb[179].mxu1 }
 0x265   : > { %v6678_v33 = vld [vmem:[%s7151_s29 + $0xb8] sm:$0xff]  }
 0x266   : > { %6196 = vmatmul.mubr.bf16.gmra.mrb[28].mxu0 %v6675_v21  ;;  %6408 = vmatmul.mubr.bf16.gmra.mrb[28].mxu1 %v6676_v28  ;;  %v6679_v28 = vld [vmem:[%s7143_s26 + $0xc0] sm:$0xff]  }
 0x267   : > { %6199 = vmatprep.mubr.msk.bf16.mxu0 %vm6739_vm0, %v8666_v57  ;;  %6411 = vmatprep.mubr.msk.bf16.mxu1 %vm6739_vm0, %v8666_v57 }
 0x269   : > { %v7841_v9 = vpop.f32.mrb[180].mxu0  ;;  %v7843_v23 = vpop.f32.mrb[180].mxu1 }
 0x26a   : > { %8791 = vst [vmem:[#allocation134_spill] sm:$0xff] %v7841_v9  ;;  %8792 = vst [vmem:[#allocation135_spill] sm:$0xff] %v7843_v23  ;;  %v5865_v26 = vpop.f32.mrb[181].mxu0  ;;  %v6077_v14 = vpop.f32.mrb[181].mxu1 }
 0x26b   : > { %v7849_v15 = vpop.f32.mrb[182].mxu0  ;;  %v7851_v21 = vpop.f32.mrb[182].mxu1 }
 0x26c   : > { %8793 = vst [vmem:[#allocation136_spill] sm:$0xff] %v7849_v15  ;;  %8794 = vst [vmem:[#allocation137_spill] sm:$0xff] %v7851_v21  ;;  %v5866_v45 = vpop.f32.mrb[183].mxu0  ;;  %v6078_v2 = vpop.f32.mrb[183].mxu1 }
 0x26d   : > { %v6680_v2 = vld [vmem:[%s7151_s29 + $0xc0] sm:$0xff]  }
 0x26e   : > { %6200 = vmatmul.mubr.bf16.gmra.mrb[32].mxu0 %v6677_v1  ;;  %6412 = vmatmul.mubr.bf16.gmra.mrb[32].mxu1 %v6678_v33  ;;  %v6681_v33 = vld [vmem:[%s7143_s26 + $0xc8] sm:$0xff]  }
 0x26f   : > { %6203 = vmatprep.mubr.msk.bf16.mxu0 %vm6739_vm0, %v8666_v57  ;;  %6415 = vmatprep.mubr.msk.bf16.mxu1 %vm6739_vm0, %v8666_v57 }
 0x271   : > { %v7859_v14 = vpop.f32.mrb[184].mxu0  ;;  %v7861_v26 = vpop.f32.mrb[184].mxu1 }
 0x272   : > { %8795 = vst [vmem:[#allocation138_spill] sm:$0xff] %v7859_v14  ;;  %8796 = vst [vmem:[#allocation139_spill] sm:$0xff] %v7861_v26  ;;  %v5869_v23 = vpop.f32.mrb[185].mxu0  ;;  %v6081_v9 = vpop.f32.mrb[185].mxu1 }
 0x273   : > { %v7867_v45 = vpop.f32.mrb[186].mxu0  ;;  %v7869_v1 = vpop.f32.mrb[186].mxu1 }
 0x274   : > { %8797 = vst [vmem:[#allocation140_spill] sm:$0xff] %v7867_v45  ;;  %8798 = vst [vmem:[#allocation141_spill] sm:$0xff] %v7869_v1  ;;  %v5870_v21 = vpop.f32.mrb[187].mxu0  ;;  %v6082_v15 = vpop.f32.mrb[187].mxu1 }
 0x275   : > { %v6682_v15 = vld [vmem:[%s7151_s29 + $0xc8] sm:$0xff]  }
 0x276   : > { %6204 = vmatmul.mubr.bf16.gmra.mrb[36].mxu0 %v6679_v28  ;;  %6416 = vmatmul.mubr.bf16.gmra.mrb[36].mxu1 %v6680_v2  ;;  %v6683_v2 = vld [vmem:[%s7143_s26 + $0xd0] sm:$0xff]  }
 0x277   : > { %6207 = vmatprep.mubr.msk.bf16.mxu0 %vm6739_vm0, %v8666_v57  ;;  %6419 = vmatprep.mubr.msk.bf16.mxu1 %vm6739_vm0, %v8666_v57 }
 0x279   : > { %v7877_v9 = vpop.f32.mrb[188].mxu0  ;;  %v7879_v23 = vpop.f32.mrb[188].mxu1 }
 0x27a   : > { %8799 = vst [vmem:[#allocation142_spill] sm:$0xff] %v7877_v9  ;;  %8800 = vst [vmem:[#allocation143_spill] sm:$0xff] %v7879_v23  ;;  %v5873_v26 = vpop.f32.mrb[189].mxu0  ;;  %v6085_v14 = vpop.f32.mrb[189].mxu1 }
 0x27b   : > { %v7885_v21 = vpop.f32.mrb[190].mxu0  ;;  %v7887_v28 = vpop.f32.mrb[190].mxu1 }
 0x27c   : > { %8801 = vst [vmem:[#allocation144_spill] sm:$0xff] %v7885_v21  ;;  %8802 = vst [vmem:[#allocation145_spill] sm:$0xff] %v7887_v28  ;;  %v5874_v1 = vpop.f32.mrb[191].mxu0  ;;  %v6086_v45 = vpop.f32.mrb[191].mxu1 }
 0x27d   : > { %v6684_v45 = vld [vmem:[%s7151_s29 + $0xd0] sm:$0xff]  }
 0x27e   : > { %6208 = vmatmul.mubr.bf16.gmra.mrb[40].mxu0 %v6681_v33  ;;  %6420 = vmatmul.mubr.bf16.gmra.mrb[40].mxu1 %v6682_v15 }
 0x27f   : > { %6211 = vmatprep.mubr.msk.bf16.mxu0 %vm6739_vm0, %v8666_v57  ;;  %6423 = vmatprep.mubr.msk.bf16.mxu1 %vm6739_vm0, %v8666_v57 }
 0x281   : > { %v7895_v14 = vpop.f32.mrb[192].mxu0  ;;  %v7897_v26 = vpop.f32.mrb[192].mxu1 }
 0x282   : > { %8803 = vst [vmem:[#allocation146_spill] sm:$0xff] %v7895_v14  ;;  %8804 = vst [vmem:[#allocation147_spill] sm:$0xff] %v7897_v26  ;;  %v5877_v23 = vpop.f32.mrb[193].mxu0  ;;  %v6089_v9 = vpop.f32.mrb[193].mxu1 }
 0x283   : > { %v7903_v1 = vpop.f32.mrb[194].mxu0  ;;  %v7905_v33 = vpop.f32.mrb[194].mxu1 }
 0x284   : > { %8805 = vst [vmem:[#allocation148_spill] sm:$0xff] %v7903_v1  ;;  %8806 = vst [vmem:[#allocation149_spill] sm:$0xff] %v7905_v33  ;;  %v5878_v28 = vpop.f32.mrb[195].mxu0  ;;  %v6090_v21 = vpop.f32.mrb[195].mxu1 }
 0x285   : > { %v7918_v28 = vld [vmem:[%s8506_s5] ss:$0 sm:$0xff] }
 0x286   : > { %6212 = vmatmul.mubr.bf16.gmra.mrb[44].mxu0 %v6683_v2  ;;  %6424 = vmatmul.mubr.bf16.gmra.mrb[44].mxu1 %v6684_v45  ;;  %v8807_v45 = vmax.f32 %v7019_v63, %v7021_v0 }
 0x287   : > { %6215 = vmatprep.mubr.msk.bf16.mxu0 %vm6739_vm0, %v8666_v57  ;;  %6427 = vmatprep.mubr.msk.bf16.mxu1 %vm6739_vm0, %v8666_v57 }
 0x289   : > { %v2446_v9 = vpop.f32.mrb[196].mxu0  ;;  %v3263_v23 = vpop.f32.mrb[196].mxu1 }
 0x28a   : > { %v3752_v50 = vmax.f32 %v2446_v9, %v3263_v23  ;;  %v6109_v26 = vpop.f32.mrb[197].mxu0  ;;  %v6321_v14 = vpop.f32.mrb[197].mxu1 }
 0x28b   : > { %v2449_v21 = vpop.f32.mrb[198].mxu0  ;;  %v3266_v2 = vpop.f32.mrb[198].mxu1  ;;  %v8808_v26 = vmax.f32 %v7027_v7, %v7029_v8  ;;  %v6687_v7 = vld [vmem:[%s7143_s26 + $0xe0] sm:$0xff]  }
 0x28c   : > { %v3850_v15 = vmax.f32 %v8807_v45, %v3752_v50  ;;  %v3753_v33 = vmax.f32 %v2449_v21, %v3266_v2  ;;  %v6110_v1 = vpop.f32.mrb[199].mxu0  ;;  %v6322_v30 = vpop.f32.mrb[199].mxu1  ;;  %v6688_v8 = vld [vmem:[%s7151_s29 + $0xe0] sm:$0xff]   ;;  %v8809_v2 = vmax.f32 %v7037_v12, %v7039_v13 }
 0x28e   : > { %v3955_v14 = vadd.f32 %v7918_v28, %v3850_v15  ;;  %v3851_v9 = vmax.f32 %v8808_v26, %v3753_v33  ;;  %6216 = vmatmul.mubr.bf16.gmra.mrb[48].mxu0 %v6685_v3  ;;  %6428 = vmatmul.mubr.bf16.gmra.mrb[48].mxu1 %v6686_v38 }
 0x28f   : > { %6219 = vmatprep.mubr.msk.bf16.mxu0 %vm6739_vm0, %v8666_v57  ;;  %6431 = vmatprep.mubr.msk.bf16.mxu1 %vm6739_vm0, %v8666_v57 }
 0x290   : > { %v3956_v63 = vadd.f32 %v7918_v28, %v3851_v9  ;;  %v4053_v50 = vmax.f32 %v3955_v14, 0.0 }
 0x291   : > { %v2454_v0 = vpop.f32.mrb[200].mxu0  ;;  %v3271_v30 = vpop.f32.mrb[200].mxu1 }
 0x292   : > { %v4054_v1 = vmax.f32 %v3956_v63, 0.0  ;;  %v3754_v15 = vmax.f32 %v2454_v0, %v3271_v30  ;;  %v6113_v23 = vpop.f32.mrb[201].mxu0  ;;  %v6325_v21 = vpop.f32.mrb[201].mxu1  ;;  %v8810_v0 = vmax.f32 %v7045_v19, %v7047_v20  ;;  %v6689_v19 = vld [vmem:[%s7143_s26 + $0xe8] sm:$0xff]  }
 0x293   : > { %v2457_v38 = vpop.f32.mrb[202].mxu0  ;;  %v3274_v3 = vpop.f32.mrb[202].mxu1  ;;  %v6690_v20 = vld [vmem:[%s7151_s29 + $0xe8] sm:$0xff]  }
 0x294   : > { %v5149_v33 = vpack.c.bf16 %v4054_v1, %v4053_v50  ;;  %v3852_v45 = vmax.f32 %v8809_v2, %v3754_v15  ;;  %v3755_v14 = vmax.f32 %v2457_v38, %v3274_v3  ;;  %v6114_v26 = vpop.f32.mrb[203].mxu0  ;;  %v6326_v9 = vpop.f32.mrb[203].mxu1 }
 0x296   : > { %5150 = vst [vmem:[%s7938_s11] sm:$0xff] %v5149_v33   ;;  %v3957_v63 = vadd.f32 %v7918_v28, %v3852_v45  ;;  %v3853_v30 = vmax.f32 %v8810_v0, %v3755_v14  ;;  %6220 = vmatmul.mubr.bf16.gmra.mrb[52].mxu0 %v6687_v7  ;;  %6432 = vmatmul.mubr.bf16.gmra.mrb[52].mxu1 %v6688_v8 }
 0x297   : > { %6223 = vmatprep.mubr.msk.bf16.mxu0 %vm6739_vm0, %v8666_v57  ;;  %6435 = vmatprep.mubr.msk.bf16.mxu1 %vm6739_vm0, %v8666_v57  ;;  %v8811_v33 = vmax.f32 %v7055_v24, %v7057_v25 }
 0x298   : > { %v3958_v12 = vadd.f32 %v7918_v28, %v3853_v30  ;;  %v4055_v1 = vmax.f32 %v3957_v63, 0.0  ;;  %v8812_v63 = vmax.f32 %v7063_v31, %v7065_v32  ;;  %v6691_v31 = vld [vmem:[%s7143_s26 + $0xf0] sm:$0xff]  }
 0x299   : > { %v2462_v13 = vpop.f32.mrb[204].mxu0  ;;  %v3279_v50 = vpop.f32.mrb[204].mxu1  ;;  %v6692_v32 = vld [vmem:[%s7151_s29 + $0xf0] sm:$0xff]  }
 0x29a   : > { %v4056_v15 = vmax.f32 %v3958_v12, 0.0  ;;  %v3756_v23 = vmax.f32 %v2462_v13, %v3279_v50  ;;  %v6117_v21 = vpop.f32.mrb[205].mxu0  ;;  %v6329_v38 = vpop.f32.mrb[205].mxu1 }
 0x29b   : > { %v2465_v7 = vpop.f32.mrb[206].mxu0  ;;  %v3282_v8 = vpop.f32.mrb[206].mxu1 }
 0x29c   : > { %v5154_v3 = vpack.c.bf16 %v4056_v15, %v4055_v1  ;;  %v3854_v2 = vmax.f32 %v8811_v33, %v3756_v23  ;;  %v3757_v45 = vmax.f32 %v2465_v7, %v3282_v8  ;;  %v6118_v14 = vpop.f32.mrb[207].mxu0  ;;  %v6330_v26 = vpop.f32.mrb[207].mxu1 }
 0x29e   : > { %5391 = vst [vmem:[%s7938_s11 + $0x8] sm:$0xff] %v5154_v3   ;;  %v3959_v9 = vadd.f32 %v7918_v28, %v3854_v2  ;;  %v3855_v0 = vmax.f32 %v8812_v63, %v3757_v45  ;;  %6224 = vmatmul.mubr.bf16.gmra.mrb[56].mxu0 %v6689_v19  ;;  %6436 = vmatmul.mubr.bf16.gmra.mrb[56].mxu1 %v6690_v20 }
 0x29f   : > { %6227 = vmatprep.mubr.msk.bf16.mxu0 %vm6739_vm0, %v8666_v57  ;;  %6439 = vmatprep.mubr.msk.bf16.mxu1 %vm6739_vm0, %v8666_v57  ;;  %v8813_v19 = vmax.f32 %v7073_v36, %v7075_v37  ;;  %v8814_v2 = vmax.f32 %v7081_v43, %v7083_v44  ;;  %v6693_v43 = vld [vmem:[%s7143_s26 + $0xf8] sm:$0xff]  }
 0x2a0   : > { %v3960_v24 = vadd.f32 %v7918_v28, %v3855_v0  ;;  %v4057_v12 = vmax.f32 %v3959_v9, 0.0  ;;  %v6694_v44 = vld [vmem:[%s7151_s29 + $0xf8] sm:$0xff]  }
 0x2a1   : > { %v2470_v25 = vpop.f32.mrb[208].mxu0  ;;  %v3287_v30 = vpop.f32.mrb[208].mxu1 }
 0x2a2   : > { %v4058_v13 = vmax.f32 %v3960_v24, 0.0  ;;  %v3758_v50 = vmax.f32 %v2470_v25, %v3287_v30  ;;  %v6121_v1 = vpop.f32.mrb[209].mxu0  ;;  %v6333_v15 = vpop.f32.mrb[209].mxu1 }
 0x2a3   : > { %v2473_v23 = vpop.f32.mrb[210].mxu0  ;;  %v3290_v21 = vpop.f32.mrb[210].mxu1 }
 0x2a4   : > { %v5159_v38 = vpack.c.bf16 %v4058_v13, %v4057_v12  ;;  %v3856_v20 = vmax.f32 %v8813_v19, %v3758_v50  ;;  %v3759_v7 = vmax.f32 %v2473_v23, %v3290_v21  ;;  %v6122_v8 = vpop.f32.mrb[211].mxu0  ;;  %v6334_v3 = vpop.f32.mrb[211].mxu1  ;;  %v8815_v13 = vmax.f32 %v7091_v48, %v7093_v49 }
 0x2a5   : > { %v8816_v23 = vmax.f32 %v7099_v55, %v7101_v56  ;;  %v6695_v55 = vld [vmem:[%s7143_s26 + $0x100] sm:$0xff]  }
 0x2a6   : > { %5392 = vst [vmem:[%s7938_s11 + $0x10] sm:$0xff] %v5159_v38   ;;  %v3961_v33 = vadd.f32 %v7918_v28, %v3856_v20  ;;  %v3857_v45 = vmax.f32 %v8814_v2, %v3759_v7  ;;  %6228 = vmatmul.mubr.bf16.gmra.mrb[60].mxu0 %v6691_v31  ;;  %6440 = vmatmul.mubr.bf16.gmra.mrb[60].mxu1 %v6692_v32  ;;  %v6696_v56 = vld [vmem:[%s7151_s29 + $0x100] sm:$0xff]  }
 0x2a7   : > { %6231 = vmatprep.mubr.msk.bf16.mxu0 %vm6739_vm0, %v8666_v57  ;;  %6443 = vmatprep.mubr.msk.bf16.mxu1 %vm6739_vm0, %v8666_v57 }
 0x2a8   : > { %v3962_v36 = vadd.f32 %v7918_v28, %v3857_v45  ;;  %v4059_v26 = vmax.f32 %v3961_v33, 0.0 }
 0x2a9   : > { %v2478_v37 = vpop.f32.mrb[212].mxu0  ;;  %v3295_v14 = vpop.f32.mrb[212].mxu1 }
 0x2aa   : > { %v4060_v9 = vmax.f32 %v3962_v36, 0.0  ;;  %v3760_v63 = vmax.f32 %v2478_v37, %v3295_v14  ;;  %v6125_v0 = vpop.f32.mrb[213].mxu0  ;;  %v6337_v24 = vpop.f32.mrb[213].mxu1  ;;  %v8817_v36 = vmax.f32 %v7109_v60, %v7111_v61 }
 0x2ab   : > { %v2481_v25 = vpop.f32.mrb[214].mxu0  ;;  %v3298_v30 = vpop.f32.mrb[214].mxu1  ;;  %v8818_v0 = vmax.f32 %v7117_v10, %v7119_v11  ;;  %v6697_v10 = vld [vmem:[%s7143_s26 + $0x108] sm:$0xff]  }
 0x2ac   : > { %v5164_v12 = vpack.c.bf16 %v4060_v9, %v4059_v26  ;;  %v3858_v50 = vmax.f32 %v8815_v13, %v3760_v63  ;;  %v3761_v1 = vmax.f32 %v2481_v25, %v3298_v30  ;;  %v6126_v15 = vpop.f32.mrb[215].mxu0  ;;  %v6338_v31 = vpop.f32.mrb[215].mxu1  ;;  %v6698_v11 = vld [vmem:[%s7151_s29 + $0x108] sm:$0xff]  }
 0x2ad   : > { %v8819_v31 = vmax.f32 %v7127_v18, %v7129_v22 }
 0x2ae   : > { %5393 = vst [vmem:[%s7938_s11 + $0x18] sm:$0xff] %v5164_v12   ;;  %v3963_v32 = vadd.f32 %v7918_v28, %v3858_v50  ;;  %v3859_v21 = vmax.f32 %v8816_v23, %v3761_v1  ;;  %6232 = vmatmul.mubr.bf16.gmra.mrb[64].mxu0 %v6693_v43  ;;  %6444 = vmatmul.mubr.bf16.gmra.mrb[64].mxu1 %v6694_v44 }
 0x2af   : > { %6235 = vmatprep.mubr.msk.bf16.mxu0 %vm6739_vm0, %v8666_v57  ;;  %6447 = vmatprep.mubr.msk.bf16.mxu1 %vm6739_vm0, %v8666_v57 }
 0x2b0   : > { %v3964_v48 = vadd.f32 %v7918_v28, %v3859_v21  ;;  %v4061_v19 = vmax.f32 %v3963_v32, 0.0 }
 0x2b1   : > { %v2486_v49 = vpop.f32.mrb[216].mxu0  ;;  %v3303_v38 = vpop.f32.mrb[216].mxu1 }
 0x2b2   : > { %v4062_v20 = vmax.f32 %v3964_v48, 0.0  ;;  %v3762_v7 = vmax.f32 %v2486_v49, %v3303_v38  ;;  %v6129_v8 = vpop.f32.mrb[217].mxu0  ;;  %v6341_v3 = vpop.f32.mrb[217].mxu1  ;;  %v8820_v38 = vmax.f32 %v7135_v34, %v7137_v35  ;;  %v6699_v34 = vld [vmem:[%s7143_s26 + $0x110] sm:$0xff]  }
 0x2b3   : > { %v2489_v33 = vpop.f32.mrb[218].mxu0  ;;  %v3306_v2 = vpop.f32.mrb[218].mxu1  ;;  %v6700_v35 = vld [vmem:[%s7151_s29 + $0x110] sm:$0xff]  }
 0x2b4   : > { %v5169_v45 = vpack.c.bf16 %v4062_v20, %v4061_v19  ;;  %v3860_v37 = vmax.f32 %v8817_v36, %v3762_v7  ;;  %v3763_v14 = vmax.f32 %v2489_v33, %v3306_v2  ;;  %v6130_v26 = vpop.f32.mrb[219].mxu0  ;;  %v6342_v9 = vpop.f32.mrb[219].mxu1  ;;  %v8821_v36 = vmax.f32 %v7159_v47, %v7161_v51 }
 0x2b6   : > { %5394 = vst [vmem:[%s7938_s11 + $0x20] sm:$0xff] %v5169_v45   ;;  %v3965_v63 = vadd.f32 %v7918_v28, %v3860_v37  ;;  %v3861_v24 = vmax.f32 %v8818_v0, %v3763_v14  ;;  %6236 = vmatmul.mubr.bf16.gmra.mrb[68].mxu0 %v6695_v55  ;;  %6448 = vmatmul.mubr.bf16.gmra.mrb[68].mxu1 %v6696_v56 }
 0x2b7   : > { %6239 = vmatprep.mubr.msk.bf16.mxu0 %vm6739_vm0, %v8666_v57  ;;  %6451 = vmatprep.mubr.msk.bf16.mxu1 %vm6739_vm0, %v8666_v57  ;;  %v8822_v0 = vmax.f32 %v7165_v58, %v7167_v59  ;;  %v6701_v58 = vld [vmem:[%s7143_s26 + $0x118] sm:$0xff]  }
 0x2b8   : > { %v3966_v60 = vadd.f32 %v7918_v28, %v3861_v24  ;;  %v4063_v44 = vmax.f32 %v3965_v63, 0.0  ;;  %v6702_v59 = vld [vmem:[%s7151_s29 + $0x118] sm:$0xff]  }
 0x2b9   : > { %v2494_v61 = vpop.f32.mrb[220].mxu0  ;;  %v3311_v43 = vpop.f32.mrb[220].mxu1 }
 0x2ba   : > { %v4064_v25 = vmax.f32 %v3966_v60, 0.0  ;;  %v3764_v30 = vmax.f32 %v2494_v61, %v3311_v43  ;;  %v6133_v12 = vpop.f32.mrb[221].mxu0  ;;  %v6345_v13 = vpop.f32.mrb[221].mxu1 }
 0x2bb   : > { %v2497_v50 = vpop.f32.mrb[222].mxu0  ;;  %v3314_v1 = vpop.f32.mrb[222].mxu1 }
 0x2bc   : > { %v5174_v15 = vpack.c.bf16 %v4064_v25, %v4063_v44  ;;  %v3862_v32 = vmax.f32 %v8819_v31, %v3764_v30  ;;  %v3765_v23 = vmax.f32 %v2497_v50, %v3314_v1  ;;  %v6134_v21 = vpop.f32.mrb[223].mxu0  ;;  %v6346_v48 = vpop.f32.mrb[223].mxu1 }
 0x2be   : > { %5395 = vst [vmem:[%s7938_s11 + $0x28] sm:$0xff] %v5174_v15   ;;  %v3967_v49 = vadd.f32 %v7918_v28, %v3862_v32  ;;  %v3863_v19 = vmax.f32 %v8820_v38, %v3765_v23  ;;  %6240 = vmatmul.mubr.bf16.gmra.mrb[72].mxu0 %v6697_v10  ;;  %6452 = vmatmul.mubr.bf16.gmra.mrb[72].mxu1 %v6698_v11 }
 0x2bf   : > { %6243 = vmatprep.mubr.msk.bf16.mxu0 %vm6739_vm0, %v8666_v57  ;;  %6455 = vmatprep.mubr.msk.bf16.mxu1 %vm6739_vm0, %v8666_v57  ;;  %v8823_v11 = vmax.f32 %v7177_v17, %v7179_v27  ;;  %v8824_v23 = vmax.f32 %v7183_v40, %v7185_v41  ;;  %v6703_v40 = vld [vmem:[%s7143_s26 + $0x120] sm:$0xff]  }
 0x2c0   : > { %v3968_v18 = vadd.f32 %v7918_v28, %v3863_v19  ;;  %v4065_v7 = vmax.f32 %v3967_v49, 0.0  ;;  %v6704_v41 = vld [vmem:[%s7151_s29 + $0x120] sm:$0xff]  }
 0x2c1   : > { %v2502_v22 = vpop.f32.mrb[224].mxu0  ;;  %v3319_v20 = vpop.f32.mrb[224].mxu1 }
 0x2c2   : > { %v4066_v8 = vmax.f32 %v3968_v18, 0.0  ;;  %v3766_v3 = vmax.f32 %v2502_v22, %v3319_v20  ;;  %v6137_v55 = vpop.f32.mrb[225].mxu0  ;;  %v6349_v56 = vpop.f32.mrb[225].mxu1 }
 0x2c3   : > { %v2505_v33 = vpop.f32.mrb[226].mxu0  ;;  %v3322_v2 = vpop.f32.mrb[226].mxu1 }
 0x2c4   : > { %v5179_v45 = vpack.c.bf16 %v4066_v8, %v4065_v7  ;;  %v3864_v37 = vmax.f32 %v8821_v36, %v3766_v3  ;;  %v3767_v14 = vmax.f32 %v2505_v33, %v3322_v2  ;;  %v6138_v26 = vpop.f32.mrb[227].mxu0  ;;  %v6350_v9 = vpop.f32.mrb[227].mxu1  ;;  %v8825_v3 = vmax.f32 %v7195_v5, %v7197_v29 }
 0x2c5   : > { %v8826_v2 = vmax.f32 %v7201_v16, %v7203_v53  ;;  %v6705_v16 = vld [vmem:[%s7143_s26 + $0x128] sm:$0xff]  }
 0x2c6   : > { %5396 = vst [vmem:[%s7938_s11 + $0x30] sm:$0xff] %v5179_v45   ;;  %v3969_v63 = vadd.f32 %v7918_v28, %v3864_v37  ;;  %v3865_v24 = vmax.f32 %v8822_v0, %v3767_v14  ;;  %6244 = vmatmul.mubr.bf16.gmra.mrb[76].mxu0 %v6699_v34  ;;  %6456 = vmatmul.mubr.bf16.gmra.mrb[76].mxu1 %v6700_v35  ;;  %v6706_v53 = vld [vmem:[%s7151_s29 + $0x128] sm:$0xff]  }
 0x2c7   : > { %6247 = vmatprep.mubr.msk.bf16.mxu0 %vm6739_vm0, %v8666_v57  ;;  %6459 = vmatprep.mubr.msk.bf16.mxu1 %vm6739_vm0, %v8666_v57 }
 0x2c8   : > { %v3970_v47 = vadd.f32 %v7918_v28, %v3865_v24  ;;  %v4067_v61 = vmax.f32 %v3969_v63, 0.0 }
 0x2c9   : > { %v2510_v51 = vpop.f32.mrb[228].mxu0  ;;  %v3327_v60 = vpop.f32.mrb[228].mxu1 }
 0x2ca   : > { %v4068_v43 = vmax.f32 %v3970_v47, 0.0  ;;  %v3768_v44 = vmax.f32 %v2510_v51, %v3327_v60  ;;  %v6141_v25 = vpop.f32.mrb[229].mxu0  ;;  %v6353_v30 = vpop.f32.mrb[229].mxu1  ;;  %v8827_v51 = vmax.f32 %v7213_v6, %v7215_v52 }
 0x2cb   : > { %v2513_v12 = vpop.f32.mrb[230].mxu0  ;;  %v3330_v13 = vpop.f32.mrb[230].mxu1  ;;  %v8828_v30 = vmax.f32 %v7219_v4, %v7221_v42  ;;  %v6707_v42 = vld [vmem:[%s7143_s26 + $0x130] sm:$0xff]  }
 0x2cc   : > { %v5184_v10 = vpack.c.bf16 %v4068_v43, %v4067_v61  ;;  %v3866_v50 = vmax.f32 %v8823_v11, %v3768_v44  ;;  %v3769_v1 = vmax.f32 %v2513_v12, %v3330_v13  ;;  %v6142_v15 = vpop.f32.mrb[231].mxu0  ;;  %v6354_v31 = vpop.f32.mrb[231].mxu1  ;;  %v6708_v4 = vld [vmem:[%s7151_s29 + $0x130] sm:$0xff]  }
 0x2ce   : > { %5397 = vst [vmem:[%s7938_s11 + $0x38] sm:$0xff] %v5184_v10   ;;  %v3971_v32 = vadd.f32 %v7918_v28, %v3866_v50  ;;  %v3867_v21 = vmax.f32 %v8824_v23, %v3769_v1  ;;  %6248 = vmatmul.mubr.bf16.gmra.mrb[80].mxu0 %v6701_v58  ;;  %6460 = vmatmul.mubr.bf16.gmra.mrb[80].mxu1 %v6702_v59 }
 0x2cf   : > { %6251 = vmatprep.mubr.msk.bf16.mxu0 %vm6739_vm0, %v8666_v57  ;;  %6463 = vmatprep.mubr.msk.bf16.mxu1 %vm6739_vm0, %v8666_v57 }
 0x2d0   : > { %v3972_v17 = vadd.f32 %v7918_v28, %v3867_v21  ;;  %v4069_v49 = vmax.f32 %v3971_v32, 0.0  ;;  %v8829_v32 = vmax.f32 %v7231_v54, %v7233_v62 }
 0x2d1   : > { %v2518_v27 = vpop.f32.mrb[232].mxu0  ;;  %v3335_v48 = vpop.f32.mrb[232].mxu1 }
 0x2d2   : > { %v4070_v38 = vmax.f32 %v3972_v17, 0.0  ;;  %v3770_v19 = vmax.f32 %v2518_v27, %v3335_v48  ;;  %v6145_v18 = vpop.f32.mrb[233].mxu0  ;;  %v6357_v22 = vpop.f32.mrb[233].mxu1 }
 0x2d3   : > { %v2521_v20 = vpop.f32.mrb[234].mxu0  ;;  %v3338_v7 = vpop.f32.mrb[234].mxu1 }
 0x2d4   : > { %v5189_v8 = vpack.c.bf16 %v4070_v38, %v4069_v49  ;;  %v3868_v55 = vmax.f32 %v8825_v3, %v3770_v19  ;;  %v3771_v56 = vmax.f32 %v2521_v20, %v3338_v7  ;;  %v6146_v34 = vpop.f32.mrb[235].mxu0  ;;  %v6358_v35 = vpop.f32.mrb[235].mxu1  ;;  %v8830_v49 = vmax.f32 %v7237_v46, %v7239_v39  ;;  %v6709_v39 = vld [vmem:[%s7143_s26 + $0x138] sm:$0xff]  }
 0x2d5   : > { %v6710_v46 = vld [vmem:[%s7151_s29 + $0x138] sm:$0xff]  }
 0x2d6   : > { %5398 = vst [vmem:[%s7938_s11 + $0x40] sm:$0xff] %v5189_v8   ;;  %v3973_v33 = vadd.f32 %v7918_v28, %v3868_v55  ;;  %v3869_v45 = vmax.f32 %v8826_v2, %v3771_v56  ;;  %6252 = vmatmul.mubr.bf16.gmra.mrb[84].mxu0 %v6703_v40  ;;  %6464 = vmatmul.mubr.bf16.gmra.mrb[84].mxu1 %v6704_v41  ;;  %v8831_v55 = vld [vmem:[#allocation2_spill] sm:$0xff]  ;;  %v8832_v56 = vld [vmem:[#allocation3_spill] sm:$0xff] }
 0x2d7   : > { %6255 = vmatprep.mubr.msk.bf16.mxu0 %vm6739_vm0, %v8666_v57  ;;  %6467 = vmatprep.mubr.msk.bf16.mxu1 %vm6739_vm0, %v8666_v57  ;;  %v8833_v34 = vmax.f32 %v8831_v55, %v8832_v56 }
 0x2d8   : > { %v3974_v5 = vadd.f32 %v7918_v28, %v3869_v45  ;;  %v4071_v37 = vmax.f32 %v3973_v33, 0.0 }
 0x2d9   : > { %v2526_v29 = vpop.f32.mrb[236].mxu0  ;;  %v3343_v36 = vpop.f32.mrb[236].mxu1 }
 0x2da   : > { %v4072_v14 = vmax.f32 %v3974_v5, 0.0  ;;  %v3772_v26 = vmax.f32 %v2526_v29, %v3343_v36  ;;  %v6149_v9 = vpop.f32.mrb[237].mxu0  ;;  %v6361_v63 = vpop.f32.mrb[237].mxu1  ;;  %v8834_v29 = vld [vmem:[#allocation4_spill] sm:$0xff]  ;;  %v8835_v36 = vld [vmem:[#allocation5_spill] sm:$0xff] }
 0x2db   : > { %v2529_v0 = vpop.f32.mrb[238].mxu0  ;;  %v3346_v24 = vpop.f32.mrb[238].mxu1 }
 0x2dc   : > { %v5194_v47 = vpack.c.bf16 %v4072_v14, %v4071_v37  ;;  %v3870_v60 = vmax.f32 %v8827_v51, %v3772_v26  ;;  %v3773_v61 = vmax.f32 %v2529_v0, %v3346_v24  ;;  %v6150_v43 = vpop.f32.mrb[239].mxu0  ;;  %v6362_v44 = vpop.f32.mrb[239].mxu1  ;;  %v8836_v37 = vmax.f32 %v8834_v29, %v8835_v36  ;;  %v6711_v51 = vld [vmem:[%s7143_s26 + $0x140] sm:$0xff]   ;;  %v6715_v29 = vld [vmem:[%s7143_s26 + $0x150] sm:$0xff]  }
 0x2dd   : > { %v6716_v36 = vld [vmem:[%s7151_s29 + $0x150] sm:$0xff]  }
 0x2de   : > { %5399 = vst [vmem:[%s7938_s11 + $0x48] sm:$0xff] %v5194_v47   ;;  %v3975_v25 = vadd.f32 %v7918_v28, %v3870_v60  ;;  %v3871_v58 = vmax.f32 %v8828_v30, %v3773_v61  ;;  %6256 = vmatmul.mubr.bf16.gmra.mrb[88].mxu0 %v6705_v16  ;;  %6468 = vmatmul.mubr.bf16.gmra.mrb[88].mxu1 %v6706_v53  ;;  %v6712_v60 = vld [vmem:[%s7151_s29 + $0x140] sm:$0xff]   ;;  %v8838_v30 = vld [vmem:[#allocation7_spill] sm:$0xff] }
 0x2df   : > { %6259 = vmatprep.mubr.msk.bf16.mxu0 %vm6739_vm0, %v8666_v57  ;;  %6471 = vmatprep.mubr.msk.bf16.mxu1 %vm6739_vm0, %v8666_v57 }
 0x2e0   : > { %v3976_v52 = vadd.f32 %v7918_v28, %v3871_v58  ;;  %v4073_v12 = vmax.f32 %v3975_v25, 0.0  ;;  %v8837_v25 = vld [vmem:[#allocation6_spill] sm:$0xff] }
 0x2e1   : > { %v2534_v6 = vpop.f32.mrb[240].mxu0  ;;  %v3351_v59 = vpop.f32.mrb[240].mxu1  ;;  %v8839_v58 = vmax.f32 %v8837_v25, %v8838_v30 }
 0x2e2   : > { %v4074_v13 = vmax.f32 %v3976_v52, 0.0  ;;  %v3774_v10 = vmax.f32 %v2534_v6, %v3351_v59  ;;  %v6153_v11 = vpop.f32.mrb[241].mxu0  ;;  %v6365_v50 = vpop.f32.mrb[241].mxu1 }
 0x2e3   : > { %v2537_v1 = vpop.f32.mrb[242].mxu0  ;;  %v3354_v15 = vpop.f32.mrb[242].mxu1  ;;  %v8841_v11 = vld [vmem:[#allocation9_spill] sm:$0xff] }
 0x2e4   : > { %v5199_v31 = vpack.c.bf16 %v4074_v13, %v4073_v12  ;;  %v3872_v23 = vmax.f32 %v8829_v32, %v3774_v10  ;;  %v3775_v21 = vmax.f32 %v2537_v1, %v3354_v15  ;;  %v6154_v17 = vpop.f32.mrb[243].mxu0  ;;  %v6366_v27 = vpop.f32.mrb[243].mxu1  ;;  %v8840_v10 = vld [vmem:[#allocation8_spill] sm:$0xff] }
 0x2e5   : > { %v8842_v50 = vmax.f32 %v8840_v10, %v8841_v11  ;;  %v6713_v27 = vld [vmem:[%s7143_s26 + $0x148] sm:$0xff]   ;;  %v6717_v10 = vld [vmem:[%s7143_s26 + $0x158] sm:$0xff]  }
 0x2e6   : > { %5400 = vst [vmem:[%s7938_s11 + $0x50] sm:$0xff] %v5199_v31   ;;  %v3977_v48 = vadd.f32 %v7918_v28, %v3872_v23  ;;  %v3873_v38 = vmax.f32 %v8830_v49, %v3775_v21  ;;  %6260 = vmatmul.mubr.bf16.gmra.mrb[92].mxu0 %v6707_v42  ;;  %6472 = vmatmul.mubr.bf16.gmra.mrb[92].mxu1 %v6708_v4  ;;  %v6718_v11 = vld [vmem:[%s7151_s29 + $0x158] sm:$0xff]  }
 0x2e7   : > { %6263 = vmatprep.mubr.msk.bf16.mxu0 %vm6739_vm0, %v8666_v57  ;;  %6475 = vmatprep.mubr.msk.bf16.mxu1 %vm6739_vm0, %v8666_v57 }
 0x2e8   : > { %v3978_v62 = vadd.f32 %v7918_v28, %v3873_v38  ;;  %v4075_v18 = vmax.f32 %v3977_v48, 0.0  ;;  %v6714_v48 = vld [vmem:[%s7151_s29 + $0x148] sm:$0xff]  }
 0x2e9   : > { %v2542_v54 = vpop.f32.mrb[244].mxu0  ;;  %v3359_v19 = vpop.f32.mrb[244].mxu1 }
 0x2ea   : > { %v4076_v22 = vmax.f32 %v3978_v62, 0.0  ;;  %v3776_v40 = vmax.f32 %v2542_v54, %v3359_v19  ;;  %v6157_v41 = vpop.f32.mrb[245].mxu0  ;;  %v6369_v20 = vpop.f32.mrb[245].mxu1  ;;  %v8843_v54 = vld [vmem:[#allocation10_spill] sm:$0xff]  ;;  %v8844_v19 = vld [vmem:[#allocation11_spill] sm:$0xff] }
 0x2eb   : > { %v2545_v7 = vpop.f32.mrb[246].mxu0  ;;  %v3362_v8 = vpop.f32.mrb[246].mxu1 }
 0x2ec   : > { %v5204_v3 = vpack.c.bf16 %v4076_v22, %v4075_v18  ;;  %v3874_v35 = vmax.f32 %v8833_v34, %v3776_v40  ;;  %v3777_v33 = vmax.f32 %v2545_v7, %v3362_v8  ;;  %v6158_v2 = vpop.f32.mrb[247].mxu0  ;;  %v6370_v45 = vpop.f32.mrb[247].mxu1  ;;  %v8845_v18 = vmax.f32 %v8843_v54, %v8844_v19  ;;  %v8847_v7 = vld [vmem:[#allocation13_spill] sm:$0xff] }
 0x2ee   : > { %5401 = vst [vmem:[%s7938_s11 + $0x58] sm:$0xff] %v5204_v3   ;;  %v3979_v5 = vadd.f32 %v7918_v28, %v3874_v35  ;;  %v3875_v14 = vmax.f32 %v8836_v37, %v3777_v33  ;;  %6264 = vmatmul.mubr.bf16.gmra.mrb[96].mxu0 %v6709_v39  ;;  %6476 = vmatmul.mubr.bf16.gmra.mrb[96].mxu1 %v6710_v46  ;;  %v8846_v46 = vld [vmem:[#allocation12_spill] sm:$0xff] }
 0x2ef   : > { %6267 = vmatprep.mubr.msk.bf16.mxu0 %vm6739_vm0, %v8666_v57  ;;  %6479 = vmatprep.mubr.msk.bf16.mxu1 %vm6739_vm0, %v8666_v57  ;;  %v8848_v8 = vmax.f32 %v8846_v46, %v8847_v7  ;;  %v6719_v46 = vld [vmem:[%s7143_s26 + $0x160] sm:$0xff]  }
 0x2f0   : > { %v3980_v26 = vadd.f32 %v7918_v28, %v3875_v14  ;;  %v4077_v16 = vmax.f32 %v3979_v5, 0.0  ;;  %v6720_v7 = vld [vmem:[%s7151_s29 + $0x160] sm:$0xff]  }
 0x2f1   : > { %v2550_v9 = vpop.f32.mrb[248].mxu0  ;;  %v3367_v63 = vpop.f32.mrb[248].mxu1 }
 0x2f2   : > { %v4078_v53 = vmax.f32 %v3980_v26, 0.0  ;;  %v3778_v0 = vmax.f32 %v2550_v9, %v3367_v63  ;;  %v6161_v24 = vpop.f32.mrb[249].mxu0  ;;  %v6373_v47 = vpop.f32.mrb[249].mxu1  ;;  %v8849_v9 = vld [vmem:[#allocation14_spill] sm:$0xff]  ;;  %v8850_v63 = vld [vmem:[#allocation15_spill] sm:$0xff] }
 0x2f3   : > { %v2553_v61 = vpop.f32.mrb[250].mxu0  ;;  %v3370_v43 = vpop.f32.mrb[250].mxu1 }
 0x2f4   : > { %v5209_v44 = vpack.c.bf16 %v4078_v53, %v4077_v16  ;;  %v3876_v52 = vmax.f32 %v8839_v58, %v3778_v0  ;;  %v3779_v6 = vmax.f32 %v2553_v61, %v3370_v43  ;;  %v6162_v59 = vpop.f32.mrb[251].mxu0  ;;  %v6374_v12 = vpop.f32.mrb[251].mxu1  ;;  %v8851_v16 = vmax.f32 %v8849_v9, %v8850_v63  ;;  %v8853_v61 = vld [vmem:[#allocation17_spill] sm:$0xff] }
 0x2f6   : > { %5402 = vst [vmem:[%s7938_s11 + $0x60] sm:$0xff] %v5209_v44   ;;  %v3981_v13 = vadd.f32 %v7918_v28, %v3876_v52  ;;  %v3877_v42 = vmax.f32 %v8842_v50, %v3779_v6  ;;  %6268 = vmatmul.mubr.bf16.gmra.mrb[100].mxu0 %v6711_v51  ;;  %6480 = vmatmul.mubr.bf16.gmra.mrb[100].mxu1 %v6712_v60  ;;  %v8852_v60 = vld [vmem:[#allocation16_spill] sm:$0xff] }
 0x2f7   : > { %6271 = vmatprep.mubr.msk.bf16.mxu0 %vm6739_vm0, %v8666_v57  ;;  %6483 = vmatprep.mubr.msk.bf16.mxu1 %vm6739_vm0, %v8666_v57  ;;  %v8854_v43 = vmax.f32 %v8852_v60, %v8853_v61  ;;  %v6721_v60 = vld [vmem:[%s7143_s26 + $0x168] sm:$0xff]  }
 0x2f8   : > { %v3982_v4 = vadd.f32 %v7918_v28, %v3877_v42  ;;  %v4079_v31 = vmax.f32 %v3981_v13, 0.0  ;;  %v6722_v61 = vld [vmem:[%s7151_s29 + $0x168] sm:$0xff]  }
 0x2f9   : > { %v2558_v1 = vpop.f32.mrb[252].mxu0  ;;  %v3375_v15 = vpop.f32.mrb[252].mxu1 }
 0x2fa   : > { %v4080_v32 = vmax.f32 %v3982_v4, 0.0  ;;  %v3780_v23 = vmax.f32 %v2558_v1, %v3375_v15  ;;  %v6165_v21 = vpop.f32.mrb[253].mxu0  ;;  %v6377_v17 = vpop.f32.mrb[253].mxu1  ;;  %v8855_v1 = vld [vmem:[#allocation18_spill] sm:$0xff]  ;;  %v8856_v15 = vld [vmem:[#allocation19_spill] sm:$0xff] }
 0x2fb   : > { %v2561_v49 = vpop.f32.mrb[254].mxu0  ;;  %v3378_v38 = vpop.f32.mrb[254].mxu1 }
 0x2fc   : > { %v5214_v62 = vpack.c.bf16 %v4080_v32, %v4079_v31  ;;  %v3878_v22 = vmax.f32 %v8845_v18, %v3780_v23  ;;  %v3781_v40 = vmax.f32 %v2561_v49, %v3378_v38  ;;  %v6166_v41 = vpop.f32.mrb[255].mxu0  ;;  %v6378_v20 = vpop.f32.mrb[255].mxu1  ;;  %v8857_v31 = vmax.f32 %v8855_v1, %v8856_v15  ;;  %v8859_v49 = vld [vmem:[#allocation21_spill] sm:$0xff] }
 0x2fe   : > { %5403 = vst [vmem:[%s7938_s11 + $0x68] sm:$0xff] %v5214_v62   ;;  %v3983_v39 = vadd.f32 %v7918_v28, %v3878_v22  ;;  %v3879_v3 = vmax.f32 %v8848_v8, %v3781_v40  ;;  %6272 = vmatmul.mubr.bf16.gmra.mrb[104].mxu0 %v6713_v27  ;;  %6484 = vmatmul.mubr.bf16.gmra.mrb[104].mxu1 %v6714_v48  ;;  %v8858_v48 = vld [vmem:[#allocation20_spill] sm:$0xff] }
 0x2ff   : > { %6275 = vmatprep.mubr.msk.bf16.mxu0 %vm6739_vm0, %v8666_v57  ;;  %6487 = vmatprep.mubr.msk.bf16.mxu1 %vm6739_vm0, %v8666_v57  ;;  %v8860_v38 = vmax.f32 %v8858_v48, %v8859_v49  ;;  %v6723_v48 = vld [vmem:[%s7143_s26 + $0x170] sm:$0xff]  }
 0x300   : > { %v3984_v55 = vadd.f32 %v7918_v28, %v3879_v3  ;;  %v4081_v35 = vmax.f32 %v3983_v39, 0.0  ;;  %v6724_v49 = vld [vmem:[%s7151_s29 + $0x170] sm:$0xff]  }
 0x301   : > { %v2566_v56 = vpop.f32.mrb[0].mxu0  ;;  %v3383_v34 = vpop.f32.mrb[0].mxu1 }
 0x302   : > { %v4082_v33 = vmax.f32 %v3984_v55, 0.0  ;;  %v3782_v2 = vmax.f32 %v2566_v56, %v3383_v34  ;;  %v6169_v45 = vpop.f32.mrb[1].mxu0  ;;  %v6381_v5 = vpop.f32.mrb[1].mxu1  ;;  %v8861_v56 = vld [vmem:[#allocation22_spill] sm:$0xff]  ;;  %v8862_v34 = vld [vmem:[#allocation23_spill] sm:$0xff] }
 0x303   : > { %v2569_v37 = vpop.f32.mrb[2].mxu0  ;;  %v3386_v14 = vpop.f32.mrb[2].mxu1 }
 0x304   : > { %v5219_v26 = vpack.c.bf16 %v4082_v33, %v4081_v35  ;;  %v3880_v53 = vmax.f32 %v8851_v16, %v3782_v2  ;;  %v3783_v0 = vmax.f32 %v2569_v37, %v3386_v14  ;;  %v6170_v24 = vpop.f32.mrb[3].mxu0  ;;  %v6382_v47 = vpop.f32.mrb[3].mxu1  ;;  %v8863_v35 = vmax.f32 %v8861_v56, %v8862_v34  ;;  %v8865_v37 = vld [vmem:[#allocation25_spill] sm:$0xff] }
 0x306   : > { %5404 = vst [vmem:[%s7938_s11 + $0x70] sm:$0xff] %v5219_v26   ;;  %v3985_v51 = vadd.f32 %v7918_v28, %v3880_v53  ;;  %v3881_v44 = vmax.f32 %v8854_v43, %v3783_v0  ;;  %6276 = vmatmul.mubr.bf16.gmra.mrb[108].mxu0 %v6715_v29  ;;  %6488 = vmatmul.mubr.bf16.gmra.mrb[108].mxu1 %v6716_v36  ;;  %v8864_v36 = vld [vmem:[#allocation24_spill] sm:$0xff] }
 0x307   : > { %6279 = vmatprep.mubr.msk.bf16.mxu0 %vm6739_vm0, %v8666_v57  ;;  %6491 = vmatprep.mubr.msk.bf16.mxu1 %vm6739_vm0, %v8666_v57  ;;  %v8866_v14 = vmax.f32 %v8864_v36, %v8865_v37  ;;  %v6725_v36 = vld [vmem:[%s7143_s26 + $0x178] sm:$0xff]  }
 0x308   : > { %v3986_v25 = vadd.f32 %v7918_v28, %v3881_v44  ;;  %v4083_v52 = vmax.f32 %v3985_v51, 0.0  ;;  %v6726_v37 = vld [vmem:[%s7151_s29 + $0x178] sm:$0xff]  }
 0x309   : > { %v2574_v30 = vpop.f32.mrb[4].mxu0  ;;  %v3391_v58 = vpop.f32.mrb[4].mxu1 }
 0x30a   : > { %v4084_v6 = vmax.f32 %v3986_v25, 0.0  ;;  %v3784_v59 = vmax.f32 %v2574_v30, %v3391_v58  ;;  %v6173_v12 = vpop.f32.mrb[5].mxu0  ;;  %v6385_v13 = vpop.f32.mrb[5].mxu1  ;;  %v8867_v30 = vld [vmem:[#allocation26_spill] sm:$0xff]  ;;  %v8868_v58 = vld [vmem:[#allocation27_spill] sm:$0xff] }
 0x30b   : > { %v2577_v50 = vpop.f32.mrb[6].mxu0  ;;  %v3394_v42 = vpop.f32.mrb[6].mxu1 }
 0x30c   : > { %v5224_v4 = vpack.c.bf16 %v4084_v6, %v4083_v52  ;;  %v3882_v32 = vmax.f32 %v8857_v31, %v3784_v59  ;;  %v3785_v23 = vmax.f32 %v2577_v50, %v3394_v42  ;;  %v6174_v21 = vpop.f32.mrb[7].mxu0  ;;  %v6386_v17 = vpop.f32.mrb[7].mxu1  ;;  %v8869_v52 = vmax.f32 %v8867_v30, %v8868_v58  ;;  %v8871_v50 = vld [vmem:[#allocation29_spill] sm:$0xff] }
 0x30e   : > { %5405 = vst [vmem:[%s7938_s11 + $0x78] sm:$0xff] %v5224_v4   ;;  %v3987_v27 = vadd.f32 %v7918_v28, %v3882_v32  ;;  %v3883_v62 = vmax.f32 %v8860_v38, %v3785_v23  ;;  %6280 = vmatmul.mubr.bf16.gmra.mrb[112].mxu0 %v6717_v10  ;;  %6492 = vmatmul.mubr.bf16.gmra.mrb[112].mxu1 %v6718_v11  ;;  %v8870_v11 = vld [vmem:[#allocation28_spill] sm:$0xff] }
 0x30f   : > { %6283 = vmatprep.mubr.msk.bf16.mxu0 %vm6739_vm0, %v8666_v57  ;;  %6495 = vmatprep.mubr.msk.bf16.mxu1 %vm6739_vm0, %v8666_v57  ;;  %v8872_v42 = vmax.f32 %v8870_v11, %v8871_v50  ;;  %v6727_v11 = vld [vmem:[%s7143_s26 + $0x180] sm:$0xff]  }
 0x310   : > { %v3988_v54 = vadd.f32 %v7918_v28, %v3883_v62  ;;  %v4085_v22 = vmax.f32 %v3987_v27, 0.0  ;;  %v6728_v50 = vld [vmem:[%s7151_s29 + $0x180] sm:$0xff]  }
 0x311   : > { %v2582_v19 = vpop.f32.mrb[8].mxu0  ;;  %v3399_v18 = vpop.f32.mrb[8].mxu1 }
 0x312   : > { %v4086_v40 = vmax.f32 %v3988_v54, 0.0  ;;  %v3786_v41 = vmax.f32 %v2582_v19, %v3399_v18  ;;  %v6177_v20 = vpop.f32.mrb[9].mxu0  ;;  %v6389_v39 = vpop.f32.mrb[9].mxu1  ;;  %v8873_v19 = vld [vmem:[#allocation30_spill] sm:$0xff]  ;;  %v8874_v18 = vld [vmem:[#allocation31_spill] sm:$0xff] }
 0x313   : > { %v2585_v8 = vpop.f32.mrb[10].mxu0  ;;  %v3402_v3 = vpop.f32.mrb[10].mxu1 }
 0x314   : > { %v5229_v55 = vpack.c.bf16 %v4086_v40, %v4085_v22  ;;  %v3884_v33 = vmax.f32 %v8863_v35, %v3786_v41  ;;  %v3787_v2 = vmax.f32 %v2585_v8, %v3402_v3  ;;  %v6178_v45 = vpop.f32.mrb[11].mxu0  ;;  %v6390_v5 = vpop.f32.mrb[11].mxu1  ;;  %v8875_v22 = vmax.f32 %v8873_v19, %v8874_v18  ;;  %v8877_v8 = vld [vmem:[#allocation33_spill] sm:$0xff] }
 0x316   : > { %5406 = vst [vmem:[%s7938_s11 + $0x80] sm:$0xff] %v5229_v55   ;;  %v3989_v29 = vadd.f32 %v7918_v28, %v3884_v33  ;;  %v3885_v26 = vmax.f32 %v8866_v14, %v3787_v2  ;;  %6284 = vmatmul.mubr.bf16.gmra.mrb[116].mxu0 %v6719_v46  ;;  %6496 = vmatmul.mubr.bf16.gmra.mrb[116].mxu1 %v6720_v7  ;;  %v8876_v7 = vld [vmem:[#allocation32_spill] sm:$0xff] }
 0x317   : > { %6287 = vmatprep.mubr.msk.bf16.mxu0 %vm6739_vm0, %v8666_v57  ;;  %6499 = vmatprep.mubr.msk.bf16.mxu1 %vm6739_vm0, %v8666_v57  ;;  %v8878_v3 = vmax.f32 %v8876_v7, %v8877_v8 }
 0x318   : > { %v3990_v9 = vadd.f32 %v7918_v28, %v3885_v26  ;;  %v4087_v53 = vmax.f32 %v3989_v29, 0.0 }
 0x319   : > { %v2590_v63 = vpop.f32.mrb[12].mxu0  ;;  %v3407_v16 = vpop.f32.mrb[12].mxu1 }
 0x31a   : > { %v4088_v0 = vmax.f32 %v3990_v9, 0.0  ;;  %v3788_v24 = vmax.f32 %v2590_v63, %v3407_v16  ;;  %v6181_v47 = vpop.f32.mrb[13].mxu0  ;;  %v6393_v51 = vpop.f32.mrb[13].mxu1  ;;  %v8879_v63 = vld [vmem:[#allocation34_spill] sm:$0xff]  ;;  %v8880_v16 = vld [vmem:[#allocation35_spill] sm:$0xff] }
 0x31b   : > { %v2593_v43 = vpop.f32.mrb[14].mxu0  ;;  %v3410_v44 = vpop.f32.mrb[14].mxu1 }
 0x31c   : > { %v5234_v25 = vpack.c.bf16 %v4088_v0, %v4087_v53  ;;  %v3886_v6 = vmax.f32 %v8869_v52, %v3788_v24  ;;  %v3789_v59 = vmax.f32 %v2593_v43, %v3410_v44  ;;  %v6182_v12 = vpop.f32.mrb[15].mxu0  ;;  %v6394_v13 = vpop.f32.mrb[15].mxu1  ;;  %v8881_v53 = vmax.f32 %v8879_v63, %v8880_v16  ;;  %v8883_v43 = vld [vmem:[#allocation37_spill] sm:$0xff] }
 0x31e   : > { %5407 = vst [vmem:[%s7938_s11 + $0x88] sm:$0xff] %v5234_v25   ;;  %v3991_v10 = vadd.f32 %v7918_v28, %v3886_v6  ;;  %v3887_v4 = vmax.f32 %v8872_v42, %v3789_v59  ;;  %6288 = vmatmul.mubr.bf16.gmra.mrb[120].mxu0 %v6721_v60  ;;  %6500 = vmatmul.mubr.bf16.gmra.mrb[120].mxu1 %v6722_v61  ;;  %v8882_v61 = vld [vmem:[#allocation36_spill] sm:$0xff] }
 0x31f   : > { %6291 = vmatprep.mubr.msk.bf16.mxu0 %vm6739_vm0, %v8666_v57  ;;  %6503 = vmatprep.mubr.msk.bf16.mxu1 %vm6739_vm0, %v8666_v57  ;;  %v8884_v44 = vmax.f32 %v8882_v61, %v8883_v43  ;;  %v8897_v61 = vld [vmem:[#allocation46_spill] sm:$0xff]  ;;  %v8898_v43 = vld [vmem:[#allocation47_spill] sm:$0xff] }
 0x320   : > { %v3992_v1 = vadd.f32 %v7918_v28, %v3887_v4  ;;  %v4089_v32 = vmax.f32 %v3991_v10, 0.0 }
 0x321   : > { %v2598_v15 = vpop.f32.mrb[16].mxu0  ;;  %v3415_v31 = vpop.f32.mrb[16].mxu1 }
 0x322   : > { %v4090_v23 = vmax.f32 %v3992_v1, 0.0  ;;  %v3790_v21 = vmax.f32 %v2598_v15, %v3415_v31  ;;  %v6185_v17 = vpop.f32.mrb[17].mxu0  ;;  %v6397_v27 = vpop.f32.mrb[17].mxu1  ;;  %v8885_v15 = vld [vmem:[#allocation38_spill] sm:$0xff]  ;;  %v8886_v31 = vld [vmem:[#allocation39_spill] sm:$0xff] }
 0x323   : > { %v2601_v38 = vpop.f32.mrb[18].mxu0  ;;  %v3418_v62 = vpop.f32.mrb[18].mxu1  ;;  %v8247_v17 = vld [vmem:[%s8506_s5] ss:$0 sm:$0xff] }
 0x324   : > { %v5239_v54 = vpack.c.bf16 %v4090_v23, %v4089_v32  ;;  %v3888_v40 = vmax.f32 %v8875_v22, %v3790_v21  ;;  %v3791_v41 = vmax.f32 %v2601_v38, %v3418_v62  ;;  %v6186_v20 = vpop.f32.mrb[19].mxu0  ;;  %v6398_v39 = vpop.f32.mrb[19].mxu1  ;;  %v8887_v32 = vmax.f32 %v8885_v15, %v8886_v31 }
 0x326   : > { %5408 = vst [vmem:[%s7938_s11 + $0x90] sm:$0xff] %v5239_v54   ;;  %v3993_v46 = vadd.f32 %v7918_v28, %v3888_v40  ;;  %v3889_v55 = vmax.f32 %v8878_v3, %v3791_v41  ;;  %6292 = vmatmul.mubr.bf16.gmra.mrb[124].mxu0 %v6723_v48  ;;  %6504 = vmatmul.mubr.bf16.gmra.mrb[124].mxu1 %v6724_v49  ;;  %v8888_v48 = vld [vmem:[#allocation40_spill] sm:$0xff]  ;;  %v8889_v49 = vld [vmem:[#allocation41_spill] sm:$0xff]  ;;  %v8891_v3 = vld [vmem:[#allocation42_spill] sm:$0xff] }
 0x327   : > { %6295 = vmatprep.mubr.msk.bf16.mxu0 %vm6739_vm0, %v8666_v57  ;;  %6507 = vmatprep.mubr.msk.bf16.mxu1 %vm6739_vm0, %v8666_v57  ;;  %v8890_v38 = vmax.f32 %v8888_v48, %v8889_v49 }
 0x328   : > { %v3994_v56 = vadd.f32 %v7918_v28, %v3889_v55  ;;  %v4091_v33 = vmax.f32 %v3993_v46, 0.0  ;;  %v8892_v55 = vld [vmem:[#allocation43_spill] sm:$0xff] }
 0x329   : > { %v2606_v34 = vpop.f32.mrb[20].mxu0  ;;  %v3423_v35 = vpop.f32.mrb[20].mxu1 }
 0x32a   : > { %v4092_v2 = vmax.f32 %v3994_v56, 0.0  ;;  %v3792_v45 = vmax.f32 %v2606_v34, %v3423_v35  ;;  %v6189_v5 = vpop.f32.mrb[21].mxu0  ;;  %v6401_v29 = vpop.f32.mrb[21].mxu1  ;;  %v8893_v56 = vmax.f32 %v8891_v3, %v8892_v55 }
 0x32b   : > { %v2609_v14 = vpop.f32.mrb[22].mxu0  ;;  %v3426_v26 = vpop.f32.mrb[22].mxu1  ;;  %v8894_v5 = vld [vmem:[#allocation44_spill] sm:$0xff]  ;;  %v8895_v29 = vld [vmem:[#allocation45_spill] sm:$0xff] }
 0x32c   : > { %v5244_v9 = vpack.c.bf16 %v4092_v2, %v4091_v33  ;;  %v3890_v0 = vmax.f32 %v8881_v53, %v3792_v45  ;;  %v3793_v24 = vmax.f32 %v2609_v14, %v3426_v26  ;;  %v6190_v47 = vpop.f32.mrb[23].mxu0  ;;  %v6402_v51 = vpop.f32.mrb[23].mxu1 }
 0x32e   : > { %5409 = vst [vmem:[%s7938_s11 + $0x98] sm:$0xff] %v5244_v9   ;;  %v3995_v60 = vadd.f32 %v7918_v28, %v3890_v0  ;;  %v3891_v25 = vmax.f32 %v8884_v44, %v3793_v24  ;;  %6296 = vmatmul.mubr.bf16.gmra.mrb[128].mxu0 %v6725_v36  ;;  %6508 = vmatmul.mubr.bf16.gmra.mrb[128].mxu1 %v6726_v37 }
 0x32f   : > { %6299 = vmatprep.mubr.msk.bf16.mxu0 %vm6739_vm0, %v8666_v57  ;;  %6511 = vmatprep.mubr.msk.bf16.mxu1 %vm6739_vm0, %v8666_v57  ;;  %v8896_v36 = vmax.f32 %v8894_v5, %v8895_v29  ;;  %v8899_v44 = vmax.f32 %v8897_v61, %v8898_v43 }
 0x330   : > { %v3996_v30 = vadd.f32 %v7918_v28, %v3891_v25  ;;  %v4093_v6 = vmax.f32 %v3995_v60, 0.0 }
 0x331   : > { %v2614_v58 = vpop.f32.mrb[24].mxu0  ;;  %v3431_v52 = vpop.f32.mrb[24].mxu1 }
 0x332   : > { %v4094_v59 = vmax.f32 %v3996_v30, 0.0  ;;  %v3794_v12 = vmax.f32 %v2614_v58, %v3431_v52  ;;  %v6193_v13 = vpop.f32.mrb[25].mxu0  ;;  %v6405_v10 = vpop.f32.mrb[25].mxu1 }
 0x333   : > { %v2617_v42 = vpop.f32.mrb[26].mxu0  ;;  %v3434_v4 = vpop.f32.mrb[26].mxu1 }
 0x334   : > { %v5249_v1 = vpack.c.bf16 %v4094_v59, %v4093_v6  ;;  %v3892_v23 = vmax.f32 %v8887_v32, %v3794_v12  ;;  %v3795_v57 = vmax.f32 %v2617_v42, %v3434_v4  ;;  %v6194_v21 = vpop.f32.mrb[27].mxu0  ;;  %v6406_v28 = vpop.f32.mrb[27].mxu1  ;;  %v8900_v59 = vld [vmem:[#allocation48_spill] sm:$0xff]  ;;  %v8901_v12 = vld [vmem:[#allocation49_spill] sm:$0xff] }
 0x335   : > { %v8902_v13 = vmax.f32 %v8900_v59, %v8901_v12  ;;  %v8903_v28 = vld [vmem:[#allocation50_spill] sm:$0xff] }
 0x336   : > { %5410 = vst [vmem:[%s7938_s11 + $0xa0] sm:$0xff] %v5249_v1   ;;  %v3997_v27 = vadd.f32 %v8247_v17, %v3892_v23  ;;  %v3893_v62 = vmax.f32 %v8890_v38, %v3795_v57  ;;  %6300 = vmatmul.mubr.bf16.gmra.mrb[132].mxu0 %v6727_v11  ;;  %6512 = vmatmul.mubr.bf16.gmra.mrb[132].mxu1 %v6728_v50 }
 0x338   : > { %v3998_v54 = vadd.f32 %v8247_v17, %v3893_v62  ;;  %v4095_v22 = vmax.f32 %v3997_v27, 0.0  ;;  %v8904_v27 = vld [vmem:[#allocation51_spill] sm:$0xff] }
 0x339   : > { %v2622_v19 = vpop.f32.mrb[28].mxu0  ;;  %v3439_v18 = vpop.f32.mrb[28].mxu1  ;;  %v8905_v48 = vmax.f32 %v8903_v28, %v8904_v27 }
 0x33a   : > { %v4096_v40 = vmax.f32 %v3998_v54, 0.0  ;;  %v3796_v41 = vmax.f32 %v2622_v19, %v3439_v18  ;;  %v6197_v20 = vpop.f32.mrb[29].mxu0  ;;  %v6409_v39 = vpop.f32.mrb[29].mxu1  ;;  %v8906_v18 = vld [vmem:[#allocation52_spill] sm:$0xff] }
 0x33b   : > { %v2625_v46 = vpop.f32.mrb[30].mxu0  ;;  %v3442_v7 = vpop.f32.mrb[30].mxu1 }
 0x33c   : > { %v5254_v8 = vpack.c.bf16 %v4096_v40, %v4095_v22  ;;  %v3894_v34 = vmax.f32 %v8893_v56, %v3796_v41  ;;  %v3797_v35 = vmax.f32 %v2625_v46, %v3442_v7  ;;  %v6198_v33 = vpop.f32.mrb[31].mxu0  ;;  %v6410_v2 = vpop.f32.mrb[31].mxu1  ;;  %v8907_v22 = vld [vmem:[#allocation53_spill] sm:$0xff] }
 0x33d   : > { %v8908_v40 = vmax.f32 %v8906_v18, %v8907_v22  ;;  %v8909_v2 = vld [vmem:[#allocation54_spill] sm:$0xff] }
 0x33e   : > { %5411 = vst [vmem:[%s7938_s11 + $0xa8] sm:$0xff] %v5254_v8   ;;  %v3999_v45 = vadd.f32 %v8247_v17, %v3894_v34  ;;  %v3895_v37 = vmax.f32 %v8896_v36, %v3797_v35 }
 0x340   : > { %v4000_v14 = vadd.f32 %v8247_v17, %v3895_v37  ;;  %v4097_v63 = vmax.f32 %v3999_v45, 0.0  ;;  %v8910_v45 = vld [vmem:[#allocation55_spill] sm:$0xff] }
 0x341   : > { %v2630_v26 = vpop.f32.mrb[32].mxu0  ;;  %v3447_v9 = vpop.f32.mrb[32].mxu1  ;;  %v8911_v5 = vmax.f32 %v8909_v2, %v8910_v45 }
 0x342   : > { %v4098_v16 = vmax.f32 %v4000_v14, 0.0  ;;  %v3798_v53 = vmax.f32 %v2630_v26, %v3447_v9  ;;  %v6201_v0 = vpop.f32.mrb[33].mxu0  ;;  %v6413_v24 = vpop.f32.mrb[33].mxu1  ;;  %v8912_v9 = vld [vmem:[#allocation56_spill] sm:$0xff] }
 0x343   : > { %v2633_v47 = vpop.f32.mrb[34].mxu0  ;;  %v3450_v51 = vpop.f32.mrb[34].mxu1 }
 0x344   : > { %v5259_v60 = vpack.c.bf16 %v4098_v16, %v4097_v63  ;;  %v3896_v25 = vmax.f32 %v8899_v44, %v3798_v53  ;;  %v3799_v30 = vmax.f32 %v2633_v47, %v3450_v51  ;;  %v6202_v58 = vpop.f32.mrb[35].mxu0  ;;  %v6414_v52 = vpop.f32.mrb[35].mxu1  ;;  %v8913_v63 = vld [vmem:[#allocation57_spill] sm:$0xff] }
 0x345   : > { %v8914_v16 = vmax.f32 %v8912_v9, %v8913_v63  ;;  %v8915_v52 = vld [vmem:[#allocation58_spill] sm:$0xff] }
 0x346   : > { %5412 = vst [vmem:[%s7938_s11 + $0xb0] sm:$0xff] %v5259_v60   ;;  %v4001_v6 = vadd.f32 %v8247_v17, %v3896_v25  ;;  %v3897_v10 = vmax.f32 %v8902_v13, %v3799_v30 }
 0x348   : > { %v4002_v11 = vadd.f32 %v8247_v17, %v3897_v10  ;;  %v4099_v4 = vmax.f32 %v4001_v6, 0.0  ;;  %v8916_v6 = vld [vmem:[#allocation59_spill] sm:$0xff] }
 0x349   : > { %v2638_v50 = vpop.f32.mrb[36].mxu0  ;;  %v3455_v42 = vpop.f32.mrb[36].mxu1  ;;  %v8917_v59 = vmax.f32 %v8915_v52, %v8916_v6 }
 0x34a   : > { %v4100_v1 = vmax.f32 %v4002_v11, 0.0  ;;  %v3800_v15 = vmax.f32 %v2638_v50, %v3455_v42  ;;  %v6205_v31 = vpop.f32.mrb[37].mxu0  ;;  %v6417_v32 = vpop.f32.mrb[37].mxu1  ;;  %v8918_v42 = vld [vmem:[#allocation60_spill] sm:$0xff] }
 0x34b   : > { %v2641_v23 = vpop.f32.mrb[38].mxu0  ;;  %v3458_v57 = vpop.f32.mrb[38].mxu1 }
 0x34c   : > { %v5264_v21 = vpack.c.bf16 %v4100_v1, %v4099_v4  ;;  %v3898_v49 = vmax.f32 %v8905_v48, %v3800_v15  ;;  %v3801_v38 = vmax.f32 %v2641_v23, %v3458_v57  ;;  %v6206_v62 = vpop.f32.mrb[39].mxu0  ;;  %v6418_v54 = vpop.f32.mrb[39].mxu1  ;;  %v8919_v4 = vld [vmem:[#allocation61_spill] sm:$0xff] }
 0x34d   : > { %v8920_v1 = vmax.f32 %v8918_v42, %v8919_v4  ;;  %v8921_v54 = vld [vmem:[#allocation62_spill] sm:$0xff] }
 0x34e   : > { %5413 = vst [vmem:[%s7938_s11 + $0xb8] sm:$0xff] %v5264_v21   ;;  %v4003_v19 = vadd.f32 %v8247_v17, %v3898_v49  ;;  %v3899_v41 = vmax.f32 %v8908_v40, %v3801_v38 }
 0x350   : > { %v4004_v20 = vadd.f32 %v8247_v17, %v3899_v41  ;;  %v4101_v7 = vmax.f32 %v4003_v19, 0.0  ;;  %v8922_v19 = vld [vmem:[#allocation63_spill] sm:$0xff] }
 0x351   : > { %v2646_v39 = vpop.f32.mrb[40].mxu0  ;;  %v3463_v46 = vpop.f32.mrb[40].mxu1  ;;  %v8923_v18 = vmax.f32 %v8921_v54, %v8922_v19 }
 0x352   : > { %v4102_v8 = vmax.f32 %v4004_v20, 0.0  ;;  %v3802_v3 = vmax.f32 %v2646_v39, %v3463_v46  ;;  %v6209_v55 = vpop.f32.mrb[41].mxu0  ;;  %v6421_v56 = vpop.f32.mrb[41].mxu1  ;;  %v8924_v46 = vld [vmem:[#allocation64_spill] sm:$0xff] }
 0x353   : > { %v2649_v34 = vpop.f32.mrb[42].mxu0  ;;  %v3466_v35 = vpop.f32.mrb[42].mxu1 }
 0x354   : > { %v5269_v33 = vpack.c.bf16 %v4102_v8, %v4101_v7  ;;  %v3900_v29 = vmax.f32 %v8911_v5, %v3802_v3  ;;  %v3803_v36 = vmax.f32 %v2649_v34, %v3466_v35  ;;  %v6210_v37 = vpop.f32.mrb[43].mxu0  ;;  %v6422_v14 = vpop.f32.mrb[43].mxu1  ;;  %v8925_v7 = vld [vmem:[#allocation65_spill] sm:$0xff] }
 0x355   : > { %v8926_v8 = vmax.f32 %v8924_v46, %v8925_v7  ;;  %v8927_v14 = vld [vmem:[#allocation66_spill] sm:$0xff] }
 0x356   : > { %5414 = vst [vmem:[%s7938_s11 + $0xc0] sm:$0xff] %v5269_v33   ;;  %v4005_v26 = vadd.f32 %v8247_v17, %v3900_v29  ;;  %v3901_v53 = vmax.f32 %v8914_v16, %v3803_v36 }
 0x358   : > { %v4006_v0 = vadd.f32 %v8247_v17, %v3901_v53  ;;  %v4103_v51 = vmax.f32 %v4005_v26, 0.0  ;;  %v8928_v26 = vld [vmem:[#allocation67_spill] sm:$0xff] }
 0x359   : > { %v2654_v24 = vpop.f32.mrb[44].mxu0  ;;  %v3471_v47 = vpop.f32.mrb[44].mxu1  ;;  %v8929_v9 = vmax.f32 %v8927_v14, %v8928_v26 }
 0x35a   : > { %v4104_v60 = vmax.f32 %v4006_v0, 0.0  ;;  %v3804_v61 = vmax.f32 %v2654_v24, %v3471_v47  ;;  %v6213_v43 = vpop.f32.mrb[45].mxu0  ;;  %v6425_v44 = vpop.f32.mrb[45].mxu1  ;;  %v8930_v47 = vld [vmem:[#allocation68_spill] sm:$0xff] }
 0x35b   : > { %v2657_v25 = vpop.f32.mrb[46].mxu0  ;;  %v3474_v30 = vpop.f32.mrb[46].mxu1 }
 0x35c   : > { %v5274_v58 = vpack.c.bf16 %v4104_v60, %v4103_v51  ;;  %v3902_v12 = vmax.f32 %v8917_v59, %v3804_v61  ;;  %v3805_v13 = vmax.f32 %v2657_v25, %v3474_v30  ;;  %v6214_v10 = vpop.f32.mrb[47].mxu0  ;;  %v6426_v11 = vpop.f32.mrb[47].mxu1  ;;  %v8931_v51 = vld [vmem:[#allocation69_spill] sm:$0xff] }
 0x35d   : > { %v8932_v60 = vmax.f32 %v8930_v47, %v8931_v51  ;;  %v8933_v11 = vld [vmem:[#allocation70_spill] sm:$0xff] }
 0x35e   : > { %5415 = vst [vmem:[%s7938_s11 + $0xc8] sm:$0xff] %v5274_v58   ;;  %v4007_v50 = vadd.f32 %v8247_v17, %v3902_v12  ;;  %v3903_v15 = vmax.f32 %v8920_v1, %v3805_v13 }
 0x360   : > { %v4008_v31 = vadd.f32 %v8247_v17, %v3903_v15  ;;  %v4105_v57 = vmax.f32 %v4007_v50, 0.0  ;;  %v8934_v50 = vld [vmem:[#allocation71_spill] sm:$0xff] }
 0x361   : > { %v2662_v32 = vpop.f32.mrb[48].mxu0  ;;  %v3479_v23 = vpop.f32.mrb[48].mxu1  ;;  %v8935_v42 = vmax.f32 %v8933_v11, %v8934_v50 }
 0x362   : > { %v4106_v21 = vmax.f32 %v4008_v31, 0.0  ;;  %v3806_v28 = vmax.f32 %v2662_v32, %v3479_v23  ;;  %v6217_v27 = vpop.f32.mrb[49].mxu0  ;;  %v6429_v48 = vpop.f32.mrb[49].mxu1  ;;  %v8936_v23 = vld [vmem:[#allocation72_spill] sm:$0xff] }
 0x363   : > { %v2665_v49 = vpop.f32.mrb[50].mxu0  ;;  %v3482_v38 = vpop.f32.mrb[50].mxu1 }
 0x364   : > { %v5279_v62 = vpack.c.bf16 %v4106_v21, %v4105_v57  ;;  %v3904_v22 = vmax.f32 %v8923_v18, %v3806_v28  ;;  %v3807_v40 = vmax.f32 %v2665_v49, %v3482_v38  ;;  %v6218_v41 = vpop.f32.mrb[51].mxu0  ;;  %v6430_v20 = vpop.f32.mrb[51].mxu1  ;;  %v8937_v57 = vld [vmem:[#allocation73_spill] sm:$0xff] }
 0x365   : > { %v8938_v21 = vmax.f32 %v8936_v23, %v8937_v57  ;;  %v8939_v20 = vld [vmem:[#allocation74_spill] sm:$0xff] }
 0x366   : > { %5416 = vst [vmem:[%s7938_s11 + $0xd0] sm:$0xff] %v5279_v62   ;;  %v4009_v39 = vadd.f32 %v8247_v17, %v3904_v22  ;;  %v3905_v3 = vmax.f32 %v8926_v8, %v3807_v40 }
 0x368   : > { %v4010_v55 = vadd.f32 %v8247_v17, %v3905_v3  ;;  %v4107_v35 = vmax.f32 %v4009_v39, 0.0  ;;  %v8940_v39 = vld [vmem:[#allocation75_spill] sm:$0xff] }
 0x369   : > { %v2670_v56 = vpop.f32.mrb[52].mxu0  ;;  %v3487_v34 = vpop.f32.mrb[52].mxu1  ;;  %v8941_v46 = vmax.f32 %v8939_v20, %v8940_v39 }
 0x36a   : > { %v4108_v33 = vmax.f32 %v4010_v55, 0.0  ;;  %v3808_v2 = vmax.f32 %v2670_v56, %v3487_v34  ;;  %v6221_v45 = vpop.f32.mrb[53].mxu0  ;;  %v6433_v5 = vpop.f32.mrb[53].mxu1  ;;  %v8942_v34 = vld [vmem:[#allocation76_spill] sm:$0xff] }
 0x36b   : > { %v2673_v29 = vpop.f32.mrb[54].mxu0  ;;  %v3490_v36 = vpop.f32.mrb[54].mxu1 }
 0x36c   : > { %v5284_v37 = vpack.c.bf16 %v4108_v33, %v4107_v35  ;;  %v3906_v63 = vmax.f32 %v8929_v9, %v3808_v2  ;;  %v3809_v16 = vmax.f32 %v2673_v29, %v3490_v36  ;;  %v6222_v53 = vpop.f32.mrb[55].mxu0  ;;  %v6434_v0 = vpop.f32.mrb[55].mxu1  ;;  %v8943_v35 = vld [vmem:[#allocation77_spill] sm:$0xff] }
 0x36d   : > { %v8944_v33 = vmax.f32 %v8942_v34, %v8943_v35  ;;  %v8945_v0 = vld [vmem:[#allocation78_spill] sm:$0xff] }
 0x36e   : > { %5417 = vst [vmem:[%s7938_s11 + $0xd8] sm:$0xff] %v5284_v37   ;;  %v4011_v24 = vadd.f32 %v8247_v17, %v3906_v63  ;;  %v3907_v61 = vmax.f32 %v8932_v60, %v3809_v16 }
 0x370   : > { %v4012_v43 = vadd.f32 %v8247_v17, %v3907_v61  ;;  %v4109_v30 = vmax.f32 %v4011_v24, 0.0  ;;  %v8946_v24 = vld [vmem:[#allocation79_spill] sm:$0xff] }
 0x371   : > { %v2678_v44 = vpop.f32.mrb[56].mxu0  ;;  %v3495_v25 = vpop.f32.mrb[56].mxu1  ;;  %v8947_v47 = vmax.f32 %v8945_v0, %v8946_v24 }
 0x372   : > { %v4110_v58 = vmax.f32 %v4012_v43, 0.0  ;;  %v3810_v52 = vmax.f32 %v2678_v44, %v3495_v25  ;;  %v6225_v6 = vpop.f32.mrb[57].mxu0  ;;  %v6437_v59 = vpop.f32.mrb[57].mxu1  ;;  %v8948_v25 = vld [vmem:[#allocation80_spill] sm:$0xff] }
 0x373   : > { %v2681_v12 = vpop.f32.mrb[58].mxu0  ;;  %v3498_v13 = vpop.f32.mrb[58].mxu1 }
 0x374   : > { %v5289_v10 = vpack.c.bf16 %v4110_v58, %v4109_v30  ;;  %v3908_v4 = vmax.f32 %v8935_v42, %v3810_v52  ;;  %v3811_v1 = vmax.f32 %v2681_v12, %v3498_v13  ;;  %v6226_v15 = vpop.f32.mrb[59].mxu0  ;;  %v6438_v31 = vpop.f32.mrb[59].mxu1  ;;  %v8949_v30 = vld [vmem:[#allocation81_spill] sm:$0xff] }
 0x375   : > { %v8950_v58 = vmax.f32 %v8948_v25, %v8949_v30  ;;  %v8951_v31 = vld [vmem:[#allocation82_spill] sm:$0xff] }
 0x376   : > { %5418 = vst [vmem:[%s7938_s11 + $0xe0] sm:$0xff] %v5289_v10   ;;  %v4013_v32 = vadd.f32 %v8247_v17, %v3908_v4  ;;  %v3909_v28 = vmax.f32 %v8938_v21, %v3811_v1 }
 0x378   : > { %v4014_v27 = vadd.f32 %v8247_v17, %v3909_v28  ;;  %v4111_v38 = vmax.f32 %v4013_v32, 0.0  ;;  %v8952_v32 = vld [vmem:[#allocation83_spill] sm:$0xff] }
 0x379   : > { %v2686_v48 = vpop.f32.mrb[60].mxu0  ;;  %v3503_v49 = vpop.f32.mrb[60].mxu1  ;;  %v8953_v23 = vmax.f32 %v8951_v31, %v8952_v32 }
 0x37a   : > { %v4112_v62 = vmax.f32 %v4014_v27, 0.0  ;;  %v3812_v54 = vmax.f32 %v2686_v48, %v3503_v49  ;;  %v6229_v19 = vpop.f32.mrb[61].mxu0  ;;  %v6441_v18 = vpop.f32.mrb[61].mxu1  ;;  %v8954_v49 = vld [vmem:[#allocation84_spill] sm:$0xff] }
 0x37b   : > { %v2689_v22 = vpop.f32.mrb[62].mxu0  ;;  %v3506_v40 = vpop.f32.mrb[62].mxu1 }
 0x37c   : > { %v5294_v41 = vpack.c.bf16 %v4112_v62, %v4111_v38  ;;  %v3910_v7 = vmax.f32 %v8941_v46, %v3812_v54  ;;  %v3813_v8 = vmax.f32 %v2689_v22, %v3506_v40  ;;  %v6230_v3 = vpop.f32.mrb[63].mxu0  ;;  %v6442_v55 = vpop.f32.mrb[63].mxu1  ;;  %v8955_v38 = vld [vmem:[#allocation85_spill] sm:$0xff] }
 0x37d   : > { %v8956_v62 = vmax.f32 %v8954_v49, %v8955_v38  ;;  %v8957_v55 = vld [vmem:[#allocation86_spill] sm:$0xff] }
 0x37e   : > { %5419 = vst [vmem:[%s7938_s11 + $0xe8] sm:$0xff] %v5294_v41   ;;  %v4015_v56 = vadd.f32 %v8247_v17, %v3910_v7  ;;  %v3911_v2 = vmax.f32 %v8944_v33, %v3813_v8 }
 0x380   : > { %v4016_v45 = vadd.f32 %v8247_v17, %v3911_v2  ;;  %v4113_v36 = vmax.f32 %v4015_v56, 0.0  ;;  %v8958_v56 = vld [vmem:[#allocation87_spill] sm:$0xff] }
 0x381   : > { %v2694_v5 = vpop.f32.mrb[64].mxu0  ;;  %v3511_v29 = vpop.f32.mrb[64].mxu1  ;;  %v8959_v34 = vmax.f32 %v8957_v55, %v8958_v56 }
 0x382   : > { %v4114_v37 = vmax.f32 %v4016_v45, 0.0  ;;  %v3814_v14 = vmax.f32 %v2694_v5, %v3511_v29  ;;  %v6233_v26 = vpop.f32.mrb[65].mxu0  ;;  %v6445_v9 = vpop.f32.mrb[65].mxu1  ;;  %v8960_v29 = vld [vmem:[#allocation88_spill] sm:$0xff] }
 0x383   : > { %v2697_v63 = vpop.f32.mrb[66].mxu0  ;;  %v3514_v16 = vpop.f32.mrb[66].mxu1 }
 0x384   : > { %v5299_v53 = vpack.c.bf16 %v4114_v37, %v4113_v36  ;;  %v3912_v51 = vmax.f32 %v8947_v47, %v3814_v14  ;;  %v3815_v60 = vmax.f32 %v2697_v63, %v3514_v16  ;;  %v6234_v61 = vpop.f32.mrb[67].mxu0  ;;  %v6446_v43 = vpop.f32.mrb[67].mxu1  ;;  %v8961_v36 = vld [vmem:[#allocation89_spill] sm:$0xff] }
 0x385   : > { %v8962_v37 = vmax.f32 %v8960_v29, %v8961_v36  ;;  %v8963_v43 = vld [vmem:[#allocation90_spill] sm:$0xff] }
 0x386   : > { %5420 = vst [vmem:[%s7938_s11 + $0xf0] sm:$0xff] %v5299_v53   ;;  %v4017_v44 = vadd.f32 %v8247_v17, %v3912_v51  ;;  %v3913_v52 = vmax.f32 %v8950_v58, %v3815_v60 }
 0x388   : > { %v4018_v6 = vadd.f32 %v8247_v17, %v3913_v52  ;;  %v4115_v13 = vmax.f32 %v4017_v44, 0.0  ;;  %v8964_v44 = vld [vmem:[#allocation91_spill] sm:$0xff] }
 0x389   : > { %v2702_v59 = vpop.f32.mrb[68].mxu0  ;;  %v3519_v12 = vpop.f32.mrb[68].mxu1  ;;  %v8965_v25 = vmax.f32 %v8963_v43, %v8964_v44 }
 0x38a   : > { %v4116_v10 = vmax.f32 %v4018_v6, 0.0  ;;  %v3816_v11 = vmax.f32 %v2702_v59, %v3519_v12  ;;  %v6237_v50 = vpop.f32.mrb[69].mxu0  ;;  %v6449_v42 = vpop.f32.mrb[69].mxu1  ;;  %v8966_v12 = vld [vmem:[#allocation92_spill] sm:$0xff] }
 0x38b   : > { %v2705_v4 = vpop.f32.mrb[70].mxu0  ;;  %v3522_v1 = vpop.f32.mrb[70].mxu1 }
 0x38c   : > { %v5304_v15 = vpack.c.bf16 %v4116_v10, %v4115_v13  ;;  %v3914_v57 = vmax.f32 %v8953_v23, %v3816_v11  ;;  %v3817_v21 = vmax.f32 %v2705_v4, %v3522_v1  ;;  %v6238_v28 = vpop.f32.mrb[71].mxu0  ;;  %v6450_v27 = vpop.f32.mrb[71].mxu1  ;;  %v8967_v13 = vld [vmem:[#allocation93_spill] sm:$0xff] }
 0x38d   : > { %v8968_v10 = vmax.f32 %v8966_v12, %v8967_v13  ;;  %v8969_v27 = vld [vmem:[#allocation94_spill] sm:$0xff] }
 0x38e   : > { %5421 = vst [vmem:[%s7938_s11 + $0xf8] sm:$0xff] %v5304_v15   ;;  %v4019_v48 = vadd.f32 %v8247_v17, %v3914_v57  ;;  %v3915_v54 = vmax.f32 %v8956_v62, %v3817_v21 }
 0x390   : > { %v4020_v19 = vadd.f32 %v8247_v17, %v3915_v54  ;;  %v4117_v40 = vmax.f32 %v4019_v48, 0.0  ;;  %v8970_v48 = vld [vmem:[#allocation95_spill] sm:$0xff] }
 0x391   : > { %v2710_v18 = vpop.f32.mrb[72].mxu0  ;;  %v3527_v22 = vpop.f32.mrb[72].mxu1  ;;  %v8971_v49 = vmax.f32 %v8969_v27, %v8970_v48 }
 0x392   : > { %v4118_v41 = vmax.f32 %v4020_v19, 0.0  ;;  %v3818_v20 = vmax.f32 %v2710_v18, %v3527_v22  ;;  %v6241_v39 = vpop.f32.mrb[73].mxu0  ;;  %v6453_v46 = vpop.f32.mrb[73].mxu1  ;;  %v8972_v22 = vld [vmem:[#allocation96_spill] sm:$0xff] }
 0x393   : > { %v2713_v7 = vpop.f32.mrb[74].mxu0  ;;  %v3530_v8 = vpop.f32.mrb[74].mxu1 }
 0x394   : > { %v5309_v3 = vpack.c.bf16 %v4118_v41, %v4117_v40  ;;  %v3916_v35 = vmax.f32 %v8959_v34, %v3818_v20  ;;  %v3819_v33 = vmax.f32 %v2713_v7, %v3530_v8  ;;  %v6242_v2 = vpop.f32.mrb[75].mxu0  ;;  %v6454_v45 = vpop.f32.mrb[75].mxu1  ;;  %v8973_v40 = vld [vmem:[#allocation97_spill] sm:$0xff] }
 0x395   : > { %v8974_v41 = vmax.f32 %v8972_v22, %v8973_v40  ;;  %v8975_v45 = vld [vmem:[#allocation98_spill] sm:$0xff] }
 0x396   : > { %5422 = vst [vmem:[%s7938_s11 + $0x100] sm:$0xff] %v5309_v3   ;;  %v4021_v5 = vadd.f32 %v8247_v17, %v3916_v35  ;;  %v3917_v14 = vmax.f32 %v8962_v37, %v3819_v33 }
 0x398   : > { %v4022_v26 = vadd.f32 %v8247_v17, %v3917_v14  ;;  %v4119_v16 = vmax.f32 %v4021_v5, 0.0  ;;  %v8976_v5 = vld [vmem:[#allocation99_spill] sm:$0xff] }
 0x399   : > { %v2718_v9 = vpop.f32.mrb[76].mxu0  ;;  %v3535_v63 = vpop.f32.mrb[76].mxu1  ;;  %v8977_v29 = vmax.f32 %v8975_v45, %v8976_v5 }
 0x39a   : > { %v4120_v53 = vmax.f32 %v4022_v26, 0.0  ;;  %v3820_v0 = vmax.f32 %v2718_v9, %v3535_v63  ;;  %v6245_v24 = vpop.f32.mrb[77].mxu0  ;;  %v6457_v47 = vpop.f32.mrb[77].mxu1  ;;  %v8978_v63 = vld [vmem:[#allocation100_spill] sm:$0xff] }
 0x39b   : > { %v2721_v51 = vpop.f32.mrb[78].mxu0  ;;  %v3538_v60 = vpop.f32.mrb[78].mxu1 }
 0x39c   : > { %v5314_v61 = vpack.c.bf16 %v4120_v53, %v4119_v16  ;;  %v3918_v30 = vmax.f32 %v8965_v25, %v3820_v0  ;;  %v3821_v58 = vmax.f32 %v2721_v51, %v3538_v60  ;;  %v6246_v52 = vpop.f32.mrb[79].mxu0  ;;  %v6458_v6 = vpop.f32.mrb[79].mxu1  ;;  %v8979_v16 = vld [vmem:[#allocation101_spill] sm:$0xff] }
 0x39d   : > { %v8980_v53 = vmax.f32 %v8978_v63, %v8979_v16  ;;  %v8981_v6 = vld [vmem:[#allocation102_spill] sm:$0xff] }
 0x39e   : > { %5423 = vst [vmem:[%s7938_s11 + $0x108] sm:$0xff] %v5314_v61   ;;  %v4023_v59 = vadd.f32 %v8247_v17, %v3918_v30  ;;  %v3919_v11 = vmax.f32 %v8968_v10, %v3821_v58 }
 0x3a0   : > { %v4024_v50 = vadd.f32 %v8247_v17, %v3919_v11  ;;  %v4121_v1 = vmax.f32 %v4023_v59, 0.0  ;;  %v8982_v59 = vld [vmem:[#allocation103_spill] sm:$0xff] }
 0x3a1   : > { %v2726_v42 = vpop.f32.mrb[80].mxu0  ;;  %v3543_v4 = vpop.f32.mrb[80].mxu1  ;;  %v8983_v12 = vmax.f32 %v8981_v6, %v8982_v59 }
 0x3a2   : > { %v4122_v15 = vmax.f32 %v4024_v50, 0.0  ;;  %v3822_v31 = vmax.f32 %v2726_v42, %v3543_v4  ;;  %v6249_v32 = vpop.f32.mrb[81].mxu0  ;;  %v6461_v23 = vpop.f32.mrb[81].mxu1  ;;  %v8984_v4 = vld [vmem:[#allocation104_spill] sm:$0xff] }
 0x3a3   : > { %v2729_v57 = vpop.f32.mrb[82].mxu0  ;;  %v3546_v21 = vpop.f32.mrb[82].mxu1 }
 0x3a4   : > { %v5319_v28 = vpack.c.bf16 %v4122_v15, %v4121_v1  ;;  %v3920_v38 = vmax.f32 %v8971_v49, %v3822_v31  ;;  %v3823_v62 = vmax.f32 %v2729_v57, %v3546_v21  ;;  %v6250_v54 = vpop.f32.mrb[83].mxu0  ;;  %v6462_v19 = vpop.f32.mrb[83].mxu1  ;;  %v8985_v1 = vld [vmem:[#allocation105_spill] sm:$0xff] }
 0x3a5   : > { %v8986_v15 = vmax.f32 %v8984_v4, %v8985_v1  ;;  %v8987_v19 = vld [vmem:[#allocation106_spill] sm:$0xff] }
 0x3a6   : > { %5424 = vst [vmem:[%s7938_s11 + $0x110] sm:$0xff] %v5319_v28   ;;  %v4025_v18 = vadd.f32 %v8247_v17, %v3920_v38  ;;  %v3921_v20 = vmax.f32 %v8974_v41, %v3823_v62 }
 0x3a8   : > { %v4026_v39 = vadd.f32 %v8247_v17, %v3921_v20  ;;  %v4123_v8 = vmax.f32 %v4025_v18, 0.0  ;;  %v8988_v18 = vld [vmem:[#allocation107_spill] sm:$0xff] }
 0x3a9   : > { %v2734_v46 = vpop.f32.mrb[84].mxu0  ;;  %v3551_v7 = vpop.f32.mrb[84].mxu1  ;;  %v8989_v22 = vmax.f32 %v8987_v19, %v8988_v18 }
 0x3aa   : > { %v4124_v3 = vmax.f32 %v4026_v39, 0.0  ;;  %v3824_v55 = vmax.f32 %v2734_v46, %v3551_v7  ;;  %v6253_v56 = vpop.f32.mrb[85].mxu0  ;;  %v6465_v34 = vpop.f32.mrb[85].mxu1  ;;  %v8990_v7 = vld [vmem:[#allocation108_spill] sm:$0xff] }
 0x3ab   : > { %v2737_v35 = vpop.f32.mrb[86].mxu0  ;;  %v3554_v33 = vpop.f32.mrb[86].mxu1 }
 0x3ac   : > { %v5324_v2 = vpack.c.bf16 %v4124_v3, %v4123_v8  ;;  %v3922_v36 = vmax.f32 %v8977_v29, %v3824_v55  ;;  %v3825_v37 = vmax.f32 %v2737_v35, %v3554_v33  ;;  %v6254_v14 = vpop.f32.mrb[87].mxu0  ;;  %v6466_v26 = vpop.f32.mrb[87].mxu1  ;;  %v8991_v8 = vld [vmem:[#allocation109_spill] sm:$0xff] }
 0x3ad   : > { %v8992_v3 = vmax.f32 %v8990_v7, %v8991_v8  ;;  %v8993_v26 = vld [vmem:[#allocation110_spill] sm:$0xff] }
 0x3ae   : > { %5425 = vst [vmem:[%s7938_s11 + $0x118] sm:$0xff] %v5324_v2   ;;  %v4027_v9 = vadd.f32 %v8247_v17, %v3922_v36  ;;  %v3923_v0 = vmax.f32 %v8980_v53, %v3825_v37 }
 0x3b0   : > { %v4028_v24 = vadd.f32 %v8247_v17, %v3923_v0  ;;  %v4125_v60 = vmax.f32 %v4027_v9, 0.0  ;;  %v8994_v9 = vld [vmem:[#allocation111_spill] sm:$0xff] }
 0x3b1   : > { %v2742_v47 = vpop.f32.mrb[88].mxu0  ;;  %v3559_v51 = vpop.f32.mrb[88].mxu1  ;;  %v8995_v63 = vmax.f32 %v8993_v26, %v8994_v9 }
 0x3b2   : > { %v4126_v61 = vmax.f32 %v4028_v24, 0.0  ;;  %v3826_v43 = vmax.f32 %v2742_v47, %v3559_v51  ;;  %v6257_v44 = vpop.f32.mrb[89].mxu0  ;;  %v6469_v25 = vpop.f32.mrb[89].mxu1  ;;  %v8996_v51 = vld [vmem:[#allocation112_spill] sm:$0xff] }
 0x3b3   : > { %v2745_v30 = vpop.f32.mrb[90].mxu0  ;;  %v3562_v58 = vpop.f32.mrb[90].mxu1 }
 0x3b4   : > { %v5329_v52 = vpack.c.bf16 %v4126_v61, %v4125_v60  ;;  %v3924_v13 = vmax.f32 %v8983_v12, %v3826_v43  ;;  %v3827_v10 = vmax.f32 %v2745_v30, %v3562_v58  ;;  %v6258_v11 = vpop.f32.mrb[91].mxu0  ;;  %v6470_v50 = vpop.f32.mrb[91].mxu1  ;;  %v8997_v60 = vld [vmem:[#allocation113_spill] sm:$0xff] }
 0x3b5   : > { %v8998_v61 = vmax.f32 %v8996_v51, %v8997_v60  ;;  %v8999_v50 = vld [vmem:[#allocation114_spill] sm:$0xff] }
 0x3b6   : > { %5426 = vst [vmem:[%s7938_s11 + $0x120] sm:$0xff] %v5329_v52   ;;  %v4029_v42 = vadd.f32 %v8247_v17, %v3924_v13  ;;  %v3925_v31 = vmax.f32 %v8986_v15, %v3827_v10 }
 0x3b8   : > { %v4030_v32 = vadd.f32 %v8247_v17, %v3925_v31  ;;  %v4127_v21 = vmax.f32 %v4029_v42, 0.0  ;;  %v9000_v42 = vld [vmem:[#allocation115_spill] sm:$0xff] }
 0x3b9   : > { %v2750_v23 = vpop.f32.mrb[92].mxu0  ;;  %v3567_v57 = vpop.f32.mrb[92].mxu1  ;;  %v9001_v4 = vmax.f32 %v8999_v50, %v9000_v42 }
 0x3ba   : > { %v4128_v28 = vmax.f32 %v4030_v32, 0.0  ;;  %v3828_v27 = vmax.f32 %v2750_v23, %v3567_v57  ;;  %v6261_v48 = vpop.f32.mrb[93].mxu0  ;;  %v6473_v49 = vpop.f32.mrb[93].mxu1  ;;  %v9002_v57 = vld [vmem:[#allocation116_spill] sm:$0xff] }
 0x3bb   : > { %v2753_v38 = vpop.f32.mrb[94].mxu0  ;;  %v3570_v62 = vpop.f32.mrb[94].mxu1 }
 0x3bc   : > { %v5334_v54 = vpack.c.bf16 %v4128_v28, %v4127_v21  ;;  %v3926_v40 = vmax.f32 %v8989_v22, %v3828_v27  ;;  %v3829_v41 = vmax.f32 %v2753_v38, %v3570_v62  ;;  %v6262_v20 = vpop.f32.mrb[95].mxu0  ;;  %v6474_v39 = vpop.f32.mrb[95].mxu1  ;;  %v9003_v21 = vld [vmem:[#allocation117_spill] sm:$0xff] }
 0x3bd   : > { %v9004_v28 = vmax.f32 %v9002_v57, %v9003_v21  ;;  %v9005_v39 = vld [vmem:[#allocation118_spill] sm:$0xff] }
 0x3be   : > { %5427 = vst [vmem:[%s7938_s11 + $0x128] sm:$0xff] %v5334_v54   ;;  %v4031_v46 = vadd.f32 %v8247_v17, %v3926_v40  ;;  %v3927_v55 = vmax.f32 %v8992_v3, %v3829_v41 }
 0x3c0   : > { %v4032_v56 = vadd.f32 %v8247_v17, %v3927_v55  ;;  %v4129_v33 = vmax.f32 %v4031_v46, 0.0  ;;  %v9006_v46 = vld [vmem:[#allocation119_spill] sm:$0xff] }
 0x3c1   : > { %v2758_v34 = vpop.f32.mrb[96].mxu0  ;;  %v3575_v35 = vpop.f32.mrb[96].mxu1  ;;  %v9007_v7 = vmax.f32 %v9005_v39, %v9006_v46 }
 0x3c2   : > { %v4130_v2 = vmax.f32 %v4032_v56, 0.0  ;;  %v3830_v45 = vmax.f32 %v2758_v34, %v3575_v35  ;;  %v6265_v5 = vpop.f32.mrb[97].mxu0  ;;  %v6477_v29 = vpop.f32.mrb[97].mxu1  ;;  %v9008_v35 = vld [vmem:[#allocation120_spill] sm:$0xff] }
 0x3c3   : > { %v2761_v36 = vpop.f32.mrb[98].mxu0  ;;  %v3578_v37 = vpop.f32.mrb[98].mxu1 }
 0x3c4   : > { %v5339_v14 = vpack.c.bf16 %v4130_v2, %v4129_v33  ;;  %v3928_v16 = vmax.f32 %v8995_v63, %v3830_v45  ;;  %v3831_v53 = vmax.f32 %v2761_v36, %v3578_v37  ;;  %v6266_v0 = vpop.f32.mrb[99].mxu0  ;;  %v6478_v24 = vpop.f32.mrb[99].mxu1  ;;  %v9009_v33 = vld [vmem:[#allocation121_spill] sm:$0xff] }
 0x3c5   : > { %v9010_v2 = vmax.f32 %v9008_v35, %v9009_v33  ;;  %v9011_v24 = vld [vmem:[#allocation122_spill] sm:$0xff] }
 0x3c6   : > { %5428 = vst [vmem:[%s7938_s11 + $0x130] sm:$0xff] %v5339_v14   ;;  %v4033_v47 = vadd.f32 %v8247_v17, %v3928_v16  ;;  %v3929_v43 = vmax.f32 %v8998_v61, %v3831_v53 }
 0x3c8   : > { %v4034_v44 = vadd.f32 %v8247_v17, %v3929_v43  ;;  %v4131_v58 = vmax.f32 %v4033_v47, 0.0  ;;  %v9012_v47 = vld [vmem:[#allocation123_spill] sm:$0xff] }
 0x3c9   : > { %v2766_v25 = vpop.f32.mrb[100].mxu0  ;;  %v3583_v30 = vpop.f32.mrb[100].mxu1  ;;  %v9013_v51 = vmax.f32 %v9011_v24, %v9012_v47 }
 0x3ca   : > { %v4132_v52 = vmax.f32 %v4034_v44, 0.0  ;;  %v3832_v6 = vmax.f32 %v2766_v25, %v3583_v30  ;;  %v6269_v59 = vpop.f32.mrb[101].mxu0  ;;  %v6481_v12 = vpop.f32.mrb[101].mxu1  ;;  %v9014_v30 = vld [vmem:[#allocation124_spill] sm:$0xff] }
 0x3cb   : > { %v2769_v13 = vpop.f32.mrb[102].mxu0  ;;  %v3586_v10 = vpop.f32.mrb[102].mxu1 }
 0x3cc   : > { %v5344_v11 = vpack.c.bf16 %v4132_v52, %v4131_v58  ;;  %v3930_v1 = vmax.f32 %v9001_v4, %v3832_v6  ;;  %v3833_v15 = vmax.f32 %v2769_v13, %v3586_v10  ;;  %v6270_v31 = vpop.f32.mrb[103].mxu0  ;;  %v6482_v32 = vpop.f32.mrb[103].mxu1  ;;  %v9015_v58 = vld [vmem:[#allocation125_spill] sm:$0xff] }
 0x3cd   : > { %v9016_v52 = vmax.f32 %v9014_v30, %v9015_v58  ;;  %v9017_v32 = vld [vmem:[#allocation126_spill] sm:$0xff] }
 0x3ce   : > { %5429 = vst [vmem:[%s7938_s11 + $0x138] sm:$0xff] %v5344_v11   ;;  %v4035_v23 = vadd.f32 %v8247_v17, %v3930_v1  ;;  %v3931_v27 = vmax.f32 %v9004_v28, %v3833_v15 }
 0x3d0   : > { %v4036_v48 = vadd.f32 %v8247_v17, %v3931_v27  ;;  %v4133_v62 = vmax.f32 %v4035_v23, 0.0  ;;  %v9018_v23 = vld [vmem:[#allocation127_spill] sm:$0xff] }
 0x3d1   : > { %v2774_v49 = vpop.f32.mrb[104].mxu0  ;;  %v3591_v38 = vpop.f32.mrb[104].mxu1  ;;  %v9019_v57 = vmax.f32 %v9017_v32, %v9018_v23 }
 0x3d2   : > { %v4134_v54 = vmax.f32 %v4036_v48, 0.0  ;;  %v3834_v19 = vmax.f32 %v2774_v49, %v3591_v38  ;;  %v6273_v18 = vpop.f32.mrb[105].mxu0  ;;  %v6485_v22 = vpop.f32.mrb[105].mxu1  ;;  %v9020_v38 = vld [vmem:[#allocation128_spill] sm:$0xff] }
 0x3d3   : > { %v2777_v40 = vpop.f32.mrb[106].mxu0  ;;  %v3594_v41 = vpop.f32.mrb[106].mxu1 }
 0x3d4   : > { %v5349_v20 = vpack.c.bf16 %v4134_v54, %v4133_v62  ;;  %v3932_v8 = vmax.f32 %v9007_v7, %v3834_v19  ;;  %v3835_v3 = vmax.f32 %v2777_v40, %v3594_v41  ;;  %v6274_v55 = vpop.f32.mrb[107].mxu0  ;;  %v6486_v56 = vpop.f32.mrb[107].mxu1  ;;  %v9021_v62 = vld [vmem:[#allocation129_spill] sm:$0xff] }
 0x3d5   : > { %v9022_v54 = vmax.f32 %v9020_v38, %v9021_v62  ;;  %v9023_v56 = vld [vmem:[#allocation130_spill] sm:$0xff] }
 0x3d6   : > { %5430 = vst [vmem:[%s7938_s11 + $0x140] sm:$0xff] %v5349_v20   ;;  %v4037_v34 = vadd.f32 %v8247_v17, %v3932_v8  ;;  %v3933_v45 = vmax.f32 %v9010_v2, %v3835_v3 }
 0x3d8   : > { %v4038_v5 = vadd.f32 %v8247_v17, %v3933_v45  ;;  %v4135_v37 = vmax.f32 %v4037_v34, 0.0  ;;  %v9024_v34 = vld [vmem:[#allocation131_spill] sm:$0xff] }
 0x3d9   : > { %v2782_v29 = vpop.f32.mrb[108].mxu0  ;;  %v3599_v36 = vpop.f32.mrb[108].mxu1  ;;  %v9025_v35 = vmax.f32 %v9023_v56, %v9024_v34 }
 0x3da   : > { %v4136_v14 = vmax.f32 %v4038_v5, 0.0  ;;  %v3836_v26 = vmax.f32 %v2782_v29, %v3599_v36  ;;  %v6277_v9 = vpop.f32.mrb[109].mxu0  ;;  %v6489_v63 = vpop.f32.mrb[109].mxu1  ;;  %v9026_v36 = vld [vmem:[#allocation132_spill] sm:$0xff] }
 0x3db   : > { %v2785_v16 = vpop.f32.mrb[110].mxu0  ;;  %v3602_v53 = vpop.f32.mrb[110].mxu1 }
 0x3dc   : > { %v5354_v0 = vpack.c.bf16 %v4136_v14, %v4135_v37  ;;  %v3934_v60 = vmax.f32 %v9013_v51, %v3836_v26  ;;  %v3837_v61 = vmax.f32 %v2785_v16, %v3602_v53  ;;  %v6278_v43 = vpop.f32.mrb[111].mxu0  ;;  %v6490_v44 = vpop.f32.mrb[111].mxu1  ;;  %v9027_v37 = vld [vmem:[#allocation133_spill] sm:$0xff] }
 0x3dd   : > { %v9028_v14 = vmax.f32 %v9026_v36, %v9027_v37  ;;  %v9029_v44 = vld [vmem:[#allocation134_spill] sm:$0xff] }
 0x3de   : > { %5431 = vst [vmem:[%s7938_s11 + $0x148] sm:$0xff] %v5354_v0   ;;  %v4039_v25 = vadd.f32 %v8247_v17, %v3934_v60  ;;  %v3935_v6 = vmax.f32 %v9016_v52, %v3837_v61 }
 0x3e0   : > { %v4040_v59 = vadd.f32 %v8247_v17, %v3935_v6  ;;  %v4137_v10 = vmax.f32 %v4039_v25, 0.0  ;;  %v9030_v25 = vld [vmem:[#allocation135_spill] sm:$0xff] }
 0x3e1   : > { %v2790_v12 = vpop.f32.mrb[112].mxu0  ;;  %v3607_v13 = vpop.f32.mrb[112].mxu1  ;;  %v9031_v30 = vmax.f32 %v9029_v44, %v9030_v25 }
 0x3e2   : > { %v4138_v11 = vmax.f32 %v4040_v59, 0.0  ;;  %v3838_v50 = vmax.f32 %v2790_v12, %v3607_v13  ;;  %v6281_v42 = vpop.f32.mrb[113].mxu0  ;;  %v6493_v4 = vpop.f32.mrb[113].mxu1  ;;  %v9032_v13 = vld [vmem:[#allocation136_spill] sm:$0xff] }
 0x3e3   : > { %v2793_v1 = vpop.f32.mrb[114].mxu0  ;;  %v3610_v15 = vpop.f32.mrb[114].mxu1 }
 0x3e4   : > { %v5359_v31 = vpack.c.bf16 %v4138_v11, %v4137_v10  ;;  %v3936_v21 = vmax.f32 %v9019_v57, %v3838_v50  ;;  %v3839_v28 = vmax.f32 %v2793_v1, %v3610_v15  ;;  %v6282_v27 = vpop.f32.mrb[115].mxu0  ;;  %v6494_v48 = vpop.f32.mrb[115].mxu1  ;;  %v9033_v10 = vld [vmem:[#allocation137_spill] sm:$0xff] }
 0x3e5   : > { %v9034_v11 = vmax.f32 %v9032_v13, %v9033_v10  ;;  %v9035_v48 = vld [vmem:[#allocation138_spill] sm:$0xff] }
 0x3e6   : > { %5432 = vst [vmem:[%s7938_s11 + $0x150] sm:$0xff] %v5359_v31   ;;  %v4041_v49 = vadd.f32 %v8247_v17, %v3936_v21  ;;  %v3937_v19 = vmax.f32 %v9022_v54, %v3839_v28 }
 0x3e8   : > { %v4042_v18 = vadd.f32 %v8247_v17, %v3937_v19  ;;  %v4139_v41 = vmax.f32 %v4041_v49, 0.0  ;;  %v9036_v49 = vld [vmem:[#allocation139_spill] sm:$0xff] }
 0x3e9   : > { %v2798_v22 = vpop.f32.mrb[116].mxu0  ;;  %v3615_v40 = vpop.f32.mrb[116].mxu1  ;;  %v9037_v38 = vmax.f32 %v9035_v48, %v9036_v49 }
 0x3ea   : > { %v4140_v20 = vmax.f32 %v4042_v18, 0.0  ;;  %v3840_v39 = vmax.f32 %v2798_v22, %v3615_v40  ;;  %v6285_v46 = vpop.f32.mrb[117].mxu0  ;;  %v6497_v7 = vpop.f32.mrb[117].mxu1  ;;  %v9038_v40 = vld [vmem:[#allocation140_spill] sm:$0xff] }
 0x3eb   : > { %v2801_v8 = vpop.f32.mrb[118].mxu0  ;;  %v3618_v3 = vpop.f32.mrb[118].mxu1 }
 0x3ec   : > { %v5364_v55 = vpack.c.bf16 %v4140_v20, %v4139_v41  ;;  %v3938_v33 = vmax.f32 %v9025_v35, %v3840_v39  ;;  %v3841_v2 = vmax.f32 %v2801_v8, %v3618_v3  ;;  %v6286_v45 = vpop.f32.mrb[119].mxu0  ;;  %v6498_v5 = vpop.f32.mrb[119].mxu1  ;;  %v9039_v41 = vld [vmem:[#allocation141_spill] sm:$0xff] }
 0x3ed   : > { %v9040_v20 = vmax.f32 %v9038_v40, %v9039_v41  ;;  %v9041_v5 = vld [vmem:[#allocation142_spill] sm:$0xff] }
 0x3ee   : > { %5433 = vst [vmem:[%s7938_s11 + $0x158] sm:$0xff] %v5364_v55   ;;  %v4043_v29 = vadd.f32 %v8247_v17, %v3938_v33  ;;  %v3939_v26 = vmax.f32 %v9028_v14, %v3841_v2 }
 0x3f0   : > { %v4044_v9 = vadd.f32 %v8247_v17, %v3939_v26  ;;  %v4141_v53 = vmax.f32 %v4043_v29, 0.0  ;;  %v9042_v29 = vld [vmem:[#allocation143_spill] sm:$0xff] }
 0x3f1   : > { %v2806_v63 = vpop.f32.mrb[120].mxu0  ;;  %v3623_v16 = vpop.f32.mrb[120].mxu1  ;;  %v9043_v36 = vmax.f32 %v9041_v5, %v9042_v29 }
 0x3f2   : > { %v4142_v0 = vmax.f32 %v4044_v9, 0.0  ;;  %v3842_v24 = vmax.f32 %v2806_v63, %v3623_v16  ;;  %v6289_v47 = vpop.f32.mrb[121].mxu0  ;;  %v6501_v51 = vpop.f32.mrb[121].mxu1  ;;  %v9044_v16 = vld [vmem:[#allocation144_spill] sm:$0xff] }
 0x3f3   : > { %v2809_v60 = vpop.f32.mrb[122].mxu0  ;;  %v3626_v61 = vpop.f32.mrb[122].mxu1 }
 0x3f4   : > { %v5369_v43 = vpack.c.bf16 %v4142_v0, %v4141_v53  ;;  %v3940_v58 = vmax.f32 %v9031_v30, %v3842_v24  ;;  %v3843_v52 = vmax.f32 %v2809_v60, %v3626_v61  ;;  %v6290_v6 = vpop.f32.mrb[123].mxu0  ;;  %v6502_v59 = vpop.f32.mrb[123].mxu1  ;;  %v9045_v53 = vld [vmem:[#allocation145_spill] sm:$0xff] }
 0x3f5   : > { %v9046_v0 = vmax.f32 %v9044_v16, %v9045_v53  ;;  %v9047_v59 = vld [vmem:[#allocation146_spill] sm:$0xff] }
 0x3f6   : > { %5434 = vst [vmem:[%s7938_s11 + $0x160] sm:$0xff] %v5369_v43   ;;  %v4045_v12 = vadd.f32 %v8247_v17, %v3940_v58  ;;  %v3941_v50 = vmax.f32 %v9034_v11, %v3843_v52 }
 0x3f8   : > { %v4046_v42 = vadd.f32 %v8247_v17, %v3941_v50  ;;  %v4143_v15 = vmax.f32 %v4045_v12, 0.0  ;;  %v9048_v12 = vld [vmem:[#allocation147_spill] sm:$0xff] }
 0x3f9   : > { %v2814_v4 = vpop.f32.mrb[124].mxu0  ;;  %v3631_v1 = vpop.f32.mrb[124].mxu1  ;;  %v9049_v13 = vmax.f32 %v9047_v59, %v9048_v12 }
 0x3fa   : > { %v4144_v31 = vmax.f32 %v4046_v42, 0.0  ;;  %v3844_v32 = vmax.f32 %v2814_v4, %v3631_v1  ;;  %v6293_v23 = vpop.f32.mrb[125].mxu0  ;;  %v6505_v57 = vpop.f32.mrb[125].mxu1  ;;  %v9050_v1 = vld [vmem:[#allocation148_spill] sm:$0xff] }
 0x3fb   : > { %v2817_v21 = vpop.f32.mrb[126].mxu0  ;;  %v3634_v28 = vpop.f32.mrb[126].mxu1 }
 0x3fc   : > { %v5374_v27 = vpack.c.bf16 %v4144_v31, %v4143_v15  ;;  %v3942_v62 = vmax.f32 %v9037_v38, %v3844_v32  ;;  %v3845_v54 = vmax.f32 %v2817_v21, %v3634_v28  ;;  %v6294_v19 = vpop.f32.mrb[127].mxu0  ;;  %v6506_v18 = vpop.f32.mrb[127].mxu1  ;;  %v9051_v15 = vld [vmem:[#allocation149_spill] sm:$0xff] }
 0x3fd   : > { %v9052_v31 = vmax.f32 %v9050_v1, %v9051_v15 }
 0x3fe   : > { %5435 = vst [vmem:[%s7938_s11 + $0x168] sm:$0xff] %v5374_v27   ;;  %v4047_v22 = vadd.f32 %v8247_v17, %v3942_v62  ;;  %v3943_v39 = vmax.f32 %v9040_v20, %v3845_v54 }
 0x400   : > { %v4048_v46 = vadd.f32 %v8247_v17, %v3943_v39  ;;  %v4145_v3 = vmax.f32 %v4047_v22, 0.0 }
 0x401   : > { %v2822_v7 = vpop.f32.mrb[128].mxu0  ;;  %v3639_v8 = vpop.f32.mrb[128].mxu1 }
 0x402   : > { %v4146_v55 = vmax.f32 %v4048_v46, 0.0  ;;  %v3846_v56 = vmax.f32 %v2822_v7, %v3639_v8  ;;  %v6297_v34 = vpop.f32.mrb[129].mxu0  ;;  %v6509_v35 = vpop.f32.mrb[129].mxu1 }
 0x403   : > { %v2825_v33 = vpop.f32.mrb[130].mxu0  ;;  %v3642_v2 = vpop.f32.mrb[130].mxu1 }
 0x404   : > { %v5379_v45 = vpack.c.bf16 %v4146_v55, %v4145_v3  ;;  %v3944_v37 = vmax.f32 %v9043_v36, %v3846_v56  ;;  %v3847_v14 = vmax.f32 %v2825_v33, %v3642_v2  ;;  %v6298_v26 = vpop.f32.mrb[131].mxu0  ;;  %v6510_v9 = vpop.f32.mrb[131].mxu1 }
 0x406   : > { %5436 = vst [vmem:[%s7938_s11 + $0x170] sm:$0xff] %v5379_v45   ;;  %v4049_v63 = vadd.f32 %v8247_v17, %v3944_v37  ;;  %v3945_v24 = vmax.f32 %v9046_v0, %v3847_v14 }
 0x408   : > { %v4050_v47 = vadd.f32 %v8247_v17, %v3945_v24  ;;  %v4147_v61 = vmax.f32 %v4049_v63, 0.0 }
 0x409   : > { %v2830_v51 = vpop.f32.mrb[132].mxu0  ;;  %v3647_v60 = vpop.f32.mrb[132].mxu1 }
 0x40a   : > { %v4148_v43 = vmax.f32 %v4050_v47, 0.0  ;;  %v3848_v44 = vmax.f32 %v2830_v51, %v3647_v60  ;;  %v6301_v25 = vpop.f32.mrb[133].mxu0  ;;  %v6513_v30 = vpop.f32.mrb[133].mxu1 }
 0x40b   : > { %v2833_v58 = vpop.f32.mrb[134].mxu0  ;;  %v3650_v52 = vpop.f32.mrb[134].mxu1 }
 0x40c   : > { %v5384_v6 = vpack.c.bf16 %v4148_v43, %v4147_v61  ;;  %v3946_v10 = vmax.f32 %v9049_v13, %v3848_v44  ;;  %v3849_v11 = vmax.f32 %v2833_v58, %v3650_v52  ;;  %v6302_v50 = vpop.f32.mrb[135].mxu0  ;;  %v6514_v42 = vpop.f32.mrb[135].mxu1 }
 0x40e   : > { %5437 = vst [vmem:[%s7938_s11 + $0x178] sm:$0xff] %v5384_v6   ;;  %v4051_v4 = vadd.f32 %v8247_v17, %v3946_v10  ;;  %v3947_v32 = vmax.f32 %v9052_v31, %v3849_v11 }
 0x410   : > { %v4052_v23 = vadd.f32 %v8247_v17, %v3947_v32  ;;  %v4149_v57 = vmax.f32 %v4051_v4, 0.0 }
 0x412   : > { %v4150_v21 = vmax.f32 %v4052_v23, 0.0 }
 0x414   : > { %v5389_v28 = vpack.c.bf16 %v4150_v21, %v4149_v57 }
 0x416   : > { %5438 = vst [vmem:[%s7938_s11 + $0x180] sm:$0xff] %v5389_v28  }
 0x417 PF: > { %s16_s21 = sadd.s32 1, %s6736_s21  }
 0x418   : > { %p13_p4 = scmp.ge.s32.totalorder %s16_s21, 4  }
 0x41a   :  { %15 = sbr.rel (!%p13_p4) target bundleno = 1 (0x1), region = 83 }

// kernel: net_forward.5
= control target key start
LH: loop header
LB: loop body
LE: loop exit
PB: predicated region body
PF: predicated region fallthrough
CT: control target
= control target key end

     0   :  { %v2668_v0 = vmov 0   ;;  %s3763_s4 = inlined_call_operand.vmem [shape: bf16[256,128], index: 4, kind: input, shape index: {}]   ;;  %s3764_s0 = inlined_call_operand.vmem [shape: bf16[288,256], index: 0, kind: input, shape index: {}]   ;;  %s3765_s1 = inlined_call_operand.vmem [shape: bf16[288,256], index: 1, kind: input, shape index: {}]   ;;  %s3766_s2 = inlined_call_operand.vmem [shape: bf16[288,256], index: 2, kind: input, shape index: {}]   ;;  %s3767_s3 = inlined_call_operand.vmem [shape: bf16[288,256], index: 3, kind: input, shape index: {}]   ;;  %s3768_s5 = inlined_call_operand.vmem [shape: f32[1,128], index: 5, kind: input, shape index: {}]   ;;  %s3769_s6 = inlined_call_operand.vmem [shape: bf16[288,128], index: 6, kind: output, shape index: {}]  }
   0x1   :  { %368 = vmatprep.subr.bf16.mxu0 %v2668_v0  ;;  %761 = vmatprep.subr.bf16.mxu1 %v2668_v0  ;;  %v2709_v1 = vld [vmem:[%s3763_s4] sm:$0xff]   ;;  %v2716_v2 = vld [vmem:[%s3763_s4 + $0x8] sm:$0xff]   ;;  %v2725_v3 = vld [vmem:[%s3763_s4 + $0x10] sm:$0xff]  }
   0x2   :  { %369 = vmatpush1.bf16.msra.mxu0 %v2709_v1  ;;  %762 = vmatpush1.bf16.msra.mxu1 %v2709_v1  ;;  %v2734_v4 = vld [vmem:[%s3763_s4 + $0x18] sm:$0xff]   ;;  %v2743_v5 = vld [vmem:[%s3763_s4 + $0x20] sm:$0xff]   ;;  %v2755_v7 = vld [vmem:[%s3763_s4 + $0x28] sm:$0xff]  }
   0x3   :  { %370 = vmatprep.subr.bf16.mxu0 %v2668_v0  ;;  %763 = vmatprep.subr.bf16.mxu1 %v2668_v0  ;;  %v2454_v6 = vld [vmem:[%s3764_s0 + $0x4] ss:$8 sps:$4 sm:$0xff]   ;;  %v2767_v9 = vld [vmem:[%s3763_s4 + $0x30] sm:$0xff]   ;;  %v2776_v10 = vld [vmem:[%s3763_s4 + $0x38] sm:$0xff]  }
   0x4   :  { %v2457_v8 = vld [vmem:[%s3765_s1 + $0x4] ss:$8 sps:$4 sm:$0xff]   ;;  %400 = vmatprep.mubr.bf16.mxu0 %v2454_v6  ;;  %v2803_v13 = vld [vmem:[%s3763_s4 + $0x50] sm:$0xff]   ;;  %v2812_v14 = vld [vmem:[%s3763_s4 + $0x58] sm:$0xff]  }
   0x5   :  { %793 = vmatprep.mubr.bf16.mxu1 %v2457_v8  ;;  %v2785_v11 = vld [vmem:[%s3763_s4 + $0x40] sm:$0xff]   ;;  %v2794_v12 = vld [vmem:[%s3763_s4 + $0x48] sm:$0xff]   ;;  %v2839_v17 = vld [vmem:[%s3763_s4 + $0x70] sm:$0xff]  }
   0x6   :  { %371 = vmatpush1.bf16.msra.mxu0 %v2716_v2  ;;  %764 = vmatpush1.bf16.msra.mxu1 %v2716_v2  ;;  %v2821_v15 = vld [vmem:[%s3763_s4 + $0x60] sm:$0xff]   ;;  %v2830_v16 = vld [vmem:[%s3763_s4 + $0x68] sm:$0xff]   ;;  %v2848_v18 = vld [vmem:[%s3763_s4 + $0x78] sm:$0xff]  }
   0x7   :  { %372 = vmatprep.subr.bf16.mxu0 %v2668_v0  ;;  %765 = vmatprep.subr.bf16.mxu1 %v2668_v0  ;;  %v2452_v19 = vld [vmem:[%s3764_s0] ss:$8 sps:$4 sm:$0xff]   ;;  %v2458_v21 = vld [vmem:[%s3764_s0 + $0x14] ss:$8 sps:$4 sm:$0xff]   ;;  %v2462_v23 = vld [vmem:[%s3764_s0 + $0x10] ss:$8 sps:$4 sm:$0xff]  }
   0x8   :  { %v2455_v20 = vld [vmem:[%s3765_s1] ss:$8 sps:$4 sm:$0xff]   ;;  %v2460_v22 = vld [vmem:[%s3765_s1 + $0x14] ss:$8 sps:$4 sm:$0xff]   ;;  %v2463_v24 = vld [vmem:[%s3765_s1 + $0x10] ss:$8 sps:$4 sm:$0xff]  }
   0x9   :  { %v2464_v25 = vld [vmem:[%s3764_s0 + $0x24] ss:$8 sps:$4 sm:$0xff]   ;;  %v2468_v27 = vld [vmem:[%s3764_s0 + $0x20] ss:$8 sps:$4 sm:$0xff]   ;;  %v2470_v29 = vld [vmem:[%s3764_s0 + $0x34] ss:$8 sps:$4 sm:$0xff]  }
   0xa   :  { %373 = vmatpush1.bf16.msra.mxu0 %v2725_v3  ;;  %766 = vmatpush1.bf16.msra.mxu1 %v2725_v3  ;;  %v2466_v26 = vld [vmem:[%s3765_s1 + $0x24] ss:$8 sps:$4 sm:$0xff]   ;;  %v2469_v28 = vld [vmem:[%s3765_s1 + $0x20] ss:$8 sps:$4 sm:$0xff]   ;;  %v2472_v30 = vld [vmem:[%s3765_s1 + $0x34] ss:$8 sps:$4 sm:$0xff]  }
   0xb   :  { %374 = vmatprep.subr.bf16.mxu0 %v2668_v0  ;;  %767 = vmatprep.subr.bf16.mxu1 %v2668_v0  ;;  %v2474_v31 = vld [vmem:[%s3764_s0 + $0x30] ss:$8 sps:$4 sm:$0xff]   ;;  %v2476_v33 = vld [vmem:[%s3764_s0 + $0x44] ss:$8 sps:$4 sm:$0xff]   ;;  %v2480_v35 = vld [vmem:[%s3764_s0 + $0x40] ss:$8 sps:$4 sm:$0xff]  }
   0xc   :  { %v2475_v32 = vld [vmem:[%s3765_s1 + $0x30] ss:$8 sps:$4 sm:$0xff]   ;;  %v2478_v34 = vld [vmem:[%s3765_s1 + $0x44] ss:$8 sps:$4 sm:$0xff]   ;;  %v2481_v36 = vld [vmem:[%s3765_s1 + $0x40] ss:$8 sps:$4 sm:$0xff]  }
   0xd   :  { %v2482_v37 = vld [vmem:[%s3764_s0 + $0x54] ss:$8 sps:$4 sm:$0xff]   ;;  %v2486_v39 = vld [vmem:[%s3764_s0 + $0x50] ss:$8 sps:$4 sm:$0xff]   ;;  %v2488_v41 = vld [vmem:[%s3764_s0 + $0x64] ss:$8 sps:$4 sm:$0xff]  }
   0xe   :  { %375 = vmatpush1.bf16.msra.mxu0 %v2734_v4  ;;  %768 = vmatpush1.bf16.msra.mxu1 %v2734_v4  ;;  %v2484_v38 = vld [vmem:[%s3765_s1 + $0x54] ss:$8 sps:$4 sm:$0xff]   ;;  %v2487_v40 = vld [vmem:[%s3765_s1 + $0x50] ss:$8 sps:$4 sm:$0xff]   ;;  %v2490_v42 = vld [vmem:[%s3765_s1 + $0x64] ss:$8 sps:$4 sm:$0xff]  }
   0xf   :  { %376 = vmatprep.subr.bf16.mxu0 %v2668_v0  ;;  %769 = vmatprep.subr.bf16.mxu1 %v2668_v0  ;;  %v2492_v43 = vld [vmem:[%s3764_s0 + $0x60] ss:$8 sps:$4 sm:$0xff]   ;;  %v2494_v45 = vld [vmem:[%s3764_s0 + $0x74] ss:$8 sps:$4 sm:$0xff]   ;;  %v2498_v47 = vld [vmem:[%s3764_s0 + $0x70] ss:$8 sps:$4 sm:$0xff]  }
  0x10   :  { %v2493_v44 = vld [vmem:[%s3765_s1 + $0x60] ss:$8 sps:$4 sm:$0xff]   ;;  %v2496_v46 = vld [vmem:[%s3765_s1 + $0x74] ss:$8 sps:$4 sm:$0xff]   ;;  %v2499_v48 = vld [vmem:[%s3765_s1 + $0x70] ss:$8 sps:$4 sm:$0xff]  }
  0x11   :  { %v2500_v49 = vld [vmem:[%s3764_s0 + $0x84] ss:$8 sps:$4 sm:$0xff]   ;;  %v2504_v51 = vld [vmem:[%s3764_s0 + $0x80] ss:$8 sps:$4 sm:$0xff]   ;;  %v2506_v53 = vld [vmem:[%s3764_s0 + $0x94] ss:$8 sps:$4 sm:$0xff]  }
  0x12   :  { %377 = vmatpush1.bf16.msra.mxu0 %v2743_v5  ;;  %770 = vmatpush1.bf16.msra.mxu1 %v2743_v5  ;;  %v2502_v50 = vld [vmem:[%s3765_s1 + $0x84] ss:$8 sps:$4 sm:$0xff]   ;;  %v2505_v52 = vld [vmem:[%s3765_s1 + $0x80] ss:$8 sps:$4 sm:$0xff]   ;;  %v2508_v54 = vld [vmem:[%s3765_s1 + $0x94] ss:$8 sps:$4 sm:$0xff]  }
  0x13   :  { %378 = vmatprep.subr.bf16.mxu0 %v2668_v0  ;;  %771 = vmatprep.subr.bf16.mxu1 %v2668_v0  ;;  %v2510_v55 = vld [vmem:[%s3764_s0 + $0x90] ss:$8 sps:$4 sm:$0xff]   ;;  %v2512_v57 = vld [vmem:[%s3764_s0 + $0xa4] ss:$8 sps:$4 sm:$0xff]   ;;  %v2516_v59 = vld [vmem:[%s3764_s0 + $0xa0] ss:$8 sps:$4 sm:$0xff]  }
  0x14   :  { %v2511_v56 = vld [vmem:[%s3765_s1 + $0x90] ss:$8 sps:$4 sm:$0xff]   ;;  %v2514_v58 = vld [vmem:[%s3765_s1 + $0xa4] ss:$8 sps:$4 sm:$0xff]   ;;  %v2517_v60 = vld [vmem:[%s3765_s1 + $0xa0] ss:$8 sps:$4 sm:$0xff]  }
  0x15   :  { %v2518_v61 = vld [vmem:[%s3764_s0 + $0xb4] ss:$8 sps:$4 sm:$0xff]   ;;  %v2522_v63 = vld [vmem:[%s3764_s0 + $0xb0] ss:$8 sps:$4 sm:$0xff]  }
  0x16   :  { %379 = vmatpush1.bf16.msra.mxu0 %v2755_v7  ;;  %772 = vmatpush1.bf16.msra.mxu1 %v2755_v7  ;;  %v2520_v62 = vld [vmem:[%s3765_s1 + $0xb4] ss:$8 sps:$4 sm:$0xff]   ;;  %v2535_v8 = vld [vmem:[%s3765_s1 + $0xd0] ss:$8 sps:$4 sm:$0xff]  }
  0x17   :  { %380 = vmatprep.subr.bf16.mxu0 %v2668_v0  ;;  %773 = vmatprep.subr.bf16.mxu1 %v2668_v0  ;;  %v2532_v6 = vld [vmem:[%s3765_s1 + $0xd4] ss:$8 sps:$4 sm:$0xff]  }
  0x1a   :  { %381 = vmatpush1.bf16.msra.mxu0 %v2767_v9  ;;  %774 = vmatpush1.bf16.msra.mxu1 %v2767_v9 }
  0x1b   :  { %382 = vmatprep.subr.bf16.mxu0 %v2668_v0  ;;  %775 = vmatprep.subr.bf16.mxu1 %v2668_v0 }
  0x1e   :  { %383 = vmatpush1.bf16.msra.mxu0 %v2776_v10  ;;  %776 = vmatpush1.bf16.msra.mxu1 %v2776_v10 }
  0x1f   :  { %384 = vmatprep.subr.bf16.mxu0 %v2668_v0  ;;  %777 = vmatprep.subr.bf16.mxu1 %v2668_v0 }
  0x22   :  { %385 = vmatpush1.bf16.msra.mxu0 %v2785_v11  ;;  %778 = vmatpush1.bf16.msra.mxu1 %v2785_v11 }
  0x23   :  { %386 = vmatprep.subr.bf16.mxu0 %v2668_v0  ;;  %779 = vmatprep.subr.bf16.mxu1 %v2668_v0 }
  0x26   :  { %387 = vmatpush1.bf16.msra.mxu0 %v2794_v12  ;;  %780 = vmatpush1.bf16.msra.mxu1 %v2794_v12 }
  0x27   :  { %388 = vmatprep.subr.bf16.mxu0 %v2668_v0  ;;  %781 = vmatprep.subr.bf16.mxu1 %v2668_v0 }
  0x2a   :  { %389 = vmatpush1.bf16.msra.mxu0 %v2803_v13  ;;  %782 = vmatpush1.bf16.msra.mxu1 %v2803_v13 }
  0x2b   :  { %390 = vmatprep.subr.bf16.mxu0 %v2668_v0  ;;  %783 = vmatprep.subr.bf16.mxu1 %v2668_v0 }
  0x2e   :  { %391 = vmatpush1.bf16.msra.mxu0 %v2812_v14  ;;  %784 = vmatpush1.bf16.msra.mxu1 %v2812_v14 }
  0x2f   :  { %392 = vmatprep.subr.bf16.mxu0 %v2668_v0  ;;  %785 = vmatprep.subr.bf16.mxu1 %v2668_v0 }
  0x32   :  { %393 = vmatpush1.bf16.msra.mxu0 %v2821_v15  ;;  %786 = vmatpush1.bf16.msra.mxu1 %v2821_v15 }
  0x33   :  { %394 = vmatprep.subr.bf16.mxu0 %v2668_v0  ;;  %787 = vmatprep.subr.bf16.mxu1 %v2668_v0 }
  0x36   :  { %395 = vmatpush1.bf16.msra.mxu0 %v2830_v16  ;;  %788 = vmatpush1.bf16.msra.mxu1 %v2830_v16 }
  0x37   :  { %396 = vmatprep.subr.bf16.mxu0 %v2668_v0  ;;  %789 = vmatprep.subr.bf16.mxu1 %v2668_v0 }
  0x3a   :  { %397 = vmatpush1.bf16.msra.mxu0 %v2839_v17  ;;  %790 = vmatpush1.bf16.msra.mxu1 %v2839_v17 }
  0x3b   :  { %398 = vmatprep.subr.bf16.mxu0 %v2668_v0  ;;  %791 = vmatprep.subr.bf16.mxu1 %v2668_v0 }
  0x3e   :  { %399 = vmatpush1.bf16.msra.mxu0 %v2848_v18  ;;  %792 = vmatpush1.bf16.msra.mxu1 %v2848_v18 }
  0x3f   :  { %1154 = vmatprep.subr.bf16.mxu0 %v2668_v0  ;;  %1547 = vmatprep.subr.bf16.mxu1 %v2668_v0 }
  0x41   :  { %401 = vmatmul.mubr.bf16.vlgmr.msra.gmra.mrb[0].mxu0 %v2452_v19  ;;  %794 = vmatmul.mubr.bf16.vlgmr.msra.gmra.mrb[0].mxu1 %v2455_v20  ;;  %v2552_v19 = vld [vmem:[%s3764_s0 + $0x100] ss:$8 sps:$4 sm:$0xff]  }
  0x42   :  { %1155 = vmatpush1.bf16.msra.mxu0 %v2709_v1  ;;  %1548 = vmatpush1.bf16.msra.mxu1 %v2709_v1  ;;  %v2524_v1 = vld [vmem:[%s3764_s0 + $0xc4] ss:$8 sps:$4 sm:$0xff]   ;;  %v2553_v20 = vld [vmem:[%s3765_s1 + $0x100] ss:$8 sps:$4 sm:$0xff]  }
  0x43   :  { %408 = vmatprep.mubr.bf16.mxu0 %v2458_v21  ;;  %801 = vmatprep.mubr.bf16.mxu1 %v2460_v22  ;;  %v2554_v21 = vld [vmem:[%s3764_s0 + $0x114] ss:$8 sps:$4 sm:$0xff]  }
  0x44   :  { %1156 = vmatprep.subr.bf16.mxu0 %v2668_v0  ;;  %1549 = vmatprep.subr.bf16.mxu1 %v2668_v0  ;;  %v2556_v22 = vld [vmem:[%s3765_s1 + $0x114] ss:$8 sps:$4 sm:$0xff]  }
  0x46   :  { %1157 = vmatpush1.bf16.msra.mxu0 %v2716_v2  ;;  %1550 = vmatpush1.bf16.msra.mxu1 %v2716_v2  ;;  %v2526_v2 = vld [vmem:[%s3765_s1 + $0xc4] ss:$8 sps:$4 sm:$0xff]  }
  0x47   :  { %1158 = vmatprep.subr.bf16.mxu0 %v2668_v0  ;;  %1551 = vmatprep.subr.bf16.mxu1 %v2668_v0 }
  0x49   :  { %409 = vmatmul.mubr.bf16.gmra.mrb[4].mxu0 %v2462_v23  ;;  %802 = vmatmul.mubr.bf16.gmra.mrb[4].mxu1 %v2463_v24  ;;  %v2558_v23 = vld [vmem:[%s3764_s0 + $0x110] ss:$8 sps:$4 sm:$0xff]  }
  0x4a   :  { %416 = vmatprep.mubr.bf16.mxu0 %v2464_v25  ;;  %809 = vmatprep.mubr.bf16.mxu1 %v2466_v26  ;;  %v2559_v24 = vld [vmem:[%s3765_s1 + $0x110] ss:$8 sps:$4 sm:$0xff]   ;;  %v2562_v25 = vld [vmem:[%s3766_s2 + $0x4] ss:$8 sps:$4 sm:$0xff]  }
  0x4b   :  { %1159 = vmatpush1.bf16.msra.mxu0 %v2725_v3  ;;  %1552 = vmatpush1.bf16.msra.mxu1 %v2725_v3  ;;  %v2528_v3 = vld [vmem:[%s3764_s0 + $0xc0] ss:$8 sps:$4 sm:$0xff]   ;;  %v2565_v26 = vld [vmem:[%s3767_s3 + $0x4] ss:$8 sps:$4 sm:$0xff]  }
  0x4c   :  { %1160 = vmatprep.subr.bf16.mxu0 %v2668_v0  ;;  %1553 = vmatprep.subr.bf16.mxu1 %v2668_v0 }
  0x4f   :  { %1161 = vmatpush1.bf16.msra.mxu0 %v2734_v4  ;;  %1554 = vmatpush1.bf16.msra.mxu1 %v2734_v4  ;;  %v2529_v4 = vld [vmem:[%s3765_s1 + $0xc0] ss:$8 sps:$4 sm:$0xff]  }
  0x50   :  { %1162 = vmatprep.subr.bf16.mxu0 %v2668_v0  ;;  %1555 = vmatprep.subr.bf16.mxu1 %v2668_v0 }
  0x51   :  { %417 = vmatmul.mubr.bf16.gmra.mrb[8].mxu0 %v2468_v27  ;;  %810 = vmatmul.mubr.bf16.gmra.mrb[8].mxu1 %v2469_v28  ;;  %v2560_v27 = vld [vmem:[%s3766_s2] ss:$8 sps:$4 sm:$0xff]  }
  0x52   :  { %424 = vmatprep.mubr.bf16.mxu0 %v2470_v29  ;;  %817 = vmatprep.mubr.bf16.mxu1 %v2472_v30  ;;  %v2563_v28 = vld [vmem:[%s3767_s3] ss:$8 sps:$4 sm:$0xff]   ;;  %v2566_v29 = vld [vmem:[%s3766_s2 + $0x14] ss:$8 sps:$4 sm:$0xff]  }
  0x53   :  { %1163 = vmatpush1.bf16.msra.mxu0 %v2743_v5  ;;  %1556 = vmatpush1.bf16.msra.mxu1 %v2743_v5  ;;  %v2530_v5 = vld [vmem:[%s3764_s0 + $0xd4] ss:$8 sps:$4 sm:$0xff]  }
  0x54   :  { %1164 = vmatprep.subr.bf16.mxu0 %v2668_v0  ;;  %1557 = vmatprep.subr.bf16.mxu1 %v2668_v0  ;;  %v2568_v30 = vld [vmem:[%s3767_s3 + $0x14] ss:$8 sps:$4 sm:$0xff]  }
  0x57   :  { %1165 = vmatpush1.bf16.msra.mxu0 %v2755_v7  ;;  %1558 = vmatpush1.bf16.msra.mxu1 %v2755_v7  ;;  %v2534_v7 = vld [vmem:[%s3764_s0 + $0xd0] ss:$8 sps:$4 sm:$0xff]  }
  0x58   :  { %1166 = vmatprep.subr.bf16.mxu0 %v2668_v0  ;;  %1559 = vmatprep.subr.bf16.mxu1 %v2668_v0 }
  0x59   :  { %425 = vmatmul.mubr.bf16.gmra.mrb[12].mxu0 %v2474_v31  ;;  %818 = vmatmul.mubr.bf16.gmra.mrb[12].mxu1 %v2475_v32  ;;  %v2570_v31 = vld [vmem:[%s3766_s2 + $0x10] ss:$8 sps:$4 sm:$0xff]  }
  0x5a   :  { %432 = vmatprep.mubr.bf16.mxu0 %v2476_v33  ;;  %825 = vmatprep.mubr.bf16.mxu1 %v2478_v34  ;;  %v2571_v32 = vld [vmem:[%s3767_s3 + $0x10] ss:$8 sps:$4 sm:$0xff]   ;;  %v2572_v33 = vld [vmem:[%s3766_s2 + $0x24] ss:$8 sps:$4 sm:$0xff]  }
  0x5b   :  { %1167 = vmatpush1.bf16.msra.mxu0 %v2767_v9  ;;  %1560 = vmatpush1.bf16.msra.mxu1 %v2767_v9  ;;  %v2536_v9 = vld [vmem:[%s3764_s0 + $0xe4] ss:$8 sps:$4 sm:$0xff]  }
  0x5c   :  { %1168 = vmatprep.subr.bf16.mxu0 %v2668_v0  ;;  %1561 = vmatprep.subr.bf16.mxu1 %v2668_v0  ;;  %v2574_v34 = vld [vmem:[%s3767_s3 + $0x24] ss:$8 sps:$4 sm:$0xff]  }
  0x5f   :  { %1169 = vmatpush1.bf16.msra.mxu0 %v2776_v10  ;;  %1562 = vmatpush1.bf16.msra.mxu1 %v2776_v10  ;;  %v2538_v10 = vld [vmem:[%s3765_s1 + $0xe4] ss:$8 sps:$4 sm:$0xff]  }
  0x60   :  { %1170 = vmatprep.subr.bf16.mxu0 %v2668_v0  ;;  %1563 = vmatprep.subr.bf16.mxu1 %v2668_v0 }
  0x61   :  { %433 = vmatmul.mubr.bf16.gmra.mrb[16].mxu0 %v2480_v35  ;;  %826 = vmatmul.mubr.bf16.gmra.mrb[16].mxu1 %v2481_v36  ;;  %v2576_v35 = vld [vmem:[%s3766_s2 + $0x20] ss:$8 sps:$4 sm:$0xff]  }
  0x62   :  { %440 = vmatprep.mubr.bf16.mxu0 %v2482_v37  ;;  %833 = vmatprep.mubr.bf16.mxu1 %v2484_v38  ;;  %v2577_v36 = vld [vmem:[%s3767_s3 + $0x20] ss:$8 sps:$4 sm:$0xff]   ;;  %v2578_v37 = vld [vmem:[%s3766_s2 + $0x34] ss:$8 sps:$4 sm:$0xff]  }
  0x63   :  { %1171 = vmatpush1.bf16.msra.mxu0 %v2785_v11  ;;  %1564 = vmatpush1.bf16.msra.mxu1 %v2785_v11  ;;  %v2540_v11 = vld [vmem:[%s3764_s0 + $0xe0] ss:$8 sps:$4 sm:$0xff]   ;;  %v2580_v38 = vld [vmem:[%s3767_s3 + $0x34] ss:$8 sps:$4 sm:$0xff]  }
  0x64   :  { %1172 = vmatprep.subr.bf16.mxu0 %v2668_v0  ;;  %1565 = vmatprep.subr.bf16.mxu1 %v2668_v0 }
  0x67   :  { %1173 = vmatpush1.bf16.msra.mxu0 %v2794_v12  ;;  %1566 = vmatpush1.bf16.msra.mxu1 %v2794_v12  ;;  %v2541_v12 = vld [vmem:[%s3765_s1 + $0xe0] ss:$8 sps:$4 sm:$0xff]  }
  0x68   :  { %1174 = vmatprep.subr.bf16.mxu0 %v2668_v0  ;;  %1567 = vmatprep.subr.bf16.mxu1 %v2668_v0 }
  0x69   :  { %441 = vmatmul.mubr.bf16.gmra.mrb[20].mxu0 %v2486_v39  ;;  %834 = vmatmul.mubr.bf16.gmra.mrb[20].mxu1 %v2487_v40  ;;  %v2582_v39 = vld [vmem:[%s3766_s2 + $0x30] ss:$8 sps:$4 sm:$0xff]  }
  0x6a   :  { %448 = vmatprep.mubr.bf16.mxu0 %v2488_v41  ;;  %841 = vmatprep.mubr.bf16.mxu1 %v2490_v42  ;;  %v2583_v40 = vld [vmem:[%s3767_s3 + $0x30] ss:$8 sps:$4 sm:$0xff]   ;;  %v2584_v41 = vld [vmem:[%s3766_s2 + $0x44] ss:$8 sps:$4 sm:$0xff]  }
  0x6b   :  { %1175 = vmatpush1.bf16.msra.mxu0 %v2803_v13  ;;  %1568 = vmatpush1.bf16.msra.mxu1 %v2803_v13  ;;  %v2542_v13 = vld [vmem:[%s3764_s0 + $0xf4] ss:$8 sps:$4 sm:$0xff]   ;;  %v2586_v42 = vld [vmem:[%s3767_s3 + $0x44] ss:$8 sps:$4 sm:$0xff]  }
  0x6c   :  { %1176 = vmatprep.subr.bf16.mxu0 %v2668_v0  ;;  %1569 = vmatprep.subr.bf16.mxu1 %v2668_v0 }
  0x6f   :  { %1177 = vmatpush1.bf16.msra.mxu0 %v2812_v14  ;;  %1570 = vmatpush1.bf16.msra.mxu1 %v2812_v14  ;;  %v2544_v14 = vld [vmem:[%s3765_s1 + $0xf4] ss:$8 sps:$4 sm:$0xff]  }
  0x70   :  { %1178 = vmatprep.subr.bf16.mxu0 %v2668_v0  ;;  %1571 = vmatprep.subr.bf16.mxu1 %v2668_v0 }
  0x71   :  { %449 = vmatmul.mubr.bf16.gmra.mrb[24].mxu0 %v2492_v43  ;;  %842 = vmatmul.mubr.bf16.gmra.mrb[24].mxu1 %v2493_v44  ;;  %v2588_v43 = vld [vmem:[%s3766_s2 + $0x40] ss:$8 sps:$4 sm:$0xff]  }
  0x72   :  { %456 = vmatprep.mubr.bf16.mxu0 %v2494_v45  ;;  %849 = vmatprep.mubr.bf16.mxu1 %v2496_v46  ;;  %v2589_v44 = vld [vmem:[%s3767_s3 + $0x40] ss:$8 sps:$4 sm:$0xff]   ;;  %v2590_v45 = vld [vmem:[%s3766_s2 + $0x54] ss:$8 sps:$4 sm:$0xff]  }
  0x73   :  { %1179 = vmatpush1.bf16.msra.mxu0 %v2821_v15  ;;  %1572 = vmatpush1.bf16.msra.mxu1 %v2821_v15  ;;  %v2546_v15 = vld [vmem:[%s3764_s0 + $0xf0] ss:$8 sps:$4 sm:$0xff]   ;;  %v2592_v46 = vld [vmem:[%s3767_s3 + $0x54] ss:$8 sps:$4 sm:$0xff]  }
  0x74   :  { %1180 = vmatprep.subr.bf16.mxu0 %v2668_v0  ;;  %1573 = vmatprep.subr.bf16.mxu1 %v2668_v0 }
  0x77   :  { %1181 = vmatpush1.bf16.msra.mxu0 %v2830_v16  ;;  %1574 = vmatpush1.bf16.msra.mxu1 %v2830_v16  ;;  %v2547_v16 = vld [vmem:[%s3765_s1 + $0xf0] ss:$8 sps:$4 sm:$0xff]  }
  0x78   :  { %1182 = vmatprep.subr.bf16.mxu0 %v2668_v0  ;;  %1575 = vmatprep.subr.bf16.mxu1 %v2668_v0 }
  0x79   :  { %457 = vmatmul.mubr.bf16.gmra.mrb[28].mxu0 %v2498_v47  ;;  %850 = vmatmul.mubr.bf16.gmra.mrb[28].mxu1 %v2499_v48  ;;  %v2594_v47 = vld [vmem:[%s3766_s2 + $0x50] ss:$8 sps:$4 sm:$0xff]  }
  0x7a   :  { %464 = vmatprep.mubr.bf16.mxu0 %v2500_v49  ;;  %857 = vmatprep.mubr.bf16.mxu1 %v2502_v50  ;;  %v2595_v48 = vld [vmem:[%s3767_s3 + $0x50] ss:$8 sps:$4 sm:$0xff]   ;;  %v2596_v49 = vld [vmem:[%s3766_s2 + $0x64] ss:$8 sps:$4 sm:$0xff]  }
  0x7b   :  { %1183 = vmatpush1.bf16.msra.mxu0 %v2839_v17  ;;  %1576 = vmatpush1.bf16.msra.mxu1 %v2839_v17  ;;  %v2548_v17 = vld [vmem:[%s3764_s0 + $0x104] ss:$8 sps:$4 sm:$0xff]  }
  0x7c   :  { %1184 = vmatprep.subr.bf16.mxu0 %v2668_v0  ;;  %1577 = vmatprep.subr.bf16.mxu1 %v2668_v0  ;;  %v2523_v0 = vld [vmem:[%s3765_s1 + $0xb0] ss:$8 sps:$4 sm:$0xff]   ;;  %v2598_v50 = vld [vmem:[%s3767_s3 + $0x64] ss:$8 sps:$4 sm:$0xff]  }
  0x7f   :  { %1185 = vmatpush1.bf16.msra.mxu0 %v2848_v18  ;;  %1578 = vmatpush1.bf16.msra.mxu1 %v2848_v18  ;;  %v2550_v18 = vld [vmem:[%s3765_s1 + $0x104] ss:$8 sps:$4 sm:$0xff]  }
  0x81   :  { %465 = vmatmul.mubr.bf16.gmra.mrb[32].mxu0 %v2504_v51  ;;  %858 = vmatmul.mubr.bf16.gmra.mrb[32].mxu1 %v2505_v52  ;;  %v2600_v51 = vld [vmem:[%s3766_s2 + $0x60] ss:$8 sps:$4 sm:$0xff]  }
  0x82   :  { %472 = vmatprep.mubr.bf16.mxu0 %v2506_v53  ;;  %865 = vmatprep.mubr.bf16.mxu1 %v2508_v54  ;;  %v2601_v52 = vld [vmem:[%s3767_s3 + $0x60] ss:$8 sps:$4 sm:$0xff]   ;;  %v2602_v53 = vld [vmem:[%s3766_s2 + $0x74] ss:$8 sps:$4 sm:$0xff]  }
  0x83   :  { %v2604_v54 = vld [vmem:[%s3767_s3 + $0x74] ss:$8 sps:$4 sm:$0xff]  }
  0x89   :  { %473 = vmatmul.mubr.bf16.gmra.mrb[36].mxu0 %v2510_v55  ;;  %866 = vmatmul.mubr.bf16.gmra.mrb[36].mxu1 %v2511_v56  ;;  %v2606_v55 = vld [vmem:[%s3766_s2 + $0x70] ss:$8 sps:$4 sm:$0xff]  }
  0x8a   :  { %480 = vmatprep.mubr.bf16.mxu0 %v2512_v57  ;;  %873 = vmatprep.mubr.bf16.mxu1 %v2514_v58  ;;  %v2607_v56 = vld [vmem:[%s3767_s3 + $0x70] ss:$8 sps:$4 sm:$0xff]   ;;  %v2608_v57 = vld [vmem:[%s3766_s2 + $0x84] ss:$8 sps:$4 sm:$0xff]  }
  0x8b   :  { %v2610_v58 = vld [vmem:[%s3767_s3 + $0x84] ss:$8 sps:$4 sm:$0xff]  }
  0x91   :  { %481 = vmatmul.mubr.bf16.gmra.mrb[40].mxu0 %v2516_v59  ;;  %874 = vmatmul.mubr.bf16.gmra.mrb[40].mxu1 %v2517_v60  ;;  %v2612_v59 = vld [vmem:[%s3766_s2 + $0x80] ss:$8 sps:$4 sm:$0xff]  }
  0x92   :  { %488 = vmatprep.mubr.bf16.mxu0 %v2518_v61  ;;  %881 = vmatprep.mubr.bf16.mxu1 %v2520_v62  ;;  %v2613_v60 = vld [vmem:[%s3767_s3 + $0x80] ss:$8 sps:$4 sm:$0xff]   ;;  %v2614_v61 = vld [vmem:[%s3766_s2 + $0x94] ss:$8 sps:$4 sm:$0xff]  }
  0x93   :  { %v2616_v62 = vld [vmem:[%s3767_s3 + $0x94] ss:$8 sps:$4 sm:$0xff]  }
  0x99   :  { %489 = vmatmul.mubr.bf16.gmra.mrb[44].mxu0 %v2522_v63  ;;  %882 = vmatmul.mubr.bf16.gmra.mrb[44].mxu1 %v2523_v0 }
  0x9a   :  { %496 = vmatprep.mubr.bf16.mxu0 %v2524_v1  ;;  %889 = vmatprep.mubr.bf16.mxu1 %v2526_v2 }
  0xa1   :  { %497 = vmatmul.mubr.bf16.gmra.mrb[48].mxu0 %v2528_v3  ;;  %890 = vmatmul.mubr.bf16.gmra.mrb[48].mxu1 %v2529_v4  ;;  %v2618_v4 = vld [vmem:[%s3766_s2 + $0x90] ss:$8 sps:$4 sm:$0xff]  }
  0xa2   :  { %504 = vmatprep.mubr.bf16.mxu0 %v2530_v5  ;;  %897 = vmatprep.mubr.bf16.mxu1 %v2532_v6  ;;  %v2619_v5 = vld [vmem:[%s3767_s3 + $0x90] ss:$8 sps:$4 sm:$0xff]  }
  0xa9   :  { %505 = vmatmul.mubr.bf16.gmra.mrb[52].mxu0 %v2534_v7  ;;  %898 = vmatmul.mubr.bf16.gmra.mrb[52].mxu1 %v2535_v8  ;;  %v2620_v8 = vld [vmem:[%s3766_s2 + $0xa4] ss:$8 sps:$4 sm:$0xff]  }
  0xaa   :  { %512 = vmatprep.mubr.bf16.mxu0 %v2536_v9  ;;  %905 = vmatprep.mubr.bf16.mxu1 %v2538_v10  ;;  %v2622_v9 = vld [vmem:[%s3767_s3 + $0xa4] ss:$8 sps:$4 sm:$0xff]  }
  0xb1   :  { %513 = vmatmul.mubr.bf16.gmra.mrb[56].mxu0 %v2540_v11  ;;  %906 = vmatmul.mubr.bf16.gmra.mrb[56].mxu1 %v2541_v12 }
  0xb2   :  { %520 = vmatprep.mubr.bf16.mxu0 %v2542_v13  ;;  %913 = vmatprep.mubr.bf16.mxu1 %v2544_v14 }
  0xb9   :  { %521 = vmatmul.mubr.bf16.gmra.mrb[60].mxu0 %v2546_v15  ;;  %914 = vmatmul.mubr.bf16.gmra.mrb[60].mxu1 %v2547_v16 }
  0xba   :  { %528 = vmatprep.mubr.bf16.mxu0 %v2548_v17  ;;  %921 = vmatprep.mubr.bf16.mxu1 %v2550_v18  ;;  %v2624_v18 = vld [vmem:[%s3766_s2 + $0xa0] ss:$8 sps:$4 sm:$0xff]  }
  0xc1   :  { %529 = vmatmul.mubr.bf16.gmra.mrb[64].mxu0 %v2552_v19  ;;  %922 = vmatmul.mubr.bf16.gmra.mrb[64].mxu1 %v2553_v20  ;;  %v2625_v19 = vld [vmem:[%s3767_s3 + $0xa0] ss:$8 sps:$4 sm:$0xff]  }
  0xc2   :  { %536 = vmatprep.mubr.bf16.mxu0 %v2554_v21  ;;  %929 = vmatprep.mubr.bf16.mxu1 %v2556_v22  ;;  %v2626_v22 = vld [vmem:[%s3766_s2 + $0xb4] ss:$8 sps:$4 sm:$0xff]  }
  0xc9   :  { %537 = vmatmul.mubr.bf16.gmra.mrb[68].mxu0 %v2558_v23  ;;  %930 = vmatmul.mubr.bf16.gmra.mrb[68].mxu1 %v2559_v24  ;;  %v2628_v23 = vld [vmem:[%s3767_s3 + $0xb4] ss:$8 sps:$4 sm:$0xff]  }
  0xca   :  { %1186 = vmatprep.mubr.bf16.mxu0 %v2562_v25  ;;  %1579 = vmatprep.mubr.bf16.mxu1 %v2565_v26 }
  0xd1   :  { %1187 = vmatmul.mubr.bf16.vlgmr.msra.gmra.mrb[72].mxu0 %v2560_v27  ;;  %1580 = vmatmul.mubr.bf16.vlgmr.msra.gmra.mrb[72].mxu1 %v2563_v28 }
  0xd2   :  { %1194 = vmatprep.mubr.bf16.mxu0 %v2566_v29  ;;  %1587 = vmatprep.mubr.bf16.mxu1 %v2568_v30 }
  0xd9   :  { %1195 = vmatmul.mubr.bf16.gmra.mrb[76].mxu0 %v2570_v31  ;;  %1588 = vmatmul.mubr.bf16.gmra.mrb[76].mxu1 %v2571_v32  ;;  %v2630_v32 = vld [vmem:[%s3766_s2 + $0xb0] ss:$8 sps:$4 sm:$0xff]  }
  0xda   :  { %1202 = vmatprep.mubr.bf16.mxu0 %v2572_v33  ;;  %1595 = vmatprep.mubr.bf16.mxu1 %v2574_v34  ;;  %v2631_v33 = vld [vmem:[%s3767_s3 + $0xb0] ss:$8 sps:$4 sm:$0xff]  }
  0xe1   :  { %1203 = vmatmul.mubr.bf16.gmra.mrb[80].mxu0 %v2576_v35  ;;  %1596 = vmatmul.mubr.bf16.gmra.mrb[80].mxu1 %v2577_v36  ;;  %v2632_v36 = vld [vmem:[%s3766_s2 + $0xc4] ss:$8 sps:$4 sm:$0xff]  }
  0xe2   :  { %1210 = vmatprep.mubr.bf16.mxu0 %v2578_v37  ;;  %1603 = vmatprep.mubr.bf16.mxu1 %v2580_v38  ;;  %v2634_v37 = vld [vmem:[%s3767_s3 + $0xc4] ss:$8 sps:$4 sm:$0xff]  }
  0xe9   :  { %1211 = vmatmul.mubr.bf16.gmra.mrb[84].mxu0 %v2582_v39  ;;  %1604 = vmatmul.mubr.bf16.gmra.mrb[84].mxu1 %v2583_v40 }
  0xea   :  { %1218 = vmatprep.mubr.bf16.mxu0 %v2584_v41  ;;  %1611 = vmatprep.mubr.bf16.mxu1 %v2586_v42 }
  0xf1   :  { %1219 = vmatmul.mubr.bf16.gmra.mrb[88].mxu0 %v2588_v43  ;;  %1612 = vmatmul.mubr.bf16.gmra.mrb[88].mxu1 %v2589_v44 }
  0xf2   :  { %1226 = vmatprep.mubr.bf16.mxu0 %v2590_v45  ;;  %1619 = vmatprep.mubr.bf16.mxu1 %v2592_v46  ;;  %v2636_v46 = vld [vmem:[%s3766_s2 + $0xc0] ss:$8 sps:$4 sm:$0xff]  }
  0xf9   :  { %1227 = vmatmul.mubr.bf16.gmra.mrb[92].mxu0 %v2594_v47  ;;  %1620 = vmatmul.mubr.bf16.gmra.mrb[92].mxu1 %v2595_v48  ;;  %v2637_v47 = vld [vmem:[%s3767_s3 + $0xc0] ss:$8 sps:$4 sm:$0xff]  }
  0xfa   :  { %1234 = vmatprep.mubr.bf16.mxu0 %v2596_v49  ;;  %1627 = vmatprep.mubr.bf16.mxu1 %v2598_v50  ;;  %v2638_v50 = vld [vmem:[%s3766_s2 + $0xd4] ss:$8 sps:$4 sm:$0xff]  }
 0x101   :  { %1235 = vmatmul.mubr.bf16.gmra.mrb[96].mxu0 %v2600_v51  ;;  %1628 = vmatmul.mubr.bf16.gmra.mrb[96].mxu1 %v2601_v52  ;;  %v2640_v51 = vld [vmem:[%s3767_s3 + $0xd4] ss:$8 sps:$4 sm:$0xff]  }
 0x102   :  { %1242 = vmatprep.mubr.bf16.mxu0 %v2602_v53  ;;  %1635 = vmatprep.mubr.bf16.mxu1 %v2604_v54 }
 0x109   :  { %1243 = vmatmul.mubr.bf16.gmra.mrb[100].mxu0 %v2606_v55  ;;  %1636 = vmatmul.mubr.bf16.gmra.mrb[100].mxu1 %v2607_v56 }
 0x10a   :  { %1250 = vmatprep.mubr.bf16.mxu0 %v2608_v57  ;;  %1643 = vmatprep.mubr.bf16.mxu1 %v2610_v58 }
 0x111   :  { %1251 = vmatmul.mubr.bf16.gmra.mrb[104].mxu0 %v2612_v59  ;;  %1644 = vmatmul.mubr.bf16.gmra.mrb[104].mxu1 %v2613_v60  ;;  %v2642_v60 = vld [vmem:[%s3766_s2 + $0xd0] ss:$8 sps:$4 sm:$0xff]  }
 0x112   :  { %1258 = vmatprep.mubr.bf16.mxu0 %v2614_v61  ;;  %1651 = vmatprep.mubr.bf16.mxu1 %v2616_v62  ;;  %v2643_v61 = vld [vmem:[%s3767_s3 + $0xd0] ss:$8 sps:$4 sm:$0xff]  }
 0x114   :  { %v3242_v63 = vpop.f32.mrb[0].mxu0  ;;  %v3244_v0 = vpop.f32.mrb[0].mxu1 }
 0x115   :  { %v404_v2 = vpop.f32.mrb[1].mxu0  ;;  %v797_v3 = vpop.f32.mrb[1].mxu1 }
 0x116   :  { %v3254_v6 = vpop.f32.mrb[2].mxu0  ;;  %v3256_v7 = vpop.f32.mrb[2].mxu1  ;;  %v2644_v3 = vld [vmem:[%s3766_s2 + $0xe4] ss:$8 sps:$4 sm:$0xff]  }
 0x117   :  { %v407_v11 = vpop.f32.mrb[3].mxu0  ;;  %v800_v12 = vpop.f32.mrb[3].mxu1 }
 0x119   :  { %1259 = vmatmul.mubr.bf16.gmra.mrb[108].mxu0 %v2618_v4  ;;  %1652 = vmatmul.mubr.bf16.gmra.mrb[108].mxu1 %v2619_v5  ;;  %v2646_v4 = vld [vmem:[%s3767_s3 + $0xe4] ss:$8 sps:$4 sm:$0xff]  }
 0x11a   :  { %1266 = vmatprep.mubr.bf16.mxu0 %v2620_v8  ;;  %1659 = vmatprep.mubr.bf16.mxu1 %v2622_v9 }
 0x11c   :  { %v3266_v13 = vpop.f32.mrb[4].mxu0  ;;  %v3268_v14 = vpop.f32.mrb[4].mxu1 }
 0x11d   :  { %v412_v16 = vpop.f32.mrb[5].mxu0  ;;  %v805_v17 = vpop.f32.mrb[5].mxu1 }
 0x11e   :  { %v3278_v20 = vpop.f32.mrb[6].mxu0  ;;  %v3280_v21 = vpop.f32.mrb[6].mxu1 }
 0x11f   :  { %v415_v25 = vpop.f32.mrb[7].mxu0  ;;  %v808_v26 = vpop.f32.mrb[7].mxu1 }
 0x120   :  { %v2650_v26 = vld [vmem:[%s3766_s2 + $0xf4] ss:$8 sps:$4 sm:$0xff]  }
 0x121   :  { %1267 = vmatmul.mubr.bf16.gmra.mrb[112].mxu0 %v2624_v18  ;;  %1660 = vmatmul.mubr.bf16.gmra.mrb[112].mxu1 %v2625_v19  ;;  %v2648_v19 = vld [vmem:[%s3766_s2 + $0xe0] ss:$8 sps:$4 sm:$0xff]  }
 0x122   :  { %1274 = vmatprep.mubr.bf16.mxu0 %v2626_v22  ;;  %1667 = vmatprep.mubr.bf16.mxu1 %v2628_v23  ;;  %v2649_v22 = vld [vmem:[%s3767_s3 + $0xe0] ss:$8 sps:$4 sm:$0xff]  }
 0x124   :  { %v3290_v27 = vpop.f32.mrb[8].mxu0  ;;  %v3292_v28 = vpop.f32.mrb[8].mxu1 }
 0x125   :  { %v420_v30 = vpop.f32.mrb[9].mxu0  ;;  %v813_v31 = vpop.f32.mrb[9].mxu1 }
 0x126   :  { %v3302_v34 = vpop.f32.mrb[10].mxu0  ;;  %v3304_v35 = vpop.f32.mrb[10].mxu1  ;;  %v2652_v30 = vld [vmem:[%s3767_s3 + $0xf4] ss:$8 sps:$4 sm:$0xff]  }
 0x127   :  { %v423_v39 = vpop.f32.mrb[11].mxu0  ;;  %v816_v40 = vpop.f32.mrb[11].mxu1 }
 0x129   :  { %1275 = vmatmul.mubr.bf16.gmra.mrb[116].mxu0 %v2630_v32  ;;  %1668 = vmatmul.mubr.bf16.gmra.mrb[116].mxu1 %v2631_v33 }
 0x12a   :  { %1282 = vmatprep.mubr.bf16.mxu0 %v2632_v36  ;;  %1675 = vmatprep.mubr.bf16.mxu1 %v2634_v37 }
 0x12c   :  { %v3314_v41 = vpop.f32.mrb[12].mxu0  ;;  %v3316_v42 = vpop.f32.mrb[12].mxu1 }
 0x12d   :  { %v428_v44 = vpop.f32.mrb[13].mxu0  ;;  %v821_v45 = vpop.f32.mrb[13].mxu1 }
 0x12e   :  { %v3326_v48 = vpop.f32.mrb[14].mxu0  ;;  %v3328_v49 = vpop.f32.mrb[14].mxu1  ;;  %v2654_v45 = vld [vmem:[%s3766_s2 + $0xf0] ss:$8 sps:$4 sm:$0xff]  }
 0x12f   :  { %v431_v53 = vpop.f32.mrb[15].mxu0  ;;  %v824_v54 = vpop.f32.mrb[15].mxu1 }
 0x130   :  { %v2658_v53 = vld [vmem:[%s3767_s3 + $0x104] ss:$8 sps:$4 sm:$0xff]  }
 0x131   :  { %1283 = vmatmul.mubr.bf16.gmra.mrb[120].mxu0 %v2636_v46  ;;  %1676 = vmatmul.mubr.bf16.gmra.mrb[120].mxu1 %v2637_v47  ;;  %v2655_v46 = vld [vmem:[%s3767_s3 + $0xf0] ss:$8 sps:$4 sm:$0xff]  }
 0x132   :  { %1290 = vmatprep.mubr.bf16.mxu0 %v2638_v50  ;;  %1683 = vmatprep.mubr.bf16.mxu1 %v2640_v51  ;;  %v2656_v51 = vld [vmem:[%s3766_s2 + $0x104] ss:$8 sps:$4 sm:$0xff]  }
 0x134   :  { %v3338_v55 = vpop.f32.mrb[16].mxu0  ;;  %v3340_v56 = vpop.f32.mrb[16].mxu1 }
 0x135   :  { %v436_v58 = vpop.f32.mrb[17].mxu0  ;;  %v829_v59 = vpop.f32.mrb[17].mxu1 }
 0x136   :  { %v3350_v62 = vpop.f32.mrb[18].mxu0  ;;  %v3352_v2 = vpop.f32.mrb[18].mxu1 }
 0x137   :  { %v439_v8 = vpop.f32.mrb[19].mxu0  ;;  %v832_v9 = vpop.f32.mrb[19].mxu1 }
 0x138   :  { %v2660_v9 = vld [vmem:[%s3766_s2 + $0x100] ss:$8 sps:$4 sm:$0xff]  }
 0x139   :  { %1291 = vmatmul.mubr.bf16.gmra.mrb[124].mxu0 %v2642_v60  ;;  %1684 = vmatmul.mubr.bf16.gmra.mrb[124].mxu1 %v2643_v61 }
 0x13a   :  { %1298 = vmatprep.mubr.bf16.mxu0 %v2644_v3  ;;  %1691 = vmatprep.mubr.bf16.mxu1 %v2646_v4 }
 0x13c   :  { %v3362_v11 = vpop.f32.mrb[20].mxu0  ;;  %v3364_v12 = vpop.f32.mrb[20].mxu1 }
 0x13d   :  { %v444_v17 = vpop.f32.mrb[21].mxu0  ;;  %v837_v18 = vpop.f32.mrb[21].mxu1 }
 0x13e   :  { %v3374_v23 = vpop.f32.mrb[22].mxu0  ;;  %v3376_v25 = vpop.f32.mrb[22].mxu1  ;;  %v2661_v17 = vld [vmem:[%s3767_s3 + $0x100] ss:$8 sps:$4 sm:$0xff]  }
 0x13f   :  { %v447_v32 = vpop.f32.mrb[23].mxu0  ;;  %v840_v33 = vpop.f32.mrb[23].mxu1 }
 0x141   :  { %1299 = vmatmul.mubr.bf16.gmra.mrb[128].mxu0 %v2648_v19  ;;  %1692 = vmatmul.mubr.bf16.gmra.mrb[128].mxu1 %v2649_v22  ;;  %v2662_v22 = vld [vmem:[%s3766_s2 + $0x114] ss:$8 sps:$4 sm:$0xff]  }
 0x142   :  { %1306 = vmatprep.mubr.bf16.mxu0 %v2650_v26  ;;  %1699 = vmatprep.mubr.bf16.mxu1 %v2652_v30  ;;  %v2664_v26 = vld [vmem:[%s3767_s3 + $0x114] ss:$8 sps:$4 sm:$0xff]  }
 0x144   :  { %v3386_v36 = vpop.f32.mrb[24].mxu0  ;;  %v3388_v37 = vpop.f32.mrb[24].mxu1 }
 0x145   :  { %v452_v40 = vpop.f32.mrb[25].mxu0  ;;  %v845_v44 = vpop.f32.mrb[25].mxu1 }
 0x146   :  { %v3398_v47 = vpop.f32.mrb[26].mxu0  ;;  %v3400_v50 = vpop.f32.mrb[26].mxu1 }
 0x147   :  { %v455_v58 = vpop.f32.mrb[27].mxu0  ;;  %v848_v59 = vpop.f32.mrb[27].mxu1 }
 0x148   :  { %v2667_v58 = vld [vmem:[%s3767_s3 + $0x110] ss:$8 sps:$4 sm:$0xff]  }
 0x149   :  { %1307 = vmatmul.mubr.bf16.gmra.mrb[132].mxu0 %v2654_v45  ;;  %1700 = vmatmul.mubr.bf16.gmra.mrb[132].mxu1 %v2655_v46 }
 0x14a   :  { %1314 = vmatprep.mubr.bf16.mxu0 %v2656_v51  ;;  %1707 = vmatprep.mubr.bf16.mxu1 %v2658_v53  ;;  %v2666_v53 = vld [vmem:[%s3766_s2 + $0x110] ss:$8 sps:$4 sm:$0xff]  }
 0x14c   :  { %v3410_v60 = vpop.f32.mrb[28].mxu0  ;;  %v3412_v61 = vpop.f32.mrb[28].mxu1 }
 0x14d   :  { %v460_v4 = vpop.f32.mrb[29].mxu0  ;;  %v853_v8 = vpop.f32.mrb[29].mxu1 }
 0x14e   :  { %v3422_v18 = vpop.f32.mrb[30].mxu0  ;;  %v3424_v19 = vpop.f32.mrb[30].mxu1 }
 0x14f   :  { %v463_v32 = vpop.f32.mrb[31].mxu0  ;;  %v856_v33 = vpop.f32.mrb[31].mxu1 }
 0x151   :  { %1315 = vmatmul.mubr.bf16.gmra.mrb[136].mxu0 %v2660_v9  ;;  %1708 = vmatmul.mubr.bf16.gmra.mrb[136].mxu1 %v2661_v17 }
 0x152   :  { %1322 = vmatprep.mubr.bf16.mxu0 %v2662_v22  ;;  %1715 = vmatprep.mubr.bf16.mxu1 %v2664_v26 }
 0x154   :  { %v3434_v40 = vpop.f32.mrb[32].mxu0  ;;  %v3436_v44 = vpop.f32.mrb[32].mxu1 }
 0x155   :  { %v468_v46 = vpop.f32.mrb[33].mxu0  ;;  %v861_v51 = vpop.f32.mrb[33].mxu1 }
 0x156   :  { %v3446_v59 = vpop.f32.mrb[34].mxu0  ;;  %v3448_v4 = vpop.f32.mrb[34].mxu1 }
 0x157   :  { %v471_v9 = vpop.f32.mrb[35].mxu0  ;;  %v864_v17 = vpop.f32.mrb[35].mxu1 }
 0x159   :  { %1323 = vmatmul.mubr.bf16.gmra.mrb[140].mxu0 %v2666_v53  ;;  %1716 = vmatmul.mubr.bf16.gmra.mrb[140].mxu1 %v2667_v58 }
 0x15c   :  { %v3452_v22 = vpop.f32.mrb[36].mxu0  ;;  %v3454_v26 = vpop.f32.mrb[36].mxu1 }
 0x15d   :  { %v476_v33 = vpop.f32.mrb[37].mxu0  ;;  %v869_v46 = vpop.f32.mrb[37].mxu1 }
 0x15e   :  { %v3458_v51 = vpop.f32.mrb[38].mxu0  ;;  %v3460_v45 = vpop.f32.mrb[38].mxu1 }
 0x15f   :  { %v479_v9 = vpop.f32.mrb[39].mxu0  ;;  %v872_v17 = vpop.f32.mrb[39].mxu1 }
 0x164   :  { %v3464_v53 = vpop.f32.mrb[40].mxu0  ;;  %v3466_v58 = vpop.f32.mrb[40].mxu1 }
 0x165   :  { %v484_v3 = vpop.f32.mrb[41].mxu0  ;;  %v877_v32 = vpop.f32.mrb[41].mxu1 }
 0x166   :  { %v3470_v33 = vpop.f32.mrb[42].mxu0  ;;  %v3472_v46 = vpop.f32.mrb[42].mxu1 }
 0x167   :  { %v487_v39 = vpop.f32.mrb[43].mxu0  ;;  %v880_v8 = vpop.f32.mrb[43].mxu1 }
 0x16c   :  { %v3476_v9 = vpop.f32.mrb[44].mxu0  ;;  %v3478_v17 = vpop.f32.mrb[44].mxu1 }
 0x16d   :  { %3798 = vst [vmem:[#allocation2_spill] sm:$0xff] %v3476_v9  ;;  %3799 = vst [vmem:[#allocation3_spill] sm:$0xff] %v3478_v17  ;;  %v492_v16 = vpop.f32.mrb[45].mxu0  ;;  %v885_v30 = vpop.f32.mrb[45].mxu1 }
 0x16e   :  { %v3482_v3 = vpop.f32.mrb[46].mxu0  ;;  %v3484_v32 = vpop.f32.mrb[46].mxu1 }
 0x16f   :  { %3800 = vst [vmem:[#allocation4_spill] sm:$0xff] %v3482_v3  ;;  %3801 = vst [vmem:[#allocation5_spill] sm:$0xff] %v3484_v32  ;;  %v495_v57 = vpop.f32.mrb[47].mxu0  ;;  %v888_v54 = vpop.f32.mrb[47].mxu1 }
 0x174   :  { %v3488_v39 = vpop.f32.mrb[48].mxu0  ;;  %v3490_v8 = vpop.f32.mrb[48].mxu1 }
 0x175   :  { %3802 = vst [vmem:[#allocation6_spill] sm:$0xff] %v3488_v39  ;;  %3803 = vst [vmem:[#allocation7_spill] sm:$0xff] %v3490_v8  ;;  %v500_v43 = vpop.f32.mrb[49].mxu0  ;;  %v893_v31 = vpop.f32.mrb[49].mxu1 }
 0x176   :  { %v3494_v16 = vpop.f32.mrb[50].mxu0  ;;  %v3496_v30 = vpop.f32.mrb[50].mxu1 }
 0x177   :  { %3804 = vst [vmem:[#allocation8_spill] sm:$0xff] %v3494_v16  ;;  %3805 = vst [vmem:[#allocation9_spill] sm:$0xff] %v3496_v30  ;;  %v503_v29 = vpop.f32.mrb[51].mxu0  ;;  %v896_v5 = vpop.f32.mrb[51].mxu1 }
 0x17c   :  { %v3500_v57 = vpop.f32.mrb[52].mxu0  ;;  %v3502_v54 = vpop.f32.mrb[52].mxu1 }
 0x17d   :  { %3806 = vst [vmem:[#allocation10_spill] sm:$0xff] %v3500_v57  ;;  %3807 = vst [vmem:[#allocation11_spill] sm:$0xff] %v3502_v54  ;;  %v508_v15 = vpop.f32.mrb[53].mxu0  ;;  %v901_v52 = vpop.f32.mrb[53].mxu1 }
 0x17e   :  { %v3506_v43 = vpop.f32.mrb[54].mxu0  ;;  %v3508_v31 = vpop.f32.mrb[54].mxu1 }
 0x17f   :  { %3808 = vst [vmem:[#allocation12_spill] sm:$0xff] %v3506_v43  ;;  %3809 = vst [vmem:[#allocation13_spill] sm:$0xff] %v3508_v31  ;;  %v511_v1 = vpop.f32.mrb[55].mxu0  ;;  %v904_v38 = vpop.f32.mrb[55].mxu1 }
 0x184   :  { %v3512_v29 = vpop.f32.mrb[56].mxu0  ;;  %v3514_v5 = vpop.f32.mrb[56].mxu1 }
 0x185   :  { %3810 = vst [vmem:[#allocation14_spill] sm:$0xff] %v3512_v29  ;;  %3811 = vst [vmem:[#allocation15_spill] sm:$0xff] %v3514_v5  ;;  %v516_v16 = vpop.f32.mrb[57].mxu0  ;;  %v909_v24 = vpop.f32.mrb[57].mxu1 }
 0x186   :  { %v3518_v15 = vpop.f32.mrb[58].mxu0  ;;  %v3520_v52 = vpop.f32.mrb[58].mxu1 }
 0x187   :  { %3812 = vst [vmem:[#allocation16_spill] sm:$0xff] %v3518_v15  ;;  %3813 = vst [vmem:[#allocation17_spill] sm:$0xff] %v3520_v52  ;;  %v519_v57 = vpop.f32.mrb[59].mxu0  ;;  %v912_v10 = vpop.f32.mrb[59].mxu1 }
 0x18c   :  { %v3524_v1 = vpop.f32.mrb[60].mxu0  ;;  %v3526_v38 = vpop.f32.mrb[60].mxu1 }
 0x18d   :  { %3814 = vst [vmem:[#allocation18_spill] sm:$0xff] %v3524_v1  ;;  %3815 = vst [vmem:[#allocation19_spill] sm:$0xff] %v3526_v38  ;;  %v524_v43 = vpop.f32.mrb[61].mxu0  ;;  %v917_v30 = vpop.f32.mrb[61].mxu1 }
 0x18e   :  { %v3530_v16 = vpop.f32.mrb[62].mxu0  ;;  %v3532_v24 = vpop.f32.mrb[62].mxu1 }
 0x18f   :  { %3816 = vst [vmem:[#allocation20_spill] sm:$0xff] %v3530_v16  ;;  %3817 = vst [vmem:[#allocation21_spill] sm:$0xff] %v3532_v24  ;;  %v527_v29 = vpop.f32.mrb[63].mxu0  ;;  %v920_v54 = vpop.f32.mrb[63].mxu1  ;;  %v3563_v24 = vld [vmem:[%s3768_s5] ss:$0 sm:$0xff] }
 0x194   :  { %v3536_v57 = vpop.f32.mrb[64].mxu0  ;;  %v3538_v10 = vpop.f32.mrb[64].mxu1 }
 0x195   :  { %3818 = vst [vmem:[#allocation22_spill] sm:$0xff] %v3536_v57  ;;  %3819 = vst [vmem:[#allocation23_spill] sm:$0xff] %v3538_v10  ;;  %v532_v15 = vpop.f32.mrb[65].mxu0  ;;  %v925_v31 = vpop.f32.mrb[65].mxu1 }
 0x196   :  { %v3542_v43 = vpop.f32.mrb[66].mxu0  ;;  %v3544_v30 = vpop.f32.mrb[66].mxu1 }
 0x197   :  { %3820 = vst [vmem:[#allocation24_spill] sm:$0xff] %v3542_v43  ;;  %3821 = vst [vmem:[#allocation25_spill] sm:$0xff] %v3544_v30  ;;  %v535_v1 = vpop.f32.mrb[67].mxu0  ;;  %v928_v5 = vpop.f32.mrb[67].mxu1 }
 0x19c   :  { %v3548_v29 = vpop.f32.mrb[68].mxu0  ;;  %v3550_v54 = vpop.f32.mrb[68].mxu1 }
 0x19d   :  { %3822 = vst [vmem:[#allocation26_spill] sm:$0xff] %v3548_v29  ;;  %3823 = vst [vmem:[#allocation27_spill] sm:$0xff] %v3550_v54  ;;  %v540_v16 = vpop.f32.mrb[69].mxu0  ;;  %v933_v52 = vpop.f32.mrb[69].mxu1  ;;  %v3826_v54 = vmax.f32 %v3242_v63, %v3244_v0 }
 0x19e   :  { %v3554_v15 = vpop.f32.mrb[70].mxu0  ;;  %v3556_v31 = vpop.f32.mrb[70].mxu1 }
 0x19f   :  { %3824 = vst [vmem:[#allocation28_spill] sm:$0xff] %v3554_v15  ;;  %3825 = vst [vmem:[#allocation29_spill] sm:$0xff] %v3556_v31  ;;  %v543_v57 = vpop.f32.mrb[71].mxu0  ;;  %v936_v38 = vpop.f32.mrb[71].mxu1 }
 0x1a4   :  { %v1188_v1 = vpop.f32.mrb[72].mxu0  ;;  %v1581_v5 = vpop.f32.mrb[72].mxu1 }
 0x1a5   :  { %v1760_v30 = vmax.f32 %v1188_v1, %v1581_v5  ;;  %v1190_v43 = vpop.f32.mrb[73].mxu0  ;;  %v1583_v8 = vpop.f32.mrb[73].mxu1 }
 0x1a6   :  { %v1191_v52 = vpop.f32.mrb[74].mxu0  ;;  %v1584_v16 = vpop.f32.mrb[74].mxu1  ;;  %v3827_v43 = vmax.f32 %v3254_v6, %v3256_v7 }
 0x1a7   :  { %v1796_v29 = vmax.f32 %v3826_v54, %v1760_v30  ;;  %v1761_v39 = vmax.f32 %v1191_v52, %v1584_v16  ;;  %v1193_v10 = vpop.f32.mrb[75].mxu0  ;;  %v1586_v57 = vpop.f32.mrb[75].mxu1 }
 0x1a8   :  { %v3828_v10 = vmax.f32 %v3266_v13, %v3268_v14 }
 0x1a9   :  { %v1839_v38 = vadd.f32 %v3563_v24, %v1796_v29  ;;  %v1797_v8 = vmax.f32 %v3827_v43, %v1761_v39 }
 0x1ab   :  { %v1840_v1 = vadd.f32 %v3563_v24, %v1797_v8  ;;  %v1875_v15 = vmax.f32 %v1839_v38, 0.0  ;;  %v3830_v8 = vmax.f32 %v3290_v27, %v3292_v28 }
 0x1ac   :  { %v1196_v5 = vpop.f32.mrb[76].mxu0  ;;  %v1589_v31 = vpop.f32.mrb[76].mxu1 }
 0x1ad   :  { %v1876_v32 = vmax.f32 %v1840_v1, 0.0  ;;  %v1762_v3 = vmax.f32 %v1196_v5, %v1589_v31  ;;  %v1198_v17 = vpop.f32.mrb[77].mxu0  ;;  %v1591_v9 = vpop.f32.mrb[77].mxu1 }
 0x1ae   :  { %v1199_v63 = vpop.f32.mrb[78].mxu0  ;;  %v1592_v0 = vpop.f32.mrb[78].mxu1  ;;  %v3829_v17 = vmax.f32 %v3278_v20, %v3280_v21 }
 0x1af   :  { %v2331_v30 = vpack.c.bf16 %v1876_v32, %v1875_v15  ;;  %v1798_v29 = vmax.f32 %v3828_v10, %v1762_v3  ;;  %v1763_v54 = vmax.f32 %v1199_v63, %v1592_v0  ;;  %v1201_v52 = vpop.f32.mrb[79].mxu0  ;;  %v1594_v6 = vpop.f32.mrb[79].mxu1  ;;  %v3831_v0 = vmax.f32 %v3302_v34, %v3304_v35 }
 0x1b1   :  { %2332 = vst [vmem:[%s3769_s6] sm:$0xff] %v2331_v30   ;;  %v1841_v7 = vadd.f32 %v3563_v24, %v1798_v29  ;;  %v1799_v9 = vmax.f32 %v3829_v17, %v1763_v54 }
 0x1b3   :  { %v1842_v39 = vadd.f32 %v3563_v24, %v1799_v9  ;;  %v1877_v31 = vmax.f32 %v1841_v7, 0.0 }
 0x1b4   :  { %v1204_v32 = vpop.f32.mrb[80].mxu0  ;;  %v1597_v15 = vpop.f32.mrb[80].mxu1 }
 0x1b5   :  { %v1878_v13 = vmax.f32 %v1842_v39, 0.0  ;;  %v1764_v14 = vmax.f32 %v1204_v32, %v1597_v15  ;;  %v1206_v3 = vpop.f32.mrb[81].mxu0  ;;  %v1599_v16 = vpop.f32.mrb[81].mxu1  ;;  %v3832_v32 = vmax.f32 %v3314_v41, %v3316_v42 }
 0x1b6   :  { %v1207_v57 = vpop.f32.mrb[82].mxu0  ;;  %v1600_v38 = vpop.f32.mrb[82].mxu1 }
 0x1b7   :  { %v2336_v43 = vpack.c.bf16 %v1878_v13, %v1877_v31  ;;  %v1800_v1 = vmax.f32 %v3830_v8, %v1764_v14  ;;  %v1765_v5 = vmax.f32 %v1207_v57, %v1600_v38  ;;  %v1209_v63 = vpop.f32.mrb[83].mxu0  ;;  %v1602_v20 = vpop.f32.mrb[83].mxu1  ;;  %v3833_v14 = vmax.f32 %v3326_v48, %v3328_v49 }
 0x1b9   :  { %2418 = vst [vmem:[%s3769_s6 + $0x8] sm:$0xff] %v2336_v43   ;;  %v1843_v21 = vadd.f32 %v3563_v24, %v1800_v1  ;;  %v1801_v30 = vmax.f32 %v3831_v0, %v1765_v5 }
 0x1bb   :  { %v1844_v10 = vadd.f32 %v3563_v24, %v1801_v30  ;;  %v1879_v52 = vmax.f32 %v1843_v21, 0.0  ;;  %v3834_v21 = vmax.f32 %v3338_v55, %v3340_v56 }
 0x1bc   :  { %v1212_v29 = vpop.f32.mrb[84].mxu0  ;;  %v1605_v54 = vpop.f32.mrb[84].mxu1 }
 0x1bd   :  { %v1880_v27 = vmax.f32 %v1844_v10, 0.0  ;;  %v1766_v28 = vmax.f32 %v1212_v29, %v1605_v54  ;;  %v1214_v6 = vpop.f32.mrb[85].mxu0  ;;  %v1607_v7 = vpop.f32.mrb[85].mxu1  ;;  %v3835_v29 = vmax.f32 %v3350_v62, %v3352_v2 }
 0x1be   :  { %v1215_v17 = vpop.f32.mrb[86].mxu0  ;;  %v1608_v9 = vpop.f32.mrb[86].mxu1 }
 0x1bf   :  { %v2341_v39 = vpack.c.bf16 %v1880_v27, %v1879_v52  ;;  %v1802_v15 = vmax.f32 %v3832_v32, %v1766_v28  ;;  %v1767_v31 = vmax.f32 %v1215_v17, %v1608_v9  ;;  %v1217_v13 = vpop.f32.mrb[87].mxu0  ;;  %v1610_v34 = vpop.f32.mrb[87].mxu1 }
 0x1c1   :  { %2419 = vst [vmem:[%s3769_s6 + $0x10] sm:$0xff] %v2341_v39   ;;  %v1845_v35 = vadd.f32 %v3563_v24, %v1802_v15  ;;  %v1803_v3 = vmax.f32 %v3833_v14, %v1767_v31  ;;  %v3836_v15 = vmax.f32 %v3362_v11, %v3364_v12 }
 0x1c3   :  { %v1846_v16 = vadd.f32 %v3563_v24, %v1803_v3  ;;  %v1881_v43 = vmax.f32 %v1845_v35, 0.0  ;;  %v3837_v35 = vmax.f32 %v3374_v23, %v3376_v25 }
 0x1c4   :  { %v1220_v57 = vpop.f32.mrb[88].mxu0  ;;  %v1613_v38 = vpop.f32.mrb[88].mxu1 }
 0x1c5   :  { %v1882_v41 = vmax.f32 %v1846_v16, 0.0  ;;  %v1768_v42 = vmax.f32 %v1220_v57, %v1613_v38  ;;  %v1222_v8 = vpop.f32.mrb[89].mxu0  ;;  %v1615_v1 = vpop.f32.mrb[89].mxu1 }
 0x1c6   :  { %v1223_v5 = vpop.f32.mrb[90].mxu0  ;;  %v1616_v63 = vpop.f32.mrb[90].mxu1 }
 0x1c7   :  { %v2346_v20 = vpack.c.bf16 %v1882_v41, %v1881_v43  ;;  %v1804_v0 = vmax.f32 %v3834_v21, %v1768_v42  ;;  %v1769_v30 = vmax.f32 %v1223_v5, %v1616_v63  ;;  %v1225_v10 = vpop.f32.mrb[91].mxu0  ;;  %v1618_v48 = vpop.f32.mrb[91].mxu1  ;;  %v3838_v5 = vmax.f32 %v3386_v36, %v3388_v37 }
 0x1c9   :  { %2420 = vst [vmem:[%s3769_s6 + $0x18] sm:$0xff] %v2346_v20   ;;  %v1847_v49 = vadd.f32 %v3563_v24, %v1804_v0  ;;  %v1805_v54 = vmax.f32 %v3835_v29, %v1769_v30  ;;  %v3839_v0 = vmax.f32 %v3398_v47, %v3400_v50 }
 0x1cb   :  { %v1848_v52 = vadd.f32 %v3563_v24, %v1805_v54  ;;  %v1883_v6 = vmax.f32 %v1847_v49, 0.0 }
 0x1cc   :  { %v1228_v27 = vpop.f32.mrb[92].mxu0  ;;  %v1621_v28 = vpop.f32.mrb[92].mxu1 }
 0x1cd   :  { %v1884_v55 = vmax.f32 %v1848_v52, 0.0  ;;  %v1770_v56 = vmax.f32 %v1228_v27, %v1621_v28  ;;  %v1230_v7 = vpop.f32.mrb[93].mxu0  ;;  %v1623_v17 = vpop.f32.mrb[93].mxu1 }
 0x1ce   :  { %v1231_v9 = vpop.f32.mrb[94].mxu0  ;;  %v1624_v39 = vpop.f32.mrb[94].mxu1 }
 0x1cf   :  { %v2351_v32 = vpack.c.bf16 %v1884_v55, %v1883_v6  ;;  %v1806_v31 = vmax.f32 %v3836_v15, %v1770_v56  ;;  %v1771_v13 = vmax.f32 %v1231_v9, %v1624_v39  ;;  %v1233_v34 = vpop.f32.mrb[95].mxu0  ;;  %v1626_v62 = vpop.f32.mrb[95].mxu1  ;;  %v3840_v55 = vmax.f32 %v3410_v60, %v3412_v61 }
 0x1d0   :  { %v3841_v9 = vmax.f32 %v3422_v18, %v3424_v19 }
 0x1d1   :  { %2421 = vst [vmem:[%s3769_s6 + $0x20] sm:$0xff] %v2351_v32   ;;  %v1849_v2 = vadd.f32 %v3563_v24, %v1806_v31  ;;  %v1807_v14 = vmax.f32 %v3837_v35, %v1771_v13 }
 0x1d3   :  { %v1850_v3 = vadd.f32 %v3563_v24, %v1807_v14  ;;  %v1885_v38 = vmax.f32 %v1849_v2, 0.0 }
 0x1d4   :  { %v1236_v16 = vpop.f32.mrb[96].mxu0  ;;  %v1629_v57 = vpop.f32.mrb[96].mxu1 }
 0x1d5   :  { %v1886_v11 = vmax.f32 %v1850_v3, 0.0  ;;  %v1772_v12 = vmax.f32 %v1236_v16, %v1629_v57  ;;  %v1238_v43 = vpop.f32.mrb[97].mxu0  ;;  %v1631_v41 = vpop.f32.mrb[97].mxu1  ;;  %v3842_v3 = vmax.f32 %v3434_v40, %v3436_v44 }
 0x1d6   :  { %v1239_v42 = vpop.f32.mrb[98].mxu0  ;;  %v1632_v8 = vpop.f32.mrb[98].mxu1 }
 0x1d7   :  { %v2356_v1 = vpack.c.bf16 %v1886_v11, %v1885_v38  ;;  %v1808_v63 = vmax.f32 %v3838_v5, %v1772_v12  ;;  %v1773_v20 = vmax.f32 %v1239_v42, %v1632_v8  ;;  %v1241_v21 = vpop.f32.mrb[99].mxu0  ;;  %v1634_v23 = vpop.f32.mrb[99].mxu1  ;;  %v3843_v11 = vmax.f32 %v3446_v59, %v3448_v4 }
 0x1d8   :  { %v3844_v23 = vmax.f32 %v3452_v22, %v3454_v26 }
 0x1d9   :  { %2422 = vst [vmem:[%s3769_s6 + $0x28] sm:$0xff] %v2356_v1   ;;  %v1851_v25 = vadd.f32 %v3563_v24, %v1808_v63  ;;  %v1809_v30 = vmax.f32 %v3839_v0, %v1773_v20 }
 0x1db   :  { %v1852_v10 = vadd.f32 %v3563_v24, %v1809_v30  ;;  %v1887_v29 = vmax.f32 %v1851_v25, 0.0 }
 0x1dc   :  { %v1244_v48 = vpop.f32.mrb[100].mxu0  ;;  %v1637_v49 = vpop.f32.mrb[100].mxu1 }
 0x1dd   :  { %v1888_v36 = vmax.f32 %v1852_v10, 0.0  ;;  %v1774_v37 = vmax.f32 %v1244_v48, %v1637_v49  ;;  %v1246_v54 = vpop.f32.mrb[101].mxu0  ;;  %v1639_v52 = vpop.f32.mrb[101].mxu1  ;;  %v3845_v10 = vmax.f32 %v3458_v51, %v3460_v45 }
 0x1de   :  { %v1247_v27 = vpop.f32.mrb[102].mxu0  ;;  %v1640_v28 = vpop.f32.mrb[102].mxu1 }
 0x1df   :  { %v2361_v6 = vpack.c.bf16 %v1888_v36, %v1887_v29  ;;  %v1810_v56 = vmax.f32 %v3840_v55, %v1774_v37  ;;  %v1775_v7 = vmax.f32 %v1247_v27, %v1640_v28  ;;  %v1249_v17 = vpop.f32.mrb[103].mxu0  ;;  %v1642_v47 = vpop.f32.mrb[103].mxu1  ;;  %v3846_v55 = vmax.f32 %v3464_v53, %v3466_v58 }
 0x1e0   :  { %v3847_v47 = vmax.f32 %v3470_v33, %v3472_v46 }
 0x1e1   :  { %2423 = vst [vmem:[%s3769_s6 + $0x30] sm:$0xff] %v2361_v6   ;;  %v1853_v50 = vadd.f32 %v3563_v24, %v1810_v56  ;;  %v1811_v39 = vmax.f32 %v3841_v9, %v1775_v7 }
 0x1e3   :  { %v1854_v32 = vadd.f32 %v3563_v24, %v1811_v39  ;;  %v1889_v13 = vmax.f32 %v1853_v50, 0.0 }
 0x1e4   :  { %v1252_v15 = vpop.f32.mrb[104].mxu0  ;;  %v1645_v31 = vpop.f32.mrb[104].mxu1 }
 0x1e5   :  { %v1890_v60 = vmax.f32 %v1854_v32, 0.0  ;;  %v1776_v61 = vmax.f32 %v1252_v15, %v1645_v31  ;;  %v1254_v34 = vpop.f32.mrb[105].mxu0  ;;  %v1647_v62 = vpop.f32.mrb[105].mxu1 }
 0x1e6   :  { %v1255_v2 = vpop.f32.mrb[106].mxu0  ;;  %v1648_v35 = vpop.f32.mrb[106].mxu1  ;;  %v3848_v62 = vld [vmem:[#allocation2_spill] sm:$0xff] }
 0x1e7   :  { %v2366_v14 = vpack.c.bf16 %v1890_v60, %v1889_v13  ;;  %v1812_v16 = vmax.f32 %v3842_v3, %v1776_v61  ;;  %v1777_v57 = vmax.f32 %v1255_v2, %v1648_v35  ;;  %v1257_v38 = vpop.f32.mrb[107].mxu0  ;;  %v1650_v18 = vpop.f32.mrb[107].mxu1  ;;  %v3849_v2 = vld [vmem:[#allocation3_spill] sm:$0xff] }
 0x1e8   :  { %v3850_v35 = vmax.f32 %v3848_v62, %v3849_v2  ;;  %v3852_v38 = vld [vmem:[#allocation5_spill] sm:$0xff] }
 0x1e9   :  { %2424 = vst [vmem:[%s3769_s6 + $0x38] sm:$0xff] %v2366_v14   ;;  %v1855_v19 = vadd.f32 %v3563_v24, %v1812_v16  ;;  %v1813_v12 = vmax.f32 %v3843_v11, %v1777_v57  ;;  %v3851_v57 = vld [vmem:[#allocation4_spill] sm:$0xff] }
 0x1ea   :  { %v3853_v18 = vmax.f32 %v3851_v57, %v3852_v38 }
 0x1eb   :  { %v1856_v43 = vadd.f32 %v3563_v24, %v1813_v12  ;;  %v1891_v8 = vmax.f32 %v1855_v19, 0.0 }
 0x1ec   :  { %v1260_v41 = vpop.f32.mrb[108].mxu0  ;;  %v1653_v42 = vpop.f32.mrb[108].mxu1 }
 0x1ed   :  { %v1892_v40 = vmax.f32 %v1856_v43, 0.0  ;;  %v1778_v44 = vmax.f32 %v1260_v41, %v1653_v42  ;;  %v1262_v1 = vpop.f32.mrb[109].mxu0  ;;  %v1655_v5 = vpop.f32.mrb[109].mxu1 }
 0x1ee   :  { %v1263_v63 = vpop.f32.mrb[110].mxu0  ;;  %v1656_v20 = vpop.f32.mrb[110].mxu1 }
 0x1ef   :  { %v2371_v21 = vpack.c.bf16 %v1892_v40, %v1891_v8  ;;  %v1814_v25 = vmax.f32 %v3844_v23, %v1778_v44  ;;  %v1779_v0 = vmax.f32 %v1263_v63, %v1656_v20  ;;  %v1265_v30 = vpop.f32.mrb[111].mxu0  ;;  %v1658_v59 = vpop.f32.mrb[111].mxu1  ;;  %v3854_v20 = vld [vmem:[#allocation6_spill] sm:$0xff] }
 0x1f1   :  { %2425 = vst [vmem:[%s3769_s6 + $0x40] sm:$0xff] %v2371_v21   ;;  %v1857_v4 = vadd.f32 %v3563_v24, %v1814_v25  ;;  %v1815_v48 = vmax.f32 %v3845_v10, %v1779_v0  ;;  %v3855_v21 = vld [vmem:[#allocation7_spill] sm:$0xff]  ;;  %v3857_v10 = vld [vmem:[#allocation8_spill] sm:$0xff] }
 0x1f2   :  { %v3856_v23 = vmax.f32 %v3854_v20, %v3855_v21 }
 0x1f3   :  { %v1858_v49 = vadd.f32 %v3563_v24, %v1815_v48  ;;  %v1893_v37 = vmax.f32 %v1857_v4, 0.0  ;;  %v3858_v48 = vld [vmem:[#allocation9_spill] sm:$0xff] }
 0x1f4   :  { %v1268_v29 = vpop.f32.mrb[112].mxu0  ;;  %v1661_v36 = vpop.f32.mrb[112].mxu1 }
 0x1f5   :  { %v1894_v22 = vmax.f32 %v1858_v49, 0.0  ;;  %v1780_v26 = vmax.f32 %v1268_v29, %v1661_v36  ;;  %v1270_v54 = vpop.f32.mrb[113].mxu0  ;;  %v1663_v52 = vpop.f32.mrb[113].mxu1  ;;  %v3859_v49 = vmax.f32 %v3857_v10, %v3858_v48 }
 0x1f6   :  { %v1271_v27 = vpop.f32.mrb[114].mxu0  ;;  %v1664_v28 = vpop.f32.mrb[114].mxu1 }
 0x1f7   :  { %v2376_v6 = vpack.c.bf16 %v1894_v22, %v1893_v37  ;;  %v1816_v56 = vmax.f32 %v3846_v55, %v1780_v26  ;;  %v1781_v7 = vmax.f32 %v1271_v27, %v1664_v28  ;;  %v1273_v17 = vpop.f32.mrb[115].mxu0  ;;  %v1666_v45 = vpop.f32.mrb[115].mxu1 }
 0x1f8   :  { %v3861_v17 = vld [vmem:[#allocation11_spill] sm:$0xff] }
 0x1f9   :  { %2426 = vst [vmem:[%s3769_s6 + $0x48] sm:$0xff] %v2376_v6   ;;  %v1859_v51 = vadd.f32 %v3563_v24, %v1816_v56  ;;  %v1817_v50 = vmax.f32 %v3847_v47, %v1781_v7  ;;  %v3860_v7 = vld [vmem:[#allocation10_spill] sm:$0xff] }
 0x1fa   :  { %v3862_v45 = vmax.f32 %v3860_v7, %v3861_v17 }
 0x1fb   :  { %v1860_v9 = vadd.f32 %v3563_v24, %v1817_v50  ;;  %v1895_v15 = vmax.f32 %v1859_v51, 0.0 }
 0x1fc   :  { %v1276_v39 = vpop.f32.mrb[116].mxu0  ;;  %v1669_v32 = vpop.f32.mrb[116].mxu1 }
 0x1fd   :  { %v1896_v53 = vmax.f32 %v1860_v9, 0.0  ;;  %v1782_v58 = vmax.f32 %v1276_v39, %v1669_v32  ;;  %v1278_v31 = vpop.f32.mrb[117].mxu0  ;;  %v1671_v13 = vpop.f32.mrb[117].mxu1  ;;  %v3863_v32 = vld [vmem:[#allocation12_spill] sm:$0xff] }
 0x1fe   :  { %v1279_v60 = vpop.f32.mrb[118].mxu0  ;;  %v1672_v61 = vpop.f32.mrb[118].mxu1 }
 0x1ff   :  { %v2381_v34 = vpack.c.bf16 %v1896_v53, %v1895_v15  ;;  %v1818_v14 = vmax.f32 %v3850_v35, %v1782_v58  ;;  %v1783_v3 = vmax.f32 %v1279_v60, %v1672_v61  ;;  %v1281_v16 = vpop.f32.mrb[119].mxu0  ;;  %v1674_v33 = vpop.f32.mrb[119].mxu1  ;;  %v3864_v15 = vld [vmem:[#allocation13_spill] sm:$0xff] }
 0x200   :  { %v3865_v53 = vmax.f32 %v3863_v32, %v3864_v15  ;;  %v3866_v33 = vld [vmem:[#allocation14_spill] sm:$0xff] }
 0x201   :  { %2427 = vst [vmem:[%s3769_s6 + $0x50] sm:$0xff] %v2381_v34   ;;  %v1861_v46 = vadd.f32 %v3563_v24, %v1818_v14  ;;  %v1819_v19 = vmax.f32 %v3853_v18, %v1783_v3 }
 0x203   :  { %v1862_v11 = vadd.f32 %v3563_v24, %v1819_v19  ;;  %v1897_v41 = vmax.f32 %v1861_v46, 0.0  ;;  %v3867_v46 = vld [vmem:[#allocation15_spill] sm:$0xff] }
 0x204   :  { %v1284_v12 = vpop.f32.mrb[120].mxu0  ;;  %v1677_v43 = vpop.f32.mrb[120].mxu1  ;;  %v3868_v57 = vmax.f32 %v3866_v33, %v3867_v46 }
 0x205   :  { %v1898_v42 = vmax.f32 %v1862_v11, 0.0  ;;  %v1784_v8 = vmax.f32 %v1284_v12, %v1677_v43  ;;  %v1286_v40 = vpop.f32.mrb[121].mxu0  ;;  %v1679_v44 = vpop.f32.mrb[121].mxu1  ;;  %v3869_v43 = vld [vmem:[#allocation16_spill] sm:$0xff] }
 0x206   :  { %v1287_v1 = vpop.f32.mrb[122].mxu0  ;;  %v1680_v5 = vpop.f32.mrb[122].mxu1 }
 0x207   :  { %v2386_v63 = vpack.c.bf16 %v1898_v42, %v1897_v41  ;;  %v1820_v25 = vmax.f32 %v3856_v23, %v1784_v8  ;;  %v1785_v0 = vmax.f32 %v1287_v1, %v1680_v5  ;;  %v1289_v30 = vpop.f32.mrb[123].mxu0  ;;  %v1682_v59 = vpop.f32.mrb[123].mxu1  ;;  %v3870_v41 = vld [vmem:[#allocation17_spill] sm:$0xff] }
 0x208   :  { %v3871_v42 = vmax.f32 %v3869_v43, %v3870_v41  ;;  %v3872_v59 = vld [vmem:[#allocation18_spill] sm:$0xff] }
 0x209   :  { %2428 = vst [vmem:[%s3769_s6 + $0x58] sm:$0xff] %v2386_v63   ;;  %v1863_v4 = vadd.f32 %v3563_v24, %v1820_v25  ;;  %v1821_v29 = vmax.f32 %v3859_v49, %v1785_v0 }
 0x20b   :  { %v1864_v36 = vadd.f32 %v3563_v24, %v1821_v29  ;;  %v1899_v26 = vmax.f32 %v1863_v4, 0.0  ;;  %v3873_v4 = vld [vmem:[#allocation19_spill] sm:$0xff] }
 0x20c   :  { %v1292_v37 = vpop.f32.mrb[124].mxu0  ;;  %v1685_v22 = vpop.f32.mrb[124].mxu1  ;;  %v3874_v10 = vmax.f32 %v3872_v59, %v3873_v4 }
 0x20d   :  { %v1900_v54 = vmax.f32 %v1864_v36, 0.0  ;;  %v1786_v52 = vmax.f32 %v1292_v37, %v1685_v22  ;;  %v1294_v27 = vpop.f32.mrb[125].mxu0  ;;  %v1687_v28 = vpop.f32.mrb[125].mxu1  ;;  %v3875_v22 = vld [vmem:[#allocation20_spill] sm:$0xff] }
 0x20e   :  { %v1295_v6 = vpop.f32.mrb[126].mxu0  ;;  %v1688_v55 = vpop.f32.mrb[126].mxu1 }
 0x20f   :  { %v2391_v56 = vpack.c.bf16 %v1900_v54, %v1899_v26  ;;  %v1822_v51 = vmax.f32 %v3862_v45, %v1786_v52  ;;  %v1787_v47 = vmax.f32 %v1295_v6, %v1688_v55  ;;  %v1297_v50 = vpop.f32.mrb[127].mxu0  ;;  %v1690_v9 = vpop.f32.mrb[127].mxu1  ;;  %v3876_v26 = vld [vmem:[#allocation21_spill] sm:$0xff] }
 0x210   :  { %v3877_v54 = vmax.f32 %v3875_v22, %v3876_v26  ;;  %v3878_v9 = vld [vmem:[#allocation22_spill] sm:$0xff] }
 0x211   :  { %2429 = vst [vmem:[%s3769_s6 + $0x60] sm:$0xff] %v2391_v56   ;;  %v1865_v39 = vadd.f32 %v3563_v24, %v1822_v51  ;;  %v1823_v58 = vmax.f32 %v3865_v53, %v1787_v47 }
 0x213   :  { %v1866_v31 = vadd.f32 %v3563_v24, %v1823_v58  ;;  %v1901_v61 = vmax.f32 %v1865_v39, 0.0  ;;  %v3879_v39 = vld [vmem:[#allocation23_spill] sm:$0xff] }
 0x214   :  { %v1300_v13 = vpop.f32.mrb[128].mxu0  ;;  %v1693_v60 = vpop.f32.mrb[128].mxu1  ;;  %v3880_v32 = vmax.f32 %v3878_v9, %v3879_v39 }
 0x215   :  { %v1902_v34 = vmax.f32 %v1866_v31, 0.0  ;;  %v1788_v62 = vmax.f32 %v1300_v13, %v1693_v60  ;;  %v1302_v2 = vpop.f32.mrb[129].mxu0  ;;  %v1695_v35 = vpop.f32.mrb[129].mxu1  ;;  %v3881_v60 = vld [vmem:[#allocation24_spill] sm:$0xff] }
 0x216   :  { %v1303_v14 = vpop.f32.mrb[130].mxu0  ;;  %v1696_v3 = vpop.f32.mrb[130].mxu1 }
 0x217   :  { %v2396_v16 = vpack.c.bf16 %v1902_v34, %v1901_v61  ;;  %v1824_v38 = vmax.f32 %v3868_v57, %v1788_v62  ;;  %v1789_v18 = vmax.f32 %v1303_v14, %v1696_v3  ;;  %v1305_v19 = vpop.f32.mrb[131].mxu0  ;;  %v1698_v11 = vpop.f32.mrb[131].mxu1  ;;  %v3882_v61 = vld [vmem:[#allocation25_spill] sm:$0xff] }
 0x218   :  { %v3883_v34 = vmax.f32 %v3881_v60, %v3882_v61  ;;  %v3884_v11 = vld [vmem:[#allocation26_spill] sm:$0xff] }
 0x219   :  { %2430 = vst [vmem:[%s3769_s6 + $0x68] sm:$0xff] %v2396_v16   ;;  %v1867_v12 = vadd.f32 %v3563_v24, %v1824_v38  ;;  %v1825_v8 = vmax.f32 %v3871_v42, %v1789_v18 }
 0x21b   :  { %v1868_v40 = vadd.f32 %v3563_v24, %v1825_v8  ;;  %v1903_v5 = vmax.f32 %v1867_v12, 0.0  ;;  %v3885_v12 = vld [vmem:[#allocation27_spill] sm:$0xff] }
 0x21c   :  { %v1308_v44 = vpop.f32.mrb[132].mxu0  ;;  %v1701_v1 = vpop.f32.mrb[132].mxu1  ;;  %v3886_v43 = vmax.f32 %v3884_v11, %v3885_v12 }
 0x21d   :  { %v1904_v63 = vmax.f32 %v1868_v40, 0.0  ;;  %v1790_v20 = vmax.f32 %v1308_v44, %v1701_v1  ;;  %v1310_v21 = vpop.f32.mrb[133].mxu0  ;;  %v1703_v23 = vpop.f32.mrb[133].mxu1  ;;  %v3887_v1 = vld [vmem:[#allocation28_spill] sm:$0xff] }
 0x21e   :  { %v1311_v25 = vpop.f32.mrb[134].mxu0  ;;  %v1704_v0 = vpop.f32.mrb[134].mxu1 }
 0x21f   :  { %v2401_v30 = vpack.c.bf16 %v1904_v63, %v1903_v5  ;;  %v1826_v48 = vmax.f32 %v3874_v10, %v1790_v20  ;;  %v1791_v49 = vmax.f32 %v1311_v25, %v1704_v0  ;;  %v1313_v29 = vpop.f32.mrb[135].mxu0  ;;  %v1706_v36 = vpop.f32.mrb[135].mxu1  ;;  %v3888_v5 = vld [vmem:[#allocation29_spill] sm:$0xff] }
 0x220   :  { %v3889_v63 = vmax.f32 %v3887_v1, %v3888_v5 }
 0x221   :  { %2431 = vst [vmem:[%s3769_s6 + $0x70] sm:$0xff] %v2401_v30   ;;  %v1869_v37 = vadd.f32 %v3563_v24, %v1826_v48  ;;  %v1827_v52 = vmax.f32 %v3877_v54, %v1791_v49 }
 0x223   :  { %v1870_v27 = vadd.f32 %v3563_v24, %v1827_v52  ;;  %v1905_v55 = vmax.f32 %v1869_v37, 0.0 }
 0x224   :  { %v1316_v28 = vpop.f32.mrb[136].mxu0  ;;  %v1709_v6 = vpop.f32.mrb[136].mxu1 }
 0x225   :  { %v1906_v56 = vmax.f32 %v1870_v27, 0.0  ;;  %v1792_v7 = vmax.f32 %v1316_v28, %v1709_v6  ;;  %v1318_v17 = vpop.f32.mrb[137].mxu0  ;;  %v1711_v45 = vpop.f32.mrb[137].mxu1 }
 0x226   :  { %v1319_v51 = vpop.f32.mrb[138].mxu0  ;;  %v1712_v47 = vpop.f32.mrb[138].mxu1 }
 0x227   :  { %v2406_v50 = vpack.c.bf16 %v1906_v56, %v1905_v55  ;;  %v1828_v15 = vmax.f32 %v3880_v32, %v1792_v7  ;;  %v1793_v53 = vmax.f32 %v1319_v51, %v1712_v47  ;;  %v1321_v58 = vpop.f32.mrb[139].mxu0  ;;  %v1714_v31 = vpop.f32.mrb[139].mxu1 }
 0x229   :  { %2432 = vst [vmem:[%s3769_s6 + $0x78] sm:$0xff] %v2406_v50   ;;  %v1871_v13 = vadd.f32 %v3563_v24, %v1828_v15  ;;  %v1829_v62 = vmax.f32 %v3883_v34, %v1793_v53 }
 0x22b   :  { %v1872_v2 = vadd.f32 %v3563_v24, %v1829_v62  ;;  %v1907_v3 = vmax.f32 %v1871_v13, 0.0 }
 0x22c   :  { %v1324_v35 = vpop.f32.mrb[140].mxu0  ;;  %v1717_v14 = vpop.f32.mrb[140].mxu1 }
 0x22d   :  { %v1908_v16 = vmax.f32 %v1872_v2, 0.0  ;;  %v1794_v33 = vmax.f32 %v1324_v35, %v1717_v14  ;;  %v1326_v46 = vpop.f32.mrb[141].mxu0  ;;  %v1719_v57 = vpop.f32.mrb[141].mxu1 }
 0x22e   :  { %v1327_v38 = vpop.f32.mrb[142].mxu0  ;;  %v1720_v18 = vpop.f32.mrb[142].mxu1 }
 0x22f   :  { %v2411_v19 = vpack.c.bf16 %v1908_v16, %v1907_v3  ;;  %v1830_v41 = vmax.f32 %v3886_v43, %v1794_v33  ;;  %v1795_v42 = vmax.f32 %v1327_v38, %v1720_v18  ;;  %v1329_v8 = vpop.f32.mrb[143].mxu0  ;;  %v1722_v40 = vpop.f32.mrb[143].mxu1 }
 0x231   :  { %2433 = vst [vmem:[%s3769_s6 + $0x80] sm:$0xff] %v2411_v19   ;;  %v1873_v44 = vadd.f32 %v3563_v24, %v1830_v41  ;;  %v1831_v20 = vmax.f32 %v3889_v63, %v1795_v42 }
 0x233   :  { %v1874_v21 = vadd.f32 %v3563_v24, %v1831_v20  ;;  %v1909_v23 = vmax.f32 %v1873_v44, 0.0 }
 0x235   :  { %v1910_v25 = vmax.f32 %v1874_v21, 0.0 }
 0x237   :  { %v2416_v0 = vpack.c.bf16 %v1910_v25, %v1909_v23 }
 0x239   :  { %2434 = vst [vmem:[%s3769_s6 + $0x88] sm:$0xff] %v2416_v0  }

// kernel: net_forward.6
= control target key start
LH: loop header
LB: loop body
LE: loop exit
PB: predicated region body
PF: predicated region fallthrough
CT: control target
= control target key end

     0   :  { %s1767_s4 = inlined_call_operand.vmem [shape: bf16[512,128], index: 4, kind: input, shape index: {}]   ;;  %s1768_s0 = inlined_call_operand.vmem [shape: bf16[32,512], index: 0, kind: input, shape index: {}]   ;;  %s1769_s1 = inlined_call_operand.vmem [shape: bf16[32,512], index: 1, kind: input, shape index: {}]   ;;  %s1770_s2 = inlined_call_operand.vmem [shape: bf16[32,512], index: 2, kind: input, shape index: {}]   ;;  %s1771_s3 = inlined_call_operand.vmem [shape: bf16[32,512], index: 3, kind: input, shape index: {}]   ;;  %s1772_s5 = inlined_call_operand.vmem [shape: f32[1,128], index: 5, kind: input, shape index: {}]   ;;  %s1773_s6 = inlined_call_operand.vmem [shape: bf16[32,128], index: 6, kind: output, shape index: {}]  }
   0x1   :  { %v1341_v0 = vld [vmem:[%s1767_s4 + $0x40] sm:$0xff]   ;;  %v1364_v4 = vld [vmem:[%s1767_s4 + $0x48] sm:$0xff]   ;;  %v1388_v8 = vld [vmem:[%s1767_s4 + $0x50] sm:$0xff]  }
   0x2   :  { %v1346_v1 = vld [vmem:[%s1767_s4 + $0xc0] sm:$0xff]   ;;  %999 = vmatprep.subr.bf16.mxu0 %v1341_v0  ;;  %v1370_v5 = vld [vmem:[%s1767_s4 + $0xc8] sm:$0xff]   ;;  %v1394_v9 = vld [vmem:[%s1767_s4 + $0xd0] sm:$0xff]  }
   0x3   :  { %v1352_v2 = vld [vmem:[%s1767_s4] sm:$0xff]   ;;  %1027 = vmatprep.subr.bf16.mxu1 %v1346_v1  ;;  %v1376_v6 = vld [vmem:[%s1767_s4 + $0x8] sm:$0xff]   ;;  %v1400_v10 = vld [vmem:[%s1767_s4 + $0x10] sm:$0xff]  }
   0x4   :  { %v1358_v3 = vld [vmem:[%s1767_s4 + $0x80] sm:$0xff]   ;;  %1000 = vmatpush3.bf16.msra.mxu0 %v1352_v2  ;;  %v1382_v7 = vld [vmem:[%s1767_s4 + $0x88] sm:$0xff]   ;;  %v1406_v11 = vld [vmem:[%s1767_s4 + $0x90] sm:$0xff]  }
   0x5   :  { %1028 = vmatpush3.bf16.msra.mxu1 %v1358_v3  ;;  %1001 = vmatprep.subr.bf16.mxu0 %v1364_v4  ;;  %v1412_v12 = vld [vmem:[%s1767_s4 + $0x58] sm:$0xff]   ;;  %v1436_v16 = vld [vmem:[%s1767_s4 + $0x60] sm:$0xff]   ;;  %v1460_v20 = vld [vmem:[%s1767_s4 + $0x68] sm:$0xff]  }
   0x6   :  { %1029 = vmatprep.subr.bf16.mxu1 %v1370_v5  ;;  %v1418_v13 = vld [vmem:[%s1767_s4 + $0xd8] sm:$0xff]   ;;  %v1442_v17 = vld [vmem:[%s1767_s4 + $0xe0] sm:$0xff]   ;;  %v1466_v21 = vld [vmem:[%s1767_s4 + $0xe8] sm:$0xff]  }
   0x7   :  { %v1424_v14 = vld [vmem:[%s1767_s4 + $0x18] sm:$0xff]   ;;  %v1448_v18 = vld [vmem:[%s1767_s4 + $0x20] sm:$0xff]   ;;  %v1472_v22 = vld [vmem:[%s1767_s4 + $0x28] sm:$0xff]  }
   0x8   :  { %1002 = vmatpush3.bf16.msra.mxu0 %v1376_v6  ;;  %v1430_v15 = vld [vmem:[%s1767_s4 + $0x98] sm:$0xff]   ;;  %v1454_v19 = vld [vmem:[%s1767_s4 + $0xa0] sm:$0xff]   ;;  %v1478_v23 = vld [vmem:[%s1767_s4 + $0xa8] sm:$0xff]  }
   0x9   :  { %1030 = vmatpush3.bf16.msra.mxu1 %v1382_v7  ;;  %1003 = vmatprep.subr.bf16.mxu0 %v1388_v8  ;;  %v1484_v24 = vld [vmem:[%s1767_s4 + $0x70] sm:$0xff]   ;;  %v1508_v28 = vld [vmem:[%s1767_s4 + $0x78] sm:$0xff]  }
   0xa   :  { %1031 = vmatprep.subr.bf16.mxu1 %v1394_v9  ;;  %v1490_v25 = vld [vmem:[%s1767_s4 + $0xf0] sm:$0xff]   ;;  %v1514_v29 = vld [vmem:[%s1767_s4 + $0xf8] sm:$0xff]  }
   0xb   :  { %v1496_v26 = vld [vmem:[%s1767_s4 + $0x30] sm:$0xff]   ;;  %v1520_v30 = vld [vmem:[%s1767_s4 + $0x38] sm:$0xff]  }
   0xc   :  { %1004 = vmatpush3.bf16.msra.mxu0 %v1400_v10  ;;  %v1502_v27 = vld [vmem:[%s1767_s4 + $0xb0] sm:$0xff]   ;;  %v1526_v31 = vld [vmem:[%s1767_s4 + $0xb8] sm:$0xff]  }
   0xd   :  { %1032 = vmatpush3.bf16.msra.mxu1 %v1406_v11  ;;  %1005 = vmatprep.subr.bf16.mxu0 %v1412_v12  ;;  %v1255_v32 = vld [vmem:[%s1768_s0] ss:$16 sps:$4 sm:$0xff]   ;;  %v1257_v33 = vld [vmem:[%s1768_s0 + $0x4] ss:$16 sps:$4 sm:$0xff]   ;;  %v1258_v34 = vld [vmem:[%s1768_s0 + $0x8] ss:$16 sps:$4 sm:$0xff]  }
   0xe   :  { %1033 = vmatprep.subr.bf16.mxu1 %v1418_v13  ;;  %v1260_v35 = vld [vmem:[%s1768_s0 + $0xc] ss:$16 sps:$4 sm:$0xff]   ;;  %360 = vmatprep.mubr.bf16.mxu0 %v1257_v33  ;;  %v1261_v36 = vld [vmem:[%s1768_s0 + $0x24] ss:$16 sps:$4 sm:$0xff]   ;;  %v1265_v38 = vld [vmem:[%s1768_s0 + $0x20] ss:$16 sps:$4 sm:$0xff]  }
   0xf   :  { %409 = vmatprep.mubr.bf16.mxu1 %v1260_v35  ;;  %v1263_v37 = vld [vmem:[%s1768_s0 + $0x2c] ss:$16 sps:$4 sm:$0xff]   ;;  %v1266_v39 = vld [vmem:[%s1768_s0 + $0x28] ss:$16 sps:$4 sm:$0xff]   ;;  %v1269_v40 = vld [vmem:[%s1769_s1 + $0x4] ss:$16 sps:$4 sm:$0xff]  }
  0x10   :  { %1006 = vmatpush3.bf16.msra.mxu0 %v1424_v14  ;;  %v1272_v41 = vld [vmem:[%s1769_s1 + $0xc] ss:$16 sps:$4 sm:$0xff]   ;;  %v1267_v42 = vld [vmem:[%s1769_s1] ss:$16 sps:$4 sm:$0xff]   ;;  %v1270_v43 = vld [vmem:[%s1769_s1 + $0x8] ss:$16 sps:$4 sm:$0xff]  }
  0x11   :  { %1034 = vmatpush3.bf16.msra.mxu1 %v1430_v15  ;;  %1007 = vmatprep.subr.bf16.mxu0 %v1436_v16  ;;  %v1273_v44 = vld [vmem:[%s1769_s1 + $0x24] ss:$16 sps:$4 sm:$0xff]   ;;  %v1275_v45 = vld [vmem:[%s1769_s1 + $0x2c] ss:$16 sps:$4 sm:$0xff]   ;;  %v1277_v46 = vld [vmem:[%s1769_s1 + $0x20] ss:$16 sps:$4 sm:$0xff]  }
  0x12   :  { %1035 = vmatprep.subr.bf16.mxu1 %v1442_v17  ;;  %v1278_v47 = vld [vmem:[%s1769_s1 + $0x28] ss:$16 sps:$4 sm:$0xff]   ;;  %v1281_v48 = vld [vmem:[%s1770_s2 + $0x4] ss:$16 sps:$4 sm:$0xff]   ;;  %v1284_v49 = vld [vmem:[%s1770_s2 + $0xc] ss:$16 sps:$4 sm:$0xff]  }
  0x13   :  { %v1279_v50 = vld [vmem:[%s1770_s2] ss:$16 sps:$4 sm:$0xff]   ;;  %v1282_v51 = vld [vmem:[%s1770_s2 + $0x8] ss:$16 sps:$4 sm:$0xff]   ;;  %v1285_v52 = vld [vmem:[%s1770_s2 + $0x24] ss:$16 sps:$4 sm:$0xff]  }
  0x14   :  { %1008 = vmatpush3.bf16.msra.mxu0 %v1448_v18  ;;  %v1287_v53 = vld [vmem:[%s1770_s2 + $0x2c] ss:$16 sps:$4 sm:$0xff]   ;;  %v1289_v54 = vld [vmem:[%s1770_s2 + $0x20] ss:$16 sps:$4 sm:$0xff]   ;;  %v1290_v55 = vld [vmem:[%s1770_s2 + $0x28] ss:$16 sps:$4 sm:$0xff]  }
  0x15   :  { %1036 = vmatpush3.bf16.msra.mxu1 %v1454_v19  ;;  %1009 = vmatprep.subr.bf16.mxu0 %v1460_v20  ;;  %v1293_v56 = vld [vmem:[%s1771_s3 + $0x4] ss:$16 sps:$4 sm:$0xff]   ;;  %v1296_v57 = vld [vmem:[%s1771_s3 + $0xc] ss:$16 sps:$4 sm:$0xff]   ;;  %v1291_v58 = vld [vmem:[%s1771_s3] ss:$16 sps:$4 sm:$0xff]  }
  0x16   :  { %1037 = vmatprep.subr.bf16.mxu1 %v1466_v21  ;;  %v1294_v59 = vld [vmem:[%s1771_s3 + $0x8] ss:$16 sps:$4 sm:$0xff]   ;;  %v1297_v60 = vld [vmem:[%s1771_s3 + $0x24] ss:$16 sps:$4 sm:$0xff]   ;;  %v1299_v61 = vld [vmem:[%s1771_s3 + $0x2c] ss:$16 sps:$4 sm:$0xff]  }
  0x17   :  { %v1301_v62 = vld [vmem:[%s1771_s3 + $0x20] ss:$16 sps:$4 sm:$0xff]   ;;  %v1302_v63 = vld [vmem:[%s1771_s3 + $0x28] ss:$16 sps:$4 sm:$0xff]  }
  0x18   :  { %1010 = vmatpush3.bf16.msra.mxu0 %v1472_v22 }
  0x19   :  { %1038 = vmatpush3.bf16.msra.mxu1 %v1478_v23  ;;  %1011 = vmatprep.subr.bf16.mxu0 %v1484_v24 }
  0x1a   :  { %1039 = vmatprep.subr.bf16.mxu1 %v1490_v25 }
  0x1c   :  { %1012 = vmatpush3.bf16.msra.mxu0 %v1496_v26 }
  0x1d   :  { %1040 = vmatpush3.bf16.msra.mxu1 %v1502_v27  ;;  %1013 = vmatprep.subr.bf16.mxu0 %v1508_v28 }
  0x1e   :  { %1041 = vmatprep.subr.bf16.mxu1 %v1514_v29 }
  0x20   :  { %1014 = vmatpush3.bf16.msra.mxu0 %v1520_v30 }
  0x21   :  { %1042 = vmatpush3.bf16.msra.mxu1 %v1526_v31  ;;  %1055 = vmatprep.subr.bf16.mxu0 %v1341_v0 }
  0x22   :  { %1083 = vmatprep.subr.bf16.mxu1 %v1346_v1 }
  0x23   :  { %361 = vmatmul.mubr.bf16.vlgmr.msra.gmra.mrb[0].mxu0 %v1255_v32 }
  0x24   :  { %410 = vmatmul.mubr.bf16.vlgmr.msra.gmra.mrb[0].mxu1 %v1258_v34  ;;  %1056 = vmatpush3.bf16.msra.mxu0 %v1352_v2 }
  0x25   :  { %1084 = vmatpush3.bf16.msra.mxu1 %v1358_v3  ;;  %1057 = vmatprep.subr.bf16.mxu0 %v1364_v4 }
  0x26   :  { %1085 = vmatprep.subr.bf16.mxu1 %v1370_v5  ;;  %368 = vmatprep.mubr.bf16.mxu0 %v1261_v36 }
  0x27   :  { %417 = vmatprep.mubr.bf16.mxu1 %v1263_v37 }
  0x28   :  { %1058 = vmatpush3.bf16.msra.mxu0 %v1376_v6 }
  0x29   :  { %1086 = vmatpush3.bf16.msra.mxu1 %v1382_v7  ;;  %1059 = vmatprep.subr.bf16.mxu0 %v1388_v8 }
  0x2a   :  { %1087 = vmatprep.subr.bf16.mxu1 %v1394_v9 }
  0x2b   :  { %369 = vmatmul.mubr.bf16.gmra.mrb[4].mxu0 %v1265_v38 }
  0x2c   :  { %1060 = vmatpush3.bf16.msra.mxu0 %v1400_v10  ;;  %418 = vmatmul.mubr.bf16.gmra.mrb[4].mxu1 %v1266_v39 }
  0x2d   :  { %1088 = vmatpush3.bf16.msra.mxu1 %v1406_v11  ;;  %1061 = vmatprep.subr.bf16.mxu0 %v1412_v12 }
  0x2e   :  { %1089 = vmatprep.subr.bf16.mxu1 %v1418_v13  ;;  %506 = vmatprep.mubr.bf16.mxu0 %v1269_v40 }
  0x2f   :  { %555 = vmatprep.mubr.bf16.mxu1 %v1272_v41 }
  0x30   :  { %1062 = vmatpush3.bf16.msra.mxu0 %v1424_v14 }
  0x31   :  { %1090 = vmatpush3.bf16.msra.mxu1 %v1430_v15  ;;  %1063 = vmatprep.subr.bf16.mxu0 %v1436_v16 }
  0x32   :  { %1091 = vmatprep.subr.bf16.mxu1 %v1442_v17 }
  0x34   :  { %1064 = vmatpush3.bf16.msra.mxu0 %v1448_v18 }
  0x35   :  { %1092 = vmatpush3.bf16.msra.mxu1 %v1454_v19  ;;  %1065 = vmatprep.subr.bf16.mxu0 %v1460_v20 }
  0x36   :  { %1093 = vmatprep.subr.bf16.mxu1 %v1466_v21 }
  0x38   :  { %1066 = vmatpush3.bf16.msra.mxu0 %v1472_v22 }
  0x39   :  { %1094 = vmatpush3.bf16.msra.mxu1 %v1478_v23  ;;  %1067 = vmatprep.subr.bf16.mxu0 %v1484_v24 }
  0x3a   :  { %1095 = vmatprep.subr.bf16.mxu1 %v1490_v25 }
  0x3c   :  { %1068 = vmatpush3.bf16.msra.mxu0 %v1496_v26 }
  0x3d   :  { %1096 = vmatpush3.bf16.msra.mxu1 %v1502_v27  ;;  %1069 = vmatprep.subr.bf16.mxu0 %v1508_v28 }
  0x3e   :  { %1097 = vmatprep.subr.bf16.mxu1 %v1514_v29 }
  0x40   :  { %1070 = vmatpush3.bf16.msra.mxu0 %v1520_v30 }
  0x41   :  { %1098 = vmatpush3.bf16.msra.mxu1 %v1526_v31  ;;  %1111 = vmatprep.subr.bf16.mxu0 %v1341_v0 }
  0x42   :  { %1139 = vmatprep.subr.bf16.mxu1 %v1346_v1 }
  0x43   :  { %507 = vmatmul.mubr.bf16.vlgmr.msra.gmra.mrb[8].mxu0 %v1267_v42 }
  0x44   :  { %556 = vmatmul.mubr.bf16.vlgmr.msra.gmra.mrb[8].mxu1 %v1270_v43  ;;  %1112 = vmatpush3.bf16.msra.mxu0 %v1352_v2 }
  0x45   :  { %1140 = vmatpush3.bf16.msra.mxu1 %v1358_v3  ;;  %1113 = vmatprep.subr.bf16.mxu0 %v1364_v4 }
  0x46   :  { %1141 = vmatprep.subr.bf16.mxu1 %v1370_v5  ;;  %514 = vmatprep.mubr.bf16.mxu0 %v1273_v44 }
  0x47   :  { %563 = vmatprep.mubr.bf16.mxu1 %v1275_v45 }
  0x48   :  { %1114 = vmatpush3.bf16.msra.mxu0 %v1376_v6 }
  0x49   :  { %1142 = vmatpush3.bf16.msra.mxu1 %v1382_v7  ;;  %1115 = vmatprep.subr.bf16.mxu0 %v1388_v8 }
  0x4a   :  { %1143 = vmatprep.subr.bf16.mxu1 %v1394_v9 }
  0x4b   :  { %515 = vmatmul.mubr.bf16.gmra.mrb[12].mxu0 %v1277_v46 }
  0x4c   :  { %564 = vmatmul.mubr.bf16.gmra.mrb[12].mxu1 %v1278_v47  ;;  %1116 = vmatpush3.bf16.msra.mxu0 %v1400_v10 }
  0x4d   :  { %1144 = vmatpush3.bf16.msra.mxu1 %v1406_v11  ;;  %1117 = vmatprep.subr.bf16.mxu0 %v1412_v12 }
  0x4e   :  { %1145 = vmatprep.subr.bf16.mxu1 %v1418_v13  ;;  %652 = vmatprep.mubr.bf16.mxu0 %v1281_v48 }
  0x4f   :  { %701 = vmatprep.mubr.bf16.mxu1 %v1284_v49 }
  0x50   :  { %1118 = vmatpush3.bf16.msra.mxu0 %v1424_v14 }
  0x51   :  { %1146 = vmatpush3.bf16.msra.mxu1 %v1430_v15  ;;  %1119 = vmatprep.subr.bf16.mxu0 %v1436_v16 }
  0x52   :  { %1147 = vmatprep.subr.bf16.mxu1 %v1442_v17 }
  0x54   :  { %1120 = vmatpush3.bf16.msra.mxu0 %v1448_v18 }
  0x55   :  { %1148 = vmatpush3.bf16.msra.mxu1 %v1454_v19  ;;  %1121 = vmatprep.subr.bf16.mxu0 %v1460_v20 }
  0x56   :  { %1149 = vmatprep.subr.bf16.mxu1 %v1466_v21 }
  0x58   :  { %1122 = vmatpush3.bf16.msra.mxu0 %v1472_v22 }
  0x59   :  { %1150 = vmatpush3.bf16.msra.mxu1 %v1478_v23  ;;  %1123 = vmatprep.subr.bf16.mxu0 %v1484_v24 }
  0x5a   :  { %1151 = vmatprep.subr.bf16.mxu1 %v1490_v25 }
  0x5c   :  { %1124 = vmatpush3.bf16.msra.mxu0 %v1496_v26 }
  0x5d   :  { %1152 = vmatpush3.bf16.msra.mxu1 %v1502_v27  ;;  %1125 = vmatprep.subr.bf16.mxu0 %v1508_v28 }
  0x5e   :  { %1153 = vmatprep.subr.bf16.mxu1 %v1514_v29 }
  0x60   :  { %1126 = vmatpush3.bf16.msra.mxu0 %v1520_v30 }
  0x61   :  { %1154 = vmatpush3.bf16.msra.mxu1 %v1526_v31  ;;  %1167 = vmatprep.subr.bf16.mxu0 %v1341_v0 }
  0x62   :  { %1195 = vmatprep.subr.bf16.mxu1 %v1346_v1 }
  0x63   :  { %653 = vmatmul.mubr.bf16.vlgmr.msra.gmra.mrb[16].mxu0 %v1279_v50 }
  0x64   :  { %702 = vmatmul.mubr.bf16.vlgmr.msra.gmra.mrb[16].mxu1 %v1282_v51  ;;  %1168 = vmatpush3.bf16.msra.mxu0 %v1352_v2 }
  0x65   :  { %1196 = vmatpush3.bf16.msra.mxu1 %v1358_v3  ;;  %1169 = vmatprep.subr.bf16.mxu0 %v1364_v4 }
  0x66   :  { %1197 = vmatprep.subr.bf16.mxu1 %v1370_v5  ;;  %660 = vmatprep.mubr.bf16.mxu0 %v1285_v52 }
  0x67   :  { %709 = vmatprep.mubr.bf16.mxu1 %v1287_v53 }
  0x68   :  { %1170 = vmatpush3.bf16.msra.mxu0 %v1376_v6 }
  0x69   :  { %1198 = vmatpush3.bf16.msra.mxu1 %v1382_v7  ;;  %1171 = vmatprep.subr.bf16.mxu0 %v1388_v8 }
  0x6a   :  { %1199 = vmatprep.subr.bf16.mxu1 %v1394_v9 }
  0x6b   :  { %661 = vmatmul.mubr.bf16.gmra.mrb[20].mxu0 %v1289_v54 }
  0x6c   :  { %1172 = vmatpush3.bf16.msra.mxu0 %v1400_v10  ;;  %710 = vmatmul.mubr.bf16.gmra.mrb[20].mxu1 %v1290_v55 }
  0x6d   :  { %1200 = vmatpush3.bf16.msra.mxu1 %v1406_v11  ;;  %1173 = vmatprep.subr.bf16.mxu0 %v1412_v12 }
  0x6e   :  { %1201 = vmatprep.subr.bf16.mxu1 %v1418_v13  ;;  %798 = vmatprep.mubr.bf16.mxu0 %v1293_v56 }
  0x6f   :  { %847 = vmatprep.mubr.bf16.mxu1 %v1296_v57 }
  0x70   :  { %1174 = vmatpush3.bf16.msra.mxu0 %v1424_v14 }
  0x71   :  { %1202 = vmatpush3.bf16.msra.mxu1 %v1430_v15  ;;  %1175 = vmatprep.subr.bf16.mxu0 %v1436_v16 }
  0x72   :  { %1203 = vmatprep.subr.bf16.mxu1 %v1442_v17 }
  0x74   :  { %1176 = vmatpush3.bf16.msra.mxu0 %v1448_v18 }
  0x75   :  { %1204 = vmatpush3.bf16.msra.mxu1 %v1454_v19  ;;  %1177 = vmatprep.subr.bf16.mxu0 %v1460_v20 }
  0x76   :  { %1205 = vmatprep.subr.bf16.mxu1 %v1466_v21 }
  0x78   :  { %1178 = vmatpush3.bf16.msra.mxu0 %v1472_v22 }
  0x79   :  { %1206 = vmatpush3.bf16.msra.mxu1 %v1478_v23  ;;  %1179 = vmatprep.subr.bf16.mxu0 %v1484_v24 }
  0x7a   :  { %1207 = vmatprep.subr.bf16.mxu1 %v1490_v25 }
  0x7c   :  { %1180 = vmatpush3.bf16.msra.mxu0 %v1496_v26 }
  0x7d   :  { %1208 = vmatpush3.bf16.msra.mxu1 %v1502_v27  ;;  %1181 = vmatprep.subr.bf16.mxu0 %v1508_v28 }
  0x7e   :  { %1209 = vmatprep.subr.bf16.mxu1 %v1514_v29 }
  0x80   :  { %1182 = vmatpush3.bf16.msra.mxu0 %v1520_v30 }
  0x81   :  { %1210 = vmatpush3.bf16.msra.mxu1 %v1526_v31 }
  0x83   :  { %799 = vmatmul.mubr.bf16.vlgmr.msra.gmra.mrb[24].mxu0 %v1291_v58 }
  0x84   :  { %848 = vmatmul.mubr.bf16.vlgmr.msra.gmra.mrb[24].mxu1 %v1294_v59  ;;  %806 = vmatprep.mubr.bf16.mxu0 %v1297_v60 }
  0x85   :  { %855 = vmatprep.mubr.bf16.mxu1 %v1299_v61 }
  0x8b   :  { %807 = vmatmul.mubr.bf16.gmra.mrb[28].mxu0 %v1301_v62 }
  0x8c   :  { %856 = vmatmul.mubr.bf16.gmra.mrb[28].mxu1 %v1302_v63 }
  0xf6   :  { %v1015_v0 = vpop.f32.mrb[0].mxu0 }
  0xf7   :  { %v1043_v1 = vpop.f32.mrb[0].mxu1  ;;  %v1016_v2 = vpop.f32.mrb[1].mxu0 }
  0xf8   :  { %v1017_v3 = vadd.f32 %v1016_v2, %v1015_v0  ;;  %v1044_v4 = vpop.f32.mrb[1].mxu1  ;;  %v1018_v5 = vpop.f32.mrb[2].mxu0 }
  0xf9   :  { %v1045_v6 = vadd.f32 %v1044_v4, %v1043_v1  ;;  %v1046_v7 = vpop.f32.mrb[2].mxu1  ;;  %v1019_v8 = vpop.f32.mrb[3].mxu0 }
  0xfa   :  { %v1020_v9 = vadd.f32 %v1019_v8, %v1018_v5  ;;  %v1047_v10 = vpop.f32.mrb[3].mxu1 }
  0xfb   :  { %v1722_v11 = vadd.f32 %v1045_v6, %v1017_v3  ;;  %v1048_v12 = vadd.f32 %v1047_v10, %v1046_v7 }
  0xfd   :  { %v1724_v13 = vadd.f32 %v1048_v12, %v1020_v9 }
  0xfe   :  { %v1021_v14 = vpop.f32.mrb[4].mxu0 }
  0xff   :  { %v1049_v15 = vpop.f32.mrb[4].mxu1  ;;  %v1022_v16 = vpop.f32.mrb[5].mxu0 }
 0x100   :  { %v1023_v17 = vadd.f32 %v1022_v16, %v1021_v14  ;;  %v1050_v18 = vpop.f32.mrb[5].mxu1  ;;  %v1024_v19 = vpop.f32.mrb[6].mxu0 }
 0x101   :  { %v1051_v20 = vadd.f32 %v1050_v18, %v1049_v15  ;;  %v1052_v21 = vpop.f32.mrb[6].mxu1  ;;  %v1025_v22 = vpop.f32.mrb[7].mxu0 }
 0x102   :  { %v1026_v23 = vadd.f32 %v1025_v22, %v1024_v19  ;;  %v1053_v24 = vpop.f32.mrb[7].mxu1 }
 0x103   :  { %v1726_v25 = vadd.f32 %v1051_v20, %v1023_v17  ;;  %v1054_v26 = vadd.f32 %v1053_v24, %v1052_v21 }
 0x105   :  { %v1728_v27 = vadd.f32 %v1054_v26, %v1026_v23 }
 0x116   :  { %v1071_v28 = vpop.f32.mrb[8].mxu0 }
 0x117   :  { %v1099_v29 = vpop.f32.mrb[8].mxu1  ;;  %v1072_v30 = vpop.f32.mrb[9].mxu0 }
 0x118   :  { %v1073_v31 = vadd.f32 %v1072_v30, %v1071_v28  ;;  %v1100_v32 = vpop.f32.mrb[9].mxu1  ;;  %v1074_v33 = vpop.f32.mrb[10].mxu0 }
 0x119   :  { %v1101_v34 = vadd.f32 %v1100_v32, %v1099_v29  ;;  %v1102_v35 = vpop.f32.mrb[10].mxu1  ;;  %v1075_v36 = vpop.f32.mrb[11].mxu0 }
 0x11a   :  { %v1076_v37 = vadd.f32 %v1075_v36, %v1074_v33  ;;  %v1103_v38 = vpop.f32.mrb[11].mxu1 }
 0x11b   :  { %v1730_v39 = vadd.f32 %v1101_v34, %v1073_v31  ;;  %v1104_v40 = vadd.f32 %v1103_v38, %v1102_v35 }
 0x11d   :  { %v864_v41 = vmax.f32 %v1722_v11, %v1730_v39  ;;  %v1734_v42 = vadd.f32 %v1104_v40, %v1076_v37 }
 0x11e   :  { %v1077_v43 = vpop.f32.mrb[12].mxu0 }
 0x11f   :  { %v865_v44 = vmax.f32 %v1724_v13, %v1734_v42  ;;  %v1105_v45 = vpop.f32.mrb[12].mxu1  ;;  %v1078_v46 = vpop.f32.mrb[13].mxu0 }
 0x120   :  { %v1079_v47 = vadd.f32 %v1078_v46, %v1077_v43  ;;  %v1106_v48 = vpop.f32.mrb[13].mxu1  ;;  %v1080_v49 = vpop.f32.mrb[14].mxu0 }
 0x121   :  { %v1107_v50 = vadd.f32 %v1106_v48, %v1105_v45  ;;  %v1108_v51 = vpop.f32.mrb[14].mxu1  ;;  %v1081_v52 = vpop.f32.mrb[15].mxu0 }
 0x122   :  { %v1082_v53 = vadd.f32 %v1081_v52, %v1080_v49  ;;  %v1109_v54 = vpop.f32.mrb[15].mxu1 }
 0x123   :  { %v1738_v55 = vadd.f32 %v1107_v50, %v1079_v47  ;;  %v1110_v56 = vadd.f32 %v1109_v54, %v1108_v51  ;;  %v979_v47 = vld [vmem:[%s1772_s5] ss:$0 sm:$0xff] }
 0x125   :  { %v866_v57 = vmax.f32 %v1726_v25, %v1738_v55  ;;  %v1742_v58 = vadd.f32 %v1110_v56, %v1082_v53 }
 0x127   :  { %v867_v59 = vmax.f32 %v1728_v27, %v1742_v58 }
 0x136   :  { %v1127_v60 = vpop.f32.mrb[16].mxu0 }
 0x137   :  { %v1155_v61 = vpop.f32.mrb[16].mxu1  ;;  %v1128_v62 = vpop.f32.mrb[17].mxu0 }
 0x138   :  { %v1129_v63 = vadd.f32 %v1128_v62, %v1127_v60  ;;  %v1156_v0 = vpop.f32.mrb[17].mxu1  ;;  %v1130_v1 = vpop.f32.mrb[18].mxu0 }
 0x139   :  { %v1157_v2 = vadd.f32 %v1156_v0, %v1155_v61  ;;  %v1158_v3 = vpop.f32.mrb[18].mxu1  ;;  %v1131_v4 = vpop.f32.mrb[19].mxu0 }
 0x13a   :  { %v1132_v5 = vadd.f32 %v1131_v4, %v1130_v1  ;;  %v1159_v6 = vpop.f32.mrb[19].mxu1 }
 0x13b   :  { %v704_v7 = vadd.f32 %v1157_v2, %v1129_v63  ;;  %v1160_v8 = vadd.f32 %v1159_v6, %v1158_v3 }
 0x13d   :  { %v707_v9 = vadd.f32 %v1160_v8, %v1132_v5 }
 0x13e   :  { %v1133_v10 = vpop.f32.mrb[20].mxu0 }
 0x13f   :  { %v1161_v12 = vpop.f32.mrb[20].mxu1  ;;  %v1134_v14 = vpop.f32.mrb[21].mxu0 }
 0x140   :  { %v1135_v15 = vadd.f32 %v1134_v14, %v1133_v10  ;;  %v1162_v16 = vpop.f32.mrb[21].mxu1  ;;  %v1136_v17 = vpop.f32.mrb[22].mxu0 }
 0x141   :  { %v1163_v18 = vadd.f32 %v1162_v16, %v1161_v12  ;;  %v1164_v19 = vpop.f32.mrb[22].mxu1  ;;  %v1137_v20 = vpop.f32.mrb[23].mxu0 }
 0x142   :  { %v1138_v21 = vadd.f32 %v1137_v20, %v1136_v17  ;;  %v1165_v22 = vpop.f32.mrb[23].mxu1 }
 0x143   :  { %v712_v23 = vadd.f32 %v1163_v18, %v1135_v15  ;;  %v1166_v24 = vadd.f32 %v1165_v22, %v1164_v19 }
 0x145   :  { %v715_v26 = vadd.f32 %v1166_v24, %v1138_v21 }
 0x156   :  { %v1183_v28 = vpop.f32.mrb[24].mxu0 }
 0x157   :  { %v1211_v29 = vpop.f32.mrb[24].mxu1  ;;  %v1184_v30 = vpop.f32.mrb[25].mxu0 }
 0x158   :  { %v1185_v31 = vadd.f32 %v1184_v30, %v1183_v28  ;;  %v1212_v32 = vpop.f32.mrb[25].mxu1  ;;  %v1186_v33 = vpop.f32.mrb[26].mxu0 }
 0x159   :  { %v1213_v34 = vadd.f32 %v1212_v32, %v1211_v29  ;;  %v1214_v35 = vpop.f32.mrb[26].mxu1  ;;  %v1187_v36 = vpop.f32.mrb[27].mxu0 }
 0x15a   :  { %v1188_v37 = vadd.f32 %v1187_v36, %v1186_v33  ;;  %v1215_v38 = vpop.f32.mrb[27].mxu1 }
 0x15b   :  { %v850_v40 = vadd.f32 %v1213_v34, %v1185_v31  ;;  %v1216_v43 = vadd.f32 %v1215_v38, %v1214_v35 }
 0x15d   :  { %v868_v45 = vmax.f32 %v704_v7, %v850_v40  ;;  %v853_v46 = vadd.f32 %v1216_v43, %v1188_v37 }
 0x15e   :  { %v1189_v48 = vpop.f32.mrb[28].mxu0 }
 0x15f   :  { %v872_v49 = vmax.f32 %v864_v41, %v868_v45  ;;  %v869_v50 = vmax.f32 %v707_v9, %v853_v46  ;;  %v1217_v51 = vpop.f32.mrb[28].mxu1  ;;  %v1190_v52 = vpop.f32.mrb[29].mxu0 }
 0x160   :  { %v1191_v53 = vadd.f32 %v1190_v52, %v1189_v48  ;;  %v1218_v54 = vpop.f32.mrb[29].mxu1  ;;  %v1192_v56 = vpop.f32.mrb[30].mxu0 }
 0x161   :  { %v883_v60 = vadd.f32 %v979_v47, %v872_v49  ;;  %v873_v61 = vmax.f32 %v865_v44, %v869_v50  ;;  %v1219_v62 = vadd.f32 %v1218_v54, %v1217_v51  ;;  %v1220_v63 = vpop.f32.mrb[30].mxu1  ;;  %v1193_v0 = vpop.f32.mrb[31].mxu0 }
 0x162   :  { %v1194_v1 = vadd.f32 %v1193_v0, %v1192_v56  ;;  %v1221_v2 = vpop.f32.mrb[31].mxu1 }
 0x163   :  { %v884_v3 = vadd.f32 %v979_v47, %v873_v61  ;;  %v858_v4 = vadd.f32 %v1219_v62, %v1191_v53  ;;  %v1222_v11 = vadd.f32 %v1221_v2, %v1220_v63  ;;  %v887_v39 = vmax.f32 %v883_v60, 0.0 }
 0x165   :  { %v888_v41 = vmax.f32 %v884_v3, 0.0  ;;  %v870_v5 = vmax.f32 %v712_v23, %v858_v4  ;;  %v861_v6 = vadd.f32 %v1222_v11, %v1194_v1 }
 0x167   :  { %v991_v7 = vpack.c.bf16 %v888_v41, %v887_v39  ;;  %v874_v8 = vmax.f32 %v866_v57, %v870_v5  ;;  %v871_v9 = vmax.f32 %v715_v26, %v861_v6 }
 0x169   :  { %992 = vst [vmem:[%s1773_s6] sm:$0xff] %v991_v7   ;;  %v885_v13 = vadd.f32 %v979_v47, %v874_v8  ;;  %v875_v42 = vmax.f32 %v867_v59, %v871_v9 }
 0x16b   :  { %v886_v44 = vadd.f32 %v979_v47, %v875_v42  ;;  %v889_v10 = vmax.f32 %v885_v13, 0.0 }
 0x16d   :  { %v890_v12 = vmax.f32 %v886_v44, 0.0 }
 0x16f   :  { %v996_v14 = vpack.c.bf16 %v890_v12, %v889_v10 }
 0x171   :  { %998 = vst [vmem:[%s1773_s6 + $0x8] sm:$0xff] %v996_v14  }

// kernel: net_forward.7
= control target key start
LH: loop header
LB: loop body
LE: loop exit
PB: predicated region body
PF: predicated region fallthrough
CT: control target
= control target key end

     0   :  { %v760_v1 = vmov 0.0   ;;  %vm761_vm0 = vmmov 0   ;;  %vm200_vm1 = vcmask 523264   ;;  %v762_v57 = vmov 0   ;;  %s973_s1 = inlined_call_operand.vmem [shape: bf16[320,128], index: 1, kind: input, shape index: {}]   ;;  %s974_s0 = inlined_call_operand.vmem [shape: bf16[8,320], index: 0, kind: input, shape index: {}]   ;;  %s975_s3 = inlined_call_operand.vmem [shape: bf16[128,512], index: 3, kind: input, shape index: {}]   ;;  %s976_s2 = inlined_call_operand.vmem [shape: f32[1,128], index: 2, kind: input, shape index: {}]   ;;  %s977_s4 = inlined_call_operand.vmem [shape: f32[1,512], index: 4, kind: input, shape index: {}]   ;;  %s978_s5 = inlined_call_operand.vmem [shape: f32[8,512], index: 5, kind: output, shape index: {}]  }
   0x1   :  { %v689_v0 = vld [vmem:[%s973_s1 + $0x40] sm:$0xff]   ;;  %674 = vmatprep.subr.bf16.mxu1 %v760_v1  ;;  %682 = vmatprep.mubr.msk.bf16.mxu1 %vm761_vm0, %v760_v1  ;;  %v691_v3 = vld [vmem:[%s973_s1 + $0x48] sm:$0xff]   ;;  %v693_v5 = vld [vmem:[%s973_s1 + $0x50] sm:$0xff]  }
   0x2   :  { %v690_v2 = vld [vmem:[%s973_s1] sm:$0xff]   ;;  %647 = vmatprep.subr.bf16.mxu0 %v689_v0  ;;  %v692_v4 = vld [vmem:[%s973_s1 + $0x8] sm:$0xff]   ;;  %v694_v6 = vld [vmem:[%s973_s1 + $0x10] sm:$0xff]  }
   0x3   :  { %648 = vmatpush3.bf16.msra.mxu0 %v690_v2  ;;  %v695_v7 = vld [vmem:[%s973_s1 + $0x58] sm:$0xff]   ;;  %v699_v8 = vld [vmem:[%s973_s1 + $0x80] sm:$0xff]   ;;  %v702_v11 = vld [vmem:[%s973_s1 + $0x88] sm:$0xff]  }
   0x4   :  { %649 = vmatprep.subr.bf16.mxu0 %v691_v3  ;;  %v696_v9 = vld [vmem:[%s973_s1 + $0x18] sm:$0xff]   ;;  %v697_v10 = vld [vmem:[%s973_s1 + $0x60] sm:$0xff]   ;;  %675 = vmatpush3.bf16.msra.mxu1 %v699_v8  ;;  %v700_v13 = vld [vmem:[%s973_s1 + $0x68] sm:$0xff]   ;;  %v320_v8 = vlaneseq }
   0x5   :  { %676 = vmatprep.subr.bf16.mxu1 %v760_v1  ;;  %v698_v12 = vld [vmem:[%s973_s1 + $0x20] sm:$0xff]   ;;  %v705_v14 = vld [vmem:[%s973_s1 + $0x90] sm:$0xff]   ;;  %v701_v15 = vld [vmem:[%s973_s1 + $0x28] sm:$0xff]  }
   0x6   :  { %v703_v16 = vld [vmem:[%s973_s1 + $0x70] sm:$0xff]   ;;  %v21_v17 = vld [vmem:[%s974_s0] sm:$0xff]  ;;  %v711_v19 = vld [vmem:[%s973_s1 + $0x98] sm:$0xff]  }
   0x7   :  { %650 = vmatpush3.bf16.msra.mxu0 %v692_v4  ;;  %v592_v18 = vcombine.high %v21_v17, %v21_v17  ;;  %v714_v20 = vld [vmem:[%s975_s3 + $0x4] ss:$16 sps:$4 sm:$0xff]   ;;  %v710_v22 = vld [vmem:[%s974_s0 + $0x8] ss:$0 sps:$4 sm:$0xff]   ;;  %v706_v23 = vld [vmem:[%s973_s1 + $0x78] sm:$0xff]   ;;  %v591_v30 = vcombine.low %v21_v17, %v21_v17 }
   0x8   :  { %651 = vmatprep.subr.bf16.mxu0 %v693_v5  ;;  %677 = vmatpush3.bf16.msra.mxu1 %v702_v11  ;;  %v704_v21 = vld [vmem:[%s973_s1 + $0x30] sm:$0xff]   ;;  %v707_v26 = vld [vmem:[%s973_s1 + $0x38] sm:$0xff]   ;;  %v590_v0 = vld [vmem:[%s976_s2] ss:$0 sm:$0xff] }
   0x9   :  { %678 = vmatprep.subr.bf16.mxu1 %v760_v1  ;;  %236 = vmatprep.mubr.bf16.mxu0 %v592_v18  ;;  %v712_v24 = vld [vmem:[%s975_s3] ss:$16 sps:$4 sm:$0xff]   ;;  %v720_v25 = vld [vmem:[%s975_s3 + $0x24] ss:$16 sps:$4 sm:$0xff]   ;;  %v717_v27 = vld [vmem:[%s975_s3 + $0xc] ss:$16 sps:$4 sm:$0xff]  }
   0xa   :  { %v718_v28 = vld [vmem:[%s975_s3 + $0x20] ss:$16 sps:$4 sm:$0xff]   ;;  %v726_v29 = vld [vmem:[%s975_s3 + $0x44] ss:$16 sps:$4 sm:$0xff]   ;;  %v715_v31 = vld [vmem:[%s975_s3 + $0x8] ss:$16 sps:$4 sm:$0xff]  }
   0xb   :  { %652 = vmatpush3.bf16.msra.mxu0 %v694_v6  ;;  %v723_v32 = vld [vmem:[%s975_s3 + $0x2c] ss:$16 sps:$4 sm:$0xff]   ;;  %v724_v33 = vld [vmem:[%s975_s3 + $0x40] ss:$16 sps:$4 sm:$0xff]   ;;  %v721_v34 = vld [vmem:[%s975_s3 + $0x28] ss:$16 sps:$4 sm:$0xff]  }
   0xc   :  { %653 = vmatprep.subr.bf16.mxu0 %v695_v7  ;;  %679 = vmatpush3.bf16.msra.mxu1 %v705_v14  ;;  %v732_v35 = vld [vmem:[%s975_s3 + $0x64] ss:$16 sps:$4 sm:$0xff]   ;;  %v729_v36 = vld [vmem:[%s975_s3 + $0x4c] ss:$16 sps:$4 sm:$0xff]   ;;  %v730_v37 = vld [vmem:[%s975_s3 + $0x60] ss:$16 sps:$4 sm:$0xff]  }
   0xd   :  { %680 = vmatprep.subr.bf16.mxu1 %v760_v1  ;;  %v738_v38 = vld [vmem:[%s975_s3 + $0x84] ss:$16 sps:$4 sm:$0xff]   ;;  %v727_v39 = vld [vmem:[%s975_s3 + $0x48] ss:$16 sps:$4 sm:$0xff]   ;;  %v735_v40 = vld [vmem:[%s975_s3 + $0x6c] ss:$16 sps:$4 sm:$0xff]  }
   0xe   :  { %v736_v41 = vld [vmem:[%s975_s3 + $0x80] ss:$16 sps:$4 sm:$0xff]   ;;  %v733_v42 = vld [vmem:[%s975_s3 + $0x68] ss:$16 sps:$4 sm:$0xff]   ;;  %v741_v43 = vld [vmem:[%s975_s3 + $0x8c] ss:$16 sps:$4 sm:$0xff]  }
   0xf   :  { %654 = vmatpush3.bf16.msra.mxu0 %v696_v9  ;;  %v739_v44 = vld [vmem:[%s975_s3 + $0x88] ss:$16 sps:$4 sm:$0xff]   ;;  %v744_v45 = vld [vmem:[%s975_s3 + $0xa4] ss:$16 sps:$4 sm:$0xff]   ;;  %v747_v46 = vld [vmem:[%s975_s3 + $0xac] ss:$16 sps:$4 sm:$0xff]  }
  0x10   :  { %655 = vmatprep.subr.bf16.mxu0 %v697_v10  ;;  %681 = vmatpush3.bf16.msra.mxu1 %v711_v19  ;;  %v742_v47 = vld [vmem:[%s975_s3 + $0xa0] ss:$16 sps:$4 sm:$0xff]   ;;  %v745_v48 = vld [vmem:[%s975_s3 + $0xa8] ss:$16 sps:$4 sm:$0xff]   ;;  %v750_v49 = vld [vmem:[%s975_s3 + $0xc4] ss:$16 sps:$4 sm:$0xff]  }
  0x11   :  { %500 = vmatprep.subr.bf16.mxu1 %v714_v20  ;;  %v753_v50 = vld [vmem:[%s975_s3 + $0xcc] ss:$16 sps:$4 sm:$0xff]   ;;  %v748_v51 = vld [vmem:[%s975_s3 + $0xc0] ss:$16 sps:$4 sm:$0xff]   ;;  %v751_v52 = vld [vmem:[%s975_s3 + $0xc8] ss:$16 sps:$4 sm:$0xff]  }
  0x12   :  { %v756_v53 = vld [vmem:[%s975_s3 + $0xe4] ss:$16 sps:$4 sm:$0xff]   ;;  %v759_v54 = vld [vmem:[%s975_s3 + $0xec] ss:$16 sps:$4 sm:$0xff]   ;;  %v754_v55 = vld [vmem:[%s975_s3 + $0xe0] ss:$16 sps:$4 sm:$0xff]  }
  0x13   :  { %656 = vmatpush3.bf16.msra.mxu0 %v698_v12  ;;  %683 = vmatmul.mubr.msk.bf16.vlgmr.msra.gmra.mrb[0].mxu1 %vm200_vm1, %v710_v22  ;;  %v757_v56 = vld [vmem:[%s975_s3 + $0xe8] ss:$16 sps:$4 sm:$0xff]   ;;  %v321_v9 = vshrl.u32 %v320_v8, 7  ;;  %v318_v12 = vld [vmem:[%s977_s4] sm:$0xf] }
  0x14   :  { %657 = vmatprep.subr.bf16.mxu0 %v700_v13  ;;  %501 = vmatpush1.bf16.msra.mxu1 %v712_v24 }
  0x15   :  { %502 = vmatprep.subr.bf16.mxu1 %v720_v25  ;;  %532 = vmatprep.mubr.bf16.mxu1 %v762_v57  ;;  %v322_v10 = vsub.s32 0, %v321_v9  ;;  %v330_v11 = vsub.s32 2, %v321_v9  ;;  %v326_v13 = vsub.s32 1, %v321_v9  ;;  %v334_v14 = vsub.s32 3, %v321_v9 }
  0x17   :  { %658 = vmatpush3.bf16.msra.mxu0 %v701_v15  ;;  %v323_v15 = vrot.slane %v318_v12, %v322_v10  ;;  %v327_v17 = vrot.slane %v318_v12, %v326_v13  ;;  %v335_v18 = vrot.slane %v318_v12, %v334_v14 }
  0x18   :  { %659 = vmatprep.subr.bf16.mxu0 %v703_v16  ;;  %503 = vmatpush1.bf16.msra.mxu1 %v718_v28  ;;  %v331_v16 = vrot.slane %v318_v12, %v330_v11 }
  0x19   :  { %504 = vmatprep.subr.bf16.mxu1 %v726_v29 }
  0x1b   :  { %660 = vmatpush3.bf16.msra.mxu0 %v704_v21 }
  0x1c   :  { %661 = vmatprep.subr.bf16.mxu0 %v706_v23  ;;  %505 = vmatpush1.bf16.msra.mxu1 %v724_v33 }
  0x1d   :  { %506 = vmatprep.subr.bf16.mxu1 %v732_v35 }
  0x1f   :  { %662 = vmatpush3.bf16.msra.mxu0 %v707_v26 }
  0x20   :  { %541 = vmatprep.subr.bf16.mxu0 %v717_v27  ;;  %507 = vmatpush1.bf16.msra.mxu1 %v730_v37 }
  0x21   :  { %508 = vmatprep.subr.bf16.mxu1 %v738_v38 }
  0x22   :  { %237 = vmatmul.mubr.bf16.vlgmr.msra.gmra.mrb[0].mxu0 %v591_v30 }
  0x23   :  { %542 = vmatpush1.bf16.msra.mxu0 %v715_v31  ;;  %573 = vmatprep.mubr.bf16.mxu0 %v762_v57 }
  0x24   :  { %543 = vmatprep.subr.bf16.mxu0 %v723_v32  ;;  %509 = vmatpush1.bf16.msra.mxu1 %v736_v41 }
  0x25   :  { %510 = vmatprep.subr.bf16.mxu1 %v744_v45 }
  0x27   :  { %544 = vmatpush1.bf16.msra.mxu0 %v721_v34 }
  0x28   :  { %545 = vmatprep.subr.bf16.mxu0 %v729_v36  ;;  %511 = vmatpush1.bf16.msra.mxu1 %v742_v47 }
  0x29   :  { %512 = vmatprep.subr.bf16.mxu1 %v750_v49 }
  0x2b   :  { %546 = vmatpush1.bf16.msra.mxu0 %v727_v39 }
  0x2c   :  { %547 = vmatprep.subr.bf16.mxu0 %v735_v40  ;;  %513 = vmatpush1.bf16.msra.mxu1 %v748_v51 }
  0x2d   :  { %514 = vmatprep.subr.bf16.mxu1 %v756_v53 }
  0x2f   :  { %548 = vmatpush1.bf16.msra.mxu0 %v733_v42 }
  0x30   :  { %549 = vmatprep.subr.bf16.mxu0 %v741_v43  ;;  %515 = vmatpush1.bf16.msra.mxu1 %v754_v55 }
  0x33   :  { %550 = vmatpush1.bf16.msra.mxu0 %v739_v44 }
  0x34   :  { %551 = vmatprep.subr.bf16.mxu0 %v747_v46 }
  0x37   :  { %552 = vmatpush1.bf16.msra.mxu0 %v745_v48 }
  0x38   :  { %553 = vmatprep.subr.bf16.mxu0 %v753_v50 }
  0x3b   :  { %554 = vmatpush1.bf16.msra.mxu0 %v751_v52 }
  0x3c   :  { %555 = vmatprep.subr.bf16.mxu0 %v759_v54 }
  0x3f   :  { %556 = vmatpush1.bf16.msra.mxu0 %v757_v56 }
  0xe6   :  { %v278_v58 = vpop.f32.mrb[0].mxu1 }
  0xe7   :  { %v684_v59 = vpop.f32.mrb[1].mxu1 }
  0xe8   :  { %v281_v60 = vpop.f32.mrb[2].mxu1 }
  0xe9   :  { %v685_v61 = vpop.f32.mrb[3].mxu1 }
  0xf5   :  { %v663_v62 = vpop.f32.mrb[0].mxu0 }
  0xf6   :  { %v664_v63 = vpop.f32.mrb[1].mxu0 }
  0xf7   :  { %v665_v1 = vadd.f32 %v664_v63, %v663_v62  ;;  %v666_v2 = vpop.f32.mrb[2].mxu0 }
  0xf8   :  { %v667_v3 = vpop.f32.mrb[3].mxu0 }
  0xf9   :  { %v239_v4 = vadd.f32 %v665_v1, %v590_v0 }
  0xfb   :  { %v279_v5 = vadd.f32 %v278_v58, %v239_v4 }
  0xfd   :  { %v284_v6 = vmax.f32 %v279_v5, 0.0 }
  0xff   :  { %v285_v7 = vpack.c.bf16 %v284_v6, %v284_v6 }
 0x101   :  { %533 = vmatmul.mubr.bf16.vlgmr.msra.gmra.mrb[4].mxu1 %v285_v7  ;;  %574 = vmatmul.mubr.bf16.vlgmr.msra.gmra.mrb[4].mxu0 %v285_v7 }
 0x1d4   :  { %v534_v19 = vpop.f32.mrb[4].mxu1  ;;  %v575_v20 = vpop.f32.mrb[4].mxu0 }
 0x1d5   :  { %v535_v21 = vadd.f32 %v534_v19, %v323_v15  ;;  %v576_v22 = vadd.f32 %v575_v20, %v331_v16  ;;  %v536_v23 = vpop.f32.mrb[5].mxu1  ;;  %v577_v24 = vpop.f32.mrb[5].mxu0 }
 0x1d6   :  { %v537_v25 = vadd.f32 %v536_v23, %v327_v17  ;;  %v578_v26 = vadd.f32 %v577_v24, %v335_v18  ;;  %v538_v27 = vpop.f32.mrb[6].mxu1  ;;  %v579_v28 = vpop.f32.mrb[6].mxu0 }
 0x1d7   :  { %582 = vst [vmem:[%s978_s5] sm:$0xff] %v535_v21  ;;  %584 = vst [vmem:[%s978_s5 + $0x10] sm:$0xff] %v576_v22  ;;  %v539_v29 = vpop.f32.mrb[7].mxu1  ;;  %v580_v30 = vpop.f32.mrb[7].mxu0 }
 0x1d8   :  { %583 = vst [vmem:[%s978_s5 + $0x8] sm:$0xff] %v537_v25  ;;  %585 = vst [vmem:[%s978_s5 + $0x18] sm:$0xff] %v578_v26 }

</bundles_post_ra>
